<compile_context>
chip_gen: v7x
topology: tpu7x:2x2x1
jax: 0.10.0
libtpu: 0.0.40
codegen_flags: <defaults>
</compile_context>

<pallas_src>
import math

import jax
import jax.numpy as jnp
from jax.experimental import pallas as pl
from jax.experimental.pallas import tpu as pltpu

# ---- model sizes (TPU-tile aligned) ------------------------------------------
B = 256          # total users per call
BT = 128         # batch tile (grid over B // BT, parallel across TensorCores)
INPUT_DIM = 256  # number of items
HIDDEN_DIM = 128
LATENT_DIM = 128
H = HIDDEN_DIM
L = LATENT_DIM
H2 = 2 * H                       # fused (live | frozen) hidden width
HEAD_DIM = 4 * L + INPUT_DIM     # mu | logvar | post_mu | post_logvar | x_pred

LN_EPS = 0.1                 # Encoder uses nn.LayerNorm(hidden_dim, eps=1e-1)
L2_EPS = 1e-12               # F.normalize epsilon
GAMMA = 0.005
MIX_W = (3.0 / 20.0, 3.0 / 4.0, 1.0 / 10.0)
LOG2PI = math.log(2.0 * math.pi)
F32 = jnp.float32
BF16 = jnp.bfloat16


# ---- shared math (used inside the kernel and by the pure-JAX reference) -------
def _dot(a, w):
    # bf16 operands on the MXU, f32 accumulation.
    return jnp.dot(a.astype(BF16), w, preferred_element_type=jnp.float32)


def _swish(x):
    return x * jax.nn.sigmoid(x)


def _layernorm(x, g, b):
    # Independent mean / mean-of-squares reductions (var = E[x^2] - E[x]^2), f32.
    mean = jnp.mean(x, axis=-1, keepdims=True)
    msq = jnp.mean(x * x, axis=-1, keepdims=True)
    var = msq - mean * mean
    return (x - mean) * jax.lax.rsqrt(var + LN_EPS) * g + b


def _dual_layernorm(x, g, b):
    # x: (N, 2H); lanes [0,H) = live encoder chain, lanes [H,2H) = frozen chain.
    # LayerNorm is applied independently per chain (slices sit on 128-lane
    # boundaries, so they are cheap vreg selections).
    parts = []
    for c in range(2):
        sl = slice(c * H, (c + 1) * H)
        parts.append(_layernorm(x[:, sl], g[:, sl], b[:, sl]))
    return jnp.concatenate(parts, axis=-1)


def _forward_tile(x, w1_cat, whb, whead, vec, hbias):
    """Eval-mode RecVAE forward for a batch tile.

    x:      (N, INPUT_DIM) f32
    w1_cat: (INPUT_DIM, 2H)           bf16  [W1_enc | W1_old]
    whb:    (4, 2H, 2H)               bf16  block-diag fc2..fc5 for both chains
    whead:  (2H, 4L + INPUT_DIM)      bf16  fused mu|logvar|post_mu|post_logvar|dec
    vec:    (15, 2H) f32  rows 0-4 biases fc1..fc5, 5-9 LN gammas, 10-14 LN betas
    hbias:  (1, 4L + INPUT_DIM) f32   fused head bias (incl. bmu @ Wd + bd)
    Returns (x_pred (N, INPUT_DIM) f32, mll_sum (1,1), kld_sum (1,1)).
    """
    # L2-normalize; training-mode dropout omitted (eval => identity).
    sumsq = jnp.sum(x * x, axis=-1, keepdims=True)
    xn = x * jax.lax.rsqrt(sumsq + L2_EPS)

    # Layer 1: one (N, 2H) MXU pass feeds both encoder chains.
    h = _dual_layernorm(_swish(_dot(xn, w1_cat) + vec[0:1]), vec[5:6], vec[10:11])
    res = h
    # fc2..fc5 with dense residuals; block-diag weights keep both chains in one
    # full-width (2H x 2H) matmul per layer.
    for k in range(4):
        pre = _dot(h, whb[k]) + vec[1 + k:2 + k] + res
        h = _dual_layernorm(_swish(pre), vec[6 + k:7 + k], vec[11 + k:12 + k])
        res = res + h

    # Fused head: mu | logvar | post_mu | post_logvar | x_pred  (eval-mode z == mu,
    # decoder folded into the head weights host-side).
    head = _dot(h, whead) + hbias
    mu = head[:, 0 * L:1 * L]
    logvar = head[:, 1 * L:2 * L]
    post_mu = head[:, 2 * L:3 * L]
    post_logvar = head[:, 3 * L:4 * L]
    x_pred = head[:, 4 * L:]

    z = mu  # eval-mode reparameterize

    # multinomial log-likelihood
    m = jnp.max(x_pred, axis=-1, keepdims=True)
    log_sm = x_pred - (m + jnp.log(jnp.sum(jnp.exp(x_pred - m), axis=-1, keepdims=True)))
    mll_sum = jnp.sum(jnp.sum(log_sm * x, axis=-1, keepdims=True), axis=0, keepdims=True)

    # composite prior: logsumexp over 3 weighted gaussians
    stnd = -0.5 * (z * z + LOG2PI) + math.log(MIX_W[0])
    post = (-0.5 * (post_logvar + LOG2PI + (z - post_mu) ** 2 * jnp.exp(-post_logvar))
            + math.log(MIX_W[1]))
    unif = -0.5 * (10.0 + LOG2PI + z * z * math.exp(-10.0)) + math.log(MIX_W[2])
    gmax = jnp.maximum(jnp.maximum(stnd, post), unif)
    prior = gmax + jnp.log(jnp.exp(stnd - gmax) + jnp.exp(post - gmax) + jnp.exp(unif - gmax))

    # log q(z|x) with z == mu:  log_norm_pdf(mu, mu, logvar) = -0.5*(logvar + log 2pi)
    kl_per = jnp.sum(-0.5 * (logvar + LOG2PI) - prior, axis=-1, keepdims=True)  # (N, 1)
    kl_weight = GAMMA * jnp.sum(x, axis=-1, keepdims=True)                      # (N, 1)
    kld_sum = jnp.sum(kl_per * kl_weight, axis=0, keepdims=True)
    return x_pred, mll_sum, kld_sum


# ---- Pallas kernel -----------------------------------------------------------
def recvae_kernel(x_ref, w1_ref, whb_ref, whead_ref, vec_ref, hbias_ref,
                  x_pred_ref, partial_ref):
    x = x_ref[...].astype(F32)
    x_pred, mll_sum, kld_sum = _forward_tile(
        x, w1_ref[...], whb_ref[...], whead_ref[...], vec_ref[...], hbias_ref[...])

    x_pred_ref[...] = x_pred.astype(x_pred_ref.dtype)

    # Per-tile partial sums: mll at [0,0,0], kld at [0,0,1], zeros elsewhere.
    sub = jax.lax.broadcasted_iota(jnp.int32, (1, 8, 128), 1)
    lane = jax.lax.broadcasted_iota(jnp.int32, (1, 8, 128), 2)
    partial_ref[...] = (jnp.where((sub == 0) & (lane == 0), mll_sum, 0.0)
                        + jnp.where((sub == 0) & (lane == 1), kld_sum, 0.0))


def _const_spec(shape):
    # Whole-array block, invariant across the grid (loaded into VMEM once).
    return pl.BlockSpec(shape, lambda i: (0,) * len(shape))


def recvae_forward(x, w1_cat, whb, whead, vec, hbias):
    b_total = x.shape[0]
    ntiles = b_total // BT
    out_shape = (
        jax.ShapeDtypeStruct((b_total, INPUT_DIM), BF16),   # x_pred
        jax.ShapeDtypeStruct((ntiles, 8, 128), F32),        # per-tile loss partials
    )
    x_pred, partials = pl.pallas_call(
        recvae_kernel,
        out_shape=out_shape,
        grid=(ntiles,),
        in_specs=[
            pl.BlockSpec((BT, INPUT_DIM), lambda i: (i, 0)),  # x (batch-tiled)
            _const_spec(w1_cat.shape),
            _const_spec(whb.shape),
            _const_spec(whead.shape),
            _const_spec(vec.shape),
            _const_spec(hbias.shape),
        ],
        out_specs=(
            pl.BlockSpec((BT, INPUT_DIM), lambda i: (i, 0)),  # x_pred (batch-tiled)
            pl.BlockSpec((1, 8, 128), lambda i: (i, 0, 0)),   # per-tile partial sums
        ),
        compiler_params=pltpu.CompilerParams(
            # Tiles are fully independent (per-tile partial loss outputs), so the
            # batch axis can be split across TensorCores (v7x megacore).
            dimension_semantics=("parallel",),
            vmem_limit_bytes=32 << 20,
        ),
    )(x, w1_cat, whb, whead, vec, hbias)

    mll = jnp.sum(partials[:, 0, 0]) / b_total
    kld = jnp.sum(partials[:, 0, 1]) / b_total
    neg = -(mll - kld)
    return x_pred, jnp.stack([mll, kld, neg])


recvae_forward_jit = jax.jit(recvae_forward)


# ---- pure-JAX reference (same math, outside Pallas) --------------------------
def recvae_reference(x, w1_cat, whb, whead, vec, hbias):
    xf = x.astype(F32)
    x_pred, mll_sum, kld_sum = _forward_tile(xf, w1_cat, whb, whead, vec, hbias)
    mll = mll_sum[0, 0] / x.shape[0]
    kld = kld_sum[0, 0] / x.shape[0]
    neg = -(mll - kld)
    return x_pred.astype(BF16), jnp.stack([mll, kld, neg])


# ---- deterministic parameter init & host-side packing ------------------------
def init_encoder(key, scale=0.05):
    ks = jax.random.split(key, 7)
    return dict(
        w1=jax.random.normal(ks[0], (INPUT_DIM, HIDDEN_DIM), F32) * scale,
        wh=jax.random.normal(ks[1], (4, HIDDEN_DIM, HIDDEN_DIM), F32) * scale,  # fc2..fc5
        b=jax.random.normal(ks[2], (5, HIDDEN_DIM), F32) * 0.01,                # fc1..fc5 biases
        g=jnp.ones((5, HIDDEN_DIM), F32),                                        # LN gammas
        beta=jnp.zeros((5, HIDDEN_DIM), F32),                                    # LN betas
        wmu=jax.random.normal(ks[3], (HIDDEN_DIM, LATENT_DIM), F32) * scale,
        bmu=jax.random.normal(ks[4], (1, LATENT_DIM), F32) * 0.01,
        wlv=jax.random.normal(ks[5], (HIDDEN_DIM, LATENT_DIM), F32) * scale,
        blv=jax.random.normal(ks[6], (1, LATENT_DIM), F32) * 0.01,
    )


def pack_params(enc, old, dec_w, dec_b):
    # Layer 1: shared input -> concatenated weight
    w1_cat = jnp.concatenate([enc["w1"], old["w1"]], axis=1).astype(BF16)     # (I, 2H)

    # fc2..fc5: block-diagonal (2H, 2H) weights (live chain top-left, frozen bottom-right)
    whb = jnp.zeros((4, H2, H2), F32)
    whb = whb.at[:, :H, :H].set(enc["wh"])
    whb = whb.at[:, H:, H:].set(old["wh"])
    whb = whb.astype(BF16)

    # Fused head: [mu | logvar | post_mu | post_logvar | x_pred] from [h_enc | h_old].
    # Eval-mode (z == mu) decoder fusion: W_dec_fused = Wmu @ Wd, b_fused = bmu @ Wd + bd.
    dec_w_fused = enc["wmu"] @ dec_w                       # (H, INPUT_DIM) f32
    dec_b_fused = enc["bmu"] @ dec_w + dec_b               # (1, INPUT_DIM)
    whead = jnp.zeros((H2, HEAD_DIM), F32)
    whead = whead.at[:H, 0 * L:1 * L].set(enc["wmu"])
    whead = whead.at[:H, 1 * L:2 * L].set(enc["wlv"])
    whead = whead.at[H:, 2 * L:3 * L].set(old["wmu"])
    whead = whead.at[H:, 3 * L:4 * L].set(old["wlv"])
    whead = whead.at[:H, 4 * L:].set(dec_w_fused)
    whead = whead.astype(BF16)

    hbias = jnp.concatenate(
        [enc["bmu"], enc["blv"], old["bmu"], old["blv"], dec_b_fused],
        axis=1).astype(F32)                                                    # (1, HEAD_DIM)

    def cat(a, b):  # (5, H) + (5, H) -> (5, 2H)
        return jnp.concatenate([a, b], axis=1)

    vec = jnp.concatenate([cat(enc["b"], old["b"]),
                           cat(enc["g"], old["g"]),
                           cat(enc["beta"], old["beta"])], axis=0).astype(F32)  # (15, 2H)
    return w1_cat, whb, whead, vec, hbias


if __name__ == "__main__":
    key = jax.random.PRNGKey(0)
    kx, ke, ko, kd = jax.random.split(key, 4)

    # binary implicit-feedback user/item matrix (0/1 is exact in bf16)
    x = (jax.random.uniform(kx, (B, INPUT_DIM)) < 0.3).astype(F32)
    x = x.at[:, 0].set(1.0)           # every user has >= 1 interaction
    x = x.astype(BF16)

    enc = init_encoder(ke)
    old = init_encoder(ko)
    dk = jax.random.split(kd, 2)
    dec_w = jax.random.normal(dk[0], (LATENT_DIM, INPUT_DIM), F32) * 0.05
    dec_b = jax.random.normal(dk[1], (1, INPUT_DIM), F32) * 0.01

    packed = pack_params(enc, old, dec_w, dec_b)

    x_pred, losses = recvae_forward_jit(x, *packed)
    jax.block_until_ready((x_pred, losses))

    ref_pred, ref_losses = recvae_reference(x, *packed)
    assert bool(jnp.allclose(x_pred.astype(F32), ref_pred.astype(F32),
                             rtol=2e-2, atol=2e-2)), "x_pred mismatch"
    assert bool(jnp.allclose(losses, ref_losses, rtol=2e-2, atol=2e-2)), "loss mismatch"
    assert bool(jnp.all(jnp.isfinite(losses)))

    print("KERNEL_OK")
</pallas_src>

<mosaic_0001>
module attributes {stable_mosaic.version = 11 : i64} {
  func.func @recvae_kernel(%arg0: i32, %arg1: memref<128x256xbf16, #tpu.memory_space<vmem>>, %arg2: memref<256x256xbf16, #tpu.memory_space<vmem>>, %arg3: memref<4x256x256xbf16, #tpu.memory_space<vmem>>, %arg4: memref<256x768xbf16, #tpu.memory_space<vmem>>, %arg5: memref<15x256xf32, #tpu.memory_space<vmem>>, %arg6: memref<1x768xf32, #tpu.memory_space<vmem>>, %arg7: memref<128x256xbf16, #tpu.memory_space<vmem>>, %arg8: memref<1x8x128xf32, #tpu.memory_space<vmem>>) attributes {dimension_semantics = [#tpu.dimension_semantics<parallel>], iteration_bounds = array<i64: 2>, scalar_prefetch = 0 : i64, scratch_operands = 0 : i64, tpu.core_type = #tpu.core_type<tc>, window_params = [{transform_indices = @transform_0, window_bounds = array<i64: 128, 256>}, {pipeline_mode = #tpu.pipeline_mode<synchronous>, transform_indices = @transform_1, window_bounds = array<i64: 256, 256>}, {pipeline_mode = #tpu.pipeline_mode<synchronous>, transform_indices = @transform_2, window_bounds = array<i64: 4, 256, 256>}, {pipeline_mode = #tpu.pipeline_mode<synchronous>, transform_indices = @transform_3, window_bounds = array<i64: 256, 768>}, {pipeline_mode = #tpu.pipeline_mode<synchronous>, transform_indices = @transform_4, window_bounds = array<i64: 15, 256>}, {pipeline_mode = #tpu.pipeline_mode<synchronous>, transform_indices = @transform_5, window_bounds = array<i64: 1, 768>}, {transform_indices = @transform_6, window_bounds = array<i64: 128, 256>}, {transform_indices = @transform_7, window_bounds = array<i64: 1, 8, 128>}]} {
    %c0 = arith.constant 0 : index
    %c0_0 = arith.constant 0 : index
    %0 = vector.load %arg1[%c0, %c0_0] : memref<128x256xbf16, #tpu.memory_space<vmem>>, vector<128x256xbf16>
    %1 = arith.extf %0 : vector<128x256xbf16> to vector<128x256xf32>
    %c0_1 = arith.constant 0 : index
    %c0_2 = arith.constant 0 : index
    %2 = vector.load %arg2[%c0_1, %c0_2] : memref<256x256xbf16, #tpu.memory_space<vmem>>, vector<256x256xbf16>
    %c0_3 = arith.constant 0 : index
    %c0_4 = arith.constant 0 : index
    %c0_5 = arith.constant 0 : index
    %3 = vector.load %arg3[%c0_3, %c0_4, %c0_5] : memref<4x256x256xbf16, #tpu.memory_space<vmem>>, vector<4x256x256xbf16>
    %c0_6 = arith.constant 0 : index
    %c0_7 = arith.constant 0 : index
    %4 = vector.load %arg4[%c0_6, %c0_7] : memref<256x768xbf16, #tpu.memory_space<vmem>>, vector<256x768xbf16>
    %c0_8 = arith.constant 0 : index
    %c0_9 = arith.constant 0 : index
    %5 = vector.load %arg5[%c0_8, %c0_9] : memref<15x256xf32, #tpu.memory_space<vmem>>, vector<15x256xf32>
    %c0_10 = arith.constant 0 : index
    %c0_11 = arith.constant 0 : index
    %6 = vector.load %arg6[%c0_10, %c0_11] : memref<1x768xf32, #tpu.memory_space<vmem>>, vector<1x768xf32>
    %7 = arith.mulf %1, %1 : vector<128x256xf32>
    %cst = arith.constant dense<0.000000e+00> : vector<128xf32>
    %8 = vector.multi_reduction <add>, %7, %cst [1] : vector<128x256xf32> to vector<128xf32>
    %9 = vector.shape_cast %8 : vector<128xf32> to vector<128x1xf32>
    %cst_12 = arith.constant 9.99999996E-13 : f32
    %10 = vector.broadcast %cst_12 : f32 to vector<128x1xf32>
    %11 = arith.addf %9, %10 : vector<128x1xf32>
    %12 = math.rsqrt %11 : vector<128x1xf32>
    %13 = vector.broadcast %12 : vector<128x1xf32> to vector<128x256xf32>
    %14 = arith.mulf %1, %13 : vector<128x256xf32>
    %15 = arith.truncf %14 : vector<128x256xf32> to vector<128x256xbf16>
    %cst_13 = arith.constant dense<0.000000e+00> : vector<128x256xf32>
    %16 = tpu.matmul %15, %2, %cst_13 {dimension_numbers = #tpu.dot_dimension_numbers<[1], [0], [0], [1], [0, 0, 1, 1], [], []>} : vector<128x256xbf16>, vector<256x256xbf16>, vector<128x256xf32> -> vector<128x256xf32>
    %17 = vector.extract_strided_slice %5 {offsets = [0, 0], sizes = [1, 256], strides = [1, 1]} : vector<15x256xf32> to vector<1x256xf32>
    %18 = vector.broadcast %17 : vector<1x256xf32> to vector<128x256xf32>
    %19 = arith.addf %16, %18 : vector<128x256xf32>
    %20 = arith.negf %19 : vector<128x256xf32>
    %21 = math.exp %20 : vector<128x256xf32>
    %cst_14 = arith.constant 1.000000e+00 : f32
    %22 = vector.broadcast %cst_14 : f32 to vector<128x256xf32>
    %23 = arith.addf %22, %21 : vector<128x256xf32>
    %24 = arith.divf %22, %23 : vector<128x256xf32>
    %25 = arith.mulf %19, %24 : vector<128x256xf32>
    %26 = vector.extract_strided_slice %5 {offsets = [5, 0], sizes = [1, 256], strides = [1, 1]} : vector<15x256xf32> to vector<1x256xf32>
    %27 = vector.extract_strided_slice %5 {offsets = [10, 0], sizes = [1, 256], strides = [1, 1]} : vector<15x256xf32> to vector<1x256xf32>
    %28 = vector.extract_strided_slice %25 {offsets = [0, 0], sizes = [128, 128], strides = [1, 1]} : vector<128x256xf32> to vector<128x128xf32>
    %29 = vector.extract_strided_slice %26 {offsets = [0, 0], sizes = [1, 128], strides = [1, 1]} : vector<1x256xf32> to vector<1x128xf32>
    %30 = vector.extract_strided_slice %27 {offsets = [0, 0], sizes = [1, 128], strides = [1, 1]} : vector<1x256xf32> to vector<1x128xf32>
    %cst_15 = arith.constant dense<0.000000e+00> : vector<128xf32>
    %31 = vector.multi_reduction <add>, %28, %cst_15 [1] : vector<128x128xf32> to vector<128xf32>
    %32 = vector.shape_cast %31 : vector<128xf32> to vector<128x1xf32>
    %cst_16 = arith.constant 1.280000e+02 : f32
    %33 = vector.broadcast %cst_16 : f32 to vector<128x1xf32>
    %34 = arith.divf %32, %33 : vector<128x1xf32>
    %35 = arith.mulf %28, %28 : vector<128x128xf32>
    %cst_17 = arith.constant dense<0.000000e+00> : vector<128xf32>
    %36 = vector.multi_reduction <add>, %35, %cst_17 [1] : vector<128x128xf32> to vector<128xf32>
    %37 = vector.shape_cast %36 : vector<128xf32> to vector<128x1xf32>
    %cst_18 = arith.constant 1.280000e+02 : f32
    %38 = vector.broadcast %cst_18 : f32 to vector<128x1xf32>
    %39 = arith.divf %37, %38 : vector<128x1xf32>
    %40 = arith.mulf %34, %34 : vector<128x1xf32>
    %41 = arith.subf %39, %40 : vector<128x1xf32>
    %42 = vector.broadcast %34 : vector<128x1xf32> to vector<128x128xf32>
    %43 = arith.subf %28, %42 : vector<128x128xf32>
    %cst_19 = arith.constant 1.000000e-01 : f32
    %44 = vector.broadcast %cst_19 : f32 to vector<128x1xf32>
    %45 = arith.addf %41, %44 : vector<128x1xf32>
    %46 = math.rsqrt %45 : vector<128x1xf32>
    %47 = vector.broadcast %46 : vector<128x1xf32> to vector<128x128xf32>
    %48 = arith.mulf %43, %47 : vector<128x128xf32>
    %49 = vector.broadcast %29 : vector<1x128xf32> to vector<128x128xf32>
    %50 = arith.mulf %48, %49 : vector<128x128xf32>
    %51 = vector.broadcast %30 : vector<1x128xf32> to vector<128x128xf32>
    %52 = arith.addf %50, %51 : vector<128x128xf32>
    %53 = vector.extract_strided_slice %25 {offsets = [0, 128], sizes = [128, 128], strides = [1, 1]} : vector<128x256xf32> to vector<128x128xf32>
    %54 = vector.extract_strided_slice %26 {offsets = [0, 128], sizes = [1, 128], strides = [1, 1]} : vector<1x256xf32> to vector<1x128xf32>
    %55 = vector.extract_strided_slice %27 {offsets = [0, 128], sizes = [1, 128], strides = [1, 1]} : vector<1x256xf32> to vector<1x128xf32>
    %cst_20 = arith.constant dense<0.000000e+00> : vector<128xf32>
    %56 = vector.multi_reduction <add>, %53, %cst_20 [1] : vector<128x128xf32> to vector<128xf32>
    %57 = vector.shape_cast %56 : vector<128xf32> to vector<128x1xf32>
    %cst_21 = arith.constant 1.280000e+02 : f32
    %58 = vector.broadcast %cst_21 : f32 to vector<128x1xf32>
    %59 = arith.divf %57, %58 : vector<128x1xf32>
    %60 = arith.mulf %53, %53 : vector<128x128xf32>
    %cst_22 = arith.constant dense<0.000000e+00> : vector<128xf32>
    %61 = vector.multi_reduction <add>, %60, %cst_22 [1] : vector<128x128xf32> to vector<128xf32>
    %62 = vector.shape_cast %61 : vector<128xf32> to vector<128x1xf32>
    %cst_23 = arith.constant 1.280000e+02 : f32
    %63 = vector.broadcast %cst_23 : f32 to vector<128x1xf32>
    %64 = arith.divf %62, %63 : vector<128x1xf32>
    %65 = arith.mulf %59, %59 : vector<128x1xf32>
    %66 = arith.subf %64, %65 : vector<128x1xf32>
    %67 = vector.broadcast %59 : vector<128x1xf32> to vector<128x128xf32>
    %68 = arith.subf %53, %67 : vector<128x128xf32>
    %cst_24 = arith.constant 1.000000e-01 : f32
    %69 = vector.broadcast %cst_24 : f32 to vector<128x1xf32>
    %70 = arith.addf %66, %69 : vector<128x1xf32>
    %71 = math.rsqrt %70 : vector<128x1xf32>
    %72 = vector.broadcast %71 : vector<128x1xf32> to vector<128x128xf32>
    %73 = arith.mulf %68, %72 : vector<128x128xf32>
    %74 = vector.broadcast %54 : vector<1x128xf32> to vector<128x128xf32>
    %75 = arith.mulf %73, %74 : vector<128x128xf32>
    %76 = vector.broadcast %55 : vector<1x128xf32> to vector<128x128xf32>
    %77 = arith.addf %75, %76 : vector<128x128xf32>
    %78 = tpu.concatenate %52, %77 in 1 : vector<128x128xf32>, vector<128x128xf32> -> vector<128x256xf32>
    %79 = vector.extract_strided_slice %3 {offsets = [0, 0, 0], sizes = [1, 256, 256], strides = [1, 1, 1]} : vector<4x256x256xbf16> to vector<1x256x256xbf16>
    %80 = vector.shape_cast %79 : vector<1x256x256xbf16> to vector<256x256xbf16>
    %81 = arith.truncf %78 : vector<128x256xf32> to vector<128x256xbf16>
    %cst_25 = arith.constant dense<0.000000e+00> : vector<128x256xf32>
    %82 = tpu.matmul %81, %80, %cst_25 {dimension_numbers = #tpu.dot_dimension_numbers<[1], [0], [0], [1], [0, 0, 1, 1], [], []>} : vector<128x256xbf16>, vector<256x256xbf16>, vector<128x256xf32> -> vector<128x256xf32>
    %83 = vector.extract_strided_slice %5 {offsets = [1, 0], sizes = [1, 256], strides = [1, 1]} : vector<15x256xf32> to vector<1x256xf32>
    %84 = vector.broadcast %83 : vector<1x256xf32> to vector<128x256xf32>
    %85 = arith.addf %82, %84 : vector<128x256xf32>
    %86 = arith.addf %85, %78 : vector<128x256xf32>
    %87 = arith.negf %86 : vector<128x256xf32>
    %88 = math.exp %87 : vector<128x256xf32>
    %cst_26 = arith.constant 1.000000e+00 : f32
    %89 = vector.broadcast %cst_26 : f32 to vector<128x256xf32>
    %90 = arith.addf %89, %88 : vector<128x256xf32>
    %91 = arith.divf %89, %90 : vector<128x256xf32>
    %92 = arith.mulf %86, %91 : vector<128x256xf32>
    %93 = vector.extract_strided_slice %5 {offsets = [6, 0], sizes = [1, 256], strides = [1, 1]} : vector<15x256xf32> to vector<1x256xf32>
    %94 = vector.extract_strided_slice %5 {offsets = [11, 0], sizes = [1, 256], strides = [1, 1]} : vector<15x256xf32> to vector<1x256xf32>
    %95 = vector.extract_strided_slice %92 {offsets = [0, 0], sizes = [128, 128], strides = [1, 1]} : vector<128x256xf32> to vector<128x128xf32>
    %96 = vector.extract_strided_slice %93 {offsets = [0, 0], sizes = [1, 128], strides = [1, 1]} : vector<1x256xf32> to vector<1x128xf32>
    %97 = vector.extract_strided_slice %94 {offsets = [0, 0], sizes = [1, 128], strides = [1, 1]} : vector<1x256xf32> to vector<1x128xf32>
    %cst_27 = arith.constant dense<0.000000e+00> : vector<128xf32>
    %98 = vector.multi_reduction <add>, %95, %cst_27 [1] : vector<128x128xf32> to vector<128xf32>
    %99 = vector.shape_cast %98 : vector<128xf32> to vector<128x1xf32>
    %cst_28 = arith.constant 1.280000e+02 : f32
    %100 = vector.broadcast %cst_28 : f32 to vector<128x1xf32>
    %101 = arith.divf %99, %100 : vector<128x1xf32>
    %102 = arith.mulf %95, %95 : vector<128x128xf32>
    %cst_29 = arith.constant dense<0.000000e+00> : vector<128xf32>
    %103 = vector.multi_reduction <add>, %102, %cst_29 [1] : vector<128x128xf32> to vector<128xf32>
    %104 = vector.shape_cast %103 : vector<128xf32> to vector<128x1xf32>
    %cst_30 = arith.constant 1.280000e+02 : f32
    %105 = vector.broadcast %cst_30 : f32 to vector<128x1xf32>
    %106 = arith.divf %104, %105 : vector<128x1xf32>
    %107 = arith.mulf %101, %101 : vector<128x1xf32>
    %108 = arith.subf %106, %107 : vector<128x1xf32>
    %109 = vector.broadcast %101 : vector<128x1xf32> to vector<128x128xf32>
    %110 = arith.subf %95, %109 : vector<128x128xf32>
    %cst_31 = arith.constant 1.000000e-01 : f32
    %111 = vector.broadcast %cst_31 : f32 to vector<128x1xf32>
    %112 = arith.addf %108, %111 : vector<128x1xf32>
    %113 = math.rsqrt %112 : vector<128x1xf32>
    %114 = vector.broadcast %113 : vector<128x1xf32> to vector<128x128xf32>
    %115 = arith.mulf %110, %114 : vector<128x128xf32>
    %116 = vector.broadcast %96 : vector<1x128xf32> to vector<128x128xf32>
    %117 = arith.mulf %115, %116 : vector<128x128xf32>
    %118 = vector.broadcast %97 : vector<1x128xf32> to vector<128x128xf32>
    %119 = arith.addf %117, %118 : vector<128x128xf32>
    %120 = vector.extract_strided_slice %92 {offsets = [0, 128], sizes = [128, 128], strides = [1, 1]} : vector<128x256xf32> to vector<128x128xf32>
    %121 = vector.extract_strided_slice %93 {offsets = [0, 128], sizes = [1, 128], strides = [1, 1]} : vector<1x256xf32> to vector<1x128xf32>
    %122 = vector.extract_strided_slice %94 {offsets = [0, 128], sizes = [1, 128], strides = [1, 1]} : vector<1x256xf32> to vector<1x128xf32>
    %cst_32 = arith.constant dense<0.000000e+00> : vector<128xf32>
    %123 = vector.multi_reduction <add>, %120, %cst_32 [1] : vector<128x128xf32> to vector<128xf32>
    %124 = vector.shape_cast %123 : vector<128xf32> to vector<128x1xf32>
    %cst_33 = arith.constant 1.280000e+02 : f32
    %125 = vector.broadcast %cst_33 : f32 to vector<128x1xf32>
    %126 = arith.divf %124, %125 : vector<128x1xf32>
    %127 = arith.mulf %120, %120 : vector<128x128xf32>
    %cst_34 = arith.constant dense<0.000000e+00> : vector<128xf32>
    %128 = vector.multi_reduction <add>, %127, %cst_34 [1] : vector<128x128xf32> to vector<128xf32>
    %129 = vector.shape_cast %128 : vector<128xf32> to vector<128x1xf32>
    %cst_35 = arith.constant 1.280000e+02 : f32
    %130 = vector.broadcast %cst_35 : f32 to vector<128x1xf32>
    %131 = arith.divf %129, %130 : vector<128x1xf32>
    %132 = arith.mulf %126, %126 : vector<128x1xf32>
    %133 = arith.subf %131, %132 : vector<128x1xf32>
    %134 = vector.broadcast %126 : vector<128x1xf32> to vector<128x128xf32>
    %135 = arith.subf %120, %134 : vector<128x128xf32>
    %cst_36 = arith.constant 1.000000e-01 : f32
    %136 = vector.broadcast %cst_36 : f32 to vector<128x1xf32>
    %137 = arith.addf %133, %136 : vector<128x1xf32>
    %138 = math.rsqrt %137 : vector<128x1xf32>
    %139 = vector.broadcast %138 : vector<128x1xf32> to vector<128x128xf32>
    %140 = arith.mulf %135, %139 : vector<128x128xf32>
    %141 = vector.broadcast %121 : vector<1x128xf32> to vector<128x128xf32>
    %142 = arith.mulf %140, %141 : vector<128x128xf32>
    %143 = vector.broadcast %122 : vector<1x128xf32> to vector<128x128xf32>
    %144 = arith.addf %142, %143 : vector<128x128xf32>
    %145 = tpu.concatenate %119, %144 in 1 : vector<128x128xf32>, vector<128x128xf32> -> vector<128x256xf32>
    %146 = arith.addf %78, %145 : vector<128x256xf32>
    %147 = vector.extract_strided_slice %3 {offsets = [1, 0, 0], sizes = [1, 256, 256], strides = [1, 1, 1]} : vector<4x256x256xbf16> to vector<1x256x256xbf16>
    %148 = vector.shape_cast %147 : vector<1x256x256xbf16> to vector<256x256xbf16>
    %149 = arith.truncf %145 : vector<128x256xf32> to vector<128x256xbf16>
    %cst_37 = arith.constant dense<0.000000e+00> : vector<128x256xf32>
    %150 = tpu.matmul %149, %148, %cst_37 {dimension_numbers = #tpu.dot_dimension_numbers<[1], [0], [0], [1], [0, 0, 1, 1], [], []>} : vector<128x256xbf16>, vector<256x256xbf16>, vector<128x256xf32> -> vector<128x256xf32>
    %151 = vector.extract_strided_slice %5 {offsets = [2, 0], sizes = [1, 256], strides = [1, 1]} : vector<15x256xf32> to vector<1x256xf32>
    %152 = vector.broadcast %151 : vector<1x256xf32> to vector<128x256xf32>
    %153 = arith.addf %150, %152 : vector<128x256xf32>
    %154 = arith.addf %153, %146 : vector<128x256xf32>
    %155 = arith.negf %154 : vector<128x256xf32>
    %156 = math.exp %155 : vector<128x256xf32>
    %cst_38 = arith.constant 1.000000e+00 : f32
    %157 = vector.broadcast %cst_38 : f32 to vector<128x256xf32>
    %158 = arith.addf %157, %156 : vector<128x256xf32>
    %159 = arith.divf %157, %158 : vector<128x256xf32>
    %160 = arith.mulf %154, %159 : vector<128x256xf32>
    %161 = vector.extract_strided_slice %5 {offsets = [7, 0], sizes = [1, 256], strides = [1, 1]} : vector<15x256xf32> to vector<1x256xf32>
    %162 = vector.extract_strided_slice %5 {offsets = [12, 0], sizes = [1, 256], strides = [1, 1]} : vector<15x256xf32> to vector<1x256xf32>
    %163 = vector.extract_strided_slice %160 {offsets = [0, 0], sizes = [128, 128], strides = [1, 1]} : vector<128x256xf32> to vector<128x128xf32>
    %164 = vector.extract_strided_slice %161 {offsets = [0, 0], sizes = [1, 128], strides = [1, 1]} : vector<1x256xf32> to vector<1x128xf32>
    %165 = vector.extract_strided_slice %162 {offsets = [0, 0], sizes = [1, 128], strides = [1, 1]} : vector<1x256xf32> to vector<1x128xf32>
    %cst_39 = arith.constant dense<0.000000e+00> : vector<128xf32>
    %166 = vector.multi_reduction <add>, %163, %cst_39 [1] : vector<128x128xf32> to vector<128xf32>
    %167 = vector.shape_cast %166 : vector<128xf32> to vector<128x1xf32>
    %cst_40 = arith.constant 1.280000e+02 : f32
    %168 = vector.broadcast %cst_40 : f32 to vector<128x1xf32>
    %169 = arith.divf %167, %168 : vector<128x1xf32>
    %170 = arith.mulf %163, %163 : vector<128x128xf32>
    %cst_41 = arith.constant dense<0.000000e+00> : vector<128xf32>
    %171 = vector.multi_reduction <add>, %170, %cst_41 [1] : vector<128x128xf32> to vector<128xf32>
    %172 = vector.shape_cast %171 : vector<128xf32> to vector<128x1xf32>
    %cst_42 = arith.constant 1.280000e+02 : f32
    %173 = vector.broadcast %cst_42 : f32 to vector<128x1xf32>
    %174 = arith.divf %172, %173 : vector<128x1xf32>
    %175 = arith.mulf %169, %169 : vector<128x1xf32>
    %176 = arith.subf %174, %175 : vector<128x1xf32>
    %177 = vector.broadcast %169 : vector<128x1xf32> to vector<128x128xf32>
    %178 = arith.subf %163, %177 : vector<128x128xf32>
    %cst_43 = arith.constant 1.000000e-01 : f32
    %179 = vector.broadcast %cst_43 : f32 to vector<128x1xf32>
    %180 = arith.addf %176, %179 : vector<128x1xf32>
    %181 = math.rsqrt %180 : vector<128x1xf32>
    %182 = vector.broadcast %181 : vector<128x1xf32> to vector<128x128xf32>
    %183 = arith.mulf %178, %182 : vector<128x128xf32>
    %184 = vector.broadcast %164 : vector<1x128xf32> to vector<128x128xf32>
    %185 = arith.mulf %183, %184 : vector<128x128xf32>
    %186 = vector.broadcast %165 : vector<1x128xf32> to vector<128x128xf32>
    %187 = arith.addf %185, %186 : vector<128x128xf32>
    %188 = vector.extract_strided_slice %160 {offsets = [0, 128], sizes = [128, 128], strides = [1, 1]} : vector<128x256xf32> to vector<128x128xf32>
    %189 = vector.extract_strided_slice %161 {offsets = [0, 128], sizes = [1, 128], strides = [1, 1]} : vector<1x256xf32> to vector<1x128xf32>
    %190 = vector.extract_strided_slice %162 {offsets = [0, 128], sizes = [1, 128], strides = [1, 1]} : vector<1x256xf32> to vector<1x128xf32>
    %cst_44 = arith.constant dense<0.000000e+00> : vector<128xf32>
    %191 = vector.multi_reduction <add>, %188, %cst_44 [1] : vector<128x128xf32> to vector<128xf32>
    %192 = vector.shape_cast %191 : vector<128xf32> to vector<128x1xf32>
    %cst_45 = arith.constant 1.280000e+02 : f32
    %193 = vector.broadcast %cst_45 : f32 to vector<128x1xf32>
    %194 = arith.divf %192, %193 : vector<128x1xf32>
    %195 = arith.mulf %188, %188 : vector<128x128xf32>
    %cst_46 = arith.constant dense<0.000000e+00> : vector<128xf32>
    %196 = vector.multi_reduction <add>, %195, %cst_46 [1] : vector<128x128xf32> to vector<128xf32>
    %197 = vector.shape_cast %196 : vector<128xf32> to vector<128x1xf32>
    %cst_47 = arith.constant 1.280000e+02 : f32
    %198 = vector.broadcast %cst_47 : f32 to vector<128x1xf32>
    %199 = arith.divf %197, %198 : vector<128x1xf32>
    %200 = arith.mulf %194, %194 : vector<128x1xf32>
    %201 = arith.subf %199, %200 : vector<128x1xf32>
    %202 = vector.broadcast %194 : vector<128x1xf32> to vector<128x128xf32>
    %203 = arith.subf %188, %202 : vector<128x128xf32>
    %cst_48 = arith.constant 1.000000e-01 : f32
    %204 = vector.broadcast %cst_48 : f32 to vector<128x1xf32>
    %205 = arith.addf %201, %204 : vector<128x1xf32>
    %206 = math.rsqrt %205 : vector<128x1xf32>
    %207 = vector.broadcast %206 : vector<128x1xf32> to vector<128x128xf32>
    %208 = arith.mulf %203, %207 : vector<128x128xf32>
    %209 = vector.broadcast %189 : vector<1x128xf32> to vector<128x128xf32>
    %210 = arith.mulf %208, %209 : vector<128x128xf32>
    %211 = vector.broadcast %190 : vector<1x128xf32> to vector<128x128xf32>
    %212 = arith.addf %210, %211 : vector<128x128xf32>
    %213 = tpu.concatenate %187, %212 in 1 : vector<128x128xf32>, vector<128x128xf32> -> vector<128x256xf32>
    %214 = arith.addf %146, %213 : vector<128x256xf32>
    %215 = vector.extract_strided_slice %3 {offsets = [2, 0, 0], sizes = [1, 256, 256], strides = [1, 1, 1]} : vector<4x256x256xbf16> to vector<1x256x256xbf16>
    %216 = vector.shape_cast %215 : vector<1x256x256xbf16> to vector<256x256xbf16>
    %217 = arith.truncf %213 : vector<128x256xf32> to vector<128x256xbf16>
    %cst_49 = arith.constant dense<0.000000e+00> : vector<128x256xf32>
    %218 = tpu.matmul %217, %216, %cst_49 {dimension_numbers = #tpu.dot_dimension_numbers<[1], [0], [0], [1], [0, 0, 1, 1], [], []>} : vector<128x256xbf16>, vector<256x256xbf16>, vector<128x256xf32> -> vector<128x256xf32>
    %219 = vector.extract_strided_slice %5 {offsets = [3, 0], sizes = [1, 256], strides = [1, 1]} : vector<15x256xf32> to vector<1x256xf32>
    %220 = vector.broadcast %219 : vector<1x256xf32> to vector<128x256xf32>
    %221 = arith.addf %218, %220 : vector<128x256xf32>
    %222 = arith.addf %221, %214 : vector<128x256xf32>
    %223 = arith.negf %222 : vector<128x256xf32>
    %224 = math.exp %223 : vector<128x256xf32>
    %cst_50 = arith.constant 1.000000e+00 : f32
    %225 = vector.broadcast %cst_50 : f32 to vector<128x256xf32>
    %226 = arith.addf %225, %224 : vector<128x256xf32>
    %227 = arith.divf %225, %226 : vector<128x256xf32>
    %228 = arith.mulf %222, %227 : vector<128x256xf32>
    %229 = vector.extract_strided_slice %5 {offsets = [8, 0], sizes = [1, 256], strides = [1, 1]} : vector<15x256xf32> to vector<1x256xf32>
    %230 = vector.extract_strided_slice %5 {offsets = [13, 0], sizes = [1, 256], strides = [1, 1]} : vector<15x256xf32> to vector<1x256xf32>
    %231 = vector.extract_strided_slice %228 {offsets = [0, 0], sizes = [128, 128], strides = [1, 1]} : vector<128x256xf32> to vector<128x128xf32>
    %232 = vector.extract_strided_slice %229 {offsets = [0, 0], sizes = [1, 128], strides = [1, 1]} : vector<1x256xf32> to vector<1x128xf32>
    %233 = vector.extract_strided_slice %230 {offsets = [0, 0], sizes = [1, 128], strides = [1, 1]} : vector<1x256xf32> to vector<1x128xf32>
    %cst_51 = arith.constant dense<0.000000e+00> : vector<128xf32>
    %234 = vector.multi_reduction <add>, %231, %cst_51 [1] : vector<128x128xf32> to vector<128xf32>
    %235 = vector.shape_cast %234 : vector<128xf32> to vector<128x1xf32>
    %cst_52 = arith.constant 1.280000e+02 : f32
    %236 = vector.broadcast %cst_52 : f32 to vector<128x1xf32>
    %237 = arith.divf %235, %236 : vector<128x1xf32>
    %238 = arith.mulf %231, %231 : vector<128x128xf32>
    %cst_53 = arith.constant dense<0.000000e+00> : vector<128xf32>
    %239 = vector.multi_reduction <add>, %238, %cst_53 [1] : vector<128x128xf32> to vector<128xf32>
    %240 = vector.shape_cast %239 : vector<128xf32> to vector<128x1xf32>
    %cst_54 = arith.constant 1.280000e+02 : f32
    %241 = vector.broadcast %cst_54 : f32 to vector<128x1xf32>
    %242 = arith.divf %240, %241 : vector<128x1xf32>
    %243 = arith.mulf %237, %237 : vector<128x1xf32>
    %244 = arith.subf %242, %243 : vector<128x1xf32>
    %245 = vector.broadcast %237 : vector<128x1xf32> to vector<128x128xf32>
    %246 = arith.subf %231, %245 : vector<128x128xf32>
    %cst_55 = arith.constant 1.000000e-01 : f32
    %247 = vector.broadcast %cst_55 : f32 to vector<128x1xf32>
    %248 = arith.addf %244, %247 : vector<128x1xf32>
    %249 = math.rsqrt %248 : vector<128x1xf32>
    %250 = vector.broadcast %249 : vector<128x1xf32> to vector<128x128xf32>
    %251 = arith.mulf %246, %250 : vector<128x128xf32>
    %252 = vector.broadcast %232 : vector<1x128xf32> to vector<128x128xf32>
    %253 = arith.mulf %251, %252 : vector<128x128xf32>
    %254 = vector.broadcast %233 : vector<1x128xf32> to vector<128x128xf32>
    %255 = arith.addf %253, %254 : vector<128x128xf32>
    %256 = vector.extract_strided_slice %228 {offsets = [0, 128], sizes = [128, 128], strides = [1, 1]} : vector<128x256xf32> to vector<128x128xf32>
    %257 = vector.extract_strided_slice %229 {offsets = [0, 128], sizes = [1, 128], strides = [1, 1]} : vector<1x256xf32> to vector<1x128xf32>
    %258 = vector.extract_strided_slice %230 {offsets = [0, 128], sizes = [1, 128], strides = [1, 1]} : vector<1x256xf32> to vector<1x128xf32>
    %cst_56 = arith.constant dense<0.000000e+00> : vector<128xf32>
    %259 = vector.multi_reduction <add>, %256, %cst_56 [1] : vector<128x128xf32> to vector<128xf32>
    %260 = vector.shape_cast %259 : vector<128xf32> to vector<128x1xf32>
    %cst_57 = arith.constant 1.280000e+02 : f32
    %261 = vector.broadcast %cst_57 : f32 to vector<128x1xf32>
    %262 = arith.divf %260, %261 : vector<128x1xf32>
    %263 = arith.mulf %256, %256 : vector<128x128xf32>
    %cst_58 = arith.constant dense<0.000000e+00> : vector<128xf32>
    %264 = vector.multi_reduction <add>, %263, %cst_58 [1] : vector<128x128xf32> to vector<128xf32>
    %265 = vector.shape_cast %264 : vector<128xf32> to vector<128x1xf32>
    %cst_59 = arith.constant 1.280000e+02 : f32
    %266 = vector.broadcast %cst_59 : f32 to vector<128x1xf32>
    %267 = arith.divf %265, %266 : vector<128x1xf32>
    %268 = arith.mulf %262, %262 : vector<128x1xf32>
    %269 = arith.subf %267, %268 : vector<128x1xf32>
    %270 = vector.broadcast %262 : vector<128x1xf32> to vector<128x128xf32>
    %271 = arith.subf %256, %270 : vector<128x128xf32>
    %cst_60 = arith.constant 1.000000e-01 : f32
    %272 = vector.broadcast %cst_60 : f32 to vector<128x1xf32>
    %273 = arith.addf %269, %272 : vector<128x1xf32>
    %274 = math.rsqrt %273 : vector<128x1xf32>
    %275 = vector.broadcast %274 : vector<128x1xf32> to vector<128x128xf32>
    %276 = arith.mulf %271, %275 : vector<128x128xf32>
    %277 = vector.broadcast %257 : vector<1x128xf32> to vector<128x128xf32>
    %278 = arith.mulf %276, %277 : vector<128x128xf32>
    %279 = vector.broadcast %258 : vector<1x128xf32> to vector<128x128xf32>
    %280 = arith.addf %278, %279 : vector<128x128xf32>
    %281 = tpu.concatenate %255, %280 in 1 : vector<128x128xf32>, vector<128x128xf32> -> vector<128x256xf32>
    %282 = arith.addf %214, %281 : vector<128x256xf32>
    %283 = vector.extract_strided_slice %3 {offsets = [3, 0, 0], sizes = [1, 256, 256], strides = [1, 1, 1]} : vector<4x256x256xbf16> to vector<1x256x256xbf16>
    %284 = vector.shape_cast %283 : vector<1x256x256xbf16> to vector<256x256xbf16>
    %285 = arith.truncf %281 : vector<128x256xf32> to vector<128x256xbf16>
    %cst_61 = arith.constant dense<0.000000e+00> : vector<128x256xf32>
    %286 = tpu.matmul %285, %284, %cst_61 {dimension_numbers = #tpu.dot_dimension_numbers<[1], [0], [0], [1], [0, 0, 1, 1], [], []>} : vector<128x256xbf16>, vector<256x256xbf16>, vector<128x256xf32> -> vector<128x256xf32>
    %287 = vector.extract_strided_slice %5 {offsets = [4, 0], sizes = [1, 256], strides = [1, 1]} : vector<15x256xf32> to vector<1x256xf32>
    %288 = vector.broadcast %287 : vector<1x256xf32> to vector<128x256xf32>
    %289 = arith.addf %286, %288 : vector<128x256xf32>
    %290 = arith.addf %289, %282 : vector<128x256xf32>
    %291 = arith.negf %290 : vector<128x256xf32>
    %292 = math.exp %291 : vector<128x256xf32>
    %cst_62 = arith.constant 1.000000e+00 : f32
    %293 = vector.broadcast %cst_62 : f32 to vector<128x256xf32>
    %294 = arith.addf %293, %292 : vector<128x256xf32>
    %295 = arith.divf %293, %294 : vector<128x256xf32>
    %296 = arith.mulf %290, %295 : vector<128x256xf32>
    %297 = vector.extract_strided_slice %5 {offsets = [9, 0], sizes = [1, 256], strides = [1, 1]} : vector<15x256xf32> to vector<1x256xf32>
    %298 = vector.extract_strided_slice %5 {offsets = [14, 0], sizes = [1, 256], strides = [1, 1]} : vector<15x256xf32> to vector<1x256xf32>
    %299 = vector.extract_strided_slice %296 {offsets = [0, 0], sizes = [128, 128], strides = [1, 1]} : vector<128x256xf32> to vector<128x128xf32>
    %300 = vector.extract_strided_slice %297 {offsets = [0, 0], sizes = [1, 128], strides = [1, 1]} : vector<1x256xf32> to vector<1x128xf32>
    %301 = vector.extract_strided_slice %298 {offsets = [0, 0], sizes = [1, 128], strides = [1, 1]} : vector<1x256xf32> to vector<1x128xf32>
    %cst_63 = arith.constant dense<0.000000e+00> : vector<128xf32>
    %302 = vector.multi_reduction <add>, %299, %cst_63 [1] : vector<128x128xf32> to vector<128xf32>
    %303 = vector.shape_cast %302 : vector<128xf32> to vector<128x1xf32>
    %cst_64 = arith.constant 1.280000e+02 : f32
    %304 = vector.broadcast %cst_64 : f32 to vector<128x1xf32>
    %305 = arith.divf %303, %304 : vector<128x1xf32>
    %306 = arith.mulf %299, %299 : vector<128x128xf32>
    %cst_65 = arith.constant dense<0.000000e+00> : vector<128xf32>
    %307 = vector.multi_reduction <add>, %306, %cst_65 [1] : vector<128x128xf32> to vector<128xf32>
    %308 = vector.shape_cast %307 : vector<128xf32> to vector<128x1xf32>
    %cst_66 = arith.constant 1.280000e+02 : f32
    %309 = vector.broadcast %cst_66 : f32 to vector<128x1xf32>
    %310 = arith.divf %308, %309 : vector<128x1xf32>
    %311 = arith.mulf %305, %305 : vector<128x1xf32>
    %312 = arith.subf %310, %311 : vector<128x1xf32>
    %313 = vector.broadcast %305 : vector<128x1xf32> to vector<128x128xf32>
    %314 = arith.subf %299, %313 : vector<128x128xf32>
    %cst_67 = arith.constant 1.000000e-01 : f32
    %315 = vector.broadcast %cst_67 : f32 to vector<128x1xf32>
    %316 = arith.addf %312, %315 : vector<128x1xf32>
    %317 = math.rsqrt %316 : vector<128x1xf32>
    %318 = vector.broadcast %317 : vector<128x1xf32> to vector<128x128xf32>
    %319 = arith.mulf %314, %318 : vector<128x128xf32>
    %320 = vector.broadcast %300 : vector<1x128xf32> to vector<128x128xf32>
    %321 = arith.mulf %319, %320 : vector<128x128xf32>
    %322 = vector.broadcast %301 : vector<1x128xf32> to vector<128x128xf32>
    %323 = arith.addf %321, %322 : vector<128x128xf32>
    %324 = vector.extract_strided_slice %296 {offsets = [0, 128], sizes = [128, 128], strides = [1, 1]} : vector<128x256xf32> to vector<128x128xf32>
    %325 = vector.extract_strided_slice %297 {offsets = [0, 128], sizes = [1, 128], strides = [1, 1]} : vector<1x256xf32> to vector<1x128xf32>
    %326 = vector.extract_strided_slice %298 {offsets = [0, 128], sizes = [1, 128], strides = [1, 1]} : vector<1x256xf32> to vector<1x128xf32>
    %cst_68 = arith.constant dense<0.000000e+00> : vector<128xf32>
    %327 = vector.multi_reduction <add>, %324, %cst_68 [1] : vector<128x128xf32> to vector<128xf32>
    %328 = vector.shape_cast %327 : vector<128xf32> to vector<128x1xf32>
    %cst_69 = arith.constant 1.280000e+02 : f32
    %329 = vector.broadcast %cst_69 : f32 to vector<128x1xf32>
    %330 = arith.divf %328, %329 : vector<128x1xf32>
    %331 = arith.mulf %324, %324 : vector<128x128xf32>
    %cst_70 = arith.constant dense<0.000000e+00> : vector<128xf32>
    %332 = vector.multi_reduction <add>, %331, %cst_70 [1] : vector<128x128xf32> to vector<128xf32>
    %333 = vector.shape_cast %332 : vector<128xf32> to vector<128x1xf32>
    %cst_71 = arith.constant 1.280000e+02 : f32
    %334 = vector.broadcast %cst_71 : f32 to vector<128x1xf32>
    %335 = arith.divf %333, %334 : vector<128x1xf32>
    %336 = arith.mulf %330, %330 : vector<128x1xf32>
    %337 = arith.subf %335, %336 : vector<128x1xf32>
    %338 = vector.broadcast %330 : vector<128x1xf32> to vector<128x128xf32>
    %339 = arith.subf %324, %338 : vector<128x128xf32>
    %cst_72 = arith.constant 1.000000e-01 : f32
    %340 = vector.broadcast %cst_72 : f32 to vector<128x1xf32>
    %341 = arith.addf %337, %340 : vector<128x1xf32>
    %342 = math.rsqrt %341 : vector<128x1xf32>
    %343 = vector.broadcast %342 : vector<128x1xf32> to vector<128x128xf32>
    %344 = arith.mulf %339, %343 : vector<128x128xf32>
    %345 = vector.broadcast %325 : vector<1x128xf32> to vector<128x128xf32>
    %346 = arith.mulf %344, %345 : vector<128x128xf32>
    %347 = vector.broadcast %326 : vector<1x128xf32> to vector<128x128xf32>
    %348 = arith.addf %346, %347 : vector<128x128xf32>
    %349 = tpu.concatenate %323, %348 in 1 : vector<128x128xf32>, vector<128x128xf32> -> vector<128x256xf32>
    %350 = arith.truncf %349 : vector<128x256xf32> to vector<128x256xbf16>
    %cst_73 = arith.constant dense<0.000000e+00> : vector<128x768xf32>
    %351 = tpu.matmul %350, %4, %cst_73 {dimension_numbers = #tpu.dot_dimension_numbers<[1], [0], [0], [1], [0, 0, 1, 1], [], []>} : vector<128x256xbf16>, vector<256x768xbf16>, vector<128x768xf32> -> vector<128x768xf32>
    %352 = vector.broadcast %6 : vector<1x768xf32> to vector<128x768xf32>
    %353 = arith.addf %351, %352 : vector<128x768xf32>
    %354 = vector.extract_strided_slice %353 {offsets = [0, 0], sizes = [128, 128], strides = [1, 1]} : vector<128x768xf32> to vector<128x128xf32>
    %355 = vector.extract_strided_slice %353 {offsets = [0, 128], sizes = [128, 128], strides = [1, 1]} : vector<128x768xf32> to vector<128x128xf32>
    %356 = vector.extract_strided_slice %353 {offsets = [0, 256], sizes = [128, 128], strides = [1, 1]} : vector<128x768xf32> to vector<128x128xf32>
    %357 = vector.extract_strided_slice %353 {offsets = [0, 384], sizes = [128, 128], strides = [1, 1]} : vector<128x768xf32> to vector<128x128xf32>
    %358 = vector.extract_strided_slice %353 {offsets = [0, 512], sizes = [128, 256], strides = [1, 1]} : vector<128x768xf32> to vector<128x256xf32>
    %cst_74 = arith.constant dense<0xFF800000> : vector<128xf32>
    %359 = vector.multi_reduction <maximumf>, %358, %cst_74 [1] : vector<128x256xf32> to vector<128xf32>
    %360 = vector.shape_cast %359 : vector<128xf32> to vector<128x1xf32>
    %361 = vector.broadcast %360 : vector<128x1xf32> to vector<128x256xf32>
    %362 = arith.subf %358, %361 : vector<128x256xf32>
    %363 = math.exp %362 : vector<128x256xf32>
    %cst_75 = arith.constant dense<0.000000e+00> : vector<128xf32>
    %364 = vector.multi_reduction <add>, %363, %cst_75 [1] : vector<128x256xf32> to vector<128xf32>
    %365 = vector.shape_cast %364 : vector<128xf32> to vector<128x1xf32>
    %366 = math.log %365 : vector<128x1xf32>
    %367 = arith.addf %360, %366 : vector<128x1xf32>
    %368 = vector.broadcast %367 : vector<128x1xf32> to vector<128x256xf32>
    %369 = arith.subf %358, %368 : vector<128x256xf32>
    %370 = arith.mulf %369, %1 : vector<128x256xf32>
    %cst_76 = arith.constant dense<0.000000e+00> : vector<128xf32>
    %371 = vector.multi_reduction <add>, %370, %cst_76 [1] : vector<128x256xf32> to vector<128xf32>
    %372 = vector.shape_cast %371 : vector<128xf32> to vector<128x1xf32>
    %cst_77 = arith.constant dense<0.000000e+00> : vector<1xf32>
    %373 = vector.multi_reduction <add>, %372, %cst_77 [0] : vector<128x1xf32> to vector<1xf32>
    %374 = vector.shape_cast %373 : vector<1xf32> to vector<1x1xf32>
    %375 = arith.mulf %354, %354 : vector<128x128xf32>
    %cst_78 = arith.constant 1.83787704 : f32
    %376 = vector.broadcast %cst_78 : f32 to vector<128x128xf32>
    %377 = arith.addf %375, %376 : vector<128x128xf32>
    %cst_79 = arith.constant -5.000000e-01 : f32
    %378 = vector.broadcast %cst_79 : f32 to vector<128x128xf32>
    %379 = arith.mulf %378, %377 : vector<128x128xf32>
    %cst_80 = arith.constant -1.897120e+00 : f32
    %380 = vector.broadcast %cst_80 : f32 to vector<128x128xf32>
    %381 = arith.addf %379, %380 : vector<128x128xf32>
    %cst_81 = arith.constant 1.83787704 : f32
    %382 = vector.broadcast %cst_81 : f32 to vector<128x128xf32>
    %383 = arith.addf %357, %382 : vector<128x128xf32>
    %384 = arith.subf %354, %356 : vector<128x128xf32>
    %385 = arith.mulf %384, %384 : vector<128x128xf32>
    %cst_82 = arith.constant 0.000000e+00 : f32
    %386 = vector.broadcast %cst_82 : f32 to vector<128x128xf32>
    %387 = arith.subf %386, %357 : vector<128x128xf32>
    %388 = math.exp %387 : vector<128x128xf32>
    %389 = arith.mulf %385, %388 : vector<128x128xf32>
    %390 = arith.addf %383, %389 : vector<128x128xf32>
    %cst_83 = arith.constant -5.000000e-01 : f32
    %391 = vector.broadcast %cst_83 : f32 to vector<128x128xf32>
    %392 = arith.mulf %391, %390 : vector<128x128xf32>
    %cst_84 = arith.constant -0.287682086 : f32
    %393 = vector.broadcast %cst_84 : f32 to vector<128x128xf32>
    %394 = arith.addf %392, %393 : vector<128x128xf32>
    %395 = arith.mulf %354, %354 : vector<128x128xf32>
    %cst_85 = arith.constant 4.5399931E-5 : f32
    %396 = vector.broadcast %cst_85 : f32 to vector<128x128xf32>
    %397 = arith.mulf %395, %396 : vector<128x128xf32>
    %cst_86 = arith.constant 11.8378773 : f32
    %398 = vector.broadcast %cst_86 : f32 to vector<128x128xf32>
    %399 = arith.addf %398, %397 : vector<128x128xf32>
    %cst_87 = arith.constant -5.000000e-01 : f32
    %400 = vector.broadcast %cst_87 : f32 to vector<128x128xf32>
    %401 = arith.mulf %400, %399 : vector<128x128xf32>
    %cst_88 = arith.constant -2.30258512 : f32
    %402 = vector.broadcast %cst_88 : f32 to vector<128x128xf32>
    %403 = arith.addf %401, %402 : vector<128x128xf32>
    %404 = arith.maximumf %381, %394 : vector<128x128xf32>
    %405 = arith.maximumf %404, %403 : vector<128x128xf32>
    %406 = arith.subf %381, %405 : vector<128x128xf32>
    %407 = math.exp %406 : vector<128x128xf32>
    %408 = arith.subf %394, %405 : vector<128x128xf32>
    %409 = math.exp %408 : vector<128x128xf32>
    %410 = arith.addf %407, %409 : vector<128x128xf32>
    %411 = arith.subf %403, %405 : vector<128x128xf32>
    %412 = math.exp %411 : vector<128x128xf32>
    %413 = arith.addf %410, %412 : vector<128x128xf32>
    %414 = math.log %413 : vector<128x128xf32>
    %415 = arith.addf %405, %414 : vector<128x128xf32>
    %cst_89 = arith.constant 1.83787704 : f32
    %416 = vector.broadcast %cst_89 : f32 to vector<128x128xf32>
    %417 = arith.addf %355, %416 : vector<128x128xf32>
    %cst_90 = arith.constant -5.000000e-01 : f32
    %418 = vector.broadcast %cst_90 : f32 to vector<128x128xf32>
    %419 = arith.mulf %418, %417 : vector<128x128xf32>
    %420 = arith.subf %419, %415 : vector<128x128xf32>
    %cst_91 = arith.constant dense<0.000000e+00> : vector<128xf32>
    %421 = vector.multi_reduction <add>, %420, %cst_91 [1] : vector<128x128xf32> to vector<128xf32>
    %422 = vector.shape_cast %421 : vector<128xf32> to vector<128x1xf32>
    %cst_92 = arith.constant dense<0.000000e+00> : vector<128xf32>
    %423 = vector.multi_reduction <add>, %1, %cst_92 [1] : vector<128x256xf32> to vector<128xf32>
    %424 = vector.shape_cast %423 : vector<128xf32> to vector<128x1xf32>
    %cst_93 = arith.constant 5.000000e-03 : f32
    %425 = vector.broadcast %cst_93 : f32 to vector<128x1xf32>
    %426 = arith.mulf %425, %424 : vector<128x1xf32>
    %427 = arith.mulf %422, %426 : vector<128x1xf32>
    %cst_94 = arith.constant dense<0.000000e+00> : vector<1xf32>
    %428 = vector.multi_reduction <add>, %427, %cst_94 [0] : vector<128x1xf32> to vector<1xf32>
    %429 = vector.shape_cast %428 : vector<1xf32> to vector<1x1xf32>
    %430 = arith.truncf %358 : vector<128x256xf32> to vector<128x256xbf16>
    %c0_95 = arith.constant 0 : index
    %c0_96 = arith.constant 0 : index
    %431 = vector.load %arg7[%c0_95, %c0_96] : memref<128x256xbf16, #tpu.memory_space<vmem>>, vector<128x256xbf16>
    tpu.vector_store %arg7[%c0_95, %c0_96], %430 {strides = array<i32>} : memref<128x256xbf16, #tpu.memory_space<vmem>>, vector<128x256xbf16>,
    %432 = tpu.iota {dimensions = array<i32: 1>} : vector<1x8x128xi32>
    %433 = tpu.iota {dimensions = array<i32: 2>} : vector<1x8x128xi32>
    %c0_i32 = arith.constant 0 : i32
    %434 = vector.broadcast %c0_i32 : i32 to vector<1x8x128xi32>
    %435 = arith.cmpi eq, %432, %434 : vector<1x8x128xi32>
    %c0_i32_97 = arith.constant 0 : i32
    %436 = vector.broadcast %c0_i32_97 : i32 to vector<1x8x128xi32>
    %437 = arith.cmpi eq, %433, %436 : vector<1x8x128xi32>
    %438 = arith.andi %435, %437 : vector<1x8x128xi1>
    %cst_98 = arith.constant 0.000000e+00 : f32
    %439 = vector.shape_cast %374 : vector<1x1xf32> to vector<1x1x1xf32>
    %440 = vector.broadcast %439 : vector<1x1x1xf32> to vector<1x8x128xf32>
    %441 = vector.broadcast %cst_98 : f32 to vector<1x8x128xf32>
    %442 = arith.select %438, %440, %441 : vector<1x8x128xi1>, vector<1x8x128xf32>
    %c0_i32_99 = arith.constant 0 : i32
    %443 = vector.broadcast %c0_i32_99 : i32 to vector<1x8x128xi32>
    %444 = arith.cmpi eq, %432, %443 : vector<1x8x128xi32>
    %c1_i32 = arith.constant 1 : i32
    %445 = vector.broadcast %c1_i32 : i32 to vector<1x8x128xi32>
    %446 = arith.cmpi eq, %433, %445 : vector<1x8x128xi32>
    %447 = arith.andi %444, %446 : vector<1x8x128xi1>
    %cst_100 = arith.constant 0.000000e+00 : f32
    %448 = vector.shape_cast %429 : vector<1x1xf32> to vector<1x1x1xf32>
    %449 = vector.broadcast %448 : vector<1x1x1xf32> to vector<1x8x128xf32>
    %450 = vector.broadcast %cst_100 : f32 to vector<1x8x128xf32>
    %451 = arith.select %447, %449, %450 : vector<1x8x128xi1>, vector<1x8x128xf32>
    %452 = arith.addf %442, %451 : vector<1x8x128xf32>
    %c0_101 = arith.constant 0 : index
    %c0_102 = arith.constant 0 : index
    %c0_103 = arith.constant 0 : index
    %453 = vector.load %arg8[%c0_101, %c0_102, %c0_103] : memref<1x8x128xf32, #tpu.memory_space<vmem>>, vector<1x8x128xf32>
    tpu.vector_store %arg8[%c0_101, %c0_102, %c0_103], %452 {strides = array<i32>} : memref<1x8x128xf32, #tpu.memory_space<vmem>>, vector<1x8x128xf32>,
    return
  }
  func.func @transform_0(%arg0: i32) -> (i32, i32) {
    %c0_i32 = arith.constant 0 : i32
    %c0_i32_0 = arith.constant 0 : i32
    return %arg0, %c0_i32 : i32, i32
  }
  func.func @transform_1(%arg0: i32) -> (i32, i32) {
    %c0_i32 = arith.constant 0 : i32
    %c0_i32_0 = arith.constant 0 : i32
    %c0_i32_1 = arith.constant 0 : i32
    return %c0_i32, %c0_i32_0 : i32, i32
  }
  func.func @transform_2(%arg0: i32) -> (i32, i32, i32) {
    %c0_i32 = arith.constant 0 : i32
    %c0_i32_0 = arith.constant 0 : i32
    %c0_i32_1 = arith.constant 0 : i32
    %c0_i32_2 = arith.constant 0 : i32
    return %c0_i32, %c0_i32_0, %c0_i32_1 : i32, i32, i32
  }
  func.func @transform_3(%arg0: i32) -> (i32, i32) {
    %c0_i32 = arith.constant 0 : i32
    %c0_i32_0 = arith.constant 0 : i32
    %c0_i32_1 = arith.constant 0 : i32
    return %c0_i32, %c0_i32_0 : i32, i32
  }
  func.func @transform_4(%arg0: i32) -> (i32, i32) {
    %c0_i32 = arith.constant 0 : i32
    %c0_i32_0 = arith.constant 0 : i32
    %c0_i32_1 = arith.constant 0 : i32
    return %c0_i32, %c0_i32_0 : i32, i32
  }
  func.func @transform_5(%arg0: i32) -> (i32, i32) {
    %c0_i32 = arith.constant 0 : i32
    %c0_i32_0 = arith.constant 0 : i32
    %c0_i32_1 = arith.constant 0 : i32
    return %c0_i32, %c0_i32_0 : i32, i32
  }
  func.func @transform_6(%arg0: i32) -> (i32, i32) {
    %c0_i32 = arith.constant 0 : i32
    %c0_i32_0 = arith.constant 0 : i32
    return %arg0, %c0_i32 : i32, i32
  }
  func.func @transform_7(%arg0: i32) -> (i32, i32, i32) {
    %c0_i32 = arith.constant 0 : i32
    %c0_i32_0 = arith.constant 0 : i32
    %c0_i32_1 = arith.constant 0 : i32
    return %arg0, %c0_i32, %c0_i32_0 : i32, i32, i32
  }
}

</mosaic_0001>

<bundles_post_ra>
// kernel: recvae_forward.1
= control target key start
LH: loop header
LB: loop body
LE: loop exit
PB: predicated region body
PF: predicated region fallthrough
CT: control target
= control target key end

     0   :  { %s16199_s0 = inlined_call_operand.hbm [shape: bf16[256,256], index: 0, kind: input, shape index: {}]   ;;  %s16200_s1 = inlined_call_operand.hbm [shape: bf16[256,256], index: 1, kind: input, shape index: {}]   ;;  %s16201_s2 = inlined_call_operand.hbm [shape: bf16[4,256,256], index: 2, kind: input, shape index: {}]   ;;  %s16202_s3 = inlined_call_operand.hbm [shape: bf16[256,768], index: 3, kind: input, shape index: {}]   ;;  %s16203_s4 = inlined_call_operand.hbm [shape: f32[15,256], index: 4, kind: input, shape index: {}]   ;;  %s16204_s5 = inlined_call_operand.vmem [shape: f32[1,768], index: 5, kind: input, shape index: {}]   ;;  %s16205_s6 = inlined_call_operand.hbm [shape: bf16[256,256], index: 6, kind: output, shape index: {0}]   ;;  %s16206_s7 = inlined_call_operand.vmem [shape: f32[2,8,128], index: 7, kind: output, shape index: {1}]  }
   0x1   :  { %16463 = sst [smem:[#allocation97_spill]] %s16200_s1 }
   0x2   :  { %13 = vsyncpa [#allocation3], 0 }
   0x3   :  { %15 = vsyncpa [#allocation3 + $0x1], 0 }
   0x4   :  { %16 = vsyncpa [#allocation6], 0 }
   0x5   :  { %17 = vsyncpa [#allocation9], 0 }
   0x6   :  { %18 = vsyncpa [#allocation4], 0 }
   0x7   :  { %20 = vsyncpa [#allocation4 + $0x1], 0  ;;  %s10870_s24 = smov 0   ;;  %s10872_s25 = smov 0  }
   0x8   :  { %s10874_s26 = smov 0   ;;  %s10876_s27 = smov 0  }
   0x9 LB: > { %s10891_s28 = sadd.s32 4294967295, %s10814_s27   ;;  %s8378_s29 = sadd.s32 4294967294, %s10814_s27   ;;  %s10814_s27 = sphi %s10876_s27, %s16943_s27   ;;  %s10810_s26 = sphi %s10874_s26, %s16942_s26   ;;  %s10806_s25 = sphi %s10872_s25, %s16941_s25   ;;  %s10802_s24 = sphi %s10870_s24, %s16940_s24  }
   0xa   : > { %p46_p0 = scmp.ne.s32.totalorder %s10806_s25, %s10802_s24  ;;  %p16207_p1 = scmp.eq.s32.totalorder %s10891_s28, 0 }
   0xb   : > { %p181_p3 = scmp.eq.s32.totalorder %s8378_s29, 1  ;;  %p8379_p5 = scmp.ge.s32.totalorder %s10814_s27, 1 }
   0xc   : > { %p10900_p4 = por %p16207_p1, %p46_p0  ;;  %p214_p7 = scmp.lt.s32.totalorder %s10814_s27, 3 }
   0xd   : > { %p10905_p6 = por %p181_p3, %p46_p0  ;;  %s10816_s10 = smov [#allocation5]  }
   0xe   : > { %s16464_s30 = scalar_select %p10900_p4, 1, 0 }
   0xf   : > { %s16465_s8 = scalar_select %p10905_p6, 1, 0 }
  0x10   : > { %p10910_p8 = pnand %p8379_p5, %p214_p7  ;;  %s226_s11 = sshll.u32 %s10816_s10, 4  ;;  %s10914_s11 = int_to_ptr.vmem [resolvable:$true] %s226_s11 }
  0x11   : > { %s10817_s13 = smov [#allocation8]   ;;  %s16468_s1 = sld [smem:[#allocation97_spill]] }
  0x12   : > { %s16466_s9 = scalar_select %p10910_p8, 1, 0 }
  0x13   : > { %p8875_p9 = pneg %p10910_p8  ;;  %s252_s14 = sshll.u32 %s10817_s13, 4  ;;  %s10925_s14 = int_to_ptr.vmem [resolvable:$true] %s252_s14 }
  0x15   : > { %p10921_p11 = pnand %p8875_p9, %p16207_p1 }
  0x17   : > { %s10598_s17 = scalar_lea.hbm %s16468_s1, 4096  ;;  %p10935_p13 = pneg %p10921_p11 }
  0x18   : > { %p10599_p12 = scmp.ne.s32.totalorder %s16468_s1, %s10598_s17  ;;  %p10605_p5 = scmp.lt.u32.totalorder %s10598_s17, %s16468_s1 }
  0x1a   : > { %p10601_p0 = pnand %p10935_p13, %p10599_p12 }
  0x1c   : > { %p10602_p3 = pneg %p10601_p0 }
  0x1e   : > { %p10607_p7 = pnand %p10605_p5, %p10602_p3 }
  0x20   : > { %10610 = shalt.err (!%p10607_p7)
}
  0x21   : > { %s10611_s23 = scalar_lea.vmem %s10914_s11, 4096  ;;  %p10619_p2 = scmp.lt.s32.totalorder %s10914_s11, %s10914_s11 }
  0x22   : > { %p10612_p9 = scmp.ne.s32.totalorder %s10914_s11, %s10611_s23  ;;  %p10620_p6 = scmp.lt.s32.totalorder %s10611_s23, %s10611_s23 }
  0x24   : > { %p10614_p10 = pnand %p10612_p9, %p10935_p13  ;;  %p10621_p12 = por %p10620_p6, %p10619_p2 }
  0x26   : > { %p10615_p1 = pneg %p10614_p10 }
  0x28   : > { %p10622_p0 = pnand %p10621_p12, %p10615_p1 }
  0x2a   : > { %10625 = shalt.err (!%p10622_p0)
}
  0x2b   : > { %s16208_s29 = smov 128   ;;  %s16210_s10 = smov 8  }
  0x2c   : > { %8878 = dma.hbm_to_vmem [thread:$0]  (!%p10921_p11), %s16468_s1, 4096, %s10914_s11, [#allocation6], %s16208_s29, %s16208_s29, %s16210_s10  }
  0x2d   : > { %s10626_s18 = scalar_lea.hbm %s16202_s3, 12288 }
  0x2e   : > { %p10627_p1 = scmp.ne.s32.totalorder %s16202_s3, %s10626_s18  ;;  %p10633_p10 = scmp.lt.u32.totalorder %s10626_s18, %s16202_s3 }
  0x30   : > { %p10629_p2 = pnand %p10627_p1, %p10935_p13 }
  0x32   : > { %p10630_p6 = pneg %p10629_p2 }
  0x34   : > { %p10635_p3 = pnand %p10633_p10, %p10630_p6 }
  0x36   : > { %10638 = shalt.err (!%p10635_p3)
}
  0x37   : > { %s10639_s11 = scalar_lea.vmem %s10925_s14, 12288  ;;  %p10647_p12 = scmp.lt.s32.totalorder %s10925_s14, %s10925_s14 }
  0x38   : > { %p10640_p5 = scmp.ne.s32.totalorder %s10925_s14, %s10639_s11  ;;  %p10648_p0 = scmp.lt.s32.totalorder %s10639_s11, %s10639_s11 }
  0x3a   : > { %p10642_p7 = pnand %p10640_p5, %p10935_p13  ;;  %p10649_p1 = por %p10648_p0, %p10647_p12 }
  0x3c   : > { %p10643_p9 = pneg %p10642_p7 }
  0x3e   : > { %p10650_p2 = pnand %p10649_p1, %p10643_p9 }
  0x40   : > { %10653 = shalt.err (!%p10650_p2)
}
  0x41   : > { %s10820_s13 = smov 384   ;;  %s10821_s15 = smov 24  }
  0x42   : > { %8884 = dma.hbm_to_vmem [thread:$0]  (!%p10921_p11), %s16202_s3, 12288, %s10925_s14, [#allocation9], %s10820_s13, %s10820_s13, %s10821_s15  }
  0x43   : > { %s10822_s18 = smov [#allocation7]   ;;  %s10823_s21 = smov [#allocation10]  }
  0x44   : > { %s239_s19 = sshll.u32 %s10822_s18, 4  ;;  %s265_s22 = sshll.u32 %s10823_s21, 4  ;;  %s240_s19 = int_to_ptr.vmem [resolvable:$true] %s239_s19  ;;  %s10982_s22 = int_to_ptr.vmem [resolvable:$true] %s265_s22 }
  0x45   : > { %s10654_s29 = scalar_lea.hbm %s16201_s2, 16384 }
  0x46   : > { %p10655_p6 = scmp.ne.s32.totalorder %s16201_s2, %s10654_s29  ;;  %p10661_p5 = scmp.lt.u32.totalorder %s10654_s29, %s16201_s2 }
  0x48   : > { %p10657_p10 = pnand %p10655_p6, %p10935_p13 }
  0x4a   : > { %p10658_p3 = pneg %p10657_p10 }
  0x4c   : > { %p10663_p7 = pnand %p10661_p5, %p10658_p3 }
  0x4e   : > { %10666 = shalt.err (!%p10663_p7)
}
  0x4f   : > { %s10667_s13 = scalar_lea.vmem %s240_s19, 16384  ;;  %p10675_p1 = scmp.lt.s32.totalorder %s240_s19, %s240_s19 }
  0x50   : > { %p10668_p9 = scmp.ne.s32.totalorder %s240_s19, %s10667_s13  ;;  %p10676_p2 = scmp.lt.s32.totalorder %s10667_s13, %s10667_s13 }
  0x52   : > { %p10670_p12 = pnand %p10668_p9, %p10935_p13  ;;  %p10677_p4 = por %p10676_p2, %p10675_p1 }
  0x54   : > { %p10671_p0 = pneg %p10670_p12 }
  0x56   : > { %p10678_p8 = pnand %p10677_p4, %p10671_p0 }
  0x58   : > { %10681 = shalt.err (!%p10678_p8)
}
  0x59   : > { %s16470_s1 = smov 8   ;;  %s16471_s10 = smov 128  }
  0x5a   : > { %8881 = dma.hbm_to_vmem [thread:$0]  (!%p10921_p11), %s16201_s2, 16384, %s240_s19, [#allocation6], %s16471_s10, %s16471_s10, %s16470_s1  }
  0x5b   : > { %s10682_s21 = scalar_lea.hbm %s16203_s4, 512 }
  0x5c   : > { %p10683_p6 = scmp.ne.s32.totalorder %s16203_s4, %s10682_s21  ;;  %p10689_p10 = scmp.lt.u32.totalorder %s10682_s21, %s16203_s4 }
  0x5e   : > { %p10685_p4 = pnand %p10683_p6, %p10935_p13 }
  0x60   : > { %p10686_p8 = pneg %p10685_p4 }
  0x62   : > { %p10691_p3 = pnand %p10689_p10, %p10686_p8 }
  0x64   : > { %10694 = shalt.err (!%p10691_p3)
}
  0x65   : > { %s10695_s19 = scalar_lea.vmem %s10982_s22, 512  ;;  %p10703_p12 = scmp.lt.s32.totalorder %s10982_s22, %s10982_s22 }
  0x66   : > { %p10696_p5 = scmp.ne.s32.totalorder %s10982_s22, %s10695_s19  ;;  %p10704_p0 = scmp.lt.s32.totalorder %s10695_s19, %s10695_s19 }
  0x68   : > { %p10698_p7 = pnand %p10696_p5, %p10935_p13  ;;  %p10705_p1 = por %p10704_p0, %p10703_p12 }
  0x6a   : > { %p10699_p9 = pneg %p10698_p7 }
  0x6c   : > { %p10706_p2 = pnand %p10705_p1, %p10699_p9 }
  0x6e   : > { %10709 = shalt.err (!%p10706_p2)
}
  0x6f   : > { %s10824_s13 = smov 256   ;;  %s10825_s20 = smov 16  }
  0x70   : > { %8887 = dma.hbm_to_vmem [thread:$0]  (!%p10921_p11), %s16203_s4, 512, %s10982_s22, [#allocation9], %s10824_s13, %s10824_s13, %s10825_s20  }
  0x71   : > { %s11029_s17 = sadd.s32 1, %s10814_s27   ;;  %s33_s21 = sadd.s32 1, %s10810_s26 }
  0x72   : > { %s30_s18 = ssub.s32 %s10814_s27, %s11029_s17  ;;  %p40_p6 = scmp.ne.s32.totalorder %s10810_s26, %s10806_s25 }
  0x73   : > { %p31_p13 = scmp.eq.s32.totalorder %s30_s18, 0  ;;  %p41_p4 = scmp.eq.s32.totalorder %s10814_s27, 0 }
  0x74   : > { %p16472_p10 = scmp.eq.s32.totalorder %s10891_s28, 1  ;;  %p8900_p5 = scmp.lt.s32.totalorder %s10814_s27, 2 }
  0x75   : > { %s11038_s23 = scalar_select %p31_p13, %s10810_s26, %s33_s21  }
  0x76   : > { %p42_p8 = por %p41_p4, %p40_p6  ;;  %p11042_p3 = por %p16472_p10, %p40_p6 }
  0x77   : > { %s282_s12 = sand.u32 1, %s10810_s26   ;;  %s8836_s22 = sshll.u32 %s10814_s27, 11 }
  0x78   : > { %s8385_s16 = sshll.u32 %s282_s12, 7  ;;  %s11052_s13 = scalar_lea.hbm %s16199_s0, %s8836_s22 }
  0x79   : > { %s286_s20 = scalar_lea.vmem [#allocation2], %s8385_s16  ;;  %p11056_p11 = pnand %p8900_p5, %p42_p8 }
  0x7a   : > { %s294_s15 = sshll.u32 %s286_s20, 4  ;;  %s11060_s18 = scalar_lea.sflag [#allocation3], %s282_s12  ;;  %s11054_s15 = int_to_ptr.vmem [resolvable:$true] %s294_s15 }
  0x7b   : > { %s10710_s21 = scalar_lea.hbm %s11052_s13, 2048  ;;  %p10712_p9 = pneg %p11056_p11 }
  0x7c   : > { %p10711_p7 = scmp.ne.s32.totalorder %s11052_s13, %s10710_s21  ;;  %s10715_s14 = scalar_lea.hbm %s16199_s0, 4096 }
  0x7d   : > { %p10716_p1 = scmp.lt.u32.totalorder %s11052_s13, %s16199_s0  ;;  %p10717_p2 = scmp.lt.u32.totalorder %s10715_s14, %s10710_s21 }
  0x7e   : > { %p10713_p12 = pnand %p10712_p9, %p10711_p7  ;;  %p10719_p6 = scmp.lt.u32.totalorder %s10710_s21, %s11052_s13 }
  0x7f   : > { %p10718_p13 = por %p10717_p2, %p10716_p1 }
  0x80   : > { %p10714_p0 = pneg %p10713_p12 }
  0x81   : > { %p10720_p4 = por %p10719_p6, %p10718_p13 }
  0x83   : > { %p10721_p8 = pnand %p10720_p4, %p10714_p0 }
  0x85   : > { %10724 = shalt.err (!%p10721_p8)
}
  0x86   : > { %s10725_s12 = scalar_lea.vmem %s11054_s15, 2048  ;;  %s10826_s16 = smov [#allocation2]  }
  0x87   : > { %p10726_p10 = scmp.ne.s32.totalorder %s11054_s15, %s10725_s12  ;;  %s10730_s22 = sshll.u32 %s10826_s16, 4  ;;  %s10731_s22 = int_to_ptr.vmem [resolvable:$false] %s10730_s22 }
  0x88   : > { %s10732_s19 = scalar_lea.vmem %s10731_s22, 4096  ;;  %p10733_p12 = scmp.lt.s32.totalorder %s11054_s15, %s10731_s22 }
  0x89   : > { %p10728_p5 = pnand %p10726_p10, %p10712_p9  ;;  %p10734_p1 = scmp.lt.s32.totalorder %s10732_s19, %s10725_s12 }
  0x8b   : > { %p10729_p7 = pneg %p10728_p5  ;;  %p10735_p2 = por %p10734_p1, %p10733_p12 }
  0x8d   : > { %p10736_p13 = pnand %p10735_p2, %p10729_p7 }
  0x8f   : > { %10739 = shalt.err (!%p10736_p13)
}
  0x90   : > { %8891 = dma.hbm_to_vmem [thread:$0]  (!%p11056_p11), %s11052_s13, 2048, %s11054_s15, %s11060_s18, %s16471_s10, %s16471_s10, %s16470_s1  }
  0x91   : > { %p16475_p9 = scmp.ne.s32.totalorder %s16466_s9, 0 }
  0x93   : > { %306 = sbr.rel (%p16475_p9) target bundleno = 3353 (0xd19), region = 44 }
  0x9a   : > { %s11094_s21 = sand.u32 1, %s10806_s25   ;;  %p16476_p0 = scmp.ne.s32.totalorder %s16464_s30, 0 }
  0x9b   : > { %s8390_s14 = sshll.u32 %s11094_s21, 7  ;;  %s309_s20 = scalar_lea.sflag [#allocation3], %s11094_s21 }
  0x9c   : > { %s11100_s29 = scalar_lea.vmem [#allocation2], %s8390_s14 }
  0x9d   : > { %10785 = dma.done.wait (%p16476_p0), %s309_s20, 2048  }
  0x9e   : > { %10787 = vsyncadd (%p16476_p0), %s309_s20, 4294965248  ;;  %p16477_p11 = scmp.eq.s32.totalorder %s10891_s28, 0 }
  0xa0   : > { %10789 = dma.done.wait (%p16477_p11), [#allocation6], 20480   ;;  %p16478_p6 = pmov %p16477_p11 }
  0xa2   : > { %10791 = vsyncadd (%p16478_p6), [#allocation6], 4294946816  ;;  %p16479_p4 = pmov %p16478_p6 }
  0xa4   : > { %10793 = dma.done.wait (%p16479_p4), [#allocation9], 12800   ;;  %p16480_p8 = pmov %p16479_p4 }
  0xa5   : > { %v369_v0 = vld [vmem:[%s11100_s29] sm:$0xff]  ;;  %v370_v1 = vld [vmem:[%s11100_s29 + $0x8] sm:$0xff]  ;;  %v371_v2 = vld [vmem:[%s11100_s29 + $0x10] sm:$0xff]  ;;  %s15501_s1 = scalar_lea.vmem [#allocation11], %s8390_s14  ;;  %s8854_s10 = sshll.u32 %s10891_s28, 11 }
  0xa6   : > { %10795 = vsyncadd (%p16480_p8), [#allocation9], 4294954496  ;;  %v11117_v3 = vunpack.c.l.bf16 %v369_v0  ;;  %v11119_v4 = vunpack.c.h.bf16 %v369_v0  ;;  %v11121_v5 = vunpack.c.l.bf16 %v370_v1  ;;  %v11123_v6 = vunpack.c.h.bf16 %v370_v1  ;;  %v372_v7 = vld [vmem:[%s11100_s29 + $0x18] sm:$0xff]  ;;  %v374_v12 = vld [vmem:[%s11100_s29 + $0x28] sm:$0xff]  ;;  %s16135_s18 = scalar_lea.hbm %s16205_s6, %s8854_s10  ;;  %s8240_s12 = sshll.u32 %s15501_s1, 4  ;;  %s16140_s12 = int_to_ptr.vmem [resolvable:$true] %s8240_s12 }
  0xa7   : > { %v11126_v8 = vunpack.c.l.bf16 %v371_v2  ;;  %v11128_v9 = vunpack.c.h.bf16 %v371_v2  ;;  %v11130_v10 = vunpack.c.l.bf16 %v372_v7  ;;  %v11132_v11 = vunpack.c.h.bf16 %v372_v7  ;;  %v373_v17 = vld [vmem:[%s11100_s29 + $0x20] sm:$0xff]  ;;  %v376_v22 = vld [vmem:[%s11100_s29 + $0x38] sm:$0xff]  ;;  %v375_v27 = vld [vmem:[%s11100_s29 + $0x30] sm:$0xff]  ;;  %s8222_s16 = scalar_lea.sflag [#allocation4], %s11094_s21  ;;  %s10740_s22 = scalar_lea.vmem %s16140_s12, 2048 }
  0xa8   : > { %16481 = vst [vmem:[#allocation16_spill] sm:$0xff] %v11117_v3  ;;  %16482 = vst [vmem:[#allocation17_spill] sm:$0xff] %v11119_v4  ;;  %v678_v13 = vmul.f32 %v11117_v3, %v11117_v3  ;;  %v679_v14 = vmul.f32 %v11119_v4, %v11119_v4  ;;  %v680_v15 = vmul.f32 %v11121_v5, %v11121_v5  ;;  %v11153_v25 = vunpack.c.l.bf16 %v374_v12  ;;  %v8950_v32 = vld [vmem:[#allocation5 + $0x4] ss:$8 sps:$4 sm:$0xff]   ;;  %v8952_v33 = vld [vmem:[#allocation5] ss:$8 sps:$4 sm:$0xff]   ;;  %p10741_p10 = scmp.ne.s32.totalorder %s16140_s12, %s10740_s22 }
  0xa9   : > { %16483 = vst [vmem:[#allocation18_spill] sm:$0xff] %v11121_v5  ;;  %16484 = vst [vmem:[#allocation19_spill] sm:$0xff] %v11123_v6  ;;  %v681_v16 = vmul.f32 %v11123_v6, %v11123_v6  ;;  %v682_v18 = vmul.f32 %v11126_v8, %v11126_v8  ;;  %v683_v19 = vmul.f32 %v11128_v9, %v11128_v9  ;;  %v11155_v26 = vunpack.c.h.bf16 %v374_v12  ;;  %v378_v38 = vld [vmem:[%s11100_s29 + $0x48] sm:$0xff]  ;;  %v8953_v39 = vld [vmem:[#allocation5 + $0x14] ss:$8 sps:$4 sm:$0xff]   ;;  %s10827_s19 = smov [#allocation11]  }
  0xaa   : > { %16485 = vst [vmem:[#allocation20_spill] sm:$0xff] %v11126_v8  ;;  %16486 = vst [vmem:[#allocation21_spill] sm:$0xff] %v11128_v9  ;;  %v684_v20 = vmul.f32 %v11130_v10, %v11130_v10  ;;  %v685_v21 = vmul.f32 %v11132_v11, %v11132_v11  ;;  %v710_v23 = vadd.f32 %v679_v14, %v678_v13  ;;  %v11158_v30 = vunpack.c.l.bf16 %v373_v17  ;;  %v377_v44 = vld [vmem:[%s11100_s29 + $0x40] sm:$0xff]  ;;  %v8955_v45 = vld [vmem:[#allocation5 + $0x10] ss:$8 sps:$4 sm:$0xff]   ;;  %p10742_p5 = pnand %p10741_p10, %p11042_p3  ;;  %s10744_s14 = sshll.u32 %s10827_s19, 4  ;;  %s10745_s14 = int_to_ptr.vmem [resolvable:$false] %s10744_s14 }
  0xab   : > { %16487 = vst [vmem:[#allocation22_spill] sm:$0xff] %v11130_v10  ;;  %16488 = vst [vmem:[#allocation23_spill] sm:$0xff] %v11132_v11  ;;  %v713_v24 = vadd.f32 %v681_v16, %v680_v15  ;;  %v716_v28 = vadd.f32 %v683_v19, %v682_v18  ;;  %v11160_v31 = vunpack.c.h.bf16 %v373_v17  ;;  %v688_v34 = vmul.f32 %v11153_v25, %v11153_v25  ;;  %v8956_v48 = vld [vmem:[#allocation5 + $0x24] ss:$8 sps:$4 sm:$0xff]   ;;  %v380_v53 = vld [vmem:[%s11100_s29 + $0x58] sm:$0xff]  ;;  %s10746_s20 = scalar_lea.vmem %s10745_s14, 4096  ;;  %p10747_p12 = scmp.lt.s32.totalorder %s16140_s12, %s10745_s14 }
  0xac   : > { %16489 = vst [vmem:[#allocation24_spill] sm:$0xff] %v11153_v25  ;;  %16490 = vst [vmem:[#allocation25_spill] sm:$0xff] %v11155_v26  ;;  %v719_v29 = vadd.f32 %v685_v21, %v684_v20  ;;  %711 = vadd.xlane.f32.xlu0 %v710_v23  ;;  %v689_v35 = vmul.f32 %v11155_v26, %v11155_v26  ;;  %v11166_v36 = vunpack.c.l.bf16 %v376_v22  ;;  %v11168_v37 = vunpack.c.h.bf16 %v376_v22  ;;  %v379_v54 = vld [vmem:[%s11100_s29 + $0x50] sm:$0xff]  ;;  %v8958_v59 = vld [vmem:[#allocation5 + $0x20] ss:$8 sps:$4 sm:$0xff]   ;;  %p10743_p7 = pneg %p10742_p5  ;;  %p10748_p1 = scmp.lt.s32.totalorder %s10746_s20, %s10740_s22 }
  0xad   : > { %16491 = vst [vmem:[#allocation26_spill] sm:$0xff] %v11158_v30  ;;  %16492 = vst [vmem:[#allocation27_spill] sm:$0xff] %v11160_v31  ;;  %717 = vadd.xlane.f32.xlu1 %v716_v28  ;;  %v686_v40 = vmul.f32 %v11158_v30, %v11158_v30  ;;  %v687_v41 = vmul.f32 %v11160_v31, %v11160_v31  ;;  %v11175_v42 = vunpack.c.l.bf16 %v375_v27  ;;  %v11177_v43 = vunpack.c.h.bf16 %v375_v27  ;;  %v8959_v0 = vld [vmem:[#allocation5 + $0x34] ss:$8 sps:$4 sm:$0xff]   ;;  %v382_v12 = vld [vmem:[%s11100_s29 + $0x68] sm:$0xff] }
  0xae   : > { %16493 = vst [vmem:[#allocation28_spill] sm:$0xff] %v11166_v36  ;;  %16494 = vst [vmem:[#allocation29_spill] sm:$0xff] %v11168_v37  ;;  %1006 = vmatprep.subr.bf16.mxu0 %v8950_v32  ;;  %v725_v46 = vadd.f32 %v689_v35, %v688_v34  ;;  %v11184_v51 = vunpack.c.l.bf16 %v377_v44  ;;  %v11186_v52 = vunpack.c.h.bf16 %v377_v44  ;;  %v692_v55 = vmul.f32 %v11166_v36, %v11166_v36  ;;  %v381_v16 = vld [vmem:[%s11100_s29 + $0x60] sm:$0xff]  ;;  %v8961_v17 = vld [vmem:[#allocation5 + $0x30] ss:$8 sps:$4 sm:$0xff]   ;;  %p10749_p2 = por %p10748_p1, %p10747_p12 }
  0xaf   : > { %16495 = vst [vmem:[#allocation30_spill] sm:$0xff] %v11175_v42  ;;  %16496 = vst [vmem:[#allocation31_spill] sm:$0xff] %v11177_v43  ;;  %1007 = vmatpush1.bf16.msra.mxu0 %v8952_v33  ;;  %v722_v47 = vadd.f32 %v687_v41, %v686_v40  ;;  %v690_v49 = vmul.f32 %v11175_v42, %v11175_v42  ;;  %v691_v50 = vmul.f32 %v11177_v43, %v11177_v43  ;;  %v8962_v22 = vld [vmem:[#allocation5 + $0x44] ss:$8 sps:$4 sm:$0xff]   ;;  %v384_v28 = vld [vmem:[%s11100_s29 + $0x78] sm:$0xff] }
  0xb0   : > { %1008 = vmatprep.subr.bf16.mxu0 %v8953_v39  ;;  %714 = vadd.xlane.f32.xlu0 %v713_v24  ;;  %16497 = vst [vmem:[#allocation32_spill] sm:$0xff] %v11184_v51  ;;  %16498 = vst [vmem:[#allocation33_spill] sm:$0xff] %v11186_v52  ;;  %v693_v56 = vmul.f32 %v11168_v37, %v11168_v37  ;;  %v11194_v57 = vunpack.c.l.bf16 %v378_v38  ;;  %v11196_v58 = vunpack.c.h.bf16 %v378_v38  ;;  %v11198_v60 = vunpack.c.l.bf16 %v380_v53  ;;  %v8964_v35 = vld [vmem:[#allocation5 + $0x40] ss:$8 sps:$4 sm:$0xff]   ;;  %v8965_v40 = vld [vmem:[#allocation5 + $0x54] ss:$8 sps:$4 sm:$0xff]   ;;  %p10750_p13 = pnand %p10749_p2, %p10743_p7 }
  0xb1   : > { %720 = vadd.xlane.f32.xlu1 %v719_v29  ;;  %v11200_v61 = vunpack.c.h.bf16 %v380_v53  ;;  %v11202_v62 = vunpack.c.l.bf16 %v379_v54  ;;  %v11204_v63 = vunpack.c.h.bf16 %v379_v54  ;;  %v728_v1 = vadd.f32 %v691_v50, %v690_v49  ;;  %v383_v29 = vld [vmem:[%s11100_s29 + $0x70] sm:$0xff]  ;;  %v8968_v54 = vld [vmem:[#allocation5 + $0x64] ss:$8 sps:$4 sm:$0xff]  }
  0xb2   : > { %16499 = vst [vmem:[#allocation34_spill] sm:$0xff] %v11194_v57  ;;  %16500 = vst [vmem:[#allocation35_spill] sm:$0xff] %v11196_v58  ;;  %v694_v2 = vmul.f32 %v11184_v51, %v11184_v51  ;;  %v695_v7 = vmul.f32 %v11186_v52, %v11186_v52  ;;  %v731_v13 = vadd.f32 %v693_v56, %v692_v55  ;;  %v11224_v24 = vunpack.c.l.bf16 %v381_v16  ;;  %v8967_v53 = vld [vmem:[#allocation5 + $0x50] ss:$8 sps:$4 sm:$0xff]  }
  0xb3   : > { %1009 = vmatpush1.bf16.msra.mxu0 %v8955_v45  ;;  %16501 = vst [vmem:[#allocation36_spill] sm:$0xff] %v11198_v60  ;;  %16502 = vst [vmem:[#allocation37_spill] sm:$0xff] %v11200_v61  ;;  %v696_v14 = vmul.f32 %v11194_v57, %v11194_v57  ;;  %v697_v15 = vmul.f32 %v11196_v58, %v11196_v58  ;;  %v700_v18 = vmul.f32 %v11198_v60, %v11198_v60 }
  0xb4   : > { %16503 = vst [vmem:[#allocation38_spill] sm:$0xff] %v11202_v62  ;;  %16504 = vst [vmem:[#allocation39_spill] sm:$0xff] %v11204_v63  ;;  %1010 = vmatprep.subr.bf16.mxu0 %v8956_v48  ;;  %723 = vadd.xlane.f32.xlu0 %v722_v47  ;;  %v701_v19 = vmul.f32 %v11200_v61, %v11200_v61  ;;  %v698_v20 = vmul.f32 %v11202_v62, %v11202_v62  ;;  %v11226_v27 = vunpack.c.h.bf16 %v381_v16  ;;  %v8974_v16 = vld [vmem:[#allocation5 + $0x84] ss:$8 sps:$4 sm:$0xff]  }
  0xb5   : > { %726 = vadd.xlane.f32.xlu1 %v725_v46  ;;  %v699_v21 = vmul.f32 %v11204_v63, %v11204_v63  ;;  %v734_v23 = vadd.f32 %v695_v7, %v694_v2  ;;  %16505 = vst [vmem:[#allocation40_spill] sm:$0xff] %v11224_v24  ;;  %v737_v32 = vadd.f32 %v697_v15, %v696_v14  ;;  %v11230_v33 = vunpack.c.l.bf16 %v382_v12  ;;  %v8970_v7 = vld [vmem:[#allocation5 + $0x60] ss:$8 sps:$4 sm:$0xff]   ;;  %v8973_v14 = vld [vmem:[#allocation5 + $0x70] ss:$8 sps:$4 sm:$0xff]  }
  0xb6   : > { %16506 = vst [vmem:[#allocation41_spill] sm:$0xff] %v11226_v27  ;;  %v11232_v34 = vunpack.c.h.bf16 %v382_v12  ;;  %v743_v38 = vadd.f32 %v701_v19, %v700_v18  ;;  %v702_v41 = vmul.f32 %v11224_v24, %v11224_v24  ;;  %v703_v44 = vmul.f32 %v11226_v27, %v11226_v27  ;;  %v8971_v12 = vld [vmem:[#allocation5 + $0x74] ss:$8 sps:$4 sm:$0xff]   ;;  %v8979_v19 = vld [vmem:[#allocation5 + $0x90] ss:$8 sps:$4 sm:$0xff]  }
  0xb7   : > { %1011 = vmatpush1.bf16.msra.mxu0 %v8958_v59  ;;  %16507 = vst [vmem:[#allocation42_spill] sm:$0xff] %v11230_v33  ;;  %v740_v39 = vadd.f32 %v699_v21, %v698_v20  ;;  %v11238_v45 = vunpack.c.l.bf16 %v383_v29  ;;  %v11240_v46 = vunpack.c.h.bf16 %v383_v29  ;;  %v704_v47 = vmul.f32 %v11230_v33, %v11230_v33  ;;  %v8977_v18 = vld [vmem:[#allocation5 + $0x94] ss:$8 sps:$4 sm:$0xff]   ;;  %v8980_v20 = vld [vmem:[#allocation5 + $0xa4] ss:$8 sps:$4 sm:$0xff]  }
  0xb8   : > { %1012 = vmatprep.subr.bf16.mxu0 %v8959_v0  ;;  %729 = vadd.xlane.f32.xlu0 %v728_v1  ;;  %16508 = vst [vmem:[#allocation43_spill] sm:$0xff] %v11232_v34  ;;  %v705_v48 = vmul.f32 %v11232_v34, %v11232_v34  ;;  %v11246_v49 = vunpack.c.l.bf16 %v384_v28  ;;  %v11248_v50 = vunpack.c.h.bf16 %v384_v28  ;;  %v746_v55 = vadd.f32 %v703_v44, %v702_v41  ;;  %v8982_v21 = vld [vmem:[#allocation5 + $0xa0] ss:$8 sps:$4 sm:$0xff]   ;;  %v8986_v28 = vld [vmem:[#allocation5 + $0xc4] ss:$8 sps:$4 sm:$0xff]  }
  0xb9   : > { %732 = vadd.xlane.f32.xlu1 %v731_v13  ;;  %16509 = vst [vmem:[#allocation44_spill] sm:$0xff] %v11238_v45  ;;  %16510 = vst [vmem:[#allocation45_spill] sm:$0xff] %v11240_v46  ;;  %v706_v56 = vmul.f32 %v11238_v45, %v11238_v45  ;;  %v707_v59 = vmul.f32 %v11240_v46, %v11240_v46  ;;  %v8988_v29 = vld [vmem:[#allocation5 + $0xc0] ss:$8 sps:$4 sm:$0xff]   ;;  %v8997_v41 = vld [vmem:[#allocation5 + $0xf0] ss:$8 sps:$4 sm:$0xff]  }
  0xba   : > { %16511 = vst [vmem:[#allocation46_spill] sm:$0xff] %v11246_v49  ;;  %16512 = vst [vmem:[#allocation47_spill] sm:$0xff] %v11248_v50  ;;  %v749_v0 = vadd.f32 %v705_v48, %v704_v47  ;;  %v708_v1 = vmul.f32 %v11246_v49, %v11246_v49  ;;  %v709_v2 = vmul.f32 %v11248_v50, %v11248_v50 }
  0xbb   : > { %1013 = vmatpush1.bf16.msra.mxu0 %v8961_v17  ;;  %v752_v13 = vadd.f32 %v707_v59, %v706_v56  ;;  %v8976_v17 = vld [vmem:[#allocation5 + $0x80] ss:$8 sps:$4 sm:$0xff]  }
  0xbc   : > { %1014 = vmatprep.subr.bf16.mxu0 %v8962_v22  ;;  %735 = vadd.xlane.f32.xlu0 %v734_v23  ;;  %v755_v15 = vadd.f32 %v709_v2, %v708_v1  ;;  %v8983_v22 = vld [vmem:[#allocation5 + $0xb4] ss:$8 sps:$4 sm:$0xff]   ;;  %v8985_v23 = vld [vmem:[#allocation5 + $0xb0] ss:$8 sps:$4 sm:$0xff]  }
  0xbd   : > { %738 = vadd.xlane.f32.xlu1 %v737_v32  ;;  %v8989_v32 = vld [vmem:[#allocation5 + $0xd4] ss:$8 sps:$4 sm:$0xff]  }
  0xbf   : > { %1015 = vmatpush1.bf16.msra.mxu0 %v8964_v35  ;;  %v8991_v35 = vld [vmem:[#allocation5 + $0xd0] ss:$8 sps:$4 sm:$0xff]  }
  0xc0   : > { %1016 = vmatprep.subr.bf16.mxu0 %v8965_v40  ;;  %741 = vadd.xlane.f32.xlu0 %v740_v39  ;;  %v8994_v39 = vld [vmem:[#allocation5 + $0xe0] ss:$8 sps:$4 sm:$0xff]   ;;  %v8995_v40 = vld [vmem:[#allocation5 + $0xf4] ss:$8 sps:$4 sm:$0xff]  }
  0xc1   : > { %744 = vadd.xlane.f32.xlu1 %v743_v38  ;;  %v8992_v38 = vld [vmem:[#allocation5 + $0xe4] ss:$8 sps:$4 sm:$0xff]  }
  0xc3   : > { %1017 = vmatpush1.bf16.msra.mxu0 %v8967_v53 }
  0xc4   : > { %1018 = vmatprep.subr.bf16.mxu0 %v8968_v54  ;;  %747 = vadd.xlane.f32.xlu0 %v746_v55 }
  0xc5   : > { %750 = vadd.xlane.f32.xlu1 %v749_v0 }
  0xc7   : > { %1019 = vmatpush1.bf16.msra.mxu0 %v8970_v7 }
  0xc8   : > { %1020 = vmatprep.subr.bf16.mxu0 %v8971_v12  ;;  %753 = vadd.xlane.f32.xlu0 %v752_v13 }
  0xc9   : > { %756 = vadd.xlane.f32.xlu1 %v755_v15 }
  0xcb   : > { %1021 = vmatpush1.bf16.msra.mxu0 %v8973_v14 }
  0xcc   : > { %1022 = vmatprep.subr.bf16.mxu0 %v8974_v16 }
  0xcf   : > { %1023 = vmatpush1.bf16.msra.mxu0 %v8976_v17 }
  0xd0   : > { %1024 = vmatprep.subr.bf16.mxu0 %v8977_v18 }
  0xd3   : > { %1025 = vmatpush1.bf16.msra.mxu0 %v8979_v19 }
  0xd4   : > { %1026 = vmatprep.subr.bf16.mxu0 %v8980_v20 }
  0xd7   : > { %1027 = vmatpush1.bf16.msra.mxu0 %v8982_v21 }
  0xd8   : > { %1028 = vmatprep.subr.bf16.mxu0 %v8983_v22 }
  0xdb   : > { %1029 = vmatpush1.bf16.msra.mxu0 %v8985_v23 }
  0xdc   : > { %1030 = vmatprep.subr.bf16.mxu0 %v8986_v28 }
  0xdf   : > { %1031 = vmatpush1.bf16.msra.mxu0 %v8988_v29 }
  0xe0   : > { %1032 = vmatprep.subr.bf16.mxu0 %v8989_v32 }
  0xe3   : > { %1033 = vmatpush1.bf16.msra.mxu0 %v8991_v35 }
  0xe4   : > { %1034 = vmatprep.subr.bf16.mxu0 %v8992_v38 }
  0xe7   : > { %1035 = vmatpush1.bf16.msra.mxu0 %v8994_v39 }
  0xe8   : > { %1036 = vmatprep.subr.bf16.mxu0 %v8995_v40 }
  0xeb   : > { %1037 = vmatpush1.bf16.msra.mxu0 %v8997_v41 }
 0x139   : > { %v712_v44 = vpop.xlane.xlu0 %711 }
 0x13a   : > { %v758_v47 = vadd.f32 1e-12, %v712_v44  ;;  %v718_v48 = vpop.xlane.xlu1 %717 }
 0x13b   : > { %v760_v53 = vadd.f32 1e-12, %v718_v48 }
 0x13c   : > { %9334 = vrsqrt.f32 %v758_v47 }
 0x13d   : > { %v715_v54 = vpop.xlane.xlu0 %714  ;;  %9336 = vrsqrt.f32 %v760_v53 }
 0x13e   : > { %v759_v55 = vadd.f32 1e-12, %v715_v54  ;;  %v721_v56 = vpop.xlane.xlu1 %720 }
 0x13f   : > { %v761_v59 = vadd.f32 1e-12, %v721_v56 }
 0x140   : > { %9338 = vrsqrt.f32 %v759_v55 }
 0x141   : > { %9340 = vrsqrt.f32 %v761_v59  ;;  %v724_v0 = vpop.xlane.xlu0 %723 }
 0x142   : > { %v727_v1 = vpop.xlane.xlu1 %726  ;;  %v762_v2 = vadd.f32 1e-12, %v724_v0 }
 0x143   : > { %v763_v7 = vadd.f32 1e-12, %v727_v1 }
 0x144   : > { %9342 = vrsqrt.f32 %v762_v2 }
 0x145   : > { %9344 = vrsqrt.f32 %v763_v7  ;;  %v730_v12 = vpop.xlane.xlu0 %729 }
 0x146   : > { %v9335_v13 = vpop.eup %9334  ;;  %v733_v14 = vpop.xlane.xlu1 %732  ;;  %v764_v16 = vadd.f32 1e-12, %v730_v12 }
 0x147   : > { %v9337_v15 = vpop.eup %9336  ;;  %v765_v17 = vadd.f32 1e-12, %v733_v14  ;;  %v791_v19 = vmul.f32 %v9335_v13, %v11119_v4  ;;  %v790_v23 = vmul.f32 %v9335_v13, %v11117_v3  ;;  %v676_v4 = vld [vmem:[#allocation10 + $0x18] sm:$0x7f] }
 0x148   : > { %v795_v20 = vmul.f32 %v9337_v15, %v11128_v9  ;;  %9346 = vrsqrt.f32 %v764_v16  ;;  %v794_v48 = vmul.f32 %v9337_v15, %v11126_v8 }
 0x149   : > { %9348 = vrsqrt.f32 %v765_v17  ;;  %v736_v32 = vpop.xlane.xlu0 %735 }
 0x14a   : > { %v9339_v18 = vpop.eup %9338  ;;  %v739_v39 = vpop.xlane.xlu1 %738  ;;  %v766_v47 = vadd.f32 1e-12, %v736_v32 }
 0x14b   : > { %v9341_v21 = vpop.eup %9340  ;;  %v793_v22 = vmul.f32 %v9339_v18, %v11123_v6  ;;  %v792_v28 = vmul.f32 %v9339_v18, %v11121_v5  ;;  %v767_v54 = vadd.f32 1e-12, %v739_v39 }
 0x14c   : > { %v797_v29 = vmul.f32 %v9341_v21, %v11132_v11  ;;  %v796_v53 = vmul.f32 %v9341_v21, %v11130_v10  ;;  %9350 = vrsqrt.f32 %v766_v47 }
 0x14d   : > { %v823_v35 = vpack.c.bf16 %v793_v22, %v791_v19  ;;  %v822_v38 = vpack.c.bf16 %v792_v28, %v790_v23  ;;  %9352 = vrsqrt.f32 %v767_v54  ;;  %v742_v0 = vpop.xlane.xlu0 %741 }
 0x14e   : > { %v9343_v40 = vpop.eup %9342  ;;  %v825_v41 = vpack.c.bf16 %v797_v29, %v795_v20  ;;  %v824_v59 = vpack.c.bf16 %v796_v53, %v794_v48  ;;  %v745_v7 = vpop.xlane.xlu1 %744  ;;  %v768_v13 = vadd.f32 1e-12, %v742_v0 }
 0x14f   : > { %v9345_v44 = vpop.eup %9344  ;;  %1038 = vmatprep.mubr.bf16.mxu0 %v823_v35  ;;  %v799_v55 = vmul.f32 %v9343_v40, %v11160_v31  ;;  %v798_v14 = vmul.f32 %v9343_v40, %v11158_v30  ;;  %v769_v16 = vadd.f32 1e-12, %v745_v7 }
 0x150   : > { %1039 = vmatmul.mubr.bf16.vlgmr.msra.gmra.mrb[0].mxu0 %v822_v38  ;;  %v801_v56 = vmul.f32 %v9345_v44, %v11155_v26  ;;  %v800_v15 = vmul.f32 %v9345_v44, %v11153_v25  ;;  %9354 = vrsqrt.f32 %v768_v13 }
 0x151   : > { %1048 = vmatprep.mubr.bf16.mxu0 %v825_v41  ;;  %9356 = vrsqrt.f32 %v769_v16  ;;  %v748_v20 = vpop.xlane.xlu0 %747 }
 0x152   : > { %v9347_v1 = vpop.eup %9346  ;;  %v827_v2 = vpack.c.bf16 %v801_v56, %v799_v55  ;;  %v826_v19 = vpack.c.bf16 %v800_v15, %v798_v14  ;;  %v751_v23 = vpop.xlane.xlu1 %750  ;;  %v770_v29 = vadd.f32 1e-12, %v748_v20 }
 0x153   : > { %v9349_v12 = vpop.eup %9348  ;;  %v803_v17 = vmul.f32 %v9347_v1, %v11177_v43  ;;  %v802_v32 = vmul.f32 %v9347_v1, %v11175_v42  ;;  %v771_v38 = vadd.f32 1e-12, %v751_v23 }
 0x154   : > { %v805_v18 = vmul.f32 %v9349_v12, %v11168_v37  ;;  %v804_v35 = vmul.f32 %v9349_v12, %v11166_v36  ;;  %9358 = vrsqrt.f32 %v770_v29  ;;  %v9027_v37 = vld [vmem:[#allocation7 + $0x90] ss:$8 sps:$4 sm:$0xff]  }
 0x155   : > { %9360 = vrsqrt.f32 %v771_v38  ;;  %v754_v44 = vpop.xlane.xlu0 %753 }
 0x156   : > { %v9351_v21 = vpop.eup %9350  ;;  %v829_v22 = vpack.c.bf16 %v805_v18, %v803_v17  ;;  %v828_v41 = vpack.c.bf16 %v804_v35, %v802_v32  ;;  %v757_v53 = vpop.xlane.xlu1 %756  ;;  %v772_v55 = vadd.f32 1e-12, %v754_v44  ;;  %v16214_v44 = vlaneseq }
 0x157   : > { %v9353_v28 = vpop.eup %9352  ;;  %v807_v39 = vmul.f32 %v9351_v21, %v11186_v52  ;;  %v806_v56 = vmul.f32 %v9351_v21, %v11184_v51  ;;  %v773_v0 = vadd.f32 1e-12, %v757_v53  ;;  %v11296_v53 = vld [vmem:[#allocation10] sm:$0xff] }
 0x158   : > { %1049 = vmatmul.mubr.bf16.gmra.mrb[4].mxu0 %v824_v59  ;;  %v809_v40 = vmul.f32 %v9353_v28, %v11196_v58  ;;  %v808_v59 = vmul.f32 %v9353_v28, %v11194_v57  ;;  %9362 = vrsqrt.f32 %v772_v55  ;;  %v9016_v57 = vld [vmem:[#allocation7 + $0x64] ss:$8 sps:$4 sm:$0xff]  }
 0x159   : > { %1058 = vmatprep.mubr.bf16.mxu0 %v827_v2  ;;  %9364 = vrsqrt.f32 %v773_v0 }
 0x15a   : > { %v9355_v47 = vpop.eup %9354  ;;  %v831_v48 = vpack.c.bf16 %v809_v40, %v807_v39  ;;  %v830_v7 = vpack.c.bf16 %v808_v59, %v806_v56 }
 0x15b   : > { %v9357_v54 = vpop.eup %9356  ;;  %v811_v1 = vmul.f32 %v9355_v47, %v11204_v63  ;;  %v810_v15 = vmul.f32 %v9355_v47, %v11202_v62  ;;  %v11291_v47 = vshrl.u32 %v16214_v44, 7 }
 0x15c   : > { %v813_v2 = vmul.f32 %v9357_v54, %v11200_v61  ;;  %v812_v16 = vmul.f32 %v9357_v54, %v11198_v60  ;;  %v11298_v54 = vld [vmem:[#allocation10 + $0x8] sm:$0xff] }
 0x15d   : > { %16513 = vst [vmem:[#allocation48_spill] sm:$0xff] %v11291_v47 }
 0x15e   : > { %v9359_v12 = vpop.eup %9358  ;;  %v833_v13 = vpack.c.bf16 %v813_v2, %v811_v1 }
 0x15f   : > { %v9361_v14 = vpop.eup %9360  ;;  %v815_v17 = vmul.f32 %v9359_v12, %v11226_v27  ;;  %v814_v23 = vmul.f32 %v9359_v12, %v11224_v24 }
 0x160   : > { %1059 = vmatmul.mubr.bf16.gmra.mrb[8].mxu0 %v826_v19  ;;  %v817_v18 = vmul.f32 %v9361_v14, %v11232_v34  ;;  %v832_v19 = vpack.c.bf16 %v812_v16, %v810_v15  ;;  %v816_v28 = vmul.f32 %v9361_v14, %v11230_v33  ;;  %v9007_v34 = vld [vmem:[#allocation7 + $0x34] ss:$8 sps:$4 sm:$0xff]  }
 0x161   : > { %1068 = vmatprep.mubr.bf16.mxu0 %v829_v22 }
 0x162   : > { %v9363_v20 = vpop.eup %9362  ;;  %v835_v21 = vpack.c.bf16 %v817_v18, %v815_v17  ;;  %v834_v35 = vpack.c.bf16 %v816_v28, %v814_v23 }
 0x163   : > { %v9365_v22 = vpop.eup %9364  ;;  %v819_v29 = vmul.f32 %v9363_v20, %v11240_v46  ;;  %v818_v39 = vmul.f32 %v9363_v20, %v11238_v45  ;;  %v9006_v45 = vld [vmem:[#allocation7 + $0x20] ss:$8 sps:$4 sm:$0xff]  }
 0x164   : > { %v821_v32 = vmul.f32 %v9365_v22, %v11248_v50  ;;  %v820_v40 = vmul.f32 %v9365_v22, %v11246_v49 }
 0x166   : > { %v837_v38 = vpack.c.bf16 %v821_v32, %v819_v29 }
 0x168   : > { %1069 = vmatmul.mubr.bf16.gmra.mrb[12].mxu0 %v828_v41  ;;  %v836_v41 = vpack.c.bf16 %v820_v40, %v818_v39 }
 0x169   : > { %1078 = vmatprep.mubr.bf16.mxu0 %v831_v48  ;;  %v11294_v48 = vsub.s32 0, %v11291_v47 }
 0x16b   : > { %16514 = vst [vmem:[#allocation49_spill] sm:$0xff] %v11294_v48  ;;  %v11302_v55 = vrot.slane %v11296_v53, %v11294_v48  ;;  %v11306_v56 = vrot.slane %v11298_v54, %v11294_v48 }
 0x170   : > { %1079 = vmatmul.mubr.bf16.gmra.mrb[16].mxu0 %v830_v7 }
 0x171   : > { %1088 = vmatprep.mubr.bf16.mxu0 %v833_v13 }
 0x178   : > { %1089 = vmatmul.mubr.bf16.gmra.mrb[20].mxu0 %v832_v19 }
 0x179   : > { %1098 = vmatprep.mubr.bf16.mxu0 %v835_v21 }
 0x180   : > { %1099 = vmatmul.mubr.bf16.gmra.mrb[24].mxu0 %v834_v35 }
 0x181   : > { %1108 = vmatprep.mubr.bf16.mxu0 %v837_v38 }
 0x188   : > { %1109 = vmatmul.mubr.bf16.gmra.mrb[28].mxu0 %v836_v41 }
 0x223   : > { %v1040_v59 = vpop.f32.mrb[0].mxu0 }
 0x224   : > { %v11309_v0 = vadd.f32 %v1040_v59, %v11302_v55  ;;  %v1042_v1 = vpop.f32.mrb[1].mxu0 }
 0x225   : > { %v11312_v2 = vadd.f32 %v1042_v1, %v11306_v56  ;;  %v1044_v7 = vpop.f32.mrb[2].mxu0 }
 0x226   : > { %v8429_v12 = vmul.f32 -1.442695, %v11309_v0  ;;  %v11316_v13 = vadd.f32 %v1044_v7, %v11302_v55  ;;  %v1046_v14 = vpop.f32.mrb[3].mxu0 }
 0x227   : > { %v8430_v15 = vmul.f32 -1.442695, %v11312_v2  ;;  %v11320_v16 = vadd.f32 %v1046_v14, %v11306_v56 }
 0x228   : > { %9366 = vpow2.f32 %v8429_v12  ;;  %v8431_v17 = vmul.f32 -1.442695, %v11316_v13 }
 0x229   : > { %9368 = vpow2.f32 %v8430_v15  ;;  %v8432_v18 = vmul.f32 -1.442695, %v11320_v16 }
 0x22a   : > { %9370 = vpow2.f32 %v8431_v17 }
 0x22b   : > { %9372 = vpow2.f32 %v8432_v18  ;;  %v1050_v19 = vpop.f32.mrb[4].mxu0 }
 0x22c   : > { %v11325_v20 = vadd.f32 %v1050_v19, %v11302_v55  ;;  %v1052_v21 = vpop.f32.mrb[5].mxu0 }
 0x22d   : > { %v11328_v22 = vadd.f32 %v1052_v21, %v11306_v56  ;;  %v1054_v23 = vpop.f32.mrb[6].mxu0 }
 0x22e   : > { %v8433_v28 = vmul.f32 -1.442695, %v11325_v20  ;;  %v11332_v29 = vadd.f32 %v1054_v23, %v11302_v55  ;;  %v1056_v32 = vpop.f32.mrb[7].mxu0 }
 0x22f   : > { %v8434_v35 = vmul.f32 -1.442695, %v11328_v22  ;;  %v11337_v39 = vadd.f32 %v1056_v32, %v11306_v56  ;;  %v8998_v32 = vld [vmem:[#allocation7 + $0x4] ss:$8 sps:$4 sm:$0xff]  }
 0x230   : > { %v8435_v38 = vmul.f32 -1.442695, %v11332_v29  ;;  %9374 = vpow2.f32 %v8433_v28  ;;  %2024 = vmatprep.subr.bf16.mxu1 %v8998_v32  ;;  %v9000_v28 = vld [vmem:[#allocation7] ss:$8 sps:$4 sm:$0xff]  }
 0x231   : > { %9376 = vpow2.f32 %v8434_v35  ;;  %v8436_v14 = vmul.f32 -1.442695, %v11337_v39  ;;  %2025 = vmatpush1.bf16.msra.mxu1 %v9000_v28  ;;  %v9004_v28 = vld [vmem:[#allocation7 + $0x24] ss:$8 sps:$4 sm:$0xff]  }
 0x232   : > { %v9367_v40 = vpop.eup %9366  ;;  %9378 = vpow2.f32 %v8435_v38  ;;  %v9001_v38 = vld [vmem:[#allocation7 + $0x14] ss:$8 sps:$4 sm:$0xff]  }
 0x233   : > { %v9369_v41 = vpop.eup %9368  ;;  %v1215_v59 = vadd.f32 1.0, %v9367_v40  ;;  %v1060_v1 = vpop.f32.mrb[8].mxu0  ;;  %2026 = vmatprep.subr.bf16.mxu1 %v9001_v38 }
 0x234   : > { %v9371_v7 = vpop.eup %9370  ;;  %v1216_v12 = vadd.f32 1.0, %v9369_v41  ;;  %v1062_v15 = vpop.f32.mrb[9].mxu0  ;;  %v11341_v35 = vadd.f32 %v1060_v1, %v11302_v55 }
 0x235   : > { %v9373_v17 = vpop.eup %9372  ;;  %9380 = vrcp.f32 %v1215_v59  ;;  %v1217_v18 = vadd.f32 1.0, %v9371_v7  ;;  %v1064_v19 = vpop.f32.mrb[10].mxu0  ;;  %v11354_v1 = vadd.f32 %v1062_v15, %v11306_v56 }
 0x236   : > { %9382 = vrcp.f32 %v1216_v12  ;;  %v1218_v21 = vadd.f32 1.0, %v9373_v17  ;;  %v1066_v23 = vpop.f32.mrb[11].mxu0  ;;  %v11346_v59 = vadd.f32 %v1064_v19, %v11302_v55  ;;  %v9003_v12 = vld [vmem:[#allocation7 + $0x10] ss:$8 sps:$4 sm:$0xff]  }
 0x237   : > { %9384 = vrcp.f32 %v1217_v18  ;;  %2027 = vmatpush1.bf16.msra.mxu1 %v9003_v12  ;;  %v11363_v46 = vadd.f32 %v1066_v23, %v11306_v56 }
 0x238   : > { %9386 = vpow2.f32 %v8436_v14  ;;  %v8439_v38 = vmul.f32 -1.442695, %v11346_v59  ;;  %2028 = vmatprep.subr.bf16.mxu1 %v9004_v28  ;;  %v9010_v28 = vld [vmem:[#allocation7 + $0x44] ss:$8 sps:$4 sm:$0xff]  }
 0x239   : > { %9388 = vrcp.f32 %v1218_v21  ;;  %v8437_v21 = vmul.f32 -1.442695, %v11341_v35 }
 0x23a   : > { %v9375_v41 = vpop.eup %9374 }
 0x23b   : > { %v11343_v40 = vpop.f32.mrb[12].mxu0  ;;  %v9377_v17 = vpop.eup %9376  ;;  %v1219_v19 = vadd.f32 1.0, %v9375_v41  ;;  %9390 = vpow2.f32 %v8437_v21  ;;  %v8438_v41 = vmul.f32 -1.442695, %v11354_v1  ;;  %2029 = vmatpush1.bf16.msra.mxu1 %v9006_v45 }
 0x23c   : > { %v11348_v7 = vpop.f32.mrb[13].mxu0  ;;  %v9379_v18 = vpop.eup %9378  ;;  %v1220_v23 = vadd.f32 1.0, %v9377_v17  ;;  %2030 = vmatprep.subr.bf16.mxu1 %v9007_v34 }
 0x23d   : > { %v11350_v14 = vpop.f32.mrb[14].mxu0  ;;  %v1221_v33 = vadd.f32 1.0, %v9379_v18  ;;  %9392 = vrcp.f32 %v1219_v19 }
 0x23e   : > { %v11356_v32 = vpop.f32.mrb[15].mxu0  ;;  %9394 = vpow2.f32 %v8439_v38  ;;  %v11396_v38 = vadd.f32 %v11343_v40, %v11302_v55 }
 0x23f   : > { %v9381_v44 = vpop.eup %9380  ;;  %9396 = vrcp.f32 %v1221_v33 }
 0x240   : > { %v9383_v50 = vpop.eup %9382  ;;  %v11359_v49 = vmul.f32 %v9381_v44, %v11309_v0  ;;  %v9009_v44 = vld [vmem:[#allocation7 + $0x30] ss:$8 sps:$4 sm:$0xff]   ;;  %9398 = vpow2.f32 %v8438_v41 }
 0x241   : > { %v9385_v15 = vpop.eup %9384  ;;  %v11371_v61 = vmul.f32 %v9383_v50, %v11312_v2  ;;  %2031 = vmatpush1.bf16.msra.mxu1 %v9009_v44  ;;  %9400 = vrcp.f32 %v1220_v23  ;;  %v9015_v41 = vld [vmem:[#allocation7 + $0x50] ss:$8 sps:$4 sm:$0xff]   ;;  %v11402_v23 = vadd.f32 %v11350_v14, %v11302_v55  ;;  %v11415_v14 = vadd.f32 %v11348_v7, %v11306_v56 }
 0x242   : > { %v9387_v27 = vpop.eup %9386  ;;  %v11366_v12 = vmul.f32 %v9385_v15, %v11316_v13  ;;  %1343 = vadd.xlane.f32.xlu0 %v11359_v49  ;;  %v8440_v13 = vmul.f32 -1.442695, %v11363_v46  ;;  %2032 = vmatprep.subr.bf16.mxu1 %v9010_v28 }
 0x243   : > { %v9389_v0 = vpop.eup %9388  ;;  %v1080_v24 = vpop.f32.mrb[16].mxu0  ;;  %v1222_v45 = vadd.f32 1.0, %v9387_v27  ;;  %v9013_v27 = vld [vmem:[#allocation7 + $0x54] ss:$8 sps:$4 sm:$0xff]   ;;  %v1640_v28 = vmul.f32 %v11371_v61, %v11371_v61  ;;  %v8443_v7 = vmul.f32 -1.442695, %v11402_v23 }
 0x244   : > { %1345 = vadd.xlane.f32.xlu1 %v11366_v12  ;;  %v11376_v18 = vadd.f32 %v1080_v24, %v11302_v55  ;;  %v1082_v21 = vpop.f32.mrb[17].mxu0  ;;  %v11382_v34 = vmul.f32 %v9389_v0, %v11320_v16  ;;  %v9012_v24 = vld [vmem:[#allocation7 + $0x40] ss:$8 sps:$4 sm:$0xff]   ;;  %9402 = vpow2.f32 %v8440_v13  ;;  %v1392_v16 = vmul.f32 %v11359_v49, %v11359_v49 }
 0x245   : > { %v11379_v19 = vadd.f32 %v1082_v21, %v11306_v56  ;;  %v1084_v17 = vpop.f32.mrb[18].mxu0  ;;  %9404 = vrcp.f32 %v1222_v45  ;;  %v1393_v15 = vmul.f32 %v11366_v12, %v11366_v12  ;;  %2033 = vmatpush1.bf16.msra.mxu1 %v9012_v24  ;;  %v9391_v0 = vpop.eup %9390  ;;  %v8441_v24 = vmul.f32 -1.442695, %v11396_v38 }
 0x246   : > { %1592 = vadd.xlane.f32.xlu0 %v11371_v61  ;;  %v11386_v50 = vadd.f32 %v1084_v17, %v11302_v55  ;;  %v1086_v2 = vpop.f32.mrb[19].mxu0  ;;  %2034 = vmatprep.subr.bf16.mxu1 %v9013_v27  ;;  %v1641_v27 = vmul.f32 %v11382_v34, %v11382_v34 }
 0x247   : > { %v11389_v33 = vadd.f32 %v1086_v2, %v11306_v56  ;;  %v9393_v21 = vpop.eup %9392  ;;  %9406 = vpow2.f32 %v8441_v24 }
 0x248   : > { %1594 = vadd.xlane.f32.xlu1 %v11382_v34  ;;  %v9395_v2 = vpop.eup %9394  ;;  %v11426_v62 = vmul.f32 %v9393_v21, %v11325_v20  ;;  %v9018_v20 = vld [vmem:[#allocation7 + $0x60] ss:$8 sps:$4 sm:$0xff]  }
 0x249   : > { %2035 = vmatpush1.bf16.msra.mxu1 %v9015_v41  ;;  %v1225_v58 = vadd.f32 1.0, %v9395_v2 }
 0x24a   : > { %1408 = vadd.xlane.f32.xlu0 %v1392_v16  ;;  %2036 = vmatprep.subr.bf16.mxu1 %v9016_v57  ;;  %v9019_v57 = vld [vmem:[#allocation7 + $0x74] ss:$8 sps:$4 sm:$0xff]  }
 0x24b   : > { %v1090_v44 = vpop.f32.mrb[20].mxu0 }
 0x24c   : > { %1410 = vadd.xlane.f32.xlu1 %v1393_v15  ;;  %v11407_v40 = vadd.f32 %v1090_v44, %v11302_v55  ;;  %v1092_v13 = vpop.f32.mrb[21].mxu0  ;;  %v9397_v44 = vpop.eup %9396 }
 0x24d   : > { %v11410_v45 = vadd.f32 %v1092_v13, %v11306_v56  ;;  %v1094_v17 = vpop.f32.mrb[22].mxu0  ;;  %v1223_v13 = vadd.f32 1.0, %v9391_v0  ;;  %v9399_v63 = vpop.eup %9398  ;;  %v11434_v0 = vmul.f32 %v9397_v44, %v11332_v29  ;;  %2037 = vmatpush1.bf16.msra.mxu1 %v9018_v20 }
 0x24e   : > { %1656 = vadd.xlane.f32.xlu0 %v1640_v28  ;;  %v11420_v16 = vadd.f32 %v1094_v17, %v11302_v55  ;;  %v1096_v15 = vpop.f32.mrb[23].mxu0  ;;  %v11431_v28 = vadd.f32 %v11356_v32, %v11306_v56  ;;  %v9401_v17 = vpop.eup %9400  ;;  %v1224_v52 = vadd.f32 1.0, %v9399_v63  ;;  %2038 = vmatprep.subr.bf16.mxu1 %v9019_v57 }
 0x24f   : > { %v11423_v60 = vadd.f32 %v1096_v15, %v11306_v56  ;;  %v9403_v41 = vpop.eup %9402  ;;  %v8442_v15 = vmul.f32 -1.442695, %v11415_v14  ;;  %9408 = vrcp.f32 %v1223_v13  ;;  %v11439_v32 = vmul.f32 %v9401_v17, %v11328_v22  ;;  %v9022_v17 = vld [vmem:[#allocation7 + $0x84] ss:$8 sps:$4 sm:$0xff]  }
 0x250   : > { %1658 = vadd.xlane.f32.xlu1 %v1641_v27  ;;  %v9405_v21 = vpop.eup %9404  ;;  %9410 = vpow2.f32 %v8443_v7  ;;  %v8444_v2 = vmul.f32 -1.442695, %v11431_v28  ;;  %v1226_v27 = vadd.f32 1.0, %v9403_v41  ;;  %v9021_v7 = vld [vmem:[#allocation7 + $0x70] ss:$8 sps:$4 sm:$0xff]   ;;  %v1395_v41 = vmul.f32 %v11434_v0, %v11434_v0 }
 0x251   : > { %9412 = vrcp.f32 %v1225_v58  ;;  %v11450_v22 = vmul.f32 %v9405_v21, %v11337_v39  ;;  %v1394_v39 = vmul.f32 %v11426_v62, %v11426_v62  ;;  %2039 = vmatpush1.bf16.msra.mxu1 %v9021_v7  ;;  %v1642_v21 = vmul.f32 %v11439_v32, %v11439_v32 }
 0x252   : > { %1347 = vadd.xlane.f32.xlu0 %v11426_v62  ;;  %9414 = vpow2.f32 %v8442_v15  ;;  %v9024_v15 = vld [vmem:[#allocation7 + $0x80] ss:$8 sps:$4 sm:$0xff]   ;;  %2040 = vmatprep.subr.bf16.mxu1 %v9022_v17 }
 0x253   : > { %v1100_v51 = vpop.f32.mrb[24].mxu0  ;;  %9416 = vrcp.f32 %v1224_v52  ;;  %v9407_v52 = vpop.eup %9406  ;;  %v1643_v17 = vmul.f32 %v11450_v22, %v11450_v22 }
 0x254   : > { %1349 = vadd.xlane.f32.xlu1 %v11434_v0  ;;  %v11444_v29 = vadd.f32 %v1100_v51, %v11302_v55  ;;  %v1102_v24 = vpop.f32.mrb[25].mxu0  ;;  %9418 = vpow2.f32 %v8444_v2 }
 0x255   : > { %v11447_v44 = vadd.f32 %v1102_v24, %v11306_v56  ;;  %v1104_v63 = vpop.f32.mrb[26].mxu0  ;;  %9420 = vrcp.f32 %v1226_v27  ;;  %2041 = vmatpush1.bf16.msra.mxu1 %v9024_v15  ;;  %v1227_v15 = vadd.f32 1.0, %v9407_v52  ;;  %v9030_v52 = vld [vmem:[#allocation7 + $0xa0] ss:$8 sps:$4 sm:$0xff]  }
 0x256   : > { %1596 = vadd.xlane.f32.xlu0 %v11439_v32  ;;  %v11454_v13 = vadd.f32 %v1104_v63, %v11302_v55  ;;  %v1106_v51 = vpop.f32.mrb[27].mxu0 }
 0x257   : > { %v11457_v58 = vadd.f32 %v1106_v51, %v11306_v56  ;;  %v9025_v51 = vld [vmem:[#allocation7 + $0x94] ss:$8 sps:$4 sm:$0xff]  }
 0x258   : > { %1598 = vadd.xlane.f32.xlu1 %v11450_v22  ;;  %2042 = vmatprep.subr.bf16.mxu1 %v9025_v51 }
 0x259   : > { %v9409_v63 = vpop.eup %9408  ;;  %2043 = vmatpush1.bf16.msra.mxu1 %v9027_v37  ;;  %v8448_v37 = vmul.f32 -1.442695, %v11389_v33 }
 0x25a   : > { %1412 = vadd.xlane.f32.xlu0 %v1394_v39  ;;  %v9411_v7 = vpop.eup %9410  ;;  %v8445_v39 = vmul.f32 -1.442695, %v11376_v18  ;;  %v11482_v42 = vmul.f32 %v9409_v63, %v11341_v35 }
 0x25b   : > { %v1110_v20 = vpop.f32.mrb[28].mxu0  ;;  %v9413_v36 = vpop.eup %9412  ;;  %v1229_v25 = vadd.f32 1.0, %v9411_v7 }
 0x25c   : > { %1414 = vadd.xlane.f32.xlu1 %v1395_v41  ;;  %v11467_v2 = vadd.f32 %v1110_v20, %v11302_v55  ;;  %v1112_v24 = vpop.f32.mrb[29].mxu0  ;;  %v11486_v31 = vmul.f32 %v9413_v36, %v11346_v59  ;;  %9422 = vpow2.f32 %v8445_v39  ;;  %v9031_v59 = vld [vmem:[#allocation7 + $0xb4] ss:$8 sps:$4 sm:$0xff]   ;;  %v9033_v39 = vld [vmem:[#allocation7 + $0xb0] ss:$8 sps:$4 sm:$0xff]  }
 0x25d   : > { %v11470_v27 = vadd.f32 %v1112_v24, %v11306_v56  ;;  %v1114_v57 = vpop.f32.mrb[30].mxu0  ;;  %v9415_v24 = vpop.eup %9414  ;;  %9424 = vrcp.f32 %v1227_v15 }
 0x25e   : > { %1660 = vadd.xlane.f32.xlu0 %v1642_v21  ;;  %v11476_v41 = vadd.f32 %v1114_v57, %v11302_v55  ;;  %v1116_v20 = vpop.f32.mrb[31].mxu0  ;;  %v8447_v21 = vmul.f32 -1.442695, %v11386_v50  ;;  %v9417_v26 = vpop.eup %9416  ;;  %v9028_v55 = vld [vmem:[#allocation7 + $0xa4] ss:$8 sps:$4 sm:$0xff]   ;;  %v1228_v35 = vadd.f32 1.0, %v9415_v24 }
 0x25f   : > { %v11479_v43 = vadd.f32 %v1116_v20, %v11306_v56  ;;  %v9419_v57 = vpop.eup %9418  ;;  %v8446_v56 = vmul.f32 -1.442695, %v11379_v19  ;;  %2044 = vmatprep.subr.bf16.mxu1 %v9028_v55  ;;  %v11491_v63 = vmul.f32 %v9417_v26, %v11354_v1  ;;  %v1396_v26 = vmul.f32 %v11482_v42, %v11482_v42  ;;  %v9036_v1 = vld [vmem:[#allocation7 + $0xc0] ss:$8 sps:$4 sm:$0xff]   ;;  %v9037_v24 = vld [vmem:[#allocation7 + $0xd4] ss:$8 sps:$4 sm:$0xff]  }
 0x260   : > { %1662 = vadd.xlane.f32.xlu1 %v1643_v17  ;;  %v9421_v51 = vpop.eup %9420  ;;  %9426 = vpow2.f32 %v8447_v21  ;;  %2045 = vmatpush1.bf16.msra.mxu1 %v9030_v52  ;;  %v1230_v36 = vadd.f32 1.0, %v9419_v57  ;;  %v8449_v55 = vmul.f32 -1.442695, %v11407_v40 }
 0x261   : > { %9428 = vrcp.f32 %v1229_v25  ;;  %v11496_v7 = vmul.f32 %v9421_v51, %v11363_v46  ;;  %2046 = vmatprep.subr.bf16.mxu1 %v9031_v59  ;;  %v9034_v25 = vld [vmem:[#allocation7 + $0xc4] ss:$8 sps:$4 sm:$0xff]   ;;  %v1397_v46 = vmul.f32 %v11486_v31, %v11486_v31  ;;  %v1644_v20 = vmul.f32 %v11491_v63, %v11491_v63 }
 0x262   : > { %1351 = vadd.xlane.f32.xlu0 %v11482_v42  ;;  %9430 = vpow2.f32 %v8446_v56  ;;  %v9039_v56 = vld [vmem:[#allocation7 + $0xd0] ss:$8 sps:$4 sm:$0xff]  }
 0x263   : > { %9432 = vrcp.f32 %v1228_v35  ;;  %v1645_v57 = vmul.f32 %v11496_v7, %v11496_v7 }
 0x264   : > { %1353 = vadd.xlane.f32.xlu1 %v11486_v31  ;;  %9434 = vpow2.f32 %v8448_v37  ;;  %2047 = vmatpush1.bf16.msra.mxu1 %v9033_v39 }
 0x265   : > { %9436 = vrcp.f32 %v1230_v36  ;;  %2048 = vmatprep.subr.bf16.mxu1 %v9034_v25  ;;  %v8451_v36 = vmul.f32 -1.442695, %v11420_v16 }
 0x266   : > { %1600 = vadd.xlane.f32.xlu0 %v11491_v63  ;;  %v9423_v17 = vpop.eup %9422  ;;  %9438 = vpow2.f32 %v8449_v55 }
 0x267   : > { %v9425_v15 = vpop.eup %9424  ;;  %v1231_v51 = vadd.f32 1.0, %v9423_v17  ;;  %v9042_v17 = vld [vmem:[#allocation7 + $0xe0] ss:$8 sps:$4 sm:$0xff]  }
 0x268   : > { %1602 = vadd.xlane.f32.xlu1 %v11496_v7  ;;  %2049 = vmatpush1.bf16.msra.mxu1 %v9036_v1  ;;  %v11510_v37 = vmul.f32 %v9425_v15, %v11396_v38  ;;  %v8450_v1 = vmul.f32 -1.442695, %v11410_v45 }
 0x269   : > { %2050 = vmatprep.subr.bf16.mxu1 %v9037_v24  ;;  %9440 = vrcp.f32 %v1231_v51  ;;  %v8452_v24 = vmul.f32 -1.442695, %v11423_v60 }
 0x26a   : > { %1416 = vadd.xlane.f32.xlu0 %v1396_v26  ;;  %v9427_v21 = vpop.eup %9426  ;;  %v9040_v26 = vld [vmem:[#allocation7 + $0xe4] ss:$8 sps:$4 sm:$0xff]   ;;  %9442 = vpow2.f32 %v8451_v36  ;;  %v8453_v36 = vmul.f32 -1.442695, %v11444_v29 }
 0x26b   : > { %v9429_v52 = vpop.eup %9428  ;;  %v1233_v39 = vadd.f32 1.0, %v9427_v21  ;;  %v9043_v21 = vld [vmem:[#allocation7 + $0xf4] ss:$8 sps:$4 sm:$0xff]  }
 0x26c   : > { %1418 = vadd.xlane.f32.xlu1 %v1397_v46  ;;  %v9431_v35 = vpop.eup %9430  ;;  %2051 = vmatpush1.bf16.msra.mxu1 %v9039_v56  ;;  %v11514_v46 = vmul.f32 %v9429_v52, %v11402_v23 }
 0x26d   : > { %v9433_v59 = vpop.eup %9432  ;;  %v1232_v38 = vadd.f32 1.0, %v9431_v35  ;;  %2052 = vmatprep.subr.bf16.mxu1 %v9040_v26  ;;  %9444 = vrcp.f32 %v1233_v39 }
 0x26e   : > { %1664 = vadd.xlane.f32.xlu0 %v1644_v20  ;;  %v9435_v25 = vpop.eup %9434  ;;  %v11519_v15 = vmul.f32 %v9433_v59, %v11415_v14  ;;  %9446 = vpow2.f32 %v8450_v1  ;;  %v1398_v14 = vmul.f32 %v11510_v37, %v11510_v37  ;;  %v1399_v56 = vmul.f32 %v11514_v46, %v11514_v46 }
 0x26f   : > { %v9437_v20 = vpop.eup %9436  ;;  %v1234_v23 = vadd.f32 1.0, %v9435_v25  ;;  %9448 = vrcp.f32 %v1232_v38 }
 0x270   : > { %1666 = vadd.xlane.f32.xlu1 %v1645_v57  ;;  %2053 = vmatpush1.bf16.msra.mxu1 %v9042_v17  ;;  %v11524_v55 = vmul.f32 %v9437_v20, %v11431_v28  ;;  %v9045_v57 = vld [vmem:[#allocation7 + $0xf0] ss:$8 sps:$4 sm:$0xff]   ;;  %9450 = vpow2.f32 %v8452_v24  ;;  %v9439_v28 = vpop.eup %9438  ;;  %v1646_v52 = vmul.f32 %v11519_v15, %v11519_v15  ;;  %v8455_v17 = vmul.f32 -1.442695, %v11454_v13 }
 0x271   : > { %2054 = vmatprep.subr.bf16.mxu1 %v9043_v21  ;;  %9452 = vrcp.f32 %v1234_v23  ;;  %v1235_v26 = vadd.f32 1.0, %v9439_v28  ;;  %v8454_v21 = vmul.f32 -1.442695, %v11447_v44 }
 0x272   : > { %1355 = vadd.xlane.f32.xlu0 %v11510_v37  ;;  %v1647_v59 = vmul.f32 %v11524_v55, %v11524_v55  ;;  %9454 = vpow2.f32 %v8453_v36 }
 0x273   : > { %v9441_v51 = vpop.eup %9440  ;;  %9456 = vrcp.f32 %v1235_v26 }
 0x274   : > { %1357 = vadd.xlane.f32.xlu1 %v11514_v46  ;;  %2055 = vmatpush1.bf16.msra.mxu1 %v9045_v57  ;;  %v9443_v35 = vpop.eup %9442  ;;  %v11538_v1 = vmul.f32 %v9441_v51, %v11376_v18  ;;  %9458 = vpow2.f32 %v8455_v17 }
 0x275   : > { %v1237_v38 = vadd.f32 1.0, %v9443_v35 }
 0x276   : > { %1604 = vadd.xlane.f32.xlu0 %v11519_v15 }
 0x277   : > { %v9445_v39 = vpop.eup %9444  ;;  %9460 = vrcp.f32 %v1237_v38  ;;  %v8459_v38 = vmul.f32 -1.442695, %v11476_v41 }
 0x278   : > { %1606 = vadd.xlane.f32.xlu1 %v11524_v55  ;;  %v9447_v25 = vpop.eup %9446  ;;  %v11542_v23 = vmul.f32 %v9445_v39, %v11386_v50  ;;  %9462 = vpow2.f32 %v8454_v21 }
 0x279   : > { %v9449_v20 = vpop.eup %9448 }
 0x27a   : > { %1420 = vadd.xlane.f32.xlu0 %v1398_v14  ;;  %v9451_v24 = vpop.eup %9450  ;;  %v1236_v14 = vadd.f32 1.0, %v9447_v25  ;;  %v11547_v18 = vmul.f32 %v9449_v20, %v11379_v19  ;;  %v1400_v19 = vmul.f32 %v11538_v1, %v11538_v1 }
 0x27b   : > { %v9453_v57 = vpop.eup %9452  ;;  %v1238_v28 = vadd.f32 1.0, %v9451_v24 }
 0x27c   : > { %1422 = vadd.xlane.f32.xlu1 %v1399_v56  ;;  %v8456_v56 = vmul.f32 -1.442695, %v11457_v58  ;;  %v11552_v50 = vmul.f32 %v9453_v57, %v11389_v33  ;;  %9464 = vrcp.f32 %v1236_v14  ;;  %v9455_v51 = vpop.eup %9454  ;;  %v1648_v33 = vmul.f32 %v11547_v18, %v11547_v18 }
 0x27d   : > { %v9457_v35 = vpop.eup %9456  ;;  %v1239_v25 = vadd.f32 1.0, %v9455_v51 }
 0x27e   : > { %1668 = vadd.xlane.f32.xlu0 %v1646_v52  ;;  %9466 = vpow2.f32 %v8456_v56  ;;  %v1401_v52 = vmul.f32 %v11542_v23, %v11542_v23  ;;  %v9459_v36 = vpop.eup %9458  ;;  %v1649_v39 = vmul.f32 %v11552_v50, %v11552_v50  ;;  %v11566_v20 = vmul.f32 %v9457_v35, %v11407_v40 }
 0x27f   : > { %9468 = vrcp.f32 %v1238_v28  ;;  %v1241_v21 = vadd.f32 1.0, %v9459_v36  ;;  %v8458_v56 = vmul.f32 -1.442695, %v11470_v27 }
 0x280   : > { %1670 = vadd.xlane.f32.xlu1 %v1647_v59  ;;  %v8457_v59 = vmul.f32 -1.442695, %v11467_v2 }
 0x281   : > { %v9461_v26 = vpop.eup %9460 }
 0x282   : > { %1359 = vadd.xlane.f32.xlu0 %v11538_v1  ;;  %v9463_v17 = vpop.eup %9462  ;;  %v11570_v14 = vmul.f32 %v9461_v26, %v11420_v16  ;;  %9470 = vpow2.f32 %v8457_v59 }
 0x283   : > { %9472 = vrcp.f32 %v1239_v25 }
 0x284   : > { %1361 = vadd.xlane.f32.xlu1 %v11542_v23  ;;  %9474 = vpow2.f32 %v8459_v38 }
 0x285   : > { %9476 = vrcp.f32 %v1241_v21 }
 0x286   : > { %1608 = vadd.xlane.f32.xlu0 %v11547_v18  ;;  %v9465_v24 = vpop.eup %9464  ;;  %9478 = vpow2.f32 %v8458_v56 }
 0x287   : > { %v11575_v40 = vmul.f32 %v9465_v24, %v11410_v45  ;;  %v1402_v45 = vmul.f32 %v11566_v20, %v11566_v20 }
 0x288   : > { %1610 = vadd.xlane.f32.xlu1 %v11552_v50  ;;  %v9467_v57 = vpop.eup %9466 }
 0x289   : > { %v9469_v28 = vpop.eup %9468  ;;  %v1242_v51 = vadd.f32 1.0, %v9467_v57 }
 0x28a   : > { %1424 = vadd.xlane.f32.xlu0 %v1400_v19  ;;  %v1240_v19 = vadd.f32 1.0, %v9463_v17  ;;  %v11580_v16 = vmul.f32 %v9469_v28, %v11423_v60  ;;  %v1650_v60 = vmul.f32 %v11575_v40, %v11575_v40 }
 0x28c   : > { %1426 = vadd.xlane.f32.xlu1 %v1401_v52  ;;  %v8460_v52 = vmul.f32 -1.442695, %v11479_v43  ;;  %9480 = vrcp.f32 %v1240_v19  ;;  %v9471_v35 = vpop.eup %9470 }
 0x28d   : > { %v9473_v36 = vpop.eup %9472  ;;  %v1243_v25 = vadd.f32 1.0, %v9471_v35 }
 0x28e   : > { %1672 = vadd.xlane.f32.xlu0 %v1648_v33  ;;  %9482 = vpow2.f32 %v8460_v52  ;;  %v1403_v33 = vmul.f32 %v11570_v14, %v11570_v14  ;;  %v9475_v59 = vpop.eup %9474  ;;  %v11593_v38 = vmul.f32 %v9473_v36, %v11444_v29 }
 0x28f   : > { %9484 = vrcp.f32 %v1242_v51  ;;  %v9477_v26 = vpop.eup %9476  ;;  %v1245_v21 = vadd.f32 1.0, %v9475_v59 }
 0x290   : > { %1674 = vadd.xlane.f32.xlu1 %v1649_v39  ;;  %v1651_v39 = vmul.f32 %v11580_v16, %v11580_v16  ;;  %v9479_v17 = vpop.eup %9478  ;;  %v11596_v56 = vmul.f32 %v9477_v26, %v11454_v13  ;;  %9486 = vrcp.f32 %v1243_v25  ;;  %v1404_v13 = vmul.f32 %v11593_v38, %v11593_v38 }
 0x291   : > { %v1244_v19 = vadd.f32 1.0, %v9479_v17  ;;  %9488 = vrcp.f32 %v1245_v21 }
 0x292   : > { %1363 = vadd.xlane.f32.xlu0 %v11566_v20 }
 0x293   : > { %9490 = vrcp.f32 %v1244_v19 }
 0x294   : > { %1365 = vadd.xlane.f32.xlu1 %v11570_v14 }
 0x296   : > { %1612 = vadd.xlane.f32.xlu0 %v11575_v40  ;;  %v9481_v24 = vpop.eup %9480 }
 0x297   : > { %v11600_v52 = vmul.f32 %v9481_v24, %v11447_v44  ;;  %v1405_v44 = vmul.f32 %v11596_v56, %v11596_v56 }
 0x298   : > { %1614 = vadd.xlane.f32.xlu1 %v11580_v16  ;;  %v9483_v57 = vpop.eup %9482 }
 0x299   : > { %v9485_v28 = vpop.eup %9484  ;;  %v1246_v29 = vadd.f32 1.0, %v9483_v57 }
 0x29a   : > { %1428 = vadd.xlane.f32.xlu0 %v1402_v45  ;;  %v11604_v51 = vmul.f32 %v9485_v28, %v11457_v58  ;;  %v1652_v45 = vmul.f32 %v11600_v52, %v11600_v52 }
 0x29b   : > { %9492 = vrcp.f32 %v1246_v29 }
 0x29c   : > { %1430 = vadd.xlane.f32.xlu1 %v1403_v33  ;;  %v9487_v33 = vpop.eup %9486  ;;  %v1653_v58 = vmul.f32 %v11604_v51, %v11604_v51 }
 0x29d   : > { %v9489_v35 = vpop.eup %9488 }
 0x29e   : > { %1676 = vadd.xlane.f32.xlu0 %v1650_v60  ;;  %v11617_v60 = vmul.f32 %v9487_v33, %v11467_v2  ;;  %v9491_v36 = vpop.eup %9490  ;;  %v11620_v59 = vmul.f32 %v9489_v35, %v11476_v41 }
 0x29f   : > { %v11624_v26 = vmul.f32 %v9491_v36, %v11470_v27 }
 0x2a0   : > { %1678 = vadd.xlane.f32.xlu1 %v1651_v39  ;;  %v1406_v27 = vmul.f32 %v11617_v60, %v11617_v60 }
 0x2a1   : > { %v1654_v2 = vmul.f32 %v11624_v26, %v11624_v26 }
 0x2a2   : > { %1367 = vadd.xlane.f32.xlu0 %v11593_v38 }
 0x2a4   : > { %1369 = vadd.xlane.f32.xlu1 %v11596_v56 }
 0x2a5   : > { %v9493_v39 = vpop.eup %9492 }
 0x2a6   : > { %1616 = vadd.xlane.f32.xlu0 %v11600_v52  ;;  %v11628_v25 = vmul.f32 %v9493_v39, %v11479_v43  ;;  %v1407_v43 = vmul.f32 %v11620_v59, %v11620_v59 }
 0x2a8   : > { %1618 = vadd.xlane.f32.xlu1 %v11604_v51  ;;  %v1655_v41 = vmul.f32 %v11628_v25, %v11628_v25 }
 0x2aa   : > { %1432 = vadd.xlane.f32.xlu0 %v1404_v13 }
 0x2ac   : > { %1434 = vadd.xlane.f32.xlu1 %v1405_v44 }
 0x2ae   : > { %1680 = vadd.xlane.f32.xlu0 %v1652_v45 }
 0x2b0   : > { %1682 = vadd.xlane.f32.xlu1 %v1653_v58 }
 0x2b2   : > { %1371 = vadd.xlane.f32.xlu0 %v11617_v60 }
 0x2b4   : > { %1373 = vadd.xlane.f32.xlu1 %v11620_v59 }
 0x2b6   : > { %1620 = vadd.xlane.f32.xlu0 %v11624_v26 }
 0x2b8   : > { %1622 = vadd.xlane.f32.xlu1 %v11628_v25 }
 0x2ba   : > { %1684 = vadd.xlane.f32.xlu0 %v1654_v2 }
 0x2bc   : > { %1686 = vadd.xlane.f32.xlu1 %v1655_v41 }
 0x2be   : > { %1436 = vadd.xlane.f32.xlu0 %v1406_v27 }
 0x2c0   : > { %1438 = vadd.xlane.f32.xlu1 %v1407_v43 }
 0x2cf   : > { %v1344_v17 = vpop.xlane.xlu0 %1343 }
 0x2d0   : > { %v11640_v57 = vmul.f32 0.0078125, %v1344_v17 }
 0x2d1   : > { %v1346_v24 = vpop.xlane.xlu1 %1345 }
 0x2d2   : > { %v1377_v19 = vmul.f32 0.0078125, %v1346_v24  ;;  %v1456_v13 = vmul.f32 %v11640_v57, %v11640_v57 }
 0x2d3   : > { %v1593_v21 = vpop.xlane.xlu0 %1592 }
 0x2d4   : > { %v1624_v44 = vmul.f32 0.0078125, %v1593_v21  ;;  %v1457_v58 = vmul.f32 %v1377_v19, %v1377_v19 }
 0x2d5   : > { %v1595_v28 = vpop.xlane.xlu1 %1594 }
 0x2d6   : > { %v11644_v35 = vmul.f32 0.0078125, %v1595_v28  ;;  %v1704_v41 = vmul.f32 %v1624_v44, %v1624_v44 }
 0x2d7   : > { %v1409_v29 = vpop.xlane.xlu0 %1408 }
 0x2d8   : > { %v1440_v45 = vmul.f32 0.0078125, %v1409_v29  ;;  %v1705_v24 = vmul.f32 %v11644_v35, %v11644_v35 }
 0x2d9   : > { %v1411_v33 = vpop.xlane.xlu1 %1410 }
 0x2da   : > { %v1472_v36 = vsub.f32 %v1440_v45, %v1456_v13  ;;  %v1441_v39 = vmul.f32 0.0078125, %v1411_v33 }
 0x2db   : > { %v1657_v2 = vpop.xlane.xlu0 %1656 }
 0x2dc   : > { %v1504_v27 = vadd.f32 0.1, %v1472_v36  ;;  %v1473_v43 = vsub.f32 %v1441_v39, %v1457_v58  ;;  %v1688_v17 = vmul.f32 0.0078125, %v1657_v2  ;;  %v11651_v36 = vsub.s32 5, %v11291_v47 }
 0x2dd   : > { %v1659_v30 = vpop.xlane.xlu1 %1658 }
 0x2de   : > { %v1505_v11 = vadd.f32 0.1, %v1473_v43  ;;  %v1720_v10 = vsub.f32 %v1688_v17, %v1704_v41  ;;  %v1689_v9 = vmul.f32 0.0078125, %v1659_v30  ;;  %9494 = vrsqrt.f32 %v1504_v27  ;;  %16515 = vst [vmem:[#allocation50_spill] sm:$0xff] %v11651_v36 }
 0x2df   : > { %v1348_v21 = vpop.xlane.xlu0 %1347  ;;  %v1489_v41 = vsub.f32 %v11366_v12, %v1377_v19  ;;  %v11663_v17 = vsub.s32 2, %v11291_v47  ;;  %v675_v12 = vld [vmem:[#allocation10 + $0x10] sm:$0x7f]  ;;  %v1736_v19 = vsub.f32 %v11371_v61, %v1624_v44 }
 0x2e0   : > { %9496 = vrsqrt.f32 %v1505_v11  ;;  %v1752_v29 = vadd.f32 0.1, %v1720_v10  ;;  %v1721_v28 = vsub.f32 %v1689_v9, %v1705_v24  ;;  %v11648_v33 = vmul.f32 0.0078125, %v1348_v21 }
 0x2e1   : > { %v1350_v8 = vpop.xlane.xlu1 %1349  ;;  %16516 = vst [vmem:[#allocation51_spill] sm:$0xff] %v11663_v17  ;;  %v1488_v21 = vsub.f32 %v11359_v49, %v11640_v57 }
 0x2e2   : > { %9498 = vrsqrt.f32 %v1752_v29  ;;  %v1753_v13 = vadd.f32 0.1, %v1721_v28  ;;  %v11653_v39 = vmul.f32 0.0078125, %v1350_v8  ;;  %v1458_v10 = vmul.f32 %v11648_v33, %v11648_v33 }
 0x2e3   : > { %v1597_v45 = vpop.xlane.xlu0 %1596  ;;  %v11667_v8 = vrot.slane %v11296_v53, %v11651_v36  ;;  %v11678_v53 = vrot.slane %v11298_v54, %v11651_v36 }
 0x2e4   : > { %9500 = vrsqrt.f32 %v1753_v13  ;;  %v11655_v2 = vmul.f32 0.0078125, %v1597_v45  ;;  %v1459_v29 = vmul.f32 %v11653_v39, %v11653_v39 }
 0x2e5   : > { %v1599_v58 = vpop.xlane.xlu1 %1598 }
 0x2e6   : > { %v11660_v27 = vmul.f32 0.0078125, %v1599_v58  ;;  %v1706_v45 = vmul.f32 %v11655_v2, %v11655_v2 }
 0x2e7   : > { %v1413_v30 = vpop.xlane.xlu0 %1412 }
 0x2e8   : > { %v1442_v9 = vmul.f32 0.0078125, %v1413_v30  ;;  %v9495_v11 = vpop.eup %9494  ;;  %v1707_v61 = vmul.f32 %v11660_v27, %v11660_v27 }
 0x2e9   : > { %v1415_v43 = vpop.xlane.xlu1 %1414  ;;  %v1536_v3 = vmul.f32 %v9495_v11, %v1488_v21 }
 0x2ea   : > { %v9497_v24 = vpop.eup %9496  ;;  %v1474_v28 = vsub.f32 %v1442_v9, %v1458_v10  ;;  %v1443_v13 = vmul.f32 0.0078125, %v1415_v43  ;;  %v1737_v10 = vsub.f32 %v11382_v34, %v11644_v35  ;;  %v11685_v43 = vrot.slane %v675_v12, %v11663_v17 }
 0x2eb   : > { %v1661_v58 = vpop.xlane.xlu0 %1660  ;;  %v1537_v30 = vmul.f32 %v9497_v24, %v1489_v41  ;;  %v11690_v34 = vrot.slane %v676_v4, %v11663_v17 }
 0x2ec   : > { %v9499_v6 = vpop.eup %9498  ;;  %v1506_v5 = vadd.f32 0.1, %v1474_v28  ;;  %v1475_v49 = vsub.f32 %v1443_v13, %v1459_v29  ;;  %v1690_v57 = vmul.f32 0.0078125, %v1661_v58  ;;  %v1556_v13 = vmul.f32 %v11667_v8, %v1536_v3 }
 0x2ed   : > { %v1663_v44 = vpop.xlane.xlu1 %1662  ;;  %v1784_v9 = vmul.f32 %v9499_v6, %v1736_v19  ;;  %v1557_v29 = vmul.f32 %v11667_v8, %v1537_v30 }
 0x2ee   : > { %v9501_v54 = vpop.eup %9500  ;;  %v1507_v36 = vadd.f32 0.1, %v1475_v49  ;;  %v1722_v41 = vsub.f32 %v1690_v57, %v1706_v45  ;;  %v1691_v24 = vmul.f32 0.0078125, %v1663_v44  ;;  %9502 = vrsqrt.f32 %v1506_v5 }
 0x2ef   : > { %v1352_v28 = vpop.xlane.xlu0 %1351  ;;  %v1785_v11 = vmul.f32 %v9501_v54, %v1737_v10  ;;  %v1804_v21 = vmul.f32 %v11678_v53, %v1784_v9  ;;  %v11695_v58 = vadd.f32 %v11685_v43, %v1557_v29  ;;  %v11706_v3 = vadd.f32 %v11685_v43, %v1556_v13 }
 0x2f0   : > { %9504 = vrsqrt.f32 %v1507_v36  ;;  %v1754_v35 = vadd.f32 0.1, %v1722_v41  ;;  %v1723_v6 = vsub.f32 %v1691_v24, %v1707_v61  ;;  %v11703_v36 = vmul.f32 0.0078125, %v1352_v28 }
 0x2f1   : > { %v1354_v12 = vpop.xlane.xlu1 %1353  ;;  %v1805_v19 = vmul.f32 %v11678_v53, %v1785_v11  ;;  %16517 = vst [vmem:[#allocation52_spill] sm:$0xff] %v11695_v58  ;;  %v11698_v30 = vadd.f32 %v11690_v34, %v1804_v21  ;;  %v1840_v61 = vpack.c.bf16 %v11695_v58, %v11706_v3  ;;  %v1491_v29 = vsub.f32 %v11434_v0, %v11653_v39 }
 0x2f2   : > { %9506 = vrsqrt.f32 %v1754_v35  ;;  %v1755_v45 = vadd.f32 0.1, %v1723_v6  ;;  %v11710_v10 = vmul.f32 0.0078125, %v1354_v12  ;;  %v1460_v54 = vmul.f32 %v11703_v36, %v11703_v36 }
 0x2f3   : > { %v1601_v5 = vpop.xlane.xlu0 %1600  ;;  %v11701_v4 = vadd.f32 %v11690_v34, %v1805_v19  ;;  %v1490_v35 = vsub.f32 %v11426_v62, %v11648_v33  ;;  %v1738_v19 = vsub.f32 %v11439_v32, %v11655_v2  ;;  %v1739_v62 = vsub.f32 %v11450_v22, %v11660_v27 }
 0x2f4   : > { %9508 = vrsqrt.f32 %v1755_v45  ;;  %v11714_v44 = vmul.f32 0.0078125, %v1601_v5  ;;  %v1461_v6 = vmul.f32 %v11710_v10, %v11710_v10 }
 0x2f5   : > { %16518 = vst [vmem:[#allocation53_spill] sm:$0xff] %v11701_v4  ;;  %v1603_v49 = vpop.xlane.xlu1 %1602  ;;  %v1841_v57 = vpack.c.bf16 %v11701_v4, %v11698_v30 }
 0x2f6   : > { %v11720_v28 = vmul.f32 0.0078125, %v1603_v49  ;;  %v1708_v45 = vmul.f32 %v11714_v44, %v11714_v44 }
 0x2f7   : > { %2056 = vmatprep.mubr.bf16.mxu1 %v1841_v57  ;;  %v1417_v9 = vpop.xlane.xlu0 %1416 }
 0x2f8   : > { %v1444_v41 = vmul.f32 0.0078125, %v1417_v9  ;;  %2057 = vmatmul.mubr.bf16.vlgmr.msra.gmra.mrb[0].mxu1 %v1840_v61  ;;  %v9503_v24 = vpop.eup %9502  ;;  %v1709_v33 = vmul.f32 %v11720_v28, %v11720_v28 }
 0x2f9   : > { %v1419_v11 = vpop.xlane.xlu1 %1418  ;;  %v1538_v9 = vmul.f32 %v9503_v24, %v1490_v35 }
 0x2fa   : > { %v9505_v21 = vpop.eup %9504  ;;  %v1476_v13 = vsub.f32 %v1444_v41, %v1460_v54  ;;  %v1445_v12 = vmul.f32 0.0078125, %v1419_v11 }
 0x2fb   : > { %v1665_v5 = vpop.xlane.xlu0 %1664  ;;  %v1539_v0 = vmul.f32 %v9505_v21, %v1491_v29  ;;  %v1558_v22 = vmul.f32 %v11667_v8, %v1538_v9 }
 0x2fc   : > { %v9507_v39 = vpop.eup %9506  ;;  %v1508_v49 = vadd.f32 0.1, %v1476_v13  ;;  %v1477_v57 = vsub.f32 %v1445_v12, %v1461_v6  ;;  %v1692_v61 = vmul.f32 0.0078125, %v1665_v5 }
 0x2fd   : > { %v1667_v54 = vpop.xlane.xlu1 %1666  ;;  %v1786_v41 = vmul.f32 %v9507_v39, %v1738_v19  ;;  %v1559_v17 = vmul.f32 %v11667_v8, %v1539_v0 }
 0x2fe   : > { %v9509_v11 = vpop.eup %9508  ;;  %v1509_v32 = vadd.f32 0.1, %v1477_v57  ;;  %v1724_v2 = vsub.f32 %v1692_v61, %v1708_v45  ;;  %v1693_v48 = vmul.f32 0.0078125, %v1667_v54  ;;  %9510 = vrsqrt.f32 %v1508_v49 }
 0x2ff   : > { %v1356_v29 = vpop.xlane.xlu0 %1355  ;;  %v1787_v21 = vmul.f32 %v9509_v11, %v1739_v62  ;;  %v1806_v6 = vmul.f32 %v11678_v53, %v1786_v41  ;;  %v11739_v19 = vadd.f32 %v11685_v43, %v1559_v17  ;;  %v1493_v11 = vsub.f32 %v11486_v31, %v11710_v10 }
 0x300   : > { %9512 = vrsqrt.f32 %v1509_v32  ;;  %v1756_v24 = vadd.f32 0.1, %v1724_v2  ;;  %v1725_v35 = vsub.f32 %v1693_v48, %v1709_v33  ;;  %v11747_v39 = vmul.f32 0.0078125, %v1356_v29 }
 0x301   : > { %v1358_v27 = vpop.xlane.xlu1 %1357  ;;  %v1807_v13 = vmul.f32 %v11678_v53, %v1787_v21  ;;  %16519 = vst [vmem:[#allocation54_spill] sm:$0xff] %v11739_v19  ;;  %v11742_v5 = vadd.f32 %v11690_v34, %v1806_v6  ;;  %v11750_v48 = vadd.f32 %v11685_v43, %v1558_v22  ;;  %v1492_v21 = vsub.f32 %v11482_v42, %v11703_v36 }
 0x302   : > { %9514 = vrsqrt.f32 %v1756_v24  ;;  %v1757_v12 = vadd.f32 0.1, %v1725_v35  ;;  %v11754_v61 = vmul.f32 0.0078125, %v1358_v27  ;;  %v1462_v33 = vmul.f32 %v11747_v39, %v11747_v39 }
 0x303   : > { %v1605_v45 = vpop.xlane.xlu0 %1604  ;;  %16520 = vst [vmem:[#allocation55_spill] sm:$0xff] %v11742_v5  ;;  %v11745_v0 = vadd.f32 %v11690_v34, %v1807_v13  ;;  %16522 = vst [vmem:[#allocation57_spill] sm:$0xff] %v11750_v48  ;;  %v1842_v17 = vpack.c.bf16 %v11739_v19, %v11750_v48  ;;  %v1740_v22 = vsub.f32 %v11491_v63, %v11714_v44 }
 0x304   : > { %9516 = vrsqrt.f32 %v1757_v12  ;;  %v11758_v9 = vmul.f32 0.0078125, %v1605_v45  ;;  %v1463_v6 = vmul.f32 %v11754_v61, %v11754_v61  ;;  %v1741_v42 = vsub.f32 %v11496_v7, %v11720_v28 }
 0x305   : > { %16521 = vst [vmem:[#allocation56_spill] sm:$0xff] %v11745_v0  ;;  %v1607_v49 = vpop.xlane.xlu1 %1606  ;;  %v1843_v57 = vpack.c.bf16 %v11745_v0, %v11742_v5 }
 0x306   : > { %v11764_v32 = vmul.f32 0.0078125, %v1607_v49  ;;  %v1710_v27 = vmul.f32 %v11758_v9, %v11758_v9 }
 0x307   : > { %2066 = vmatprep.mubr.bf16.mxu1 %v1843_v57  ;;  %v1421_v62 = vpop.xlane.xlu0 %1420 }
 0x308   : > { %v1446_v54 = vmul.f32 0.0078125, %v1421_v62  ;;  %2067 = vmatmul.mubr.bf16.gmra.mrb[4].mxu1 %v1842_v17  ;;  %v9511_v41 = vpop.eup %9510  ;;  %v1711_v36 = vmul.f32 %v11764_v32, %v11764_v32 }
 0x309   : > { %v1423_v2 = vpop.xlane.xlu1 %1422  ;;  %v1540_v57 = vmul.f32 %v9511_v41, %v1492_v21 }
 0x30a   : > { %v9513_v29 = vpop.eup %9512  ;;  %v1478_v24 = vsub.f32 %v1446_v54, %v1462_v33  ;;  %v1447_v35 = vmul.f32 0.0078125, %v1423_v2 }
 0x30b   : > { %v1669_v13 = vpop.xlane.xlu0 %1668  ;;  %v1541_v31 = vmul.f32 %v9513_v29, %v1493_v11  ;;  %v1560_v7 = vmul.f32 %v11667_v8, %v1540_v57 }
 0x30c   : > { %v9515_v10 = vpop.eup %9514  ;;  %v1510_v12 = vadd.f32 0.1, %v1478_v24  ;;  %v1479_v45 = vsub.f32 %v1447_v35, %v1463_v6  ;;  %v1694_v49 = vmul.f32 0.0078125, %v1669_v13 }
 0x30d   : > { %v1671_v17 = vpop.xlane.xlu1 %1670  ;;  %v1788_v62 = vmul.f32 %v9515_v10, %v1740_v22  ;;  %v1561_v2 = vmul.f32 %v11667_v8, %v1541_v31 }
 0x30e   : > { %v9517_v33 = vpop.eup %9516  ;;  %v1511_v63 = vadd.f32 0.1, %v1479_v45  ;;  %v1726_v44 = vsub.f32 %v1694_v49, %v1710_v27  ;;  %v1695_v54 = vmul.f32 0.0078125, %v1671_v17  ;;  %9518 = vrsqrt.f32 %v1510_v12 }
 0x30f   : > { %v1360_v11 = vpop.xlane.xlu0 %1359  ;;  %v1789_v29 = vmul.f32 %v9517_v33, %v1741_v42  ;;  %v1808_v6 = vmul.f32 %v11678_v53, %v1788_v62  ;;  %v11783_v22 = vadd.f32 %v11685_v43, %v1561_v2  ;;  %v11794_v12 = vadd.f32 %v11685_v43, %v1560_v7 }
 0x310   : > { %9520 = vrsqrt.f32 %v1511_v63  ;;  %v1758_v41 = vadd.f32 0.1, %v1726_v44  ;;  %v1727_v21 = vsub.f32 %v1695_v54, %v1711_v36  ;;  %v11791_v10 = vmul.f32 0.0078125, %v1360_v11 }
 0x311   : > { %v1362_v28 = vpop.xlane.xlu1 %1361  ;;  %v1809_v24 = vmul.f32 %v11678_v53, %v1789_v29  ;;  %16523 = vst [vmem:[#allocation58_spill] sm:$0xff] %v11783_v22  ;;  %v11786_v13 = vadd.f32 %v11690_v34, %v1808_v6  ;;  %16526 = vst [vmem:[#allocation61_spill] sm:$0xff] %v11794_v12  ;;  %v1844_v42 = vpack.c.bf16 %v11783_v22, %v11794_v12 }
 0x312   : > { %9522 = vrsqrt.f32 %v1758_v41  ;;  %v1759_v35 = vadd.f32 0.1, %v1727_v21  ;;  %v11798_v57 = vmul.f32 0.0078125, %v1362_v28  ;;  %v1464_v62 = vmul.f32 %v11791_v10, %v11791_v10 }
 0x313   : > { %v1609_v27 = vpop.xlane.xlu0 %1608  ;;  %16524 = vst [vmem:[#allocation59_spill] sm:$0xff] %v11786_v13  ;;  %v11789_v31 = vadd.f32 %v11690_v34, %v1809_v24  ;;  %v1495_v44 = vsub.f32 %v11514_v46, %v11754_v61  ;;  %v1494_v29 = vsub.f32 %v11510_v37, %v11747_v39  ;;  %v1742_v7 = vsub.f32 %v11519_v15, %v11758_v9 }
 0x314   : > { %9524 = vrsqrt.f32 %v1759_v35  ;;  %v11802_v36 = vmul.f32 0.0078125, %v1609_v27  ;;  %v1465_v6 = vmul.f32 %v11798_v57, %v11798_v57  ;;  %v1743_v37 = vsub.f32 %v11524_v55, %v11764_v32 }
 0x315   : > { %16525 = vst [vmem:[#allocation60_spill] sm:$0xff] %v11789_v31  ;;  %v1611_v45 = vpop.xlane.xlu1 %1610  ;;  %v1845_v49 = vpack.c.bf16 %v11789_v31, %v11786_v13 }
 0x316   : > { %v11808_v54 = vmul.f32 0.0078125, %v1611_v45  ;;  %v1712_v28 = vmul.f32 %v11802_v36, %v11802_v36 }
 0x317   : > { %2076 = vmatprep.mubr.bf16.mxu1 %v1845_v49  ;;  %v1425_v17 = vpop.xlane.xlu0 %1424 }
 0x318   : > { %v1448_v33 = vmul.f32 0.0078125, %v1425_v17  ;;  %2077 = vmatmul.mubr.bf16.gmra.mrb[8].mxu1 %v1844_v42  ;;  %v9519_v63 = vpop.eup %9518  ;;  %v1713_v39 = vmul.f32 %v11808_v54, %v11808_v54 }
 0x319   : > { %v1427_v2 = vpop.xlane.xlu1 %1426  ;;  %v1542_v49 = vmul.f32 %v9519_v63, %v1494_v29 }
 0x31a   : > { %v9521_v11 = vpop.eup %9520  ;;  %v1480_v41 = vsub.f32 %v1448_v33, %v1464_v62  ;;  %v1449_v21 = vmul.f32 0.0078125, %v1427_v2 }
 0x31b   : > { %v1673_v24 = vpop.xlane.xlu0 %1672  ;;  %v1543_v46 = vmul.f32 %v9521_v11, %v1495_v44  ;;  %v1562_v55 = vmul.f32 %v11667_v8, %v1542_v49 }
 0x31c   : > { %v9523_v61 = vpop.eup %9522  ;;  %v1512_v35 = vadd.f32 0.1, %v1480_v41  ;;  %v1481_v27 = vsub.f32 %v1449_v21, %v1465_v6  ;;  %v1696_v45 = vmul.f32 0.0078125, %v1673_v24 }
 0x31d   : > { %v1675_v42 = vpop.xlane.xlu1 %1674  ;;  %v1790_v17 = vmul.f32 %v9523_v61, %v1742_v7  ;;  %v1563_v2 = vmul.f32 %v11667_v8, %v1543_v46 }
 0x31e   : > { %v9525_v62 = vpop.eup %9524  ;;  %v1513_v15 = vadd.f32 0.1, %v1481_v27  ;;  %v1728_v9 = vsub.f32 %v1696_v45, %v1712_v28  ;;  %v1697_v33 = vmul.f32 0.0078125, %v1675_v42  ;;  %9526 = vrsqrt.f32 %v1512_v35 }
 0x31f   : > { %v1364_v44 = vpop.xlane.xlu0 %1363  ;;  %v1791_v11 = vmul.f32 %v9525_v62, %v1743_v37  ;;  %v1810_v6 = vmul.f32 %v11678_v53, %v1790_v17  ;;  %v11827_v7 = vadd.f32 %v11685_v43, %v1563_v2  ;;  %v11838_v35 = vadd.f32 %v11685_v43, %v1562_v55 }
 0x320   : > { %9528 = vrsqrt.f32 %v1513_v15  ;;  %v1760_v63 = vadd.f32 0.1, %v1728_v9  ;;  %v1729_v29 = vsub.f32 %v1697_v33, %v1713_v39  ;;  %v11835_v61 = vmul.f32 0.0078125, %v1364_v44 }
 0x321   : > { %v1366_v32 = vpop.xlane.xlu1 %1365  ;;  %v1811_v41 = vmul.f32 %v11678_v53, %v1791_v11  ;;  %16527 = vst [vmem:[#allocation62_spill] sm:$0xff] %v11827_v7  ;;  %v11830_v24 = vadd.f32 %v11690_v34, %v1810_v6  ;;  %16530 = vst [vmem:[#allocation65_spill] sm:$0xff] %v11838_v35  ;;  %v1846_v37 = vpack.c.bf16 %v11827_v7, %v11838_v35 }
 0x322   : > { %9530 = vrsqrt.f32 %v1760_v63  ;;  %v1761_v21 = vadd.f32 0.1, %v1729_v29  ;;  %v11842_v49 = vmul.f32 0.0078125, %v1366_v32  ;;  %v1466_v17 = vmul.f32 %v11835_v61, %v11835_v61 }
 0x323   : > { %v1613_v28 = vpop.xlane.xlu0 %1612  ;;  %16528 = vst [vmem:[#allocation63_spill] sm:$0xff] %v11830_v24  ;;  %v11833_v46 = vadd.f32 %v11690_v34, %v1811_v41  ;;  %v1497_v9 = vsub.f32 %v11542_v23, %v11798_v57  ;;  %v1496_v11 = vsub.f32 %v11538_v1, %v11791_v10  ;;  %v1744_v55 = vsub.f32 %v11547_v18, %v11802_v36 }
 0x324   : > { %9532 = vrsqrt.f32 %v1761_v21  ;;  %v11846_v39 = vmul.f32 0.0078125, %v1613_v28  ;;  %v1467_v6 = vmul.f32 %v11842_v49, %v11842_v49  ;;  %v1745_v1 = vsub.f32 %v11552_v50, %v11808_v54 }
 0x325   : > { %16529 = vst [vmem:[#allocation64_spill] sm:$0xff] %v11833_v46  ;;  %v1615_v27 = vpop.xlane.xlu1 %1614  ;;  %v1847_v45 = vpack.c.bf16 %v11833_v46, %v11830_v24 }
 0x326   : > { %v11852_v33 = vmul.f32 0.0078125, %v1615_v27  ;;  %v1714_v32 = vmul.f32 %v11846_v39, %v11846_v39 }
 0x327   : > { %2086 = vmatprep.mubr.bf16.mxu1 %v1847_v45  ;;  %v1429_v42 = vpop.xlane.xlu0 %1428 }
 0x328   : > { %v1450_v62 = vmul.f32 0.0078125, %v1429_v42  ;;  %2087 = vmatmul.mubr.bf16.gmra.mrb[12].mxu1 %v1846_v37  ;;  %v9527_v15 = vpop.eup %9526  ;;  %v1715_v10 = vmul.f32 %v11852_v33, %v11852_v33 }
 0x329   : > { %v1431_v2 = vpop.xlane.xlu1 %1430  ;;  %v1544_v45 = vmul.f32 %v9527_v15, %v1496_v11 }
 0x32a   : > { %v9529_v44 = vpop.eup %9528  ;;  %v1482_v63 = vsub.f32 %v1450_v62, %v1466_v17  ;;  %v1451_v29 = vmul.f32 0.0078125, %v1431_v2 }
 0x32b   : > { %v1677_v41 = vpop.xlane.xlu0 %1676  ;;  %v1545_v23 = vmul.f32 %v9529_v44, %v1497_v9  ;;  %v1564_v50 = vmul.f32 %v11667_v8, %v1544_v45 }
 0x32c   : > { %v9531_v57 = vpop.eup %9530  ;;  %v1514_v21 = vadd.f32 0.1, %v1482_v63  ;;  %v1483_v28 = vsub.f32 %v1451_v29, %v1467_v6  ;;  %v1698_v27 = vmul.f32 0.0078125, %v1677_v41 }
 0x32d   : > { %v1679_v37 = vpop.xlane.xlu1 %1678  ;;  %v1792_v42 = vmul.f32 %v9531_v57, %v1744_v55  ;;  %v1565_v2 = vmul.f32 %v11667_v8, %v1545_v23 }
 0x32e   : > { %v9533_v17 = vpop.eup %9532  ;;  %v1515_v18 = vadd.f32 0.1, %v1483_v28  ;;  %v1730_v36 = vsub.f32 %v1698_v27, %v1714_v32  ;;  %v1699_v62 = vmul.f32 0.0078125, %v1679_v37  ;;  %9534 = vrsqrt.f32 %v1514_v21 }
 0x32f   : > { %v1368_v9 = vpop.xlane.xlu0 %1367  ;;  %v1793_v44 = vmul.f32 %v9533_v17, %v1745_v1  ;;  %v1812_v6 = vmul.f32 %v11678_v53, %v1792_v42  ;;  %v11871_v55 = vadd.f32 %v11685_v43, %v1565_v2  ;;  %v11882_v21 = vadd.f32 %v11685_v43, %v1564_v50 }
 0x330   : > { %9536 = vrsqrt.f32 %v1515_v18  ;;  %v1762_v15 = vadd.f32 0.1, %v1730_v36  ;;  %v1731_v11 = vsub.f32 %v1699_v62, %v1715_v10  ;;  %v11879_v57 = vmul.f32 0.0078125, %v1368_v9 }
 0x331   : > { %v1370_v54 = vpop.xlane.xlu1 %1369  ;;  %v1813_v63 = vmul.f32 %v11678_v53, %v1793_v44  ;;  %16531 = vst [vmem:[#allocation66_spill] sm:$0xff] %v11871_v55  ;;  %v11874_v41 = vadd.f32 %v11690_v34, %v1812_v6  ;;  %16534 = vst [vmem:[#allocation69_spill] sm:$0xff] %v11882_v21  ;;  %v1848_v1 = vpack.c.bf16 %v11871_v55, %v11882_v21 }
 0x332   : > { %9538 = vrsqrt.f32 %v1762_v15  ;;  %v1763_v29 = vadd.f32 0.1, %v1731_v11  ;;  %v11886_v45 = vmul.f32 0.0078125, %v1370_v54  ;;  %v1468_v42 = vmul.f32 %v11879_v57, %v11879_v57 }
 0x333   : > { %v1617_v32 = vpop.xlane.xlu0 %1616  ;;  %16532 = vst [vmem:[#allocation67_spill] sm:$0xff] %v11874_v41  ;;  %v11877_v23 = vadd.f32 %v11690_v34, %v1813_v63  ;;  %v1499_v36 = vsub.f32 %v11570_v14, %v11842_v49  ;;  %v1498_v44 = vsub.f32 %v11566_v20, %v11835_v61  ;;  %v1746_v50 = vsub.f32 %v11575_v40, %v11846_v39 }
 0x334   : > { %9540 = vrsqrt.f32 %v1763_v29  ;;  %v11890_v10 = vmul.f32 0.0078125, %v1617_v32  ;;  %v1469_v6 = vmul.f32 %v11886_v45, %v11886_v45  ;;  %v1747_v20 = vsub.f32 %v11580_v16, %v11852_v33 }
 0x335   : > { %16533 = vst [vmem:[#allocation68_spill] sm:$0xff] %v11877_v23  ;;  %v1619_v28 = vpop.xlane.xlu1 %1618  ;;  %v1849_v27 = vpack.c.bf16 %v11877_v23, %v11874_v41 }
 0x336   : > { %v11896_v62 = vmul.f32 0.0078125, %v1619_v28  ;;  %v1716_v54 = vmul.f32 %v11890_v10, %v11890_v10 }
 0x337   : > { %2096 = vmatprep.mubr.bf16.mxu1 %v1849_v27  ;;  %v1433_v37 = vpop.xlane.xlu0 %1432 }
 0x338   : > { %v1452_v17 = vmul.f32 0.0078125, %v1433_v37  ;;  %2097 = vmatmul.mubr.bf16.gmra.mrb[16].mxu1 %v1848_v1  ;;  %v9535_v18 = vpop.eup %9534  ;;  %v1717_v61 = vmul.f32 %v11896_v62, %v11896_v62 }
 0x339   : > { %v1435_v2 = vpop.xlane.xlu1 %1434  ;;  %v1546_v27 = vmul.f32 %v9535_v18, %v1498_v44 }
 0x33a   : > { %v9537_v9 = vpop.eup %9536  ;;  %v1484_v15 = vsub.f32 %v1452_v17, %v1468_v42  ;;  %v1453_v11 = vmul.f32 0.0078125, %v1435_v2 }
 0x33b   : > { %v1681_v63 = vpop.xlane.xlu0 %1680  ;;  %v1547_v14 = vmul.f32 %v9537_v9, %v1499_v36  ;;  %v1566_v16 = vmul.f32 %v11667_v8, %v1546_v27 }
 0x33c   : > { %v9539_v49 = vpop.eup %9538  ;;  %v1516_v29 = vadd.f32 0.1, %v1484_v15  ;;  %v1485_v32 = vsub.f32 %v1453_v11, %v1469_v6  ;;  %v1700_v28 = vmul.f32 0.0078125, %v1681_v63 }
 0x33d   : > { %v1683_v1 = vpop.xlane.xlu1 %1682  ;;  %v1794_v37 = vmul.f32 %v9539_v49, %v1746_v50  ;;  %v1567_v2 = vmul.f32 %v11667_v8, %v1547_v14 }
 0x33e   : > { %v9541_v42 = vpop.eup %9540  ;;  %v1517_v40 = vadd.f32 0.1, %v1485_v32  ;;  %v1732_v39 = vsub.f32 %v1700_v28, %v1716_v54  ;;  %v1701_v17 = vmul.f32 0.0078125, %v1683_v1  ;;  %9542 = vrsqrt.f32 %v1516_v29 }
 0x33f   : > { %v1372_v36 = vpop.xlane.xlu0 %1371  ;;  %v1795_v9 = vmul.f32 %v9541_v42, %v1747_v20  ;;  %v1814_v6 = vmul.f32 %v11678_v53, %v1794_v37  ;;  %v11915_v50 = vadd.f32 %v11685_v43, %v1567_v2  ;;  %v11924_v29 = vadd.f32 %v11685_v43, %v1566_v16 }
 0x340   : > { %9544 = vrsqrt.f32 %v1517_v40  ;;  %v1764_v18 = vadd.f32 0.1, %v1732_v39  ;;  %v1733_v44 = vsub.f32 %v1701_v17, %v1717_v61  ;;  %v11930_v61 = vmul.f32 0.0078125, %v1372_v36 }
 0x341   : > { %v1374_v33 = vpop.xlane.xlu1 %1373  ;;  %v1815_v15 = vmul.f32 %v11678_v53, %v1795_v9  ;;  %16535 = vst [vmem:[#allocation70_spill] sm:$0xff] %v11915_v50  ;;  %v11918_v63 = vadd.f32 %v11690_v34, %v1814_v6  ;;  %16538 = vst [vmem:[#allocation73_spill] sm:$0xff] %v11924_v29  ;;  %v1850_v20 = vpack.c.bf16 %v11915_v50, %v11924_v29 }
 0x342   : > { %9546 = vrsqrt.f32 %v1764_v18  ;;  %v1765_v11 = vadd.f32 0.1, %v1733_v44  ;;  %v1501_v39 = vsub.f32 %v11596_v56, %v11886_v45  ;;  %v1391_v17 = vmul.f32 0.0078125, %v1374_v33 }
 0x343   : > { %v1621_v54 = vpop.xlane.xlu0 %1620  ;;  %16536 = vst [vmem:[#allocation71_spill] sm:$0xff] %v11918_v63  ;;  %v11921_v14 = vadd.f32 %v11690_v34, %v1815_v15  ;;  %v1500_v6 = vsub.f32 %v11593_v38, %v11879_v57  ;;  %v1748_v36 = vsub.f32 %v11600_v52, %v11890_v10  ;;  %v1470_v15 = vmul.f32 %v11930_v61, %v11930_v61 }
 0x344   : > { %9548 = vrsqrt.f32 %v1765_v11  ;;  %v1638_v49 = vmul.f32 0.0078125, %v1621_v54  ;;  %v1471_v38 = vmul.f32 %v1391_v17, %v1391_v17 }
 0x345   : > { %16537 = vst [vmem:[#allocation72_spill] sm:$0xff] %v11921_v14  ;;  %v1623_v32 = vpop.xlane.xlu1 %1622  ;;  %v1851_v28 = vpack.c.bf16 %v11921_v14, %v11918_v63 }
 0x346   : > { %v1639_v27 = vmul.f32 0.0078125, %v1623_v32  ;;  %v1718_v37 = vmul.f32 %v1638_v49, %v1638_v49 }
 0x347   : > { %2106 = vmatprep.mubr.bf16.mxu1 %v1851_v28  ;;  %v1685_v1 = vpop.xlane.xlu0 %1684 }
 0x348   : > { %v1702_v42 = vmul.f32 0.0078125, %v1685_v1  ;;  %2107 = vmatmul.mubr.bf16.gmra.mrb[20].mxu1 %v1850_v20  ;;  %v9543_v40 = vpop.eup %9542  ;;  %v1719_v18 = vmul.f32 %v1639_v27, %v1639_v27  ;;  %v1749_v20 = vsub.f32 %v11604_v51, %v11896_v62 }
 0x349   : > { %v1687_v2 = vpop.xlane.xlu1 %1686  ;;  %v1548_v33 = vmul.f32 %v9543_v40, %v1500_v6 }
 0x34a   : > { %v9545_v9 = vpop.eup %9544  ;;  %v1734_v44 = vsub.f32 %v1702_v42, %v1718_v37  ;;  %v1703_v16 = vmul.f32 0.0078125, %v1687_v2 }
 0x34b   : > { %v1437_v11 = vpop.xlane.xlu0 %1436  ;;  %v1549_v54 = vmul.f32 %v9545_v9, %v1501_v39  ;;  %v1568_v40 = vmul.f32 %v11667_v8, %v1548_v33 }
 0x34c   : > { %v9547_v32 = vpop.eup %9546  ;;  %v1766_v28 = vadd.f32 0.1, %v1734_v44  ;;  %v1735_v56 = vsub.f32 %v1703_v16, %v1719_v18  ;;  %v1454_v45 = vmul.f32 0.0078125, %v1437_v11  ;;  %v1750_v11 = vsub.f32 %v11624_v26, %v1638_v49 }
 0x34d   : > { %v1439_v57 = vpop.xlane.xlu1 %1438  ;;  %v1796_v1 = vmul.f32 %v9547_v32, %v1748_v36  ;;  %v1569_v37 = vmul.f32 %v11667_v8, %v1549_v54  ;;  %v11956_v36 = vadd.f32 %v11685_v43, %v1568_v40  ;;  %v1751_v32 = vsub.f32 %v11628_v25, %v1639_v27 }
 0x34e   : > { %v9549_v42 = vpop.eup %9548  ;;  %9550 = vrsqrt.f32 %v1766_v28  ;;  %v1767_v52 = vadd.f32 0.1, %v1735_v56  ;;  %v1486_v10 = vsub.f32 %v1454_v45, %v1470_v15  ;;  %v1455_v2 = vmul.f32 0.0078125, %v1439_v57 }
 0x34f   : > { %v1797_v14 = vmul.f32 %v9549_v42, %v1749_v20  ;;  %v1816_v39 = vmul.f32 %v11678_v53, %v1796_v1  ;;  %v11947_v6 = vadd.f32 %v11685_v43, %v1569_v37  ;;  %16542 = vst [vmem:[#allocation77_spill] sm:$0xff] %v11956_v36  ;;  %v1502_v45 = vsub.f32 %v11617_v60, %v11930_v61 }
 0x350   : > { %9552 = vrsqrt.f32 %v1767_v52  ;;  %v1518_v9 = vadd.f32 0.1, %v1486_v10  ;;  %v1487_v18 = vsub.f32 %v1455_v2, %v1471_v38  ;;  %v1503_v57 = vsub.f32 %v11620_v59, %v1391_v17  ;;  %v10582_v52 = vld [vmem:[#allocation10] sm:$0xff]  ;;  %v10583_v2 = vld [vmem:[#allocation10 + $0x8] sm:$0xff] }
 0x351   : > { %v1817_v51 = vmul.f32 %v11678_v53, %v1797_v14  ;;  %16539 = vst [vmem:[#allocation74_spill] sm:$0xff] %v11947_v6  ;;  %v11950_v44 = vadd.f32 %v11690_v34, %v1816_v39  ;;  %v1852_v14 = vpack.c.bf16 %v11947_v6, %v11956_v36 }
 0x352   : > { %9554 = vrsqrt.f32 %v1518_v9  ;;  %v1519_v62 = vadd.f32 0.1, %v1487_v18 }
 0x353   : > { %16540 = vst [vmem:[#allocation75_spill] sm:$0xff] %v11950_v44  ;;  %v11953_v16 = vadd.f32 %v11690_v34, %v1817_v51 }
 0x354   : > { %9556 = vrsqrt.f32 %v1519_v62 }
 0x355   : > { %16541 = vst [vmem:[#allocation76_spill] sm:$0xff] %v11953_v16  ;;  %v1853_v15 = vpack.c.bf16 %v11953_v16, %v11950_v44 }
 0x357   : > { %2116 = vmatprep.mubr.bf16.mxu1 %v1853_v15 }
 0x358   : > { %v9551_v54 = vpop.eup %9550  ;;  %2117 = vmatmul.mubr.bf16.gmra.mrb[24].mxu1 %v1852_v14 }
 0x359   : > { %v1798_v28 = vmul.f32 %v9551_v54, %v1750_v11 }
 0x35a   : > { %v9553_v56 = vpop.eup %9552 }
 0x35b   : > { %v1799_v33 = vmul.f32 %v9553_v56, %v1751_v32  ;;  %v1818_v20 = vmul.f32 %v11678_v53, %v1798_v28 }
 0x35c   : > { %v9555_v38 = vpop.eup %9554 }
 0x35d   : > { %v1819_v1 = vmul.f32 %v11678_v53, %v1799_v33  ;;  %v1550_v37 = vmul.f32 %v9555_v38, %v1502_v45  ;;  %v11970_v49 = vadd.f32 %v11690_v34, %v1818_v20 }
 0x35e   : > { %v9557_v26 = vpop.eup %9556 }
 0x35f   : > { %16543 = vst [vmem:[#allocation78_spill] sm:$0xff] %v11970_v49  ;;  %v11973_v25 = vadd.f32 %v11690_v34, %v1819_v1  ;;  %v1551_v27 = vmul.f32 %v9557_v26, %v1503_v57  ;;  %v1570_v42 = vmul.f32 %v11667_v8, %v1550_v37  ;;  %v11988_v34 = vsub.s32 1, %v11291_v47 }
 0x361   : > { %16544 = vst [vmem:[#allocation79_spill] sm:$0xff] %v11973_v25  ;;  %v1855_v60 = vpack.c.bf16 %v11973_v25, %v11970_v49  ;;  %v1571_v61 = vmul.f32 %v11667_v8, %v1551_v27  ;;  %v11980_v59 = vadd.f32 %v11685_v43, %v1570_v42  ;;  %16547 = vst [vmem:[#allocation82_spill] sm:$0xff] %v11988_v34 }
 0x362   : > { %v11991_v10 = vrot.slane %v10582_v52, %v11988_v34  ;;  %v11994_v8 = vrot.slane %v10583_v2, %v11988_v34 }
 0x363   : > { %2126 = vmatprep.mubr.bf16.mxu1 %v1855_v60  ;;  %16545 = vst [vmem:[#allocation80_spill] sm:$0xff] %v11980_v59  ;;  %v11983_v53 = vadd.f32 %v11685_v43, %v1571_v61 }
 0x365   : > { %16546 = vst [vmem:[#allocation81_spill] sm:$0xff] %v11983_v53  ;;  %v1854_v17 = vpack.c.bf16 %v11983_v53, %v11980_v59 }
 0x367   : > { %2127 = vmatmul.mubr.bf16.gmra.mrb[28].mxu1 %v1854_v17 }
 0x3cb   : > { %v2058_v39 = vpop.f32.mrb[0].mxu1 }
 0x3cc   : > { %v2059_v9 = vadd.f32 %v2058_v39, %v11991_v10  ;;  %v2060_v43 = vpop.f32.mrb[1].mxu1 }
 0x3cd   : > { %v2061_v18 = vadd.f32 %v2060_v43, %v11994_v8  ;;  %v2062_v40 = vpop.f32.mrb[2].mxu1 }
 0x3ce   : > { %v2137_v51 = vadd.f32 %v2059_v9, %v11706_v3  ;;  %v2063_v62 = vadd.f32 %v2062_v40, %v11991_v10  ;;  %v2064_v15 = vpop.f32.mrb[3].mxu1 }
 0x3cf   : > { %v12001_v14 = vadd.f32 %v2061_v18, %v11698_v30  ;;  %v2065_v11 = vadd.f32 %v2064_v15, %v11994_v8 }
 0x3d0   : > { %v8493_v54 = vmul.f32 -1.442695, %v2137_v51  ;;  %v2139_v32 = vadd.f32 %v2063_v62, %v11695_v58 }
 0x3d1   : > { %v8494_v28 = vmul.f32 -1.442695, %v12001_v14  ;;  %v12007_v56 = vadd.f32 %v2065_v11, %v11701_v4 }
 0x3d2   : > { %9558 = vpow2.f32 %v8493_v54  ;;  %v8495_v45 = vmul.f32 -1.442695, %v2139_v32 }
 0x3d3   : > { %9560 = vpow2.f32 %v8494_v28  ;;  %v8496_v33 = vmul.f32 -1.442695, %v12007_v56 }
 0x3d4   : > { %9562 = vpow2.f32 %v8495_v45 }
 0x3d5   : > { %9564 = vpow2.f32 %v8496_v33  ;;  %v9046_v33 = vld [vmem:[#allocation7 + $0x100] ss:$8 sps:$4 sm:$0xff]  }
 0x3db   : > { %v2068_v20 = vpop.f32.mrb[4].mxu1 }
 0x3dc   : > { %v9559_v38 = vpop.eup %9558  ;;  %v2069_v57 = vadd.f32 %v2068_v20, %v11991_v10  ;;  %v2070_v1 = vpop.f32.mrb[5].mxu1  ;;  %v9048_v20 = vld [vmem:[#allocation7 + $0x104] ss:$8 sps:$4 sm:$0xff]  }
 0x3dd   : > { %v9561_v37 = vpop.eup %9560  ;;  %v2265_v26 = vadd.f32 1.0, %v9559_v38  ;;  %v2071_v27 = vadd.f32 %v2070_v1, %v11994_v8  ;;  %v2072_v42 = vpop.f32.mrb[6].mxu1  ;;  %3105 = vmatprep.subr.bf16.mxu0 %v9048_v20  ;;  %v9049_v38 = vld [vmem:[#allocation7 + $0x110] ss:$8 sps:$4 sm:$0xff]  }
 0x3de   : > { %v9563_v60 = vpop.eup %9562  ;;  %v2266_v61 = vadd.f32 1.0, %v9561_v37  ;;  %v12013_v17 = vadd.f32 %v2069_v57, %v11750_v48  ;;  %v2073_v52 = vadd.f32 %v2072_v42, %v11991_v10  ;;  %v2074_v2 = vpop.f32.mrb[7].mxu1  ;;  %3106 = vmatpush1.bf16.msra.mxu0 %v9046_v33  ;;  %v9051_v57 = vld [vmem:[#allocation7 + $0x114] ss:$8 sps:$4 sm:$0xff]  }
 0x3df   : > { %v9565_v39 = vpop.eup %9564  ;;  %9566 = vrcp.f32 %v2265_v26  ;;  %v2267_v9 = vadd.f32 1.0, %v9563_v60  ;;  %v12017_v43 = vadd.f32 %v2071_v27, %v11742_v5  ;;  %v2075_v18 = vadd.f32 %v2074_v2, %v11994_v8  ;;  %3107 = vmatprep.subr.bf16.mxu0 %v9051_v57  ;;  %v10586_v5 = vld [vmem:[#allocation10 + $0x10] sm:$0x7f] }
 0x3e0   : > { %9568 = vrcp.f32 %v2266_v61  ;;  %v2268_v40 = vadd.f32 1.0, %v9565_v39  ;;  %v8497_v62 = vmul.f32 -1.442695, %v12013_v17  ;;  %v12022_v15 = vadd.f32 %v2073_v52, %v11739_v19  ;;  %v9052_v39 = vld [vmem:[#allocation7 + $0x120] ss:$8 sps:$4 sm:$0xff]  }
 0x3e1   : > { %9570 = vrcp.f32 %v2267_v9  ;;  %v8498_v11 = vmul.f32 -1.442695, %v12017_v43  ;;  %v12026_v54 = vadd.f32 %v2075_v18, %v11745_v0  ;;  %v9054_v9 = vld [vmem:[#allocation7 + $0x124] ss:$8 sps:$4 sm:$0xff]  }
 0x3e2   : > { %9572 = vrcp.f32 %v2268_v40  ;;  %v8499_v28 = vmul.f32 -1.442695, %v12022_v15  ;;  %3108 = vmatpush1.bf16.msra.mxu0 %v9049_v38 }
 0x3e3   : > { %9574 = vpow2.f32 %v8497_v62  ;;  %v8500_v45 = vmul.f32 -1.442695, %v12026_v54  ;;  %3109 = vmatprep.subr.bf16.mxu0 %v9054_v9  ;;  %v9060_v9 = vld [vmem:[#allocation7 + $0x144] ss:$8 sps:$4 sm:$0xff]  }
 0x3e4   : > { %9576 = vpow2.f32 %v8498_v11 }
 0x3e5   : > { %9578 = vpow2.f32 %v8499_v28 }
 0x3e6   : > { %9580 = vpow2.f32 %v8500_v45  ;;  %3110 = vmatpush1.bf16.msra.mxu0 %v9052_v39 }
 0x3e9   : > { %v9567_v1 = vpop.eup %9566 }
 0x3ea   : > { %v9569_v37 = vpop.eup %9568  ;;  %v12030_v26 = vmul.f32 %v9567_v1, %v2137_v51 }
 0x3eb   : > { %v9571_v27 = vpop.eup %9570  ;;  %v2078_v42 = vpop.f32.mrb[8].mxu1  ;;  %v12043_v20 = vmul.f32 %v9569_v37, %v12001_v14 }
 0x3ec   : > { %v9573_v60 = vpop.eup %9572  ;;  %v2079_v61 = vadd.f32 %v2078_v42, %v11991_v10  ;;  %2393 = vadd.xlane.f32.xlu0 %v12030_v26  ;;  %v2080_v52 = vpop.f32.mrb[9].mxu1  ;;  %v12034_v2 = vmul.f32 %v9571_v27, %v2139_v32  ;;  %v9057_v32 = vld [vmem:[#allocation7 + $0x134] ss:$8 sps:$4 sm:$0xff]   ;;  %v2441_v39 = vmul.f32 %v12030_v26, %v12030_v26 }
 0x3ed   : > { %v9575_v18 = vpop.eup %9574  ;;  %v2081_v40 = vadd.f32 %v2080_v52, %v11994_v8  ;;  %v2082_v62 = vpop.f32.mrb[10].mxu1  ;;  %v12050_v42 = vmul.f32 %v9573_v60, %v12007_v56  ;;  %3111 = vmatprep.subr.bf16.mxu0 %v9057_v32  ;;  %v2689_v32 = vmul.f32 %v12043_v20, %v12043_v20 }
 0x3ee   : > { %v9577_v51 = vpop.eup %9576  ;;  %v2269_v11 = vadd.f32 1.0, %v9575_v18  ;;  %v12038_v28 = vadd.f32 %v2079_v61, %v11794_v12  ;;  %v2083_v45 = vadd.f32 %v2082_v62, %v11991_v10  ;;  %2395 = vadd.xlane.f32.xlu1 %v12034_v2  ;;  %v2084_v33 = vpop.f32.mrb[11].mxu1  ;;  %v9055_v61 = vld [vmem:[#allocation7 + $0x130] ss:$8 sps:$4 sm:$0xff]  }
 0x3ef   : > { %v9579_v38 = vpop.eup %9578  ;;  %v2270_v57 = vadd.f32 1.0, %v9577_v51  ;;  %v12046_v1 = vadd.f32 %v2081_v40, %v11786_v13  ;;  %v2085_v27 = vadd.f32 %v2084_v33, %v11994_v8  ;;  %3112 = vmatpush1.bf16.msra.mxu0 %v9055_v61  ;;  %v9063_v33 = vld [vmem:[#allocation7 + $0x154] ss:$8 sps:$4 sm:$0xff]  }
 0x3f0   : > { %v9581_v52 = vpop.eup %9580  ;;  %9582 = vrcp.f32 %v2269_v11  ;;  %v2271_v18 = vadd.f32 1.0, %v9579_v38  ;;  %v8501_v14 = vmul.f32 -1.442695, %v12038_v28  ;;  %v12054_v37 = vadd.f32 %v2083_v45, %v11783_v22  ;;  %2641 = vadd.xlane.f32.xlu0 %v12043_v20  ;;  %v9058_v11 = vld [vmem:[#allocation7 + $0x140] ss:$8 sps:$4 sm:$0xff]   ;;  %3113 = vmatprep.subr.bf16.mxu0 %v9060_v9 }
 0x3f1   : > { %9584 = vrcp.f32 %v2270_v57  ;;  %v2272_v40 = vadd.f32 1.0, %v9581_v52  ;;  %v8502_v62 = vmul.f32 -1.442695, %v12046_v1  ;;  %v12059_v56 = vadd.f32 %v2085_v27, %v11789_v31  ;;  %v9061_v38 = vld [vmem:[#allocation7 + $0x150] ss:$8 sps:$4 sm:$0xff]  }
 0x3f2   : > { %9586 = vrcp.f32 %v2271_v18  ;;  %v8503_v60 = vmul.f32 -1.442695, %v12054_v37  ;;  %2643 = vadd.xlane.f32.xlu1 %v12050_v42  ;;  %v2442_v45 = vmul.f32 %v12034_v2, %v12034_v2  ;;  %v2690_v57 = vmul.f32 %v12050_v42, %v12050_v42  ;;  %v9066_v27 = vld [vmem:[#allocation7 + $0x164] ss:$8 sps:$4 sm:$0xff]   ;;  %v9064_v9 = vld [vmem:[#allocation7 + $0x160] ss:$8 sps:$4 sm:$0xff]  }
 0x3f3   : > { %9588 = vrcp.f32 %v2272_v40  ;;  %v8504_v51 = vmul.f32 -1.442695, %v12059_v56  ;;  %3114 = vmatpush1.bf16.msra.mxu0 %v9058_v11 }
 0x3f4   : > { %9590 = vpow2.f32 %v8501_v14  ;;  %2457 = vadd.xlane.f32.xlu0 %v2441_v39  ;;  %3115 = vmatprep.subr.bf16.mxu0 %v9063_v33 }
 0x3f5   : > { %9592 = vpow2.f32 %v8502_v62 }
 0x3f6   : > { %9594 = vpow2.f32 %v8503_v60  ;;  %2459 = vadd.xlane.f32.xlu1 %v2442_v45 }
 0x3f7   : > { %9596 = vpow2.f32 %v8504_v51  ;;  %3116 = vmatpush1.bf16.msra.mxu0 %v9061_v38 }
 0x3f8   : > { %2705 = vadd.xlane.f32.xlu0 %v2689_v32  ;;  %3117 = vmatprep.subr.bf16.mxu0 %v9066_v27 }
 0x3fa   : > { %v9583_v61 = vpop.eup %9582  ;;  %2707 = vadd.xlane.f32.xlu1 %v2690_v57  ;;  %v9069_v57 = vld [vmem:[#allocation7 + $0x174] ss:$8 sps:$4 sm:$0xff]  }
 0x3fb   : > { %v9585_v52 = vpop.eup %9584  ;;  %v2088_v18 = vpop.f32.mrb[12].mxu1  ;;  %v12073_v14 = vmul.f32 %v9583_v61, %v12013_v17  ;;  %3118 = vmatpush1.bf16.msra.mxu0 %v9064_v9 }
 0x3fc   : > { %v9587_v40 = vpop.eup %9586  ;;  %v2089_v62 = vadd.f32 %v2088_v18, %v11991_v10  ;;  %v2090_v60 = vpop.f32.mrb[13].mxu1  ;;  %3119 = vmatprep.subr.bf16.mxu0 %v9069_v57 }
 0x3fd   : > { %v9589_v39 = vpop.eup %9588  ;;  %2397 = vadd.xlane.f32.xlu0 %v12073_v14  ;;  %v2091_v51 = vadd.f32 %v2090_v60, %v11994_v8  ;;  %v2092_v11 = vpop.f32.mrb[14].mxu1  ;;  %v12079_v45 = vmul.f32 %v9587_v40, %v12022_v15  ;;  %v12091_v15 = vmul.f32 %v9585_v52, %v12017_v43  ;;  %v9067_v40 = vld [vmem:[#allocation7 + $0x170] ss:$8 sps:$4 sm:$0xff]  }
 0x3fe   : > { %v9591_v33 = vpop.eup %9590  ;;  %v12082_v17 = vadd.f32 %v2089_v62, %v11838_v35  ;;  %v2093_v32 = vadd.f32 %v2092_v11, %v11991_v10  ;;  %v2094_v38 = vpop.f32.mrb[15].mxu1  ;;  %v12097_v35 = vmul.f32 %v9589_v39, %v12026_v54  ;;  %v2443_v54 = vmul.f32 %v12073_v14, %v12073_v14  ;;  %v9070_v39 = vld [vmem:[#allocation7 + $0x180] ss:$8 sps:$4 sm:$0xff]  }
 0x3ff   : > { %v9593_v61 = vpop.eup %9592  ;;  %v2273_v18 = vadd.f32 1.0, %v9591_v33  ;;  %v12086_v27 = vadd.f32 %v2091_v51, %v11830_v24  ;;  %2399 = vadd.xlane.f32.xlu1 %v12079_v45  ;;  %v2095_v60 = vadd.f32 %v2094_v38, %v11994_v8  ;;  %3120 = vmatpush1.bf16.msra.mxu0 %v9067_v40  ;;  %v9073_v40 = vld [vmem:[#allocation7 + $0x190] ss:$8 sps:$4 sm:$0xff]  }
 0x400   : > { %v9595_v62 = vpop.eup %9594  ;;  %v2274_v34 = vadd.f32 1.0, %v9593_v61  ;;  %v12094_v11 = vadd.f32 %v2093_v32, %v11827_v7  ;;  %v8505_v24 = vmul.f32 -1.442695, %v12082_v17  ;;  %v9072_v32 = vld [vmem:[#allocation7 + $0x184] ss:$8 sps:$4 sm:$0xff]   ;;  %v2691_v61 = vmul.f32 %v12091_v15, %v12091_v15 }
 0x401   : > { %v9597_v51 = vpop.eup %9596  ;;  %9598 = vrcp.f32 %v2273_v18  ;;  %v2275_v33 = vadd.f32 1.0, %v9595_v62  ;;  %v12101_v38 = vadd.f32 %v2095_v60, %v11833_v46  ;;  %2645 = vadd.xlane.f32.xlu0 %v12091_v15  ;;  %v8506_v52 = vmul.f32 -1.442695, %v12086_v27  ;;  %3121 = vmatprep.subr.bf16.mxu0 %v9072_v32  ;;  %v9075_v18 = vld [vmem:[#allocation7 + $0x194] ss:$8 sps:$4 sm:$0xff]  }
 0x402   : > { %9600 = vrcp.f32 %v2274_v34  ;;  %v2276_v43 = vadd.f32 1.0, %v9597_v51  ;;  %v8507_v9 = vmul.f32 -1.442695, %v12094_v11  ;;  %v2444_v34 = vmul.f32 %v12079_v45, %v12079_v45 }
 0x403   : > { %9602 = vrcp.f32 %v2275_v33  ;;  %2647 = vadd.xlane.f32.xlu1 %v12097_v35  ;;  %v8508_v57 = vmul.f32 -1.442695, %v12101_v38  ;;  %3122 = vmatpush1.bf16.msra.mxu0 %v9070_v39  ;;  %v2692_v60 = vmul.f32 %v12097_v35, %v12097_v35 }
 0x404   : > { %9604 = vrcp.f32 %v2276_v43  ;;  %3123 = vmatprep.subr.bf16.mxu0 %v9075_v18 }
 0x405   : > { %9606 = vpow2.f32 %v8505_v24  ;;  %2461 = vadd.xlane.f32.xlu0 %v2443_v54 }
 0x406   : > { %9608 = vpow2.f32 %v8506_v52 }
 0x407   : > { %9610 = vpow2.f32 %v8507_v9  ;;  %2463 = vadd.xlane.f32.xlu1 %v2444_v34  ;;  %3124 = vmatpush1.bf16.msra.mxu0 %v9073_v40  ;;  %v9078_v9 = vld [vmem:[#allocation7 + $0x1a4] ss:$8 sps:$4 sm:$0xff]  }
 0x408   : > { %9612 = vpow2.f32 %v8508_v57  ;;  %v9076_v57 = vld [vmem:[#allocation7 + $0x1a0] ss:$8 sps:$4 sm:$0xff]   ;;  %3125 = vmatprep.subr.bf16.mxu0 %v9078_v9 }
 0x409   : > { %2709 = vadd.xlane.f32.xlu0 %v2691_v61 }
 0x40b   : > { %v9599_v24 = vpop.eup %9598  ;;  %2711 = vadd.xlane.f32.xlu1 %v2692_v60  ;;  %v2098_v62 = vpop.f32.mrb[16].mxu1  ;;  %3126 = vmatpush1.bf16.msra.mxu0 %v9076_v57 }
 0x40c   : > { %v9601_v51 = vpop.eup %9600  ;;  %v2099_v33 = vadd.f32 %v2098_v62, %v11991_v10  ;;  %v12118_v43 = vmul.f32 %v9599_v24, %v12038_v28  ;;  %v2100_v52 = vpop.f32.mrb[17].mxu1 }
 0x40d   : > { %v9603_v54 = vpop.eup %9602  ;;  %v2101_v39 = vadd.f32 %v2100_v52, %v11994_v8  ;;  %v2102_v32 = vpop.f32.mrb[18].mxu1 }
 0x40e   : > { %v9605_v34 = vpop.eup %9604  ;;  %v12122_v61 = vadd.f32 %v2099_v33, %v11882_v21  ;;  %2401 = vadd.xlane.f32.xlu0 %v12118_v43  ;;  %v2103_v18 = vadd.f32 %v2102_v32, %v11991_v10  ;;  %v12127_v60 = vmul.f32 %v9603_v54, %v12054_v37  ;;  %v2104_v28 = vpop.f32.mrb[19].mxu1  ;;  %v12138_v32 = vmul.f32 %v9601_v51, %v12046_v1  ;;  %v9081_v37 = vld [vmem:[#allocation7 + $0x1b4] ss:$8 sps:$4 sm:$0xff]  }
 0x40f   : > { %v9607_v40 = vpop.eup %9606  ;;  %v12130_v24 = vadd.f32 %v2101_v39, %v11874_v41  ;;  %v2105_v62 = vadd.f32 %v2104_v28, %v11994_v8  ;;  %v9079_v41 = vld [vmem:[#allocation7 + $0x1b0] ss:$8 sps:$4 sm:$0xff]   ;;  %3127 = vmatprep.subr.bf16.mxu0 %v9081_v37  ;;  %v9087_v37 = vld [vmem:[#allocation7 + $0x1d4] ss:$8 sps:$4 sm:$0xff]  }
 0x410   : > { %v9609_v52 = vpop.eup %9608  ;;  %v2277_v46 = vadd.f32 1.0, %v9607_v40  ;;  %v12134_v33 = vadd.f32 %v2103_v18, %v11871_v55  ;;  %2403 = vadd.xlane.f32.xlu1 %v12127_v60  ;;  %v8509_v40 = vmul.f32 -1.442695, %v12122_v61  ;;  %v12146_v18 = vmul.f32 %v9605_v34, %v12059_v56  ;;  %3128 = vmatpush1.bf16.msra.mxu0 %v9079_v41  ;;  %v9082_v56 = vld [vmem:[#allocation7 + $0x1c0] ss:$8 sps:$4 sm:$0xff]  }
 0x411   : > { %v9611_v54 = vpop.eup %9610  ;;  %v2278_v21 = vadd.f32 1.0, %v9609_v52  ;;  %v12141_v39 = vadd.f32 %v2105_v62, %v11877_v23  ;;  %v8510_v51 = vmul.f32 -1.442695, %v12130_v24  ;;  %v9084_v62 = vld [vmem:[#allocation7 + $0x1c4] ss:$8 sps:$4 sm:$0xff]   ;;  %v2693_v34 = vmul.f32 %v12138_v32, %v12138_v32 }
 0x412   : > { %v9613_v28 = vpop.eup %9612  ;;  %9614 = vrcp.f32 %v2277_v46  ;;  %v2279_v9 = vadd.f32 1.0, %v9611_v54  ;;  %2649 = vadd.xlane.f32.xlu0 %v12138_v32  ;;  %v8511_v57 = vmul.f32 -1.442695, %v12134_v33  ;;  %v2445_v46 = vmul.f32 %v12118_v43, %v12118_v43  ;;  %3129 = vmatprep.subr.bf16.mxu0 %v9084_v62  ;;  %v9085_v41 = vld [vmem:[#allocation7 + $0x1d0] ss:$8 sps:$4 sm:$0xff]  }
 0x413   : > { %9616 = vrcp.f32 %v2278_v21  ;;  %v2280_v1 = vadd.f32 1.0, %v9613_v28  ;;  %v8512_v52 = vmul.f32 -1.442695, %v12141_v39  ;;  %v2446_v21 = vmul.f32 %v12127_v60, %v12127_v60 }
 0x414   : > { %9618 = vrcp.f32 %v2279_v9  ;;  %2651 = vadd.xlane.f32.xlu1 %v12146_v18  ;;  %3130 = vmatpush1.bf16.msra.mxu0 %v9082_v56  ;;  %v2694_v54 = vmul.f32 %v12146_v18, %v12146_v18  ;;  %v9088_v56 = vld [vmem:[#allocation7 + $0x1e0] ss:$8 sps:$4 sm:$0xff]  }
 0x415   : > { %9620 = vrcp.f32 %v2280_v1  ;;  %3131 = vmatprep.subr.bf16.mxu0 %v9087_v37 }
 0x416   : > { %9622 = vpow2.f32 %v8509_v40  ;;  %2465 = vadd.xlane.f32.xlu0 %v2445_v46 }
 0x417   : > { %9624 = vpow2.f32 %v8510_v51  ;;  %v9090_v51 = vld [vmem:[#allocation7 + $0x1e4] ss:$8 sps:$4 sm:$0xff]  }
 0x418   : > { %9626 = vpow2.f32 %v8511_v57  ;;  %2467 = vadd.xlane.f32.xlu1 %v2446_v21  ;;  %3132 = vmatpush1.bf16.msra.mxu0 %v9085_v41 }
 0x419   : > { %9628 = vpow2.f32 %v8512_v52  ;;  %3133 = vmatprep.subr.bf16.mxu0 %v9090_v51  ;;  %v9093_v51 = vld [vmem:[#allocation7 + $0x1f4] ss:$8 sps:$4 sm:$0xff]  }
 0x41a   : > { %2713 = vadd.xlane.f32.xlu0 %v2693_v34 }
 0x41b   : > { %v2108_v28 = vpop.f32.mrb[20].mxu1 }
 0x41c   : > { %v9615_v9 = vpop.eup %9614  ;;  %2715 = vadd.xlane.f32.xlu1 %v2694_v54  ;;  %v2109_v40 = vadd.f32 %v2108_v28, %v11991_v10  ;;  %v2110_v1 = vpop.f32.mrb[21].mxu1  ;;  %3134 = vmatpush1.bf16.msra.mxu0 %v9088_v56 }
 0x41d   : > { %v9617_v57 = vpop.eup %9616  ;;  %v12162_v46 = vmul.f32 %v9615_v9, %v12082_v17  ;;  %v2111_v62 = vadd.f32 %v2110_v1, %v11994_v8  ;;  %v2112_v52 = vpop.f32.mrb[22].mxu1  ;;  %3135 = vmatprep.subr.bf16.mxu0 %v9093_v51 }
 0x41e   : > { %v9619_v21 = vpop.eup %9618  ;;  %v12166_v34 = vadd.f32 %v2109_v40, %v11924_v29  ;;  %v2113_v37 = vadd.f32 %v2112_v52, %v11991_v10  ;;  %v2114_v54 = vpop.f32.mrb[23].mxu1  ;;  %v9091_v52 = vld [vmem:[#allocation7 + $0x1f0] ss:$8 sps:$4 sm:$0xff]  }
 0x41f   : > { %v9621_v28 = vpop.eup %9620  ;;  %2405 = vadd.xlane.f32.xlu0 %v12162_v46  ;;  %v12171_v41 = vadd.f32 %v2111_v62, %v11918_v63  ;;  %v12174_v17 = vmul.f32 %v9619_v21, %v12094_v11  ;;  %v2115_v9 = vadd.f32 %v2114_v54, %v11994_v8  ;;  %v16548_v62 = vld [vmem:[#allocation72_spill] sm:$0xff]  ;;  %v12186_v11 = vmul.f32 %v9617_v57, %v12086_v27 }
 0x420   : > { %v9623_v1 = vpop.eup %9622  ;;  %v8513_v23 = vmul.f32 -1.442695, %v12166_v34  ;;  %v12179_v40 = vadd.f32 %v2113_v37, %v11915_v50  ;;  %3136 = vmatpush1.bf16.msra.mxu0 %v9091_v52 }
 0x421   : > { %v9625_v29 = vpop.eup %9624  ;;  %v2281_v55 = vadd.f32 1.0, %v9623_v1  ;;  %2407 = vadd.xlane.f32.xlu1 %v12174_v17  ;;  %v12183_v63 = vadd.f32 %v2115_v9, %v16548_v62  ;;  %v8514_v56 = vmul.f32 -1.442695, %v12171_v41  ;;  %v12191_v1 = vmul.f32 %v9621_v28, %v12101_v38 }
 0x422   : > { %v9627_v21 = vpop.eup %9626  ;;  %v2282_v54 = vadd.f32 1.0, %v9625_v29  ;;  %9630 = vpow2.f32 %v8513_v23  ;;  %v8515_v62 = vmul.f32 -1.442695, %v12179_v40  ;;  %v2448_v23 = vmul.f32 %v12174_v17, %v12174_v17 }
 0x423   : > { %v9629_v7 = vpop.eup %9628  ;;  %9632 = vrcp.f32 %v2281_v55  ;;  %v2283_v37 = vadd.f32 1.0, %v9627_v21  ;;  %2653 = vadd.xlane.f32.xlu0 %v12186_v11  ;;  %v8516_v29 = vmul.f32 -1.442695, %v12183_v63  ;;  %v2447_v55 = vmul.f32 %v12162_v46, %v12162_v46 }
 0x424   : > { %9634 = vrcp.f32 %v2282_v54  ;;  %v2284_v9 = vadd.f32 1.0, %v9629_v7  ;;  %v2695_v7 = vmul.f32 %v12186_v11, %v12186_v11  ;;  %v2696_v27 = vmul.f32 %v12191_v1, %v12191_v1 }
 0x425   : > { %9636 = vrcp.f32 %v2283_v37  ;;  %2655 = vadd.xlane.f32.xlu1 %v12191_v1 }
 0x426   : > { %9638 = vrcp.f32 %v2284_v9 }
 0x427   : > { %9640 = vpow2.f32 %v8514_v56  ;;  %2469 = vadd.xlane.f32.xlu0 %v2447_v55 }
 0x428   : > { %9642 = vpow2.f32 %v8515_v62 }
 0x429   : > { %9644 = vpow2.f32 %v8516_v29  ;;  %2471 = vadd.xlane.f32.xlu1 %v2448_v23 }
 0x42b   : > { %2717 = vadd.xlane.f32.xlu0 %v2695_v7  ;;  %v2118_v38 = vpop.f32.mrb[24].mxu1 }
 0x42c   : > { %v9631_v57 = vpop.eup %9630  ;;  %v2119_v28 = vadd.f32 %v2118_v38, %v11991_v10  ;;  %v2120_v52 = vpop.f32.mrb[25].mxu1 }
 0x42d   : > { %v9633_v51 = vpop.eup %9632  ;;  %v2285_v21 = vadd.f32 1.0, %v9631_v57  ;;  %2719 = vadd.xlane.f32.xlu1 %v2696_v27  ;;  %v2121_v54 = vadd.f32 %v2120_v52, %v11994_v8  ;;  %v2122_v62 = vpop.f32.mrb[26].mxu1 }
 0x42e   : > { %v9635_v37 = vpop.eup %9634  ;;  %v12207_v56 = vadd.f32 %v2119_v28, %v11956_v36  ;;  %v12210_v9 = vmul.f32 %v9633_v51, %v12122_v61  ;;  %v2123_v29 = vadd.f32 %v2122_v62, %v11991_v10  ;;  %v2124_v55 = vpop.f32.mrb[27].mxu1 }
 0x42f   : > { %v9637_v23 = vpop.eup %9636  ;;  %9646 = vrcp.f32 %v2285_v21  ;;  %v12214_v7 = vadd.f32 %v2121_v54, %v11950_v44  ;;  %v2125_v27 = vadd.f32 %v2124_v55, %v11994_v8  ;;  %v12231_v55 = vmul.f32 %v9635_v37, %v12130_v24 }
 0x430   : > { %v9639_v38 = vpop.eup %9638  ;;  %v8517_v57 = vmul.f32 -1.442695, %v12207_v56  ;;  %2409 = vadd.xlane.f32.xlu0 %v12210_v9  ;;  %v12220_v28 = vadd.f32 %v2123_v29, %v11947_v6  ;;  %v12223_v61 = vmul.f32 %v9637_v23, %v12134_v33  ;;  %v2449_v24 = vmul.f32 %v12210_v9, %v12210_v9 }
 0x431   : > { %v9641_v52 = vpop.eup %9640  ;;  %v8518_v51 = vmul.f32 -1.442695, %v12214_v7  ;;  %v12227_v21 = vadd.f32 %v2125_v27, %v11953_v16  ;;  %v12237_v27 = vmul.f32 %v9639_v38, %v12141_v39 }
 0x432   : > { %v9643_v54 = vpop.eup %9642  ;;  %v2286_v62 = vadd.f32 1.0, %v9641_v52  ;;  %9648 = vpow2.f32 %v8517_v57  ;;  %2411 = vadd.xlane.f32.xlu1 %v12223_v61  ;;  %v8519_v33 = vmul.f32 -1.442695, %v12220_v28  ;;  %v2697_v57 = vmul.f32 %v12231_v55, %v12231_v55 }
 0x433   : > { %v9645_v44 = vpop.eup %9644  ;;  %v2287_v29 = vadd.f32 1.0, %v9643_v54  ;;  %9650 = vpow2.f32 %v8518_v51  ;;  %v8520_v6 = vmul.f32 -1.442695, %v12227_v21  ;;  %v2698_v54 = vmul.f32 %v12237_v27, %v12237_v27 }
 0x434   : > { %9652 = vrcp.f32 %v2286_v62  ;;  %v2288_v23 = vadd.f32 1.0, %v9645_v44  ;;  %2657 = vadd.xlane.f32.xlu0 %v12231_v55  ;;  %v2450_v44 = vmul.f32 %v12223_v61, %v12223_v61 }
 0x435   : > { %9654 = vrcp.f32 %v2287_v29 }
 0x436   : > { %9656 = vrcp.f32 %v2288_v23  ;;  %2659 = vadd.xlane.f32.xlu1 %v12237_v27 }
 0x437   : > { %9658 = vpow2.f32 %v8519_v33 }
 0x438   : > { %9660 = vpow2.f32 %v8520_v6  ;;  %2473 = vadd.xlane.f32.xlu0 %v2449_v24 }
 0x439   : > { %v9647_v37 = vpop.eup %9646 }
 0x43a   : > { %2475 = vadd.xlane.f32.xlu1 %v2450_v44  ;;  %v2128_v39 = vpop.f32.mrb[28].mxu1  ;;  %v12251_v62 = vmul.f32 %v9647_v37, %v12166_v34 }
 0x43b   : > { %v2129_v38 = vadd.f32 %v2128_v39, %v11991_v10  ;;  %v2130_v52 = vpop.f32.mrb[29].mxu1 }
 0x43c   : > { %v9649_v51 = vpop.eup %9648  ;;  %2721 = vadd.xlane.f32.xlu0 %v2697_v57  ;;  %v2131_v6 = vadd.f32 %v2130_v52, %v11994_v8  ;;  %v2132_v29 = vpop.f32.mrb[30].mxu1 }
 0x43d   : > { %v9651_v33 = vpop.eup %9650  ;;  %v2289_v23 = vadd.f32 1.0, %v9649_v51  ;;  %v12254_v24 = vadd.f32 %v2129_v38, %v11980_v59  ;;  %v2133_v44 = vadd.f32 %v2132_v29, %v11991_v10  ;;  %v2134_v39 = vpop.f32.mrb[31].mxu1 }
 0x43e   : > { %v9653_v16 = vpop.eup %9652  ;;  %2723 = vadd.xlane.f32.xlu1 %v2698_v54  ;;  %v12258_v57 = vadd.f32 %v2131_v6, %v11970_v49  ;;  %v2135_v36 = vadd.f32 %v2134_v39, %v11994_v8  ;;  %v2290_v8 = vadd.f32 1.0, %v9651_v33  ;;  %v2451_v33 = vmul.f32 %v12251_v62, %v12251_v62 }
 0x43f   : > { %v9655_v52 = vpop.eup %9654  ;;  %9662 = vrcp.f32 %v2289_v23  ;;  %v8521_v34 = vmul.f32 -1.442695, %v12254_v24  ;;  %v12263_v37 = vadd.f32 %v2133_v44, %v11983_v53  ;;  %v12277_v53 = vmul.f32 %v9653_v16, %v12171_v41 }
 0x440   : > { %v9657_v51 = vpop.eup %9656  ;;  %v8522_v38 = vmul.f32 -1.442695, %v12258_v57  ;;  %2413 = vadd.xlane.f32.xlu0 %v12251_v62  ;;  %v12268_v10 = vadd.f32 %v2135_v36, %v11973_v25  ;;  %v12271_v54 = vmul.f32 %v9655_v52, %v12179_v40 }
 0x441   : > { %v9659_v6 = vpop.eup %9658  ;;  %9664 = vpow2.f32 %v8521_v34  ;;  %v8523_v29 = vmul.f32 -1.442695, %v12263_v37  ;;  %v12281_v40 = vmul.f32 %v9657_v51, %v12183_v63  ;;  %v2699_v52 = vmul.f32 %v12277_v53, %v12277_v53 }
 0x442   : > { %v9661_v23 = vpop.eup %9660  ;;  %v2291_v39 = vadd.f32 1.0, %v9659_v6  ;;  %9666 = vpow2.f32 %v8522_v38  ;;  %v8524_v44 = vmul.f32 -1.442695, %v12268_v10  ;;  %2415 = vadd.xlane.f32.xlu1 %v12271_v54  ;;  %v2452_v16 = vmul.f32 %v12271_v54, %v12271_v54 }
 0x443   : > { %v2292_v36 = vadd.f32 1.0, %v9661_v23  ;;  %9668 = vpow2.f32 %v8523_v29  ;;  %v2700_v38 = vmul.f32 %v12281_v40, %v12281_v40 }
 0x444   : > { %9670 = vrcp.f32 %v2291_v39  ;;  %2661 = vadd.xlane.f32.xlu0 %v12277_v53 }
 0x445   : > { %9672 = vrcp.f32 %v2290_v8 }
 0x446   : > { %9674 = vpow2.f32 %v8524_v44  ;;  %2663 = vadd.xlane.f32.xlu1 %v12281_v40 }
 0x447   : > { %9676 = vrcp.f32 %v2292_v36 }
 0x448   : > { %2477 = vadd.xlane.f32.xlu0 %v2451_v33 }
 0x449   : > { %v9663_v41 = vpop.eup %9662 }
 0x44a   : > { %2479 = vadd.xlane.f32.xlu1 %v2452_v16  ;;  %v12293_v6 = vmul.f32 %v9663_v41, %v12207_v56 }
 0x44b   : > { %v9665_v34 = vpop.eup %9664 }
 0x44c   : > { %v9667_v63 = vpop.eup %9666  ;;  %v2293_v51 = vadd.f32 1.0, %v9665_v34  ;;  %2725 = vadd.xlane.f32.xlu0 %v2699_v52 }
 0x44d   : > { %v9669_v8 = vpop.eup %9668  ;;  %v2294_v16 = vadd.f32 1.0, %v9667_v63 }
 0x44e   : > { %v9671_v29 = vpop.eup %9670  ;;  %v2295_v23 = vadd.f32 1.0, %v9669_v8  ;;  %2727 = vadd.xlane.f32.xlu1 %v2700_v38  ;;  %9678 = vrcp.f32 %v2293_v51 }
 0x44f   : > { %v9673_v39 = vpop.eup %9672  ;;  %v12296_v44 = vmul.f32 %v9671_v29, %v12220_v28  ;;  %v2453_v28 = vmul.f32 %v12293_v6, %v12293_v6 }
 0x450   : > { %v9675_v36 = vpop.eup %9674  ;;  %2417 = vadd.xlane.f32.xlu0 %v12293_v6  ;;  %9680 = vrcp.f32 %v2295_v23  ;;  %v12301_v56 = vmul.f32 %v9673_v39, %v12214_v7 }
 0x451   : > { %v9677_v33 = vpop.eup %9676  ;;  %v2296_v41 = vadd.f32 1.0, %v9675_v36  ;;  %9682 = vrcp.f32 %v2294_v16  ;;  %v2454_v34 = vmul.f32 %v12296_v44, %v12296_v44 }
 0x452   : > { %2419 = vadd.xlane.f32.xlu1 %v12296_v44  ;;  %v12305_v52 = vmul.f32 %v9677_v33, %v12227_v21  ;;  %v2701_v7 = vmul.f32 %v12301_v56, %v12301_v56 }
 0x453   : > { %9684 = vrcp.f32 %v2296_v41 }
 0x454   : > { %2665 = vadd.xlane.f32.xlu0 %v12301_v56  ;;  %v2702_v21 = vmul.f32 %v12305_v52, %v12305_v52 }
 0x456   : > { %2667 = vadd.xlane.f32.xlu1 %v12305_v52 }
 0x458   : > { %2481 = vadd.xlane.f32.xlu0 %v2453_v28  ;;  %v9679_v63 = vpop.eup %9678 }
 0x459   : > { %v12317_v38 = vmul.f32 %v9679_v63, %v12254_v24 }
 0x45a   : > { %2483 = vadd.xlane.f32.xlu1 %v2454_v34  ;;  %v9681_v51 = vpop.eup %9680 }
 0x45b   : > { %v12320_v8 = vmul.f32 %v9681_v51, %v12263_v37  ;;  %v9683_v29 = vpop.eup %9682  ;;  %v2455_v33 = vmul.f32 %v12317_v38, %v12317_v38 }
 0x45c   : > { %2729 = vadd.xlane.f32.xlu0 %v2701_v7  ;;  %v12325_v39 = vmul.f32 %v9683_v29, %v12258_v57 }
 0x45d   : > { %v9685_v23 = vpop.eup %9684  ;;  %v2456_v57 = vmul.f32 %v12320_v8, %v12320_v8 }
 0x45e   : > { %2731 = vadd.xlane.f32.xlu1 %v2702_v21  ;;  %v12329_v36 = vmul.f32 %v9685_v23, %v12268_v10  ;;  %v2703_v24 = vmul.f32 %v12325_v39, %v12325_v39 }
 0x460   : > { %2421 = vadd.xlane.f32.xlu0 %v12317_v38  ;;  %v2704_v37 = vmul.f32 %v12329_v36, %v12329_v36 }
 0x462   : > { %2423 = vadd.xlane.f32.xlu1 %v12320_v8 }
 0x464   : > { %2669 = vadd.xlane.f32.xlu0 %v12325_v39 }
 0x466   : > { %2671 = vadd.xlane.f32.xlu1 %v12329_v36 }
 0x468   : > { %2733 = vadd.xlane.f32.xlu0 %v2703_v24 }
 0x46a   : > { %2735 = vadd.xlane.f32.xlu1 %v2704_v37 }
 0x46c   : > { %2485 = vadd.xlane.f32.xlu0 %v2455_v33 }
 0x46e   : > { %2487 = vadd.xlane.f32.xlu1 %v2456_v57 }
 0x479   : > { %v2394_v10 = vpop.xlane.xlu0 %2393 }
 0x47a   : > { %v2425_v28 = vmul.f32 0.0078125, %v2394_v10 }
 0x47b   : > { %v2396_v16 = vpop.xlane.xlu1 %2395 }
 0x47c   : > { %v2426_v63 = vmul.f32 0.0078125, %v2396_v16  ;;  %v2505_v51 = vmul.f32 %v2425_v28, %v2425_v28 }
 0x47d   : > { %v2642_v41 = vpop.xlane.xlu0 %2641 }
 0x47e   : > { %v2673_v21 = vmul.f32 0.0078125, %v2642_v41  ;;  %v2506_v24 = vmul.f32 %v2426_v63, %v2426_v63 }
 0x47f   : > { %v2644_v34 = vpop.xlane.xlu1 %2643 }
 0x480   : > { %v12340_v37 = vmul.f32 0.0078125, %v2644_v34  ;;  %v2753_v59 = vmul.f32 %v2673_v21, %v2673_v21 }
 0x481   : > { %v2458_v7 = vpop.xlane.xlu0 %2457 }
 0x482   : > { %v2489_v29 = vmul.f32 0.0078125, %v2458_v7  ;;  %v2754_v10 = vmul.f32 %v12340_v37, %v12340_v37 }
 0x483   : > { %v2460_v23 = vpop.xlane.xlu1 %2459 }
 0x484   : > { %v2521_v25 = vsub.f32 %v2489_v29, %v2505_v51  ;;  %v2490_v33 = vmul.f32 0.0078125, %v2460_v23 }
 0x485   : > { %v2706_v49 = vpop.xlane.xlu0 %2705 }
 0x486   : > { %v2553_v50 = vadd.f32 0.1, %v2521_v25  ;;  %v2522_v57 = vsub.f32 %v2490_v33, %v2506_v24  ;;  %v2737_v31 = vmul.f32 0.0078125, %v2706_v49 }
 0x487   : > { %v2708_v13 = vpop.xlane.xlu1 %2707 }
 0x488   : > { %v2554_v16 = vadd.f32 0.1, %v2522_v57  ;;  %v2769_v22 = vsub.f32 %v2737_v31, %v2753_v59  ;;  %v2738_v12 = vmul.f32 0.0078125, %v2708_v13  ;;  %9686 = vrsqrt.f32 %v2553_v50 }
 0x489   : > { %v12351_v13 = vsub.s32 6, %v11291_v47 }
 0x48a   : > { %9688 = vrsqrt.f32 %v2554_v16  ;;  %v2801_v41 = vadd.f32 0.1, %v2769_v22  ;;  %v2770_v7 = vsub.f32 %v2738_v12, %v2754_v10  ;;  %v2398_v34 = vpop.xlane.xlu0 %2397  ;;  %v2538_v22 = vsub.f32 %v12034_v2, %v2426_v63 }
 0x48b   : > { %v12344_v25 = vmul.f32 0.0078125, %v2398_v34  ;;  %16549 = vst [vmem:[#allocation83_spill] sm:$0xff] %v12351_v13  ;;  %v2537_v10 = vsub.f32 %v12030_v26, %v2425_v28  ;;  %v2785_v16 = vsub.f32 %v12043_v20, %v2673_v21  ;;  %v12361_v34 = vsub.s32 3, %v11291_v47  ;;  %v12367_v28 = vld [vmem:[#allocation10 + $0x8] sm:$0xff]  ;;  %v12373_v21 = vld [vmem:[#allocation10] sm:$0xff] }
 0x48c   : > { %9690 = vrsqrt.f32 %v2801_v41  ;;  %v2802_v51 = vadd.f32 0.1, %v2770_v7  ;;  %v2400_v29 = vpop.xlane.xlu1 %2399  ;;  %v12371_v20 = vrot.slane %v12367_v28, %v12351_v13 }
 0x48d   : > { %v12346_v24 = vmul.f32 0.0078125, %v2400_v29  ;;  %v2507_v12 = vmul.f32 %v12344_v25, %v12344_v25  ;;  %16550 = vst [vmem:[#allocation84_spill] sm:$0xff] %v12361_v34  ;;  %v12384_v19 = vrot.slane %v10586_v5, %v12361_v34 }
 0x48e   : > { %9692 = vrsqrt.f32 %v2802_v51  ;;  %v2646_v23 = vpop.xlane.xlu0 %2645 }
 0x48f   : > { %v12348_v33 = vmul.f32 0.0078125, %v2646_v23  ;;  %v2508_v29 = vmul.f32 %v12346_v24, %v12346_v24 }
 0x490   : > { %v2648_v49 = vpop.xlane.xlu1 %2647 }
 0x491   : > { %v12358_v41 = vmul.f32 0.0078125, %v2648_v49  ;;  %v12377_v49 = vrot.slane %v12373_v21, %v12351_v13 }
 0x492   : > { %v2462_v57 = vpop.xlane.xlu0 %2461  ;;  %v9687_v31 = vpop.eup %9686 }
 0x493   : > { %v2491_v50 = vmul.f32 0.0078125, %v2462_v57  ;;  %v2585_v0 = vmul.f32 %v9687_v31, %v2537_v10  ;;  %v2755_v57 = vmul.f32 %v12348_v33, %v12348_v33  ;;  %v2786_v10 = vsub.f32 %v12050_v42, %v12340_v37 }
 0x494   : > { %v9689_v59 = vpop.eup %9688  ;;  %v2464_v7 = vpop.xlane.xlu1 %2463 }
 0x495   : > { %v2586_v51 = vmul.f32 %v9689_v59, %v2538_v22  ;;  %v2523_v2 = vsub.f32 %v2491_v50, %v2507_v12  ;;  %v2492_v63 = vmul.f32 0.0078125, %v2464_v7  ;;  %v2756_v7 = vmul.f32 %v12358_v41, %v12358_v41 }
 0x496   : > { %v9691_v23 = vpop.eup %9690  ;;  %v2710_v26 = vpop.xlane.xlu0 %2709  ;;  %v2605_v5 = vmul.f32 %v12377_v49, %v2585_v0 }
 0x497   : > { %v2555_v22 = vadd.f32 0.1, %v2523_v2  ;;  %v2524_v12 = vsub.f32 %v2492_v63, %v2508_v29  ;;  %v2739_v50 = vmul.f32 0.0078125, %v2710_v26  ;;  %v2833_v31 = vmul.f32 %v9691_v23, %v2785_v16  ;;  %v10587_v63 = vld [vmem:[#allocation10 + $0x18] sm:$0x7f] }
 0x498   : > { %v9693_v59 = vpop.eup %9692  ;;  %v2712_v47 = vpop.xlane.xlu1 %2711  ;;  %v2606_v2 = vmul.f32 %v12377_v49, %v2586_v51  ;;  %v12389_v42 = vrot.slane %v10587_v63, %v12361_v34 }
 0x499   : > { %v2556_v48 = vadd.f32 0.1, %v2524_v12  ;;  %v2771_v4 = vsub.f32 %v2739_v50, %v2755_v57  ;;  %v2740_v13 = vmul.f32 0.0078125, %v2712_v47  ;;  %9694 = vrsqrt.f32 %v2555_v22 }
 0x49a   : > { %v2834_v29 = vmul.f32 %v9693_v59, %v2786_v10  ;;  %v2853_v16 = vmul.f32 %v12371_v20, %v2833_v31  ;;  %v12394_v51 = vadd.f32 %v12384_v19, %v2606_v2 }
 0x49b   : > { %9696 = vrsqrt.f32 %v2556_v48  ;;  %v2803_v37 = vadd.f32 0.1, %v2771_v4  ;;  %v2772_v23 = vsub.f32 %v2740_v13, %v2756_v7  ;;  %v2402_v26 = vpop.xlane.xlu0 %2401  ;;  %v12403_v48 = vadd.f32 %v12384_v19, %v2605_v5 }
 0x49c   : > { %v2854_v12 = vmul.f32 %v12371_v20, %v2834_v29  ;;  %16551 = vst [vmem:[#allocation85_spill] sm:$0xff] %v12394_v51  ;;  %v12397_v22 = vadd.f32 %v12389_v42, %v2853_v16  ;;  %v12405_v0 = vmul.f32 0.0078125, %v2402_v26  ;;  %v2540_v16 = vsub.f32 %v12079_v45, %v12346_v24 }
 0x49d   : > { %9698 = vrsqrt.f32 %v2803_v37  ;;  %v2804_v47 = vadd.f32 0.1, %v2772_v23  ;;  %v2404_v57 = vpop.xlane.xlu1 %2403  ;;  %v2921_v59 = vpack.c.bf16 %v12394_v51, %v12403_v48  ;;  %v2539_v26 = vsub.f32 %v12073_v14, %v12344_v25 }
 0x49e   : > { %v12400_v50 = vadd.f32 %v12389_v42, %v2854_v12  ;;  %v12411_v10 = vmul.f32 0.0078125, %v2404_v57  ;;  %v2509_v63 = vmul.f32 %v12405_v0, %v12405_v0  ;;  %v2787_v5 = vsub.f32 %v12091_v15, %v12348_v33 }
 0x49f   : > { %9700 = vrsqrt.f32 %v2804_v47  ;;  %v2650_v4 = vpop.xlane.xlu0 %2649  ;;  %v2788_v33 = vsub.f32 %v12097_v35, %v12358_v41 }
 0x4a0   : > { %16552 = vst [vmem:[#allocation86_spill] sm:$0xff] %v12400_v50  ;;  %v2922_v13 = vpack.c.bf16 %v12400_v50, %v12397_v22  ;;  %v12413_v7 = vmul.f32 0.0078125, %v2650_v4  ;;  %v2510_v57 = vmul.f32 %v12411_v10, %v12411_v10 }
 0x4a1   : > { %v2652_v31 = vpop.xlane.xlu1 %2651 }
 0x4a2   : > { %3137 = vmatprep.mubr.bf16.mxu0 %v2922_v13  ;;  %v12423_v12 = vmul.f32 0.0078125, %v2652_v31 }
 0x4a3   : > { %v2466_v2 = vpop.xlane.xlu0 %2465  ;;  %3138 = vmatmul.mubr.bf16.vlgmr.msra.gmra.mrb[32].mxu0 %v2921_v59  ;;  %v9695_v29 = vpop.eup %9694  ;;  %v2757_v59 = vmul.f32 %v12413_v7, %v12413_v7 }
 0x4a4   : > { %v2493_v37 = vmul.f32 0.0078125, %v2466_v2  ;;  %v2587_v34 = vmul.f32 %v9695_v29, %v2539_v26  ;;  %v2758_v31 = vmul.f32 %v12423_v12, %v12423_v12 }
 0x4a5   : > { %v9697_v23 = vpop.eup %9696  ;;  %v2468_v47 = vpop.xlane.xlu1 %2467 }
 0x4a6   : > { %v2525_v4 = vsub.f32 %v2493_v37, %v2509_v63  ;;  %v2494_v13 = vmul.f32 0.0078125, %v2468_v47  ;;  %v2588_v45 = vmul.f32 %v9697_v23, %v2540_v16 }
 0x4a7   : > { %v9699_v24 = vpop.eup %9698  ;;  %v2714_v2 = vpop.xlane.xlu0 %2713 }
 0x4a8   : > { %v2557_v50 = vadd.f32 0.1, %v2525_v4  ;;  %v2526_v14 = vsub.f32 %v2494_v13, %v2510_v57  ;;  %v2741_v25 = vmul.f32 0.0078125, %v2714_v2  ;;  %v2835_v51 = vmul.f32 %v9699_v24, %v2787_v5 }
 0x4a9   : > { %v9701_v15 = vpop.eup %9700  ;;  %v2716_v63 = vpop.xlane.xlu1 %2715  ;;  %v2608_v47 = vmul.f32 %v12377_v49, %v2588_v45  ;;  %v2607_v4 = vmul.f32 %v12377_v49, %v2587_v34 }
 0x4aa   : > { %v2558_v37 = vadd.f32 0.1, %v2526_v14  ;;  %v2773_v16 = vsub.f32 %v2741_v25, %v2757_v59  ;;  %v2742_v23 = vmul.f32 0.0078125, %v2716_v63  ;;  %9702 = vrsqrt.f32 %v2557_v50 }
 0x4ab   : > { %v2836_v58 = vmul.f32 %v9701_v15, %v2788_v33  ;;  %v2855_v29 = vmul.f32 %v12371_v20, %v2835_v51  ;;  %v12438_v24 = vadd.f32 %v12384_v19, %v2608_v47  ;;  %v12447_v59 = vadd.f32 %v12384_v19, %v2607_v4 }
 0x4ac   : > { %9704 = vrsqrt.f32 %v2558_v37  ;;  %v2805_v26 = vadd.f32 0.1, %v2773_v16  ;;  %v2774_v5 = vsub.f32 %v2742_v23, %v2758_v31  ;;  %v2406_v57 = vpop.xlane.xlu0 %2405  ;;  %v2542_v63 = vsub.f32 %v12127_v60, %v12411_v10 }
 0x4ad   : > { %v2856_v35 = vmul.f32 %v12371_v20, %v2836_v58  ;;  %v12441_v45 = vadd.f32 %v12389_v42, %v2855_v29  ;;  %v12449_v34 = vmul.f32 0.0078125, %v2406_v57  ;;  %v2923_v14 = vpack.c.bf16 %v12438_v24, %v12447_v59 }
 0x4ae   : > { %9706 = vrsqrt.f32 %v2805_v26  ;;  %v2806_v41 = vadd.f32 0.1, %v2774_v5  ;;  %v2408_v13 = vpop.xlane.xlu1 %2407  ;;  %v2541_v47 = vsub.f32 %v12118_v43, %v12405_v0  ;;  %v2789_v29 = vsub.f32 %v12138_v32, %v12413_v7 }
 0x4af   : > { %v12444_v50 = vadd.f32 %v12389_v42, %v2856_v35  ;;  %v12455_v25 = vmul.f32 0.0078125, %v2408_v13  ;;  %v2511_v37 = vmul.f32 %v12449_v34, %v12449_v34  ;;  %v2790_v7 = vsub.f32 %v12146_v18, %v12423_v12 }
 0x4b0   : > { %9708 = vrsqrt.f32 %v2806_v41  ;;  %v2654_v51 = vpop.xlane.xlu0 %2653 }
 0x4b1   : > { %v2924_v58 = vpack.c.bf16 %v12444_v50, %v12441_v45  ;;  %v12457_v15 = vmul.f32 0.0078125, %v2654_v51  ;;  %v2512_v57 = vmul.f32 %v12455_v25, %v12455_v25 }
 0x4b2   : > { %v2656_v2 = vpop.xlane.xlu1 %2655 }
 0x4b3   : > { %3147 = vmatprep.mubr.bf16.mxu0 %v2924_v58  ;;  %v12467_v26 = vmul.f32 0.0078125, %v2656_v2  ;;  %v2759_v41 = vmul.f32 %v12457_v15, %v12457_v15 }
 0x4b4   : > { %v2470_v33 = vpop.xlane.xlu0 %2469  ;;  %3148 = vmatmul.mubr.bf16.gmra.mrb[36].mxu0 %v2923_v14  ;;  %v9703_v31 = vpop.eup %9702 }
 0x4b5   : > { %v2495_v16 = vmul.f32 0.0078125, %v2470_v33  ;;  %v2589_v51 = vmul.f32 %v9703_v31, %v2541_v47  ;;  %v2760_v2 = vmul.f32 %v12467_v26, %v12467_v26 }
 0x4b6   : > { %v9705_v23 = vpop.eup %9704  ;;  %v2472_v5 = vpop.xlane.xlu1 %2471 }
 0x4b7   : > { %v2527_v4 = vsub.f32 %v2495_v16, %v2511_v37  ;;  %v2496_v35 = vmul.f32 0.0078125, %v2472_v5  ;;  %v2590_v60 = vmul.f32 %v9705_v23, %v2542_v63 }
 0x4b8   : > { %v9707_v10 = vpop.eup %9706  ;;  %v2718_v13 = vpop.xlane.xlu0 %2717 }
 0x4b9   : > { %v2559_v58 = vadd.f32 0.1, %v2527_v4  ;;  %v2528_v43 = vsub.f32 %v2496_v35, %v2512_v57  ;;  %v2743_v0 = vmul.f32 0.0078125, %v2718_v13  ;;  %v2837_v14 = vmul.f32 %v9707_v10, %v2789_v29 }
 0x4ba   : > { %v9709_v32 = vpop.eup %9708  ;;  %v2720_v33 = vpop.xlane.xlu1 %2719  ;;  %v2610_v23 = vmul.f32 %v12377_v49, %v2590_v60  ;;  %v2609_v4 = vmul.f32 %v12377_v49, %v2589_v51 }
 0x4bb   : > { %v2560_v37 = vadd.f32 0.1, %v2528_v43  ;;  %v2775_v63 = vsub.f32 %v2743_v0, %v2759_v41  ;;  %v2744_v16 = vmul.f32 0.0078125, %v2720_v33  ;;  %9710 = vrsqrt.f32 %v2559_v58 }
 0x4bc   : > { %v2838_v5 = vmul.f32 %v9709_v32, %v2790_v7  ;;  %v2857_v31 = vmul.f32 %v12371_v20, %v2837_v14  ;;  %v12482_v10 = vadd.f32 %v12384_v19, %v2610_v23  ;;  %v12491_v58 = vadd.f32 %v12384_v19, %v2609_v4 }
 0x4bd   : > { %9712 = vrsqrt.f32 %v2560_v37  ;;  %v2807_v47 = vadd.f32 0.1, %v2775_v63  ;;  %v2776_v29 = vsub.f32 %v2744_v16, %v2760_v2  ;;  %v2410_v57 = vpop.xlane.xlu0 %2409  ;;  %v2544_v37 = vsub.f32 %v12174_v17, %v12455_v25 }
 0x4be   : > { %v2858_v18 = vmul.f32 %v12371_v20, %v2838_v5  ;;  %v12485_v60 = vadd.f32 %v12389_v42, %v2857_v31  ;;  %v12493_v51 = vmul.f32 0.0078125, %v2410_v57  ;;  %v2925_v14 = vpack.c.bf16 %v12482_v10, %v12491_v58 }
 0x4bf   : > { %9714 = vrsqrt.f32 %v2807_v47  ;;  %v2808_v12 = vadd.f32 0.1, %v2776_v29  ;;  %v2412_v35 = vpop.xlane.xlu1 %2411  ;;  %v2543_v5 = vsub.f32 %v12162_v46, %v12449_v34  ;;  %v2791_v31 = vsub.f32 %v12186_v11, %v12457_v15 }
 0x4c0   : > { %v12488_v41 = vadd.f32 %v12389_v42, %v2858_v18  ;;  %v12499_v32 = vmul.f32 0.0078125, %v2412_v35  ;;  %v2513_v63 = vmul.f32 %v12493_v51, %v12493_v51  ;;  %v2792_v15 = vsub.f32 %v12191_v1, %v12467_v26 }
 0x4c1   : > { %9716 = vrsqrt.f32 %v2808_v12  ;;  %v2658_v13 = vpop.xlane.xlu0 %2657 }
 0x4c2   : > { %v2926_v43 = vpack.c.bf16 %v12488_v41, %v12485_v60  ;;  %v12501_v7 = vmul.f32 0.0078125, %v2658_v13  ;;  %v2514_v57 = vmul.f32 %v12499_v32, %v12499_v32 }
 0x4c3   : > { %v2660_v0 = vpop.xlane.xlu1 %2659 }
 0x4c4   : > { %3157 = vmatprep.mubr.bf16.mxu0 %v2926_v43  ;;  %v12511_v47 = vmul.f32 0.0078125, %v2660_v0  ;;  %v2761_v12 = vmul.f32 %v12501_v7, %v12501_v7 }
 0x4c5   : > { %v2474_v2 = vpop.xlane.xlu0 %2473  ;;  %3158 = vmatmul.mubr.bf16.gmra.mrb[40].mxu0 %v2925_v14  ;;  %v9711_v33 = vpop.eup %9710 }
 0x4c6   : > { %v2497_v16 = vmul.f32 0.0078125, %v2474_v2  ;;  %v2591_v13 = vmul.f32 %v9711_v33, %v2543_v5  ;;  %v2762_v0 = vmul.f32 %v12511_v47, %v12511_v47 }
 0x4c7   : > { %v9713_v23 = vpop.eup %9712  ;;  %v2476_v29 = vpop.xlane.xlu1 %2475 }
 0x4c8   : > { %v2529_v4 = vsub.f32 %v2497_v16, %v2513_v63  ;;  %v2498_v18 = vmul.f32 0.0078125, %v2476_v29  ;;  %v2592_v17 = vmul.f32 %v9713_v23, %v2544_v37 }
 0x4c9   : > { %v9715_v25 = vpop.eup %9714  ;;  %v2722_v35 = vpop.xlane.xlu0 %2721 }
 0x4ca   : > { %v2561_v43 = vadd.f32 0.1, %v2529_v4  ;;  %v2530_v46 = vsub.f32 %v2498_v18, %v2514_v57  ;;  %v2745_v34 = vmul.f32 0.0078125, %v2722_v35  ;;  %v2839_v14 = vmul.f32 %v9715_v25, %v2791_v31 }
 0x4cb   : > { %v9717_v11 = vpop.eup %9716  ;;  %v2724_v2 = vpop.xlane.xlu1 %2723  ;;  %v2612_v23 = vmul.f32 %v12377_v49, %v2592_v17  ;;  %v2611_v4 = vmul.f32 %v12377_v49, %v2591_v13 }
 0x4cc   : > { %v2562_v63 = vadd.f32 0.1, %v2530_v46  ;;  %v2777_v37 = vsub.f32 %v2745_v34, %v2761_v12  ;;  %v2746_v16 = vmul.f32 0.0078125, %v2724_v2  ;;  %9718 = vrsqrt.f32 %v2561_v43 }
 0x4cd   : > { %v2414_v29 = vpop.xlane.xlu0 %2413  ;;  %v2840_v33 = vmul.f32 %v9717_v11, %v2792_v15  ;;  %v2859_v5 = vmul.f32 %v12371_v20, %v2839_v14  ;;  %v12526_v25 = vadd.f32 %v12384_v19, %v2612_v23  ;;  %v12537_v13 = vadd.f32 %v12384_v19, %v2611_v4 }
 0x4ce   : > { %9720 = vrsqrt.f32 %v2562_v63  ;;  %v2809_v31 = vadd.f32 0.1, %v2777_v37  ;;  %v2778_v57 = vsub.f32 %v2746_v16, %v2762_v0  ;;  %v12534_v43 = vmul.f32 0.0078125, %v2414_v29 }
 0x4cf   : > { %v2416_v1 = vpop.xlane.xlu1 %2415  ;;  %v2860_v26 = vmul.f32 %v12371_v20, %v2840_v33  ;;  %v12529_v17 = vadd.f32 %v12389_v42, %v2859_v5  ;;  %v2927_v11 = vpack.c.bf16 %v12526_v25, %v12537_v13  ;;  %v2546_v16 = vsub.f32 %v12223_v61, %v12499_v32 }
 0x4d0   : > { %9722 = vrsqrt.f32 %v2809_v31  ;;  %v2810_v18 = vadd.f32 0.1, %v2778_v57  ;;  %v12541_v14 = vmul.f32 0.0078125, %v2416_v1  ;;  %v2515_v2 = vmul.f32 %v12534_v43, %v12534_v43 }
 0x4d1   : > { %v2662_v12 = vpop.xlane.xlu0 %2661  ;;  %v12532_v35 = vadd.f32 %v12389_v42, %v2860_v26  ;;  %v2545_v5 = vsub.f32 %v12210_v9, %v12493_v51  ;;  %v2793_v1 = vsub.f32 %v12231_v55, %v12501_v7  ;;  %v2794_v9 = vsub.f32 %v12237_v27, %v12511_v47 }
 0x4d2   : > { %9724 = vrsqrt.f32 %v2810_v18  ;;  %v12545_v15 = vmul.f32 0.0078125, %v2662_v12  ;;  %v2516_v31 = vmul.f32 %v12541_v14, %v12541_v14 }
 0x4d3   : > { %16553 = vst [vmem:[#allocation87_spill] sm:$0xff] %v12532_v35  ;;  %v2664_v46 = vpop.xlane.xlu1 %2663  ;;  %v2928_v34 = vpack.c.bf16 %v12532_v35, %v12529_v17 }
 0x4d4   : > { %v12551_v23 = vmul.f32 0.0078125, %v2664_v46  ;;  %v2763_v26 = vmul.f32 %v12545_v15, %v12545_v15 }
 0x4d5   : > { %3167 = vmatprep.mubr.bf16.mxu0 %v2928_v34  ;;  %v2478_v0 = vpop.xlane.xlu0 %2477 }
 0x4d6   : > { %v2499_v63 = vmul.f32 0.0078125, %v2478_v0  ;;  %3168 = vmatmul.mubr.bf16.gmra.mrb[44].mxu0 %v2927_v11  ;;  %v9719_v37 = vpop.eup %9718  ;;  %v2764_v51 = vmul.f32 %v12551_v23, %v12551_v23 }
 0x4d7   : > { %v2480_v29 = vpop.xlane.xlu1 %2479  ;;  %v2593_v11 = vmul.f32 %v9719_v37, %v2545_v5 }
 0x4d8   : > { %v9721_v33 = vpop.eup %9720  ;;  %v2531_v57 = vsub.f32 %v2499_v63, %v2515_v2  ;;  %v2500_v4 = vmul.f32 0.0078125, %v2480_v29 }
 0x4d9   : > { %v2726_v18 = vpop.xlane.xlu0 %2725  ;;  %v2594_v61 = vmul.f32 %v9721_v33, %v2546_v16  ;;  %v2613_v27 = vmul.f32 %v12377_v49, %v2593_v11 }
 0x4da   : > { %v9723_v32 = vpop.eup %9722  ;;  %v2563_v12 = vadd.f32 0.1, %v2531_v57  ;;  %v2532_v46 = vsub.f32 %v2500_v4, %v2516_v31  ;;  %v2747_v34 = vmul.f32 0.0078125, %v2726_v18 }
 0x4db   : > { %v2728_v0 = vpop.xlane.xlu1 %2727  ;;  %v2841_v2 = vmul.f32 %v9723_v32, %v2793_v1  ;;  %v2614_v35 = vmul.f32 %v12377_v49, %v2594_v61 }
 0x4dc   : > { %v9725_v63 = vpop.eup %9724  ;;  %v2564_v55 = vadd.f32 0.1, %v2532_v46  ;;  %v2779_v7 = vsub.f32 %v2747_v34, %v2763_v26  ;;  %v2748_v29 = vmul.f32 0.0078125, %v2728_v0  ;;  %9726 = vrsqrt.f32 %v2563_v12 }
 0x4dd   : > { %v2418_v16 = vpop.xlane.xlu0 %2417  ;;  %v2842_v33 = vmul.f32 %v9725_v63, %v2794_v9  ;;  %v2861_v31 = vmul.f32 %v12371_v20, %v2841_v2  ;;  %v12570_v1 = vadd.f32 %v12384_v19, %v2614_v35  ;;  %v12581_v12 = vadd.f32 %v12384_v19, %v2613_v27 }
 0x4de   : > { %9728 = vrsqrt.f32 %v2564_v55  ;;  %v2811_v37 = vadd.f32 0.1, %v2779_v7  ;;  %v2780_v5 = vsub.f32 %v2748_v29, %v2764_v51  ;;  %v12578_v32 = vmul.f32 0.0078125, %v2418_v16 }
 0x4df   : > { %v2420_v47 = vpop.xlane.xlu1 %2419  ;;  %v2862_v57 = vmul.f32 %v12371_v20, %v2842_v33  ;;  %v12573_v18 = vadd.f32 %v12389_v42, %v2861_v31  ;;  %v2929_v35 = vpack.c.bf16 %v12570_v1, %v12581_v12  ;;  %v2548_v55 = vsub.f32 %v12271_v54, %v12541_v14 }
 0x4e0   : > { %9730 = vrsqrt.f32 %v2811_v37  ;;  %v2812_v4 = vadd.f32 0.1, %v2780_v5  ;;  %v12585_v11 = vmul.f32 0.0078125, %v2420_v47  ;;  %v2517_v0 = vmul.f32 %v12578_v32, %v12578_v32 }
 0x4e1   : > { %v2666_v26 = vpop.xlane.xlu0 %2665  ;;  %v12576_v61 = vadd.f32 %v12389_v42, %v2862_v57  ;;  %v2547_v33 = vsub.f32 %v12251_v62, %v12534_v43  ;;  %v2795_v27 = vsub.f32 %v12277_v53, %v12545_v15  ;;  %v2796_v62 = vsub.f32 %v12281_v40, %v12551_v23 }
 0x4e2   : > { %9732 = vrsqrt.f32 %v2812_v4  ;;  %v12589_v9 = vmul.f32 0.0078125, %v2666_v26  ;;  %v2518_v31 = vmul.f32 %v12585_v11, %v12585_v11 }
 0x4e3   : > { %v2668_v46 = vpop.xlane.xlu1 %2667  ;;  %v2930_v34 = vpack.c.bf16 %v12576_v61, %v12573_v18 }
 0x4e4   : > { %v12595_v7 = vmul.f32 0.0078125, %v2668_v46  ;;  %v2765_v47 = vmul.f32 %v12589_v9, %v12589_v9 }
 0x4e5   : > { %3177 = vmatprep.mubr.bf16.mxu0 %v2930_v34  ;;  %v2482_v51 = vpop.xlane.xlu0 %2481 }
 0x4e6   : > { %v2501_v2 = vmul.f32 0.0078125, %v2482_v51  ;;  %3178 = vmatmul.mubr.bf16.gmra.mrb[48].mxu0 %v2929_v35  ;;  %v9727_v63 = vpop.eup %9726  ;;  %v2766_v43 = vmul.f32 %v12595_v7, %v12595_v7 }
 0x4e7   : > { %v2484_v29 = vpop.xlane.xlu1 %2483  ;;  %v2595_v34 = vmul.f32 %v9727_v63, %v2547_v33 }
 0x4e8   : > { %v9729_v16 = vpop.eup %9728  ;;  %v2533_v37 = vsub.f32 %v2501_v2, %v2517_v0  ;;  %v2502_v5 = vmul.f32 0.0078125, %v2484_v29 }
 0x4e9   : > { %v2730_v57 = vpop.xlane.xlu0 %2729  ;;  %v2596_v54 = vmul.f32 %v9729_v16, %v2548_v55  ;;  %v2615_v40 = vmul.f32 %v12377_v49, %v2595_v34 }
 0x4ea   : > { %v9731_v14 = vpop.eup %9730  ;;  %v2565_v4 = vadd.f32 0.1, %v2533_v37  ;;  %v2534_v26 = vsub.f32 %v2502_v5, %v2518_v31  ;;  %v2749_v46 = vmul.f32 0.0078125, %v2730_v57 }
 0x4eb   : > { %v2732_v35 = vpop.xlane.xlu1 %2731  ;;  %v2843_v51 = vmul.f32 %v9731_v14, %v2795_v27  ;;  %v2616_v29 = vmul.f32 %v12377_v49, %v2596_v54 }
 0x4ec   : > { %v9733_v0 = vpop.eup %9732  ;;  %v2566_v53 = vadd.f32 0.1, %v2534_v26  ;;  %v2781_v15 = vsub.f32 %v2749_v46, %v2765_v47  ;;  %v2750_v2 = vmul.f32 0.0078125, %v2732_v35  ;;  %9734 = vrsqrt.f32 %v2565_v4 }
 0x4ed   : > { %v2422_v55 = vpop.xlane.xlu0 %2421  ;;  %v2844_v16 = vmul.f32 %v9733_v0, %v2796_v62  ;;  %v2863_v31 = vmul.f32 %v12371_v20, %v2843_v51  ;;  %v12614_v27 = vadd.f32 %v12384_v19, %v2616_v29  ;;  %v12623_v4 = vadd.f32 %v12384_v19, %v2615_v40 }
 0x4ee   : > { %9736 = vrsqrt.f32 %v2566_v53  ;;  %v2813_v63 = vadd.f32 0.1, %v2781_v15  ;;  %v2782_v33 = vsub.f32 %v2750_v2, %v2766_v43  ;;  %v12629_v43 = vmul.f32 0.0078125, %v2422_v55 }
 0x4ef   : > { %v2424_v23 = vpop.xlane.xlu1 %2423  ;;  %v2864_v37 = vmul.f32 %v12371_v20, %v2844_v16  ;;  %v12617_v57 = vadd.f32 %v12389_v42, %v2863_v31  ;;  %v2931_v62 = vpack.c.bf16 %v12614_v27, %v12623_v4  ;;  %v2550_v15 = vsub.f32 %v12296_v44, %v12585_v11 }
 0x4f0   : > { %9738 = vrsqrt.f32 %v2813_v63  ;;  %v2814_v5 = vadd.f32 0.1, %v2782_v33  ;;  %v2440_v2 = vmul.f32 0.0078125, %v2424_v23  ;;  %v2549_v31 = vsub.f32 %v12293_v6, %v12578_v32 }
 0x4f1   : > { %v2670_v47 = vpop.xlane.xlu0 %2669  ;;  %v12620_v54 = vadd.f32 %v12389_v42, %v2864_v37  ;;  %v2797_v55 = vsub.f32 %v12301_v56, %v12589_v9  ;;  %v2519_v37 = vmul.f32 %v12629_v43, %v12629_v43 }
 0x4f2   : > { %9740 = vrsqrt.f32 %v2814_v5  ;;  %v2687_v14 = vmul.f32 0.0078125, %v2670_v47  ;;  %v2520_v6 = vmul.f32 %v2440_v2, %v2440_v2 }
 0x4f3   : > { %16554 = vst [vmem:[#allocation88_spill] sm:$0xff] %v12620_v54  ;;  %v2672_v26 = vpop.xlane.xlu1 %2671  ;;  %v2932_v46 = vpack.c.bf16 %v12620_v54, %v12617_v57 }
 0x4f4   : > { %v2688_v34 = vmul.f32 0.0078125, %v2672_v26  ;;  %v2767_v51 = vmul.f32 %v2687_v14, %v2687_v14 }
 0x4f5   : > { %3187 = vmatprep.mubr.bf16.mxu0 %v2932_v46  ;;  %v2734_v35 = vpop.xlane.xlu0 %2733 }
 0x4f6   : > { %v2751_v0 = vmul.f32 0.0078125, %v2734_v35  ;;  %3188 = vmatmul.mubr.bf16.gmra.mrb[52].mxu0 %v2931_v62  ;;  %v9735_v53 = vpop.eup %9734  ;;  %v2768_v63 = vmul.f32 %v2688_v34, %v2688_v34  ;;  %v2798_v62 = vsub.f32 %v12305_v52, %v12595_v7 }
 0x4f7   : > { %v2736_v29 = vpop.xlane.xlu1 %2735  ;;  %v2597_v23 = vmul.f32 %v9735_v53, %v2549_v31 }
 0x4f8   : > { %v9737_v16 = vpop.eup %9736  ;;  %v2783_v33 = vsub.f32 %v2751_v0, %v2767_v51  ;;  %v2752_v40 = vmul.f32 0.0078125, %v2736_v29 }
 0x4f9   : > { %v2486_v5 = vpop.xlane.xlu0 %2485  ;;  %v2598_v47 = vmul.f32 %v9737_v16, %v2550_v15  ;;  %v2617_v53 = vmul.f32 %v12377_v49, %v2597_v23 }
 0x4fa   : > { %v9739_v26 = vpop.eup %9738  ;;  %v2815_v46 = vadd.f32 0.1, %v2783_v33  ;;  %v2784_v44 = vsub.f32 %v2752_v40, %v2768_v63  ;;  %v2503_v11 = vmul.f32 0.0078125, %v2486_v5  ;;  %v2799_v5 = vsub.f32 %v12325_v39, %v2687_v14 }
 0x4fb   : > { %v2488_v32 = vpop.xlane.xlu1 %2487  ;;  %v2845_v35 = vmul.f32 %v9739_v26, %v2797_v55  ;;  %v2618_v51 = vmul.f32 %v12377_v49, %v2598_v47  ;;  %v12655_v55 = vadd.f32 %v12384_v19, %v2617_v53  ;;  %v2800_v26 = vsub.f32 %v12329_v36, %v2688_v34 }
 0x4fc   : > { %v9741_v0 = vpop.eup %9740  ;;  %9742 = vrsqrt.f32 %v2815_v46  ;;  %v2816_v56 = vadd.f32 0.1, %v2784_v44  ;;  %v2535_v9 = vsub.f32 %v2503_v11, %v2519_v37  ;;  %v2504_v29 = vmul.f32 0.0078125, %v2488_v32 }
 0x4fd   : > { %v2846_v54 = vmul.f32 %v9741_v0, %v2798_v62  ;;  %v2865_v15 = vmul.f32 %v12371_v20, %v2845_v35  ;;  %v12646_v31 = vadd.f32 %v12384_v19, %v2618_v51  ;;  %v2551_v11 = vsub.f32 %v12317_v38, %v12629_v43 }
 0x4fe   : > { %9744 = vrsqrt.f32 %v2816_v56  ;;  %v2567_v16 = vadd.f32 0.1, %v2535_v9  ;;  %v2536_v63 = vsub.f32 %v2504_v29, %v2520_v6  ;;  %v2552_v32 = vsub.f32 %v12320_v8, %v2440_v2 }
 0x4ff   : > { %v2866_v52 = vmul.f32 %v12371_v20, %v2846_v54  ;;  %v12649_v33 = vadd.f32 %v12389_v42, %v2865_v15  ;;  %v2933_v54 = vpack.c.bf16 %v12646_v31, %v12655_v55  ;;  %v12696_v29 = vadd.f32 %v12403_v48, %v11706_v3 }
 0x500   : > { %9746 = vrsqrt.f32 %v2567_v16  ;;  %v2568_v7 = vadd.f32 0.1, %v2536_v63  ;;  %v12701_v16 = vadd.f32 %v12397_v22, %v11698_v30 }
 0x501   : > { %v12652_v40 = vadd.f32 %v12389_v42, %v2866_v52  ;;  %v16556_v52 = vld [vmem:[#allocation52_spill] sm:$0xff] }
 0x502   : > { %9748 = vrsqrt.f32 %v2568_v7 }
 0x503   : > { %v2934_v37 = vpack.c.bf16 %v12652_v40, %v12649_v33 }
 0x505   : > { %3197 = vmatprep.mubr.bf16.mxu0 %v2934_v37 }
 0x506   : > { %v9743_v47 = vpop.eup %9742  ;;  %3198 = vmatmul.mubr.bf16.gmra.mrb[56].mxu0 %v2933_v54  ;;  %v16559_v54 = vld [vmem:[#allocation53_spill] sm:$0xff] }
 0x507   : > { %v2847_v46 = vmul.f32 %v9743_v47, %v2799_v5  ;;  %v16560_v5 = vld [vmem:[#allocation86_spill] sm:$0xff] }
 0x508   : > { %v9745_v44 = vpop.eup %9744  ;;  %v12715_v47 = vadd.f32 %v16560_v5, %v16559_v54 }
 0x509   : > { %v2848_v23 = vmul.f32 %v9745_v44, %v2800_v26  ;;  %v2867_v62 = vmul.f32 %v12371_v20, %v2847_v46 }
 0x50a   : > { %v9747_v6 = vpop.eup %9746 }
 0x50b   : > { %v2868_v35 = vmul.f32 %v12371_v20, %v2848_v23  ;;  %v2599_v51 = vmul.f32 %v9747_v6, %v2551_v11  ;;  %v12669_v14 = vadd.f32 %v12389_v42, %v2867_v62 }
 0x50c   : > { %v9749_v39 = vpop.eup %9748 }
 0x50d   : > { %v12672_v36 = vadd.f32 %v12389_v42, %v2868_v35  ;;  %v2600_v34 = vmul.f32 %v9749_v39, %v2552_v32  ;;  %v2619_v0 = vmul.f32 %v12377_v49, %v2599_v51  ;;  %v16555_v42 = vld [vmem:[#allocation51_spill] sm:$0xff]  ;;  %v16562_v51 = vld [vmem:[#allocation57_spill] sm:$0xff] }
 0x50e   : > { %v12688_v56 = vrot.slane %v12373_v21, %v16555_v42  ;;  %v12692_v9 = vrot.slane %v12367_v28, %v16555_v42  ;;  %v16557_v28 = vld [vmem:[#allocation85_spill] sm:$0xff]  ;;  %v12726_v39 = vadd.f32 %v12447_v59, %v16562_v51 }
 0x50f   : > { %v2936_v38 = vpack.c.bf16 %v12672_v36, %v12669_v14  ;;  %v2620_v43 = vmul.f32 %v12377_v49, %v2600_v34  ;;  %v12679_v8 = vadd.f32 %v12384_v19, %v2619_v0  ;;  %v12707_v7 = vadd.f32 %v16557_v28, %v16556_v52  ;;  %16561 = vst [vmem:[#allocation85_spill] sm:$0xff] %v12715_v47  ;;  %v16568_v52 = vld [vmem:[#allocation56_spill] sm:$0xff] }
 0x510   : > { %16563 = vst [vmem:[#allocation53_spill] sm:$0xff] %v12726_v39  ;;  %v12740_v59 = vadd.f32 %v12444_v50, %v16568_v52 }
 0x511   : > { %3207 = vmatprep.mubr.bf16.mxu0 %v2936_v38  ;;  %v12682_v20 = vadd.f32 %v12384_v19, %v2620_v43  ;;  %16558 = vst [vmem:[#allocation52_spill] sm:$0xff] %v12707_v7  ;;  %v16564_v38 = vld [vmem:[#allocation54_spill] sm:$0xff] }
 0x512   : > { %v12731_v43 = vadd.f32 %v12438_v24, %v16564_v38  ;;  %16569 = vst [vmem:[#allocation54_spill] sm:$0xff] %v12740_v59  ;;  %v9099_v38 = vld [vmem:[#allocation7 + $0x214] ss:$8 sps:$4 sm:$0xff]  }
 0x513   : > { %v2935_v2 = vpack.c.bf16 %v12682_v20, %v12679_v8 }
 0x514   : > { %16565 = vst [vmem:[#allocation86_spill] sm:$0xff] %v12731_v43 }
 0x515   : > { %3208 = vmatmul.mubr.bf16.gmra.mrb[60].mxu0 %v2935_v2 }
 0x576   : > { %v3139_v49 = vpop.f32.mrb[32].mxu0 }
 0x577   : > { %v3140_v19 = vadd.f32 %v3139_v49, %v12688_v56  ;;  %v3141_v15 = vpop.f32.mrb[33].mxu0 }
 0x578   : > { %v3142_v63 = vadd.f32 %v3141_v15, %v12692_v9  ;;  %v3143_v21 = vpop.f32.mrb[34].mxu0 }
 0x579   : > { %v3218_v53 = vadd.f32 %v3140_v19, %v12696_v29  ;;  %v3144_v37 = vadd.f32 %v3143_v21, %v12688_v56  ;;  %v3145_v3 = vpop.f32.mrb[35].mxu0  ;;  %v16566_v19 = vld [vmem:[#allocation55_spill] sm:$0xff] }
 0x57a   : > { %v12711_v48 = vadd.f32 %v3142_v63, %v12701_v16  ;;  %v3146_v30 = vadd.f32 %v3145_v3, %v12692_v9  ;;  %v12735_v15 = vadd.f32 %v12441_v45, %v16566_v19 }
 0x57b   : > { %v8557_v22 = vmul.f32 -1.442695, %v3218_v53  ;;  %v3220_v26 = vadd.f32 %v3144_v37, %v12707_v7 }
 0x57c   : > { %v8558_v46 = vmul.f32 -1.442695, %v12711_v48  ;;  %v12721_v44 = vadd.f32 %v3146_v30, %v12715_v47  ;;  %16567 = vst [vmem:[#allocation57_spill] sm:$0xff] %v12735_v15 }
 0x57d   : > { %9750 = vpow2.f32 %v8557_v22  ;;  %v8559_v11 = vmul.f32 -1.442695, %v3220_v26 }
 0x57e   : > { %9752 = vpow2.f32 %v8558_v46  ;;  %v8560_v23 = vmul.f32 -1.442695, %v12721_v44 }
 0x57f   : > { %9754 = vpow2.f32 %v8559_v11 }
 0x580   : > { %9756 = vpow2.f32 %v8560_v23 }
 0x587   : > { %v9751_v62 = vpop.eup %9750  ;;  %v3149_v6 = vpop.f32.mrb[36].mxu0 }
 0x588   : > { %v9753_v32 = vpop.eup %9752  ;;  %v3346_v35 = vadd.f32 1.0, %v9751_v62  ;;  %v3150_v34 = vadd.f32 %v3149_v6, %v12688_v56  ;;  %v3151_v0 = vpop.f32.mrb[37].mxu0  ;;  %v9094_v6 = vld [vmem:[#allocation7 + $0x200] ss:$8 sps:$4 sm:$0xff]  }
 0x589   : > { %v9755_v2 = vpop.eup %9754  ;;  %v3347_v49 = vadd.f32 1.0, %v9753_v32  ;;  %v3152_v63 = vadd.f32 %v3151_v0, %v12692_v9  ;;  %v3153_v21 = vpop.f32.mrb[38].mxu0  ;;  %v9096_v32 = vld [vmem:[#allocation7 + $0x204] ss:$8 sps:$4 sm:$0xff]   ;;  %v9097_v0 = vld [vmem:[#allocation7 + $0x210] ss:$8 sps:$4 sm:$0xff]  }
 0x58a   : > { %v9757_v28 = vpop.eup %9756  ;;  %9758 = vrcp.f32 %v3346_v35  ;;  %v3348_v37 = vadd.f32 1.0, %v9755_v2  ;;  %v12743_v3 = vadd.f32 %v3150_v34, %v12726_v39  ;;  %v3154_v24 = vadd.f32 %v3153_v21, %v12688_v56  ;;  %v3155_v54 = vpop.f32.mrb[39].mxu0  ;;  %4186 = vmatprep.subr.bf16.mxu1 %v9096_v32  ;;  %v16570_v21 = vld [vmem:[#allocation61_spill] sm:$0xff] }
 0x58b   : > { %9760 = vrcp.f32 %v3347_v49  ;;  %v3349_v5 = vadd.f32 1.0, %v9757_v28  ;;  %v12747_v45 = vadd.f32 %v3152_v63, %v12735_v15  ;;  %v3156_v30 = vadd.f32 %v3155_v54, %v12692_v9  ;;  %4187 = vmatpush1.bf16.msra.mxu1 %v9094_v6  ;;  %v10590_v15 = vld [vmem:[#allocation10 + $0x10] sm:$0x7f] }
 0x58c   : > { %9762 = vrcp.f32 %v3348_v37  ;;  %v8561_v50 = vmul.f32 -1.442695, %v12743_v3  ;;  %v12752_v22 = vadd.f32 %v3154_v24, %v12731_v43  ;;  %4188 = vmatprep.subr.bf16.mxu1 %v9099_v38  ;;  %v12767_v52 = vadd.f32 %v12491_v58, %v16570_v21  ;;  %v16572_v37 = vld [vmem:[#allocation58_spill] sm:$0xff] }
 0x58d   : > { %9764 = vrcp.f32 %v3349_v5  ;;  %v8562_v46 = vmul.f32 -1.442695, %v12747_v45  ;;  %v12756_v11 = vadd.f32 %v3156_v30, %v12740_v59  ;;  %v12771_v24 = vadd.f32 %v12482_v10, %v16572_v37  ;;  %v16574_v30 = vld [vmem:[#allocation59_spill] sm:$0xff] }
 0x58e   : > { %9766 = vpow2.f32 %v8561_v50  ;;  %v8563_v23 = vmul.f32 -1.442695, %v12752_v22  ;;  %16571 = vst [vmem:[#allocation55_spill] sm:$0xff] %v12767_v52  ;;  %v9105_v21 = vld [vmem:[#allocation7 + $0x234] ss:$8 sps:$4 sm:$0xff]  }
 0x58f   : > { %9768 = vpow2.f32 %v8562_v46  ;;  %v8564_v62 = vmul.f32 -1.442695, %v12756_v11  ;;  %16573 = vst [vmem:[#allocation56_spill] sm:$0xff] %v12771_v24  ;;  %4189 = vmatpush1.bf16.msra.mxu1 %v9097_v0  ;;  %v9100_v46 = vld [vmem:[#allocation7 + $0x220] ss:$8 sps:$4 sm:$0xff]  }
 0x590   : > { %9770 = vpow2.f32 %v8563_v23  ;;  %v9102_v23 = vld [vmem:[#allocation7 + $0x224] ss:$8 sps:$4 sm:$0xff]  }
 0x591   : > { %9772 = vpow2.f32 %v8564_v62  ;;  %4190 = vmatprep.subr.bf16.mxu1 %v9102_v23 }
 0x593   : > { %4191 = vmatpush1.bf16.msra.mxu1 %v9100_v46 }
 0x594   : > { %v9759_v35 = vpop.eup %9758  ;;  %4192 = vmatprep.subr.bf16.mxu1 %v9105_v21 }
 0x595   : > { %v9761_v51 = vpop.eup %9760  ;;  %v12760_v34 = vmul.f32 %v9759_v35, %v3218_v53  ;;  %v16576_v35 = vld [vmem:[#allocation60_spill] sm:$0xff] }
 0x596   : > { %v9763_v2 = vpop.eup %9762  ;;  %v12780_v58 = vmul.f32 %v9761_v51, %v12711_v48  ;;  %v12785_v0 = vadd.f32 %v12488_v41, %v16576_v35 }
 0x597   : > { %v9765_v49 = vpop.eup %9764  ;;  %3474 = vadd.xlane.f32.xlu0 %v12760_v34  ;;  %v12763_v19 = vmul.f32 %v9763_v2, %v3220_v26  ;;  %v12776_v26 = vadd.f32 %v12485_v60, %v16574_v30 }
 0x598   : > { %v9767_v63 = vpop.eup %9766  ;;  %v3159_v28 = vpop.f32.mrb[40].mxu0  ;;  %16577 = vst [vmem:[#allocation58_spill] sm:$0xff] %v12785_v0  ;;  %v12788_v60 = vmul.f32 %v9765_v49, %v12721_v44  ;;  %v9103_v49 = vld [vmem:[#allocation7 + $0x230] ss:$8 sps:$4 sm:$0xff]  }
 0x599   : > { %v9769_v53 = vpop.eup %9768  ;;  %v3350_v54 = vadd.f32 1.0, %v9767_v63  ;;  %v3160_v5 = vadd.f32 %v3159_v28, %v12688_v56  ;;  %16575 = vst [vmem:[#allocation61_spill] sm:$0xff] %v12776_v26  ;;  %v3161_v50 = vpop.f32.mrb[41].mxu0  ;;  %3476 = vadd.xlane.f32.xlu1 %v12763_v19  ;;  %v3523_v23 = vmul.f32 %v12763_v19, %v12763_v19  ;;  %4193 = vmatpush1.bf16.msra.mxu1 %v9103_v49 }
 0x59a   : > { %v9771_v62 = vpop.eup %9770  ;;  %v3351_v10 = vadd.f32 1.0, %v9769_v53  ;;  %v3162_v6 = vadd.f32 %v3161_v50, %v12692_v9  ;;  %v3163_v32 = vpop.f32.mrb[42].mxu0  ;;  %v3771_v35 = vmul.f32 %v12788_v60, %v12788_v60 }
 0x59b   : > { %v9773_v38 = vpop.eup %9772  ;;  %9774 = vrcp.f32 %v3350_v54  ;;  %v3352_v2 = vadd.f32 1.0, %v9771_v62  ;;  %v12791_v48 = vadd.f32 %v3160_v5, %v12767_v52  ;;  %v3164_v51 = vadd.f32 %v3163_v32, %v12688_v56  ;;  %v3165_v63 = vpop.f32.mrb[43].mxu0  ;;  %3722 = vadd.xlane.f32.xlu0 %v12780_v58  ;;  %v9108_v5 = vld [vmem:[#allocation7 + $0x244] ss:$8 sps:$4 sm:$0xff]   ;;  %v9111_v32 = vld [vmem:[#allocation7 + $0x254] ss:$8 sps:$4 sm:$0xff]  }
 0x59c   : > { %9776 = vrcp.f32 %v3351_v10  ;;  %v3353_v28 = vadd.f32 1.0, %v9773_v38  ;;  %v12796_v41 = vadd.f32 %v3162_v6, %v12776_v26  ;;  %v3166_v44 = vadd.f32 %v3165_v63, %v12692_v9  ;;  %v9106_v10 = vld [vmem:[#allocation7 + $0x240] ss:$8 sps:$4 sm:$0xff]   ;;  %4194 = vmatprep.subr.bf16.mxu1 %v9108_v5  ;;  %v9109_v38 = vld [vmem:[#allocation7 + $0x250] ss:$8 sps:$4 sm:$0xff]  }
 0x59d   : > { %9778 = vrcp.f32 %v3352_v2  ;;  %v8565_v37 = vmul.f32 -1.442695, %v12791_v48  ;;  %v12801_v53 = vadd.f32 %v3164_v51, %v12771_v24  ;;  %3724 = vadd.xlane.f32.xlu1 %v12788_v60  ;;  %v3522_v54 = vmul.f32 %v12760_v34, %v12760_v34  ;;  %4195 = vmatpush1.bf16.msra.mxu1 %v9106_v10  ;;  %v9114_v51 = vld [vmem:[#allocation7 + $0x264] ss:$8 sps:$4 sm:$0xff]  }
 0x59e   : > { %9780 = vrcp.f32 %v3353_v28  ;;  %v8566_v30 = vmul.f32 -1.442695, %v12796_v41  ;;  %v12808_v50 = vadd.f32 %v3166_v44, %v12785_v0  ;;  %v3770_v6 = vmul.f32 %v12780_v58, %v12780_v58  ;;  %4196 = vmatprep.subr.bf16.mxu1 %v9111_v32  ;;  %v16578_v5 = vld [vmem:[#allocation65_spill] sm:$0xff] }
 0x59f   : > { %9782 = vpow2.f32 %v8565_v37  ;;  %v8567_v46 = vmul.f32 -1.442695, %v12801_v53  ;;  %3538 = vadd.xlane.f32.xlu0 %v3522_v54  ;;  %v9112_v37 = vld [vmem:[#allocation7 + $0x260] ss:$8 sps:$4 sm:$0xff]  }
 0x5a0   : > { %9784 = vpow2.f32 %v8566_v30  ;;  %v8568_v62 = vmul.f32 -1.442695, %v12808_v50  ;;  %v12827_v30 = vadd.f32 %v12537_v13, %v16578_v5  ;;  %v16584_v5 = vld [vmem:[#allocation64_spill] sm:$0xff] }
 0x5a1   : > { %9786 = vpow2.f32 %v8567_v46  ;;  %3540 = vadd.xlane.f32.xlu1 %v3523_v23  ;;  %4197 = vmatpush1.bf16.msra.mxu1 %v9109_v38  ;;  %v16580_v23 = vld [vmem:[#allocation62_spill] sm:$0xff] }
 0x5a2   : > { %9788 = vpow2.f32 %v8568_v62  ;;  %16579 = vst [vmem:[#allocation59_spill] sm:$0xff] %v12827_v30  ;;  %v12831_v62 = vadd.f32 %v12526_v25, %v16580_v23  ;;  %4198 = vmatprep.subr.bf16.mxu1 %v9114_v51  ;;  %v16585_v23 = vld [vmem:[#allocation87_spill] sm:$0xff] }
 0x5a3   : > { %3786 = vadd.xlane.f32.xlu0 %v3770_v6 }
 0x5a4   : > { %16581 = vst [vmem:[#allocation60_spill] sm:$0xff] %v12831_v62 }
 0x5a5   : > { %v9775_v2 = vpop.eup %9774  ;;  %3788 = vadd.xlane.f32.xlu1 %v3771_v35  ;;  %4199 = vmatpush1.bf16.msra.mxu1 %v9112_v37 }
 0x5a6   : > { %v9777_v63 = vpop.eup %9776  ;;  %v12819_v21 = vmul.f32 %v9775_v2, %v12743_v3  ;;  %v9117_v3 = vld [vmem:[#allocation7 + $0x274] ss:$8 sps:$4 sm:$0xff]  }
 0x5a7   : > { %v9779_v28 = vpop.eup %9778  ;;  %v12840_v13 = vmul.f32 %v9777_v63, %v12747_v45  ;;  %4200 = vmatprep.subr.bf16.mxu1 %v9117_v3 }
 0x5a8   : > { %v9781_v44 = vpop.eup %9780  ;;  %3478 = vadd.xlane.f32.xlu0 %v12819_v21  ;;  %v12823_v49 = vmul.f32 %v9779_v28, %v12752_v22  ;;  %v16582_v22 = vld [vmem:[#allocation63_spill] sm:$0xff]  ;;  %v3524_v37 = vmul.f32 %v12819_v21, %v12819_v21 }
 0x5a9   : > { %v9783_v54 = vpop.eup %9782  ;;  %v3169_v46 = vpop.f32.mrb[44].mxu0  ;;  %v12836_v35 = vadd.f32 %v12529_v17, %v16582_v22 }
 0x5aa   : > { %v9785_v10 = vpop.eup %9784  ;;  %v3354_v6 = vadd.f32 1.0, %v9783_v54  ;;  %v3170_v32 = vadd.f32 %v3169_v46, %v12688_v56  ;;  %v3171_v38 = vpop.f32.mrb[45].mxu0  ;;  %3480 = vadd.xlane.f32.xlu1 %v12823_v49  ;;  %v12845_v54 = vadd.f32 %v16585_v23, %v16584_v5  ;;  %v12848_v46 = vmul.f32 %v9781_v44, %v12756_v11  ;;  %v9120_v44 = vld [vmem:[#allocation7 + $0x284] ss:$8 sps:$4 sm:$0xff]  }
 0x5ab   : > { %16583 = vst [vmem:[#allocation65_spill] sm:$0xff] %v12836_v35  ;;  %v9787_v2 = vpop.eup %9786  ;;  %v3355_v28 = vadd.f32 1.0, %v9785_v10  ;;  %v3172_v25 = vadd.f32 %v3171_v38, %v12692_v9  ;;  %v3173_v51 = vpop.f32.mrb[46].mxu0  ;;  %v9115_v10 = vld [vmem:[#allocation7 + $0x270] ss:$8 sps:$4 sm:$0xff]  }
 0x5ac   : > { %16586 = vst [vmem:[#allocation62_spill] sm:$0xff] %v12845_v54  ;;  %v9789_v17 = vpop.eup %9788  ;;  %9790 = vrcp.f32 %v3354_v6  ;;  %v3356_v22 = vadd.f32 1.0, %v9787_v2  ;;  %v12851_v42 = vadd.f32 %v3170_v32, %v12827_v30  ;;  %v3174_v45 = vadd.f32 %v3173_v51, %v12688_v56  ;;  %v3175_v63 = vpop.f32.mrb[47].mxu0  ;;  %3726 = vadd.xlane.f32.xlu0 %v12840_v13  ;;  %4201 = vmatpush1.bf16.msra.mxu1 %v9115_v10  ;;  %v9118_v51 = vld [vmem:[#allocation7 + $0x280] ss:$8 sps:$4 sm:$0xff]  }
 0x5ad   : > { %9792 = vrcp.f32 %v3355_v28  ;;  %v3357_v38 = vadd.f32 1.0, %v9789_v17  ;;  %v12856_v5 = vadd.f32 %v3172_v25, %v12836_v35  ;;  %v3176_v11 = vadd.f32 %v3175_v63, %v12692_v9  ;;  %4202 = vmatprep.subr.bf16.mxu1 %v9120_v44  ;;  %v9123_v63 = vld [vmem:[#allocation7 + $0x294] ss:$8 sps:$4 sm:$0xff]  }
 0x5ae   : > { %9794 = vrcp.f32 %v3356_v22  ;;  %v8569_v6 = vmul.f32 -1.442695, %v12851_v42  ;;  %v12861_v32 = vadd.f32 %v3174_v45, %v12831_v62  ;;  %3728 = vadd.xlane.f32.xlu1 %v12848_v46  ;;  %v3525_v25 = vmul.f32 %v12823_v49, %v12823_v49 }
 0x5af   : > { %9796 = vrcp.f32 %v3357_v38  ;;  %v8570_v2 = vmul.f32 -1.442695, %v12856_v5  ;;  %v12868_v28 = vadd.f32 %v3176_v11, %v12845_v54  ;;  %v3772_v17 = vmul.f32 %v12840_v13, %v12840_v13  ;;  %v9121_v11 = vld [vmem:[#allocation7 + $0x290] ss:$8 sps:$4 sm:$0xff]   ;;  %v9126_v54 = vld [vmem:[#allocation7 + $0x2a4] ss:$8 sps:$4 sm:$0xff]  }
 0x5b0   : > { %9798 = vpow2.f32 %v8569_v6  ;;  %v8571_v3 = vmul.f32 -1.442695, %v12861_v32  ;;  %3542 = vadd.xlane.f32.xlu0 %v3524_v37  ;;  %v3773_v22 = vmul.f32 %v12848_v46, %v12848_v46  ;;  %4203 = vmatpush1.bf16.msra.mxu1 %v9118_v51 }
 0x5b1   : > { %9800 = vpow2.f32 %v8570_v2  ;;  %v8572_v23 = vmul.f32 -1.442695, %v12868_v28  ;;  %4204 = vmatprep.subr.bf16.mxu1 %v9123_v63 }
 0x5b2   : > { %9802 = vpow2.f32 %v8571_v3  ;;  %3544 = vadd.xlane.f32.xlu1 %v3525_v25  ;;  %v16587_v25 = vld [vmem:[#allocation69_spill] sm:$0xff] }
 0x5b3   : > { %9804 = vpow2.f32 %v8572_v23  ;;  %v12887_v51 = vadd.f32 %v12581_v12, %v16587_v25  ;;  %v16593_v12 = vld [vmem:[#allocation68_spill] sm:$0xff] }
 0x5b4   : > { %3790 = vadd.xlane.f32.xlu0 %v3772_v17  ;;  %4205 = vmatpush1.bf16.msra.mxu1 %v9121_v11  ;;  %v9124_v25 = vld [vmem:[#allocation7 + $0x2a0] ss:$8 sps:$4 sm:$0xff]  }
 0x5b5   : > { %16588 = vst [vmem:[#allocation63_spill] sm:$0xff] %v12887_v51  ;;  %4206 = vmatprep.subr.bf16.mxu1 %v9126_v54 }
 0x5b6   : > { %v9791_v45 = vpop.eup %9790  ;;  %3792 = vadd.xlane.f32.xlu1 %v3773_v22 }
 0x5b7   : > { %v9793_v10 = vpop.eup %9792  ;;  %v12879_v38 = vmul.f32 %v9791_v45, %v12791_v48  ;;  %v16589_v48 = vld [vmem:[#allocation67_spill] sm:$0xff]  ;;  %v16591_v45 = vld [vmem:[#allocation66_spill] sm:$0xff] }
 0x5b8   : > { %v9795_v44 = vpop.eup %9794  ;;  %v12892_v17 = vadd.f32 %v12573_v18, %v16589_v48  ;;  %v12896_v63 = vadd.f32 %v12570_v1, %v16591_v45  ;;  %v12905_v18 = vmul.f32 %v9793_v10, %v12796_v41  ;;  %4207 = vmatpush1.bf16.msra.mxu1 %v9124_v25 }
 0x5b9   : > { %v9797_v6 = vpop.eup %9796  ;;  %v3179_v37 = vpop.f32.mrb[48].mxu0  ;;  %3482 = vadd.xlane.f32.xlu0 %v12879_v38  ;;  %v12883_v2 = vmul.f32 %v9795_v44, %v12801_v53 }
 0x5ba   : > { %v9799_v3 = vpop.eup %9798  ;;  %v3180_v23 = vadd.f32 %v3179_v37, %v12688_v56  ;;  %16590 = vst [vmem:[#allocation64_spill] sm:$0xff] %v12892_v17  ;;  %v3181_v22 = vpop.f32.mrb[49].mxu0  ;;  %16592 = vst [vmem:[#allocation87_spill] sm:$0xff] %v12896_v63  ;;  %v12902_v37 = vadd.f32 %v12576_v61, %v16593_v12 }
 0x5bb   : > { %v9801_v53 = vpop.eup %9800  ;;  %v3358_v44 = vadd.f32 1.0, %v9799_v3  ;;  %v3182_v11 = vadd.f32 %v3181_v22, %v12692_v9  ;;  %v3183_v35 = vpop.f32.mrb[50].mxu0  ;;  %3484 = vadd.xlane.f32.xlu1 %v12883_v2  ;;  %v12912_v22 = vmul.f32 %v9797_v6, %v12808_v50  ;;  %v9129_v50 = vld [vmem:[#allocation7 + $0x2b4] ss:$8 sps:$4 sm:$0xff]   ;;  %v3527_v25 = vmul.f32 %v12883_v2, %v12883_v2 }
 0x5bc   : > { %16594 = vst [vmem:[#allocation69_spill] sm:$0xff] %v12902_v37  ;;  %v9803_v48 = vpop.eup %9802  ;;  %v3359_v62 = vadd.f32 1.0, %v9801_v53  ;;  %v12908_v1 = vadd.f32 %v3180_v23, %v12887_v51  ;;  %v3184_v3 = vadd.f32 %v3183_v35, %v12688_v56  ;;  %v3185_v45 = vpop.f32.mrb[51].mxu0  ;;  %v3526_v53 = vmul.f32 %v12879_v38, %v12879_v38  ;;  %4208 = vmatprep.subr.bf16.mxu1 %v9129_v50 }
 0x5bd   : > { %v9805_v30 = vpop.eup %9804  ;;  %9806 = vrcp.f32 %v3358_v44  ;;  %v3360_v61 = vadd.f32 1.0, %v9803_v48  ;;  %v12915_v12 = vadd.f32 %v3182_v11, %v12892_v17  ;;  %v3186_v41 = vadd.f32 %v3185_v45, %v12692_v9  ;;  %3730 = vadd.xlane.f32.xlu0 %v12905_v18  ;;  %v9127_v44 = vld [vmem:[#allocation7 + $0x2b0] ss:$8 sps:$4 sm:$0xff]   ;;  %v9130_v48 = vld [vmem:[#allocation7 + $0x2c0] ss:$8 sps:$4 sm:$0xff]  }
 0x5be   : > { %9808 = vrcp.f32 %v3359_v62  ;;  %v3361_v10 = vadd.f32 1.0, %v9805_v30  ;;  %v8573_v35 = vmul.f32 -1.442695, %v12908_v1  ;;  %v12921_v23 = vadd.f32 %v3184_v3, %v12896_v63  ;;  %v9132_v62 = vld [vmem:[#allocation7 + $0x2c4] ss:$8 sps:$4 sm:$0xff]   ;;  %4209 = vmatpush1.bf16.msra.mxu1 %v9127_v44 }
 0x5bf   : > { %9810 = vrcp.f32 %v3360_v61  ;;  %v8574_v54 = vmul.f32 -1.442695, %v12915_v12  ;;  %v12925_v6 = vadd.f32 %v3186_v41, %v12902_v37  ;;  %3732 = vadd.xlane.f32.xlu1 %v12912_v22  ;;  %4210 = vmatprep.subr.bf16.mxu1 %v9132_v62  ;;  %v3774_v3 = vmul.f32 %v12905_v18, %v12905_v18  ;;  %v9133_v61 = vld [vmem:[#allocation7 + $0x2d0] ss:$8 sps:$4 sm:$0xff]   ;;  %v9135_v41 = vld [vmem:[#allocation7 + $0x2d4] ss:$8 sps:$4 sm:$0xff]  }
 0x5c0   : > { %9812 = vrcp.f32 %v3361_v10  ;;  %v8575_v30 = vmul.f32 -1.442695, %v12921_v23  ;;  %v3775_v45 = vmul.f32 %v12912_v22, %v12912_v22  ;;  %v16599_v37 = vld [vmem:[#allocation70_spill] sm:$0xff]  ;;  %v16602_v17 = vld [vmem:[#allocation88_spill] sm:$0xff] }
 0x5c1   : > { %9814 = vpow2.f32 %v8573_v35  ;;  %v8576_v11 = vmul.f32 -1.442695, %v12925_v6  ;;  %3546 = vadd.xlane.f32.xlu0 %v3526_v53 }
 0x5c2   : > { %9816 = vpow2.f32 %v8574_v54  ;;  %4211 = vmatpush1.bf16.msra.mxu1 %v9130_v48 }
 0x5c3   : > { %9818 = vpow2.f32 %v8575_v30  ;;  %3548 = vadd.xlane.f32.xlu1 %v3527_v25  ;;  %4212 = vmatprep.subr.bf16.mxu1 %v9135_v41  ;;  %v16595_v30 = vld [vmem:[#allocation73_spill] sm:$0xff]  ;;  %v16597_v41 = vld [vmem:[#allocation71_spill] sm:$0xff] }
 0x5c4   : > { %9820 = vpow2.f32 %v8576_v11  ;;  %v12943_v62 = vadd.f32 %v12623_v4, %v16595_v30  ;;  %v12957_v4 = vadd.f32 %v12614_v27, %v16599_v37  ;;  %v16601_v30 = vld [vmem:[#allocation72_spill] sm:$0xff] }
 0x5c5   : > { %3794 = vadd.xlane.f32.xlu0 %v3774_v3  ;;  %v9136_v3 = vld [vmem:[#allocation7 + $0x2e0] ss:$8 sps:$4 sm:$0xff]   ;;  %v12961_v63 = vadd.f32 %v16602_v17, %v16601_v30 }
 0x5c6   : > { %4213 = vmatpush1.bf16.msra.mxu1 %v9133_v61  ;;  %16596 = vst [vmem:[#allocation67_spill] sm:$0xff] %v12943_v62  ;;  %16600 = vst [vmem:[#allocation68_spill] sm:$0xff] %v12957_v4 }
 0x5c7   : > { %v9807_v10 = vpop.eup %9806  ;;  %3796 = vadd.xlane.f32.xlu1 %v3775_v45  ;;  %16603 = vst [vmem:[#allocation73_spill] sm:$0xff] %v12961_v63 }
 0x5c8   : > { %v9809_v35 = vpop.eup %9808  ;;  %v12939_v50 = vmul.f32 %v9807_v10, %v12851_v42  ;;  %v9138_v42 = vld [vmem:[#allocation7 + $0x2e4] ss:$8 sps:$4 sm:$0xff]   ;;  %v12952_v10 = vadd.f32 %v12617_v57, %v16597_v41 }
 0x5c9   : > { %v9811_v54 = vpop.eup %9810  ;;  %v3189_v53 = vpop.f32.mrb[52].mxu0  ;;  %v12969_v41 = vmul.f32 %v9809_v35, %v12856_v5  ;;  %4214 = vmatprep.subr.bf16.mxu1 %v9138_v42 }
 0x5ca   : > { %v9813_v44 = vpop.eup %9812  ;;  %v3190_v11 = vadd.f32 %v3189_v53, %v12688_v56  ;;  %3486 = vadd.xlane.f32.xlu0 %v12939_v50  ;;  %v3191_v25 = vpop.f32.mrb[53].mxu0  ;;  %v12948_v48 = vmul.f32 %v9811_v54, %v12861_v32  ;;  %16598 = vst [vmem:[#allocation66_spill] sm:$0xff] %v12952_v10  ;;  %v9141_v32 = vld [vmem:[#allocation7 + $0x2f4] ss:$8 sps:$4 sm:$0xff]   ;;  %4215 = vmatpush1.bf16.msra.mxu1 %v9136_v3 }
 0x5cb   : > { %v9815_v45 = vpop.eup %9814  ;;  %v3192_v61 = vadd.f32 %v3191_v25, %v12692_v9  ;;  %v3193_v53 = vpop.f32.mrb[54].mxu0  ;;  %4216 = vmatprep.subr.bf16.mxu1 %v9141_v32 }
 0x5cc   : > { %v9817_v54 = vpop.eup %9816  ;;  %v3362_v51 = vadd.f32 1.0, %v9815_v45  ;;  %v12964_v0 = vadd.f32 %v3190_v11, %v12943_v62  ;;  %v3194_v57 = vadd.f32 %v3193_v53, %v12688_v56  ;;  %3488 = vadd.xlane.f32.xlu1 %v12948_v48  ;;  %v3195_v25 = vpop.f32.mrb[55].mxu0  ;;  %v12976_v45 = vmul.f32 %v9813_v44, %v12868_v28  ;;  %v9139_v11 = vld [vmem:[#allocation7 + $0x2f0] ss:$8 sps:$4 sm:$0xff]  }
 0x5cd   : > { %v9819_v27 = vpop.eup %9818  ;;  %v3363_v37 = vadd.f32 1.0, %v9817_v54  ;;  %v12972_v17 = vadd.f32 %v3192_v61, %v12952_v10  ;;  %v3196_v30 = vadd.f32 %v3195_v25, %v12692_v9  ;;  %v3529_v61 = vmul.f32 %v12948_v48, %v12948_v48 }
 0x5ce   : > { %v9821_v53 = vpop.eup %9820  ;;  %9822 = vrcp.f32 %v3362_v51  ;;  %v3364_v62 = vadd.f32 1.0, %v9819_v27  ;;  %v8577_v26 = vmul.f32 -1.442695, %v12964_v0  ;;  %v12980_v5 = vadd.f32 %v3194_v57, %v12957_v4  ;;  %3734 = vadd.xlane.f32.xlu0 %v12969_v41  ;;  %4217 = vmatpush1.bf16.msra.mxu1 %v9139_v11 }
 0x5cf   : > { %9824 = vrcp.f32 %v3363_v37  ;;  %v3365_v35 = vadd.f32 1.0, %v9821_v53  ;;  %v8578_v42 = vmul.f32 -1.442695, %v12972_v17  ;;  %v12985_v28 = vadd.f32 %v3196_v30, %v12961_v63  ;;  %v16604_v37 = vld [vmem:[#allocation77_spill] sm:$0xff] }
 0x5d0   : > { %9826 = vrcp.f32 %v3364_v62  ;;  %v8579_v44 = vmul.f32 -1.442695, %v12980_v5  ;;  %3736 = vadd.xlane.f32.xlu1 %v12976_v45  ;;  %v3528_v51 = vmul.f32 %v12939_v50, %v12939_v50  ;;  %v3776_v62 = vmul.f32 %v12969_v41, %v12969_v41 }
 0x5d1   : > { %9828 = vrcp.f32 %v3365_v35  ;;  %v8580_v3 = vmul.f32 -1.442695, %v12985_v28  ;;  %v3777_v32 = vmul.f32 %v12976_v45, %v12976_v45  ;;  %v13003_v30 = vadd.f32 %v12655_v55, %v16604_v37 }
 0x5d2   : > { %9830 = vpow2.f32 %v8577_v26  ;;  %3550 = vadd.xlane.f32.xlu0 %v3528_v51 }
 0x5d3   : > { %9832 = vpow2.f32 %v8578_v42  ;;  %16605 = vst [vmem:[#allocation71_spill] sm:$0xff] %v13003_v30  ;;  %v16606_v42 = vld [vmem:[#allocation75_spill] sm:$0xff] }
 0x5d4   : > { %9834 = vpow2.f32 %v8579_v44  ;;  %3552 = vadd.xlane.f32.xlu1 %v3529_v61  ;;  %v13009_v44 = vadd.f32 %v12649_v33, %v16606_v42 }
 0x5d5   : > { %9836 = vpow2.f32 %v8580_v3 }
 0x5d6   : > { %3798 = vadd.xlane.f32.xlu0 %v3776_v62  ;;  %16607 = vst [vmem:[#allocation70_spill] sm:$0xff] %v13009_v44  ;;  %v16608_v62 = vld [vmem:[#allocation74_spill] sm:$0xff] }
 0x5d8   : > { %v9823_v54 = vpop.eup %9822  ;;  %3800 = vadd.xlane.f32.xlu1 %v3777_v32  ;;  %v13020_v32 = vadd.f32 %v12646_v31, %v16608_v62 }
 0x5d9   : > { %v9825_v57 = vpop.eup %9824  ;;  %v3199_v25 = vpop.f32.mrb[56].mxu0  ;;  %v12999_v26 = vmul.f32 %v9823_v54, %v12908_v1 }
 0x5da   : > { %v9827_v27 = vpop.eup %9826  ;;  %v3200_v11 = vadd.f32 %v3199_v25, %v12688_v56  ;;  %v3201_v53 = vpop.f32.mrb[57].mxu0  ;;  %16609 = vst [vmem:[#allocation72_spill] sm:$0xff] %v13020_v32  ;;  %v16610_v25 = vld [vmem:[#allocation76_spill] sm:$0xff] }
 0x5db   : > { %v9829_v35 = vpop.eup %9828  ;;  %3490 = vadd.xlane.f32.xlu0 %v12999_v26  ;;  %v3202_v51 = vadd.f32 %v3201_v53, %v12692_v9  ;;  %v3203_v3 = vpop.f32.mrb[58].mxu0  ;;  %v13013_v1 = vmul.f32 %v9827_v27, %v12921_v23  ;;  %v13025_v33 = vadd.f32 %v12652_v40, %v16610_v25 }
 0x5dc   : > { %v9831_v61 = vpop.eup %9830  ;;  %v13016_v55 = vadd.f32 %v3200_v11, %v13003_v30  ;;  %v3204_v54 = vadd.f32 %v3203_v3, %v12688_v56  ;;  %v3205_v37 = vpop.f32.mrb[59].mxu0  ;;  %v13033_v11 = vmul.f32 %v9825_v57, %v12915_v12  ;;  %v13039_v40 = vmul.f32 %v9829_v35, %v12925_v6 }
 0x5dd   : > { %16611 = vst [vmem:[#allocation88_spill] sm:$0xff] %v13025_v33  ;;  %v9833_v53 = vpop.eup %9832  ;;  %v3366_v42 = vadd.f32 1.0, %v9831_v61  ;;  %v13028_v23 = vadd.f32 %v3202_v51, %v13009_v44  ;;  %3492 = vadd.xlane.f32.xlu1 %v13013_v1  ;;  %v3206_v27 = vadd.f32 %v3205_v37, %v12692_v9  ;;  %v3530_v6 = vmul.f32 %v12999_v26, %v12999_v26 }
 0x5de   : > { %v9835_v31 = vpop.eup %9834  ;;  %v3367_v62 = vadd.f32 1.0, %v9833_v53  ;;  %v13036_v3 = vadd.f32 %v3204_v54, %v13020_v32  ;;  %v8581_v51 = vmul.f32 -1.442695, %v13016_v55  ;;  %v3531_v37 = vmul.f32 %v13013_v1, %v13013_v1 }
 0x5df   : > { %v9837_v25 = vpop.eup %9836  ;;  %9838 = vrcp.f32 %v3366_v42  ;;  %v3368_v61 = vadd.f32 1.0, %v9835_v31  ;;  %v13043_v44 = vadd.f32 %v3206_v27, %v13025_v33  ;;  %3738 = vadd.xlane.f32.xlu0 %v13033_v11  ;;  %v8582_v57 = vmul.f32 -1.442695, %v13028_v23 }
 0x5e0   : > { %9840 = vrcp.f32 %v3367_v62  ;;  %v3369_v12 = vadd.f32 1.0, %v9837_v25  ;;  %v8583_v54 = vmul.f32 -1.442695, %v13036_v3  ;;  %v3778_v53 = vmul.f32 %v13033_v11, %v13033_v11  ;;  %v16612_v62 = vld [vmem:[#allocation80_spill] sm:$0xff] }
 0x5e1   : > { %9842 = vrcp.f32 %v3368_v61  ;;  %3740 = vadd.xlane.f32.xlu1 %v13039_v40  ;;  %v8584_v35 = vmul.f32 -1.442695, %v13043_v44  ;;  %v3779_v42 = vmul.f32 %v13039_v40, %v13039_v40  ;;  %v13060_v25 = vadd.f32 %v12679_v8, %v16612_v62  ;;  %v16616_v8 = vld [vmem:[#allocation81_spill] sm:$0xff] }
 0x5e2   : > { %9844 = vrcp.f32 %v3369_v12  ;;  %v13076_v62 = vadd.f32 %v12682_v20, %v16616_v8 }
 0x5e3   : > { %9846 = vpow2.f32 %v8581_v51  ;;  %3554 = vadd.xlane.f32.xlu0 %v3530_v6  ;;  %16613 = vst [vmem:[#allocation77_spill] sm:$0xff] %v13060_v25 }
 0x5e4   : > { %9848 = vpow2.f32 %v8582_v57  ;;  %v16614_v57 = vld [vmem:[#allocation78_spill] sm:$0xff]  ;;  %16617 = vst [vmem:[#allocation74_spill] sm:$0xff] %v13076_v62 }
 0x5e5   : > { %9850 = vpow2.f32 %v8583_v54  ;;  %3556 = vadd.xlane.f32.xlu1 %v3531_v37  ;;  %v13065_v54 = vadd.f32 %v12669_v14, %v16614_v57 }
 0x5e6   : > { %9852 = vpow2.f32 %v8584_v35 }
 0x5e7   : > { %3802 = vadd.xlane.f32.xlu0 %v3778_v53  ;;  %16615 = vst [vmem:[#allocation75_spill] sm:$0xff] %v13065_v54 }
 0x5e8   : > { %v3209_v27 = vpop.f32.mrb[60].mxu0 }
 0x5e9   : > { %v9839_v31 = vpop.eup %9838  ;;  %3804 = vadd.xlane.f32.xlu1 %v3779_v42  ;;  %v3210_v61 = vadd.f32 %v3209_v27, %v12688_v56  ;;  %v3211_v51 = vpop.f32.mrb[61].mxu0 }
 0x5ea   : > { %v9841_v12 = vpop.eup %9840  ;;  %v3212_v6 = vadd.f32 %v3211_v51, %v12692_v9  ;;  %v13069_v35 = vmul.f32 %v9839_v31, %v12964_v0  ;;  %v3213_v37 = vpop.f32.mrb[62].mxu0  ;;  %v16618_v0 = vld [vmem:[#allocation79_spill] sm:$0xff] }
 0x5eb   : > { %v9843_v53 = vpop.eup %9842  ;;  %v13072_v42 = vadd.f32 %v3210_v61, %v13060_v25  ;;  %v3214_v27 = vadd.f32 %v3213_v37, %v12688_v56  ;;  %v3215_v33 = vpop.f32.mrb[63].mxu0  ;;  %v13085_v31 = vadd.f32 %v12672_v36, %v16618_v0  ;;  %v13100_v36 = vmul.f32 %v9841_v12, %v12972_v17 }
 0x5ec   : > { %v9845_v32 = vpop.eup %9844  ;;  %v13080_v14 = vadd.f32 %v3212_v6, %v13065_v54  ;;  %3494 = vadd.xlane.f32.xlu0 %v13069_v35  ;;  %v3216_v61 = vadd.f32 %v3215_v33, %v12692_v9  ;;  %v13089_v51 = vmul.f32 %v9843_v53, %v12980_v5  ;;  %v3532_v12 = vmul.f32 %v13069_v35, %v13069_v35 }
 0x5ed   : > { %16619 = vst [vmem:[#allocation76_spill] sm:$0xff] %v13085_v31  ;;  %v9847_v20 = vpop.eup %9846  ;;  %v8585_v57 = vmul.f32 -1.442695, %v13072_v42  ;;  %v13093_v56 = vadd.f32 %v3214_v27, %v13076_v62  ;;  %v13105_v27 = vmul.f32 %v9845_v32, %v12985_v28  ;;  %v3780_v28 = vmul.f32 %v13100_v36, %v13100_v36 }
 0x5ee   : > { %v9849_v37 = vpop.eup %9848  ;;  %v3370_v6 = vadd.f32 1.0, %v9847_v20  ;;  %v13096_v8 = vadd.f32 %v3216_v61, %v13085_v31  ;;  %3496 = vadd.xlane.f32.xlu1 %v13089_v51  ;;  %v8586_v0 = vmul.f32 -1.442695, %v13080_v14 }
 0x5ef   : > { %v9851_v9 = vpop.eup %9850  ;;  %v3371_v33 = vadd.f32 1.0, %v9849_v37  ;;  %9854 = vpow2.f32 %v8585_v57  ;;  %v8587_v20 = vmul.f32 -1.442695, %v13093_v56  ;;  %v3533_v57 = vmul.f32 %v13089_v51, %v13089_v51 }
 0x5f0   : > { %v9853_v5 = vpop.eup %9852  ;;  %9856 = vrcp.f32 %v3370_v6  ;;  %v3372_v53 = vadd.f32 1.0, %v9851_v9  ;;  %3742 = vadd.xlane.f32.xlu0 %v13100_v36  ;;  %v8588_v17 = vmul.f32 -1.442695, %v13096_v8  ;;  %v3781_v32 = vmul.f32 %v13105_v27, %v13105_v27 }
 0x5f1   : > { %9858 = vrcp.f32 %v3371_v33  ;;  %v3373_v61 = vadd.f32 1.0, %v9853_v5 }
 0x5f2   : > { %9860 = vrcp.f32 %v3372_v53  ;;  %3744 = vadd.xlane.f32.xlu1 %v13105_v27 }
 0x5f3   : > { %9862 = vrcp.f32 %v3373_v61 }
 0x5f4   : > { %9864 = vpow2.f32 %v8586_v0  ;;  %3558 = vadd.xlane.f32.xlu0 %v3532_v12 }
 0x5f5   : > { %9866 = vpow2.f32 %v8587_v20 }
 0x5f6   : > { %9868 = vpow2.f32 %v8588_v17  ;;  %3560 = vadd.xlane.f32.xlu1 %v3533_v57 }
 0x5f8   : > { %3806 = vadd.xlane.f32.xlu0 %v3780_v28 }
 0x5f9   : > { %v9855_v37 = vpop.eup %9854 }
 0x5fa   : > { %v9857_v6 = vpop.eup %9856  ;;  %v3374_v9 = vadd.f32 1.0, %v9855_v37  ;;  %3808 = vadd.xlane.f32.xlu1 %v3781_v32 }
 0x5fb   : > { %v9859_v33 = vpop.eup %9858  ;;  %v13119_v5 = vmul.f32 %v9857_v6, %v13016_v55 }
 0x5fc   : > { %v9861_v53 = vpop.eup %9860  ;;  %9870 = vrcp.f32 %v3374_v9  ;;  %v13127_v57 = vmul.f32 %v9859_v33, %v13028_v23 }
 0x5fd   : > { %v9863_v0 = vpop.eup %9862  ;;  %3498 = vadd.xlane.f32.xlu0 %v13119_v5  ;;  %v13123_v61 = vmul.f32 %v9861_v53, %v13036_v3  ;;  %v3534_v3 = vmul.f32 %v13119_v5, %v13119_v5 }
 0x5fe   : > { %v9865_v20 = vpop.eup %9864  ;;  %v13131_v37 = vmul.f32 %v9863_v0, %v13043_v44  ;;  %v3782_v9 = vmul.f32 %v13127_v57, %v13127_v57 }
 0x5ff   : > { %v9867_v17 = vpop.eup %9866  ;;  %v3375_v12 = vadd.f32 1.0, %v9865_v20  ;;  %3500 = vadd.xlane.f32.xlu1 %v13123_v61  ;;  %v3535_v23 = vmul.f32 %v13123_v61, %v13123_v61 }
 0x600   : > { %v9869_v28 = vpop.eup %9868  ;;  %v3376_v32 = vadd.f32 1.0, %v9867_v17  ;;  %v3783_v44 = vmul.f32 %v13131_v37, %v13131_v37 }
 0x601   : > { %9872 = vrcp.f32 %v3375_v12  ;;  %v3377_v55 = vadd.f32 1.0, %v9869_v28  ;;  %3746 = vadd.xlane.f32.xlu0 %v13127_v57 }
 0x602   : > { %9874 = vrcp.f32 %v3376_v32 }
 0x603   : > { %3748 = vadd.xlane.f32.xlu1 %v13131_v37  ;;  %9876 = vrcp.f32 %v3377_v55 }
 0x605   : > { %3562 = vadd.xlane.f32.xlu0 %v3534_v3 }
 0x606   : > { %v9871_v6 = vpop.eup %9870 }
 0x607   : > { %3564 = vadd.xlane.f32.xlu1 %v3535_v23  ;;  %v13143_v33 = vmul.f32 %v9871_v6, %v13072_v42 }
 0x609   : > { %3810 = vadd.xlane.f32.xlu0 %v3782_v9  ;;  %v3536_v32 = vmul.f32 %v13143_v33, %v13143_v33 }
 0x60b   : > { %v9873_v53 = vpop.eup %9872  ;;  %3812 = vadd.xlane.f32.xlu1 %v3783_v44 }
 0x60c   : > { %v9875_v0 = vpop.eup %9874  ;;  %v13151_v12 = vmul.f32 %v9873_v53, %v13080_v14 }
 0x60d   : > { %3502 = vadd.xlane.f32.xlu0 %v13143_v33  ;;  %v13147_v20 = vmul.f32 %v9875_v0, %v13093_v56  ;;  %v9877_v17 = vpop.eup %9876 }
 0x60e   : > { %v13155_v28 = vmul.f32 %v9877_v17, %v13096_v8  ;;  %v3784_v42 = vmul.f32 %v13151_v12, %v13151_v12 }
 0x60f   : > { %3504 = vadd.xlane.f32.xlu1 %v13147_v20  ;;  %v3537_v14 = vmul.f32 %v13147_v20, %v13147_v20 }
 0x610   : > { %v3785_v56 = vmul.f32 %v13155_v28, %v13155_v28 }
 0x611   : > { %3750 = vadd.xlane.f32.xlu0 %v13151_v12 }
 0x613   : > { %3752 = vadd.xlane.f32.xlu1 %v13155_v28 }
 0x615   : > { %3814 = vadd.xlane.f32.xlu0 %v3784_v42 }
 0x617   : > { %3816 = vadd.xlane.f32.xlu1 %v3785_v56 }
 0x619   : > { %3566 = vadd.xlane.f32.xlu0 %v3536_v32 }
 0x61b   : > { %3568 = vadd.xlane.f32.xlu1 %v3537_v14 }
 0x624   : > { %v3475_v8 = vpop.xlane.xlu0 %3474 }
 0x625   : > { %v3506_v23 = vmul.f32 0.0078125, %v3475_v8 }
 0x626   : > { %v3477_v55 = vpop.xlane.xlu1 %3476 }
 0x627   : > { %v3507_v9 = vmul.f32 0.0078125, %v3477_v55  ;;  %v3586_v53 = vmul.f32 %v3506_v23, %v3506_v23 }
 0x628   : > { %v3723_v3 = vpop.xlane.xlu0 %3722 }
 0x629   : > { %v3754_v0 = vmul.f32 0.0078125, %v3723_v3  ;;  %v3587_v56 = vmul.f32 %v3507_v9, %v3507_v9 }
 0x62a   : > { %v3725_v6 = vpop.xlane.xlu1 %3724 }
 0x62b   : > { %v13166_v31 = vmul.f32 0.0078125, %v3725_v6  ;;  %v3834_v25 = vmul.f32 %v3754_v0, %v3754_v0 }
 0x62c   : > { %v3539_v44 = vpop.xlane.xlu0 %3538 }
 0x62d   : > { %v3570_v17 = vmul.f32 0.0078125, %v3539_v44  ;;  %v3835_v8 = vmul.f32 %v13166_v31, %v13166_v31 }
 0x62e   : > { %v3541_v42 = vpop.xlane.xlu1 %3540 }
 0x62f   : > { %v3602_v62 = vsub.f32 %v3570_v17, %v3586_v53  ;;  %v3571_v32 = vmul.f32 0.0078125, %v3541_v42 }
 0x630   : > { %v3787_v54 = vpop.xlane.xlu0 %3786 }
 0x631   : > { %v3634_v30 = vadd.f32 0.1, %v3602_v62  ;;  %v3603_v14 = vsub.f32 %v3571_v32, %v3587_v56  ;;  %v3818_v63 = vmul.f32 0.0078125, %v3787_v54 }
 0x632   : > { %v3789_v10 = vpop.xlane.xlu1 %3788 }
 0x633   : > { %v3635_v55 = vadd.f32 0.1, %v3603_v14  ;;  %v3850_v4 = vsub.f32 %v3818_v63, %v3834_v25  ;;  %v3819_v24 = vmul.f32 0.0078125, %v3789_v10  ;;  %9878 = vrsqrt.f32 %v3634_v30  ;;  %v16620_v63 = vld [vmem:[#allocation48_spill] sm:$0xff] }
 0x634   : > { %v3684_v10 = vsub.s32 7, %v16620_v63 }
 0x635   : > { %9880 = vrsqrt.f32 %v3635_v55  ;;  %v3882_v3 = vadd.f32 0.1, %v3850_v4  ;;  %v3851_v44 = vsub.f32 %v3819_v24, %v3835_v8  ;;  %v3479_v6 = vpop.xlane.xlu0 %3478  ;;  %v3619_v4 = vsub.f32 %v12763_v19, %v3507_v9 }
 0x636   : > { %v13170_v62 = vmul.f32 0.0078125, %v3479_v6  ;;  %v3618_v55 = vsub.f32 %v12760_v34, %v3506_v23  ;;  %v13191_v23 = vld [vmem:[#allocation10] sm:$0xff] }
 0x637   : > { %9882 = vrsqrt.f32 %v3882_v3  ;;  %v3883_v53 = vadd.f32 0.1, %v3851_v44  ;;  %v3481_v17 = vpop.xlane.xlu1 %3480  ;;  %v3866_v3 = vsub.f32 %v12780_v58, %v3754_v0  ;;  %v13194_v58 = vrot.slane %v13191_v23, %v3684_v10  ;;  %v13196_v0 = vld [vmem:[#allocation10 + $0x8] sm:$0xff] }
 0x638   : > { %v13172_v56 = vmul.f32 0.0078125, %v3481_v17  ;;  %v3588_v24 = vmul.f32 %v13170_v62, %v13170_v62 }
 0x639   : > { %9884 = vrsqrt.f32 %v3883_v53  ;;  %v3727_v42 = vpop.xlane.xlu0 %3726  ;;  %v13185_v53 = vsub.s32 4, %v16620_v63 }
 0x63a   : > { %v13174_v32 = vmul.f32 0.0078125, %v3727_v42  ;;  %v3589_v42 = vmul.f32 %v13172_v56, %v13172_v56 }
 0x63b   : > { %v3729_v54 = vpop.xlane.xlu1 %3728  ;;  %16621 = vst [vmem:[#allocation80_spill] sm:$0xff] %v13185_v53  ;;  %v13206_v43 = vrot.slane %v10590_v15, %v13185_v53 }
 0x63c   : > { %v13182_v44 = vmul.f32 0.0078125, %v3729_v54  ;;  %v13199_v54 = vrot.slane %v13196_v0, %v3684_v10 }
 0x63d   : > { %v3543_v14 = vpop.xlane.xlu0 %3542  ;;  %v9879_v30 = vpop.eup %9878 }
 0x63e   : > { %v3572_v25 = vmul.f32 0.0078125, %v3543_v14  ;;  %v3666_v59 = vmul.f32 %v9879_v30, %v3618_v55  ;;  %v3836_v14 = vmul.f32 %v13174_v32, %v13174_v32  ;;  %v3867_v30 = vsub.f32 %v12788_v60, %v13166_v31 }
 0x63f   : > { %v9881_v8 = vpop.eup %9880  ;;  %v3545_v6 = vpop.xlane.xlu1 %3544  ;;  %v3837_v55 = vmul.f32 %v13182_v44, %v13182_v44 }
 0x640   : > { %v3667_v17 = vmul.f32 %v9881_v8, %v3619_v4  ;;  %v3604_v19 = vsub.f32 %v3572_v25, %v3588_v24  ;;  %v3573_v9 = vmul.f32 0.0078125, %v3545_v6  ;;  %v3686_v15 = vmul.f32 %v13194_v58, %v3666_v59 }
 0x641   : > { %v9883_v52 = vpop.eup %9882  ;;  %v3791_v34 = vpop.xlane.xlu0 %3790 }
 0x642   : > { %v3636_v4 = vadd.f32 0.1, %v3604_v19  ;;  %v3605_v8 = vsub.f32 %v3573_v9, %v3589_v42  ;;  %v3820_v24 = vmul.f32 0.0078125, %v3791_v34  ;;  %v3914_v25 = vmul.f32 %v9883_v52, %v3866_v3  ;;  %v10591_v3 = vld [vmem:[#allocation10 + $0x18] sm:$0x7f] }
 0x643   : > { %v9885_v6 = vpop.eup %9884  ;;  %v3793_v63 = vpop.xlane.xlu1 %3792  ;;  %v3687_v19 = vmul.f32 %v13194_v58, %v3667_v17  ;;  %v13211_v60 = vrot.slane %v10591_v3, %v13185_v53 }
 0x644   : > { %v3637_v39 = vadd.f32 0.1, %v3605_v8  ;;  %v3852_v47 = vsub.f32 %v3820_v24, %v3836_v14  ;;  %v3821_v10 = vmul.f32 0.0078125, %v3793_v63  ;;  %9886 = vrsqrt.f32 %v3636_v4 }
 0x645   : > { %v3915_v42 = vmul.f32 %v9885_v6, %v3867_v30  ;;  %v3934_v52 = vmul.f32 %v13199_v54, %v3914_v25  ;;  %v13216_v17 = vadd.f32 %v13206_v43, %v3687_v19 }
 0x646   : > { %9888 = vrsqrt.f32 %v3637_v39  ;;  %v3884_v31 = vadd.f32 0.1, %v3852_v47  ;;  %v3853_v9 = vsub.f32 %v3821_v10, %v3837_v55  ;;  %v3483_v34 = vpop.xlane.xlu0 %3482  ;;  %v13225_v39 = vadd.f32 %v13206_v43, %v3686_v15 }
 0x647   : > { %v3935_v8 = vmul.f32 %v13199_v54, %v3915_v42  ;;  %16622 = vst [vmem:[#allocation78_spill] sm:$0xff] %v13216_v17  ;;  %v13219_v4 = vadd.f32 %v13211_v60, %v3934_v52  ;;  %v13227_v59 = vmul.f32 0.0078125, %v3483_v34  ;;  %v3621_v52 = vsub.f32 %v12823_v49, %v13172_v56 }
 0x648   : > { %9890 = vrsqrt.f32 %v3884_v31  ;;  %v3885_v63 = vadd.f32 0.1, %v3853_v9  ;;  %v3485_v14 = vpop.xlane.xlu1 %3484  ;;  %v4002_v30 = vpack.c.bf16 %v13216_v17, %v13225_v39  ;;  %v3620_v34 = vsub.f32 %v12819_v21, %v13170_v62 }
 0x649   : > { %v13222_v24 = vadd.f32 %v13211_v60, %v3935_v8  ;;  %v13233_v55 = vmul.f32 0.0078125, %v3485_v14  ;;  %v3590_v3 = vmul.f32 %v13227_v59, %v13227_v59  ;;  %v3868_v15 = vsub.f32 %v12840_v13, %v13174_v32 }
 0x64a   : > { %9892 = vrsqrt.f32 %v3885_v63  ;;  %v3731_v47 = vpop.xlane.xlu0 %3730  ;;  %v3869_v32 = vsub.f32 %v12848_v46, %v13182_v44 }
 0x64b   : > { %16623 = vst [vmem:[#allocation81_spill] sm:$0xff] %v13222_v24  ;;  %v4003_v25 = vpack.c.bf16 %v13222_v24, %v13219_v4  ;;  %v13235_v10 = vmul.f32 0.0078125, %v3731_v47  ;;  %v3591_v14 = vmul.f32 %v13233_v55, %v13233_v55 }
 0x64c   : > { %v3733_v6 = vpop.xlane.xlu1 %3732 }
 0x64d   : > { %4218 = vmatprep.mubr.bf16.mxu1 %v4003_v25  ;;  %v13245_v8 = vmul.f32 0.0078125, %v3733_v6 }
 0x64e   : > { %v3547_v19 = vpop.xlane.xlu0 %3546  ;;  %4219 = vmatmul.mubr.bf16.vlgmr.msra.gmra.mrb[32].mxu1 %v4002_v30  ;;  %v9887_v42 = vpop.eup %9886  ;;  %v3838_v30 = vmul.f32 %v13235_v10, %v13235_v10 }
 0x64f   : > { %v3574_v31 = vmul.f32 0.0078125, %v3547_v19  ;;  %v3668_v53 = vmul.f32 %v9887_v42, %v3620_v34  ;;  %v3839_v6 = vmul.f32 %v13245_v8, %v13245_v8 }
 0x650   : > { %v9889_v9 = vpop.eup %9888  ;;  %v3549_v63 = vpop.xlane.xlu1 %3548 }
 0x651   : > { %v3606_v47 = vsub.f32 %v3574_v31, %v3590_v3  ;;  %v3575_v25 = vmul.f32 0.0078125, %v3549_v63  ;;  %v3669_v49 = vmul.f32 %v9889_v9, %v3621_v52 }
 0x652   : > { %v9891_v56 = vpop.eup %9890  ;;  %v3795_v19 = vpop.xlane.xlu0 %3794 }
 0x653   : > { %v3638_v24 = vadd.f32 0.1, %v3606_v47  ;;  %v3607_v21 = vsub.f32 %v3575_v25, %v3591_v14  ;;  %v3822_v62 = vmul.f32 0.0078125, %v3795_v19  ;;  %v3916_v17 = vmul.f32 %v9891_v56, %v3868_v15 }
 0x654   : > { %v9893_v13 = vpop.eup %9892  ;;  %v3797_v3 = vpop.xlane.xlu1 %3796  ;;  %v3689_v63 = vmul.f32 %v13194_v58, %v3669_v49  ;;  %v3688_v47 = vmul.f32 %v13194_v58, %v3668_v53 }
 0x655   : > { %v3639_v31 = vadd.f32 0.1, %v3607_v21  ;;  %v3854_v52 = vsub.f32 %v3822_v62, %v3838_v30  ;;  %v3823_v9 = vmul.f32 0.0078125, %v3797_v3  ;;  %9894 = vrsqrt.f32 %v3638_v24 }
 0x656   : > { %v3917_v7 = vmul.f32 %v9893_v13, %v3869_v32  ;;  %v3936_v42 = vmul.f32 %v13199_v54, %v3916_v17  ;;  %v13260_v56 = vadd.f32 %v13206_v43, %v3689_v63  ;;  %v13269_v30 = vadd.f32 %v13206_v43, %v3688_v47 }
 0x657   : > { %9896 = vrsqrt.f32 %v3639_v31  ;;  %v3886_v34 = vadd.f32 0.1, %v3854_v52  ;;  %v3855_v15 = vsub.f32 %v3823_v9, %v3839_v6  ;;  %v3487_v14 = vpop.xlane.xlu0 %3486  ;;  %v3623_v3 = vsub.f32 %v12883_v2, %v13233_v55 }
 0x658   : > { %v3937_v46 = vmul.f32 %v13199_v54, %v3917_v7  ;;  %v13263_v49 = vadd.f32 %v13211_v60, %v3936_v42  ;;  %v13271_v53 = vmul.f32 0.0078125, %v3487_v14  ;;  %v4004_v21 = vpack.c.bf16 %v13260_v56, %v13269_v30 }
 0x659   : > { %9898 = vrsqrt.f32 %v3886_v34  ;;  %v3887_v44 = vadd.f32 0.1, %v3855_v15  ;;  %v3489_v25 = vpop.xlane.xlu1 %3488  ;;  %v3622_v63 = vsub.f32 %v12879_v38, %v13227_v59  ;;  %v3870_v42 = vsub.f32 %v12905_v18, %v13235_v10 }
 0x65a   : > { %v13266_v24 = vadd.f32 %v13211_v60, %v3937_v46  ;;  %v13277_v62 = vmul.f32 0.0078125, %v3489_v25  ;;  %v3592_v31 = vmul.f32 %v13271_v53, %v13271_v53  ;;  %v3871_v10 = vsub.f32 %v12912_v22, %v13245_v8 }
 0x65b   : > { %9900 = vrsqrt.f32 %v3887_v44  ;;  %v3735_v17 = vpop.xlane.xlu0 %3734 }
 0x65c   : > { %v4005_v7 = vpack.c.bf16 %v13266_v24, %v13263_v49  ;;  %v13279_v13 = vmul.f32 0.0078125, %v3735_v17  ;;  %v3593_v14 = vmul.f32 %v13277_v62, %v13277_v62 }
 0x65d   : > { %v3737_v19 = vpop.xlane.xlu1 %3736 }
 0x65e   : > { %4228 = vmatprep.mubr.bf16.mxu1 %v4005_v7  ;;  %v13289_v34 = vmul.f32 0.0078125, %v3737_v19  ;;  %v3840_v44 = vmul.f32 %v13279_v13, %v13279_v13 }
 0x65f   : > { %v3551_v32 = vpop.xlane.xlu0 %3550  ;;  %4229 = vmatmul.mubr.bf16.gmra.mrb[36].mxu1 %v4004_v21  ;;  %v9895_v6 = vpop.eup %9894 }
 0x660   : > { %v3576_v52 = vmul.f32 0.0078125, %v3551_v32  ;;  %v3670_v17 = vmul.f32 %v9895_v6, %v3622_v63  ;;  %v3841_v19 = vmul.f32 %v13289_v34, %v13289_v34 }
 0x661   : > { %v9897_v9 = vpop.eup %9896  ;;  %v3553_v15 = vpop.xlane.xlu1 %3552 }
 0x662   : > { %v3608_v47 = vsub.f32 %v3576_v52, %v3592_v31  ;;  %v3577_v46 = vmul.f32 0.0078125, %v3553_v15  ;;  %v3671_v2 = vmul.f32 %v9897_v9, %v3623_v3 }
 0x663   : > { %v9899_v55 = vpop.eup %9898  ;;  %v3799_v25 = vpop.xlane.xlu0 %3798 }
 0x664   : > { %v3640_v7 = vadd.f32 0.1, %v3608_v47  ;;  %v3609_v38 = vsub.f32 %v3577_v46, %v3593_v14  ;;  %v3824_v59 = vmul.f32 0.0078125, %v3799_v25  ;;  %v3918_v21 = vmul.f32 %v9899_v55, %v3870_v42 }
 0x665   : > { %v9901_v18 = vpop.eup %9900  ;;  %v3801_v32 = vpop.xlane.xlu1 %3800  ;;  %v3691_v9 = vmul.f32 %v13194_v58, %v3671_v2  ;;  %v3690_v47 = vmul.f32 %v13194_v58, %v3670_v17 }
 0x666   : > { %v3641_v31 = vadd.f32 0.1, %v3609_v38  ;;  %v3856_v3 = vsub.f32 %v3824_v59, %v3840_v44  ;;  %v3825_v52 = vmul.f32 0.0078125, %v3801_v32  ;;  %9902 = vrsqrt.f32 %v3640_v7 }
 0x667   : > { %v3919_v15 = vmul.f32 %v9901_v18, %v3871_v10  ;;  %v3938_v6 = vmul.f32 %v13199_v54, %v3918_v21  ;;  %v13304_v55 = vadd.f32 %v13206_v43, %v3691_v9  ;;  %v13313_v7 = vadd.f32 %v13206_v43, %v3690_v47 }
 0x668   : > { %9904 = vrsqrt.f32 %v3641_v31  ;;  %v3888_v63 = vadd.f32 0.1, %v3856_v3  ;;  %v3857_v42 = vsub.f32 %v3825_v52, %v3841_v19  ;;  %v3491_v14 = vpop.xlane.xlu0 %3490  ;;  %v3625_v31 = vsub.f32 %v12948_v48, %v13277_v62 }
 0x669   : > { %v3939_v22 = vmul.f32 %v13199_v54, %v3919_v15  ;;  %v13307_v2 = vadd.f32 %v13211_v60, %v3938_v6  ;;  %v13315_v17 = vmul.f32 0.0078125, %v3491_v14  ;;  %v4006_v21 = vpack.c.bf16 %v13304_v55, %v13313_v7 }
 0x66a   : > { %9906 = vrsqrt.f32 %v3888_v63  ;;  %v3889_v8 = vadd.f32 0.1, %v3857_v42  ;;  %v3493_v46 = vpop.xlane.xlu1 %3492  ;;  %v3624_v15 = vsub.f32 %v12939_v50, %v13271_v53  ;;  %v3872_v6 = vsub.f32 %v12969_v41, %v13279_v13 }
 0x66b   : > { %v13310_v44 = vadd.f32 %v13211_v60, %v3939_v22  ;;  %v13321_v18 = vmul.f32 0.0078125, %v3493_v46  ;;  %v3594_v3 = vmul.f32 %v13315_v17, %v13315_v17  ;;  %v3873_v13 = vsub.f32 %v12976_v45, %v13289_v34 }
 0x66c   : > { %9908 = vrsqrt.f32 %v3889_v8  ;;  %v3739_v25 = vpop.xlane.xlu0 %3738 }
 0x66d   : > { %v4007_v38 = vpack.c.bf16 %v13310_v44, %v13307_v2  ;;  %v13323_v10 = vmul.f32 0.0078125, %v3739_v25  ;;  %v3595_v14 = vmul.f32 %v13321_v18, %v13321_v18 }
 0x66e   : > { %v3741_v59 = vpop.xlane.xlu1 %3740 }
 0x66f   : > { %4238 = vmatprep.mubr.bf16.mxu1 %v4007_v38  ;;  %v13333_v63 = vmul.f32 0.0078125, %v3741_v59  ;;  %v3842_v8 = vmul.f32 %v13323_v10, %v13323_v10 }
 0x670   : > { %v3555_v19 = vpop.xlane.xlu0 %3554  ;;  %4239 = vmatmul.mubr.bf16.gmra.mrb[40].mxu1 %v4006_v21  ;;  %v9903_v32 = vpop.eup %9902 }
 0x671   : > { %v3578_v52 = vmul.f32 0.0078125, %v3555_v19  ;;  %v3672_v25 = vmul.f32 %v9903_v32, %v3624_v15  ;;  %v3843_v59 = vmul.f32 %v13333_v63, %v13333_v63 }
 0x672   : > { %v9905_v9 = vpop.eup %9904  ;;  %v3557_v42 = vpop.xlane.xlu1 %3556 }
 0x673   : > { %v3610_v47 = vsub.f32 %v3578_v52, %v3594_v3  ;;  %v3579_v22 = vmul.f32 0.0078125, %v3557_v42  ;;  %v3673_v48 = vmul.f32 %v9905_v9, %v3625_v31 }
 0x674   : > { %v9907_v62 = vpop.eup %9906  ;;  %v3803_v46 = vpop.xlane.xlu0 %3802 }
 0x675   : > { %v3642_v38 = vadd.f32 0.1, %v3610_v47  ;;  %v3611_v50 = vsub.f32 %v3579_v22, %v3595_v14  ;;  %v3826_v53 = vmul.f32 0.0078125, %v3803_v46  ;;  %v3920_v21 = vmul.f32 %v9907_v62, %v3872_v6 }
 0x676   : > { %v9909_v41 = vpop.eup %9908  ;;  %v3805_v19 = vpop.xlane.xlu1 %3804  ;;  %v3693_v9 = vmul.f32 %v13194_v58, %v3673_v48  ;;  %v3692_v47 = vmul.f32 %v13194_v58, %v3672_v25 }
 0x677   : > { %v3643_v3 = vadd.f32 0.1, %v3611_v50  ;;  %v3858_v31 = vsub.f32 %v3826_v53, %v3842_v8  ;;  %v3827_v52 = vmul.f32 0.0078125, %v3805_v19  ;;  %9910 = vrsqrt.f32 %v3642_v38 }
 0x678   : > { %v3921_v42 = vmul.f32 %v9909_v41, %v3873_v13  ;;  %v3940_v32 = vmul.f32 %v13199_v54, %v3920_v21  ;;  %v13348_v62 = vadd.f32 %v13206_v43, %v3693_v9  ;;  %v13357_v38 = vadd.f32 %v13206_v43, %v3692_v47 }
 0x679   : > { %9912 = vrsqrt.f32 %v3643_v3  ;;  %v3890_v15 = vadd.f32 0.1, %v3858_v31  ;;  %v3859_v6 = vsub.f32 %v3827_v52, %v3843_v59  ;;  %v3495_v14 = vpop.xlane.xlu0 %3494  ;;  %v3627_v3 = vsub.f32 %v13013_v1, %v13321_v18 }
 0x67a   : > { %v3941_v45 = vmul.f32 %v13199_v54, %v3921_v42  ;;  %v13351_v48 = vadd.f32 %v13211_v60, %v3940_v32  ;;  %v13359_v25 = vmul.f32 0.0078125, %v3495_v14  ;;  %v4008_v21 = vpack.c.bf16 %v13348_v62, %v13357_v38 }
 0x67b   : > { %9914 = vrsqrt.f32 %v3890_v15  ;;  %v3891_v34 = vadd.f32 0.1, %v3859_v6  ;;  %v3497_v22 = vpop.xlane.xlu1 %3496  ;;  %v3626_v42 = vsub.f32 %v12999_v26, %v13315_v17  ;;  %v3874_v32 = vsub.f32 %v13033_v11, %v13323_v10 }
 0x67c   : > { %v13354_v8 = vadd.f32 %v13211_v60, %v3941_v45  ;;  %v13365_v41 = vmul.f32 0.0078125, %v3497_v22  ;;  %v3596_v31 = vmul.f32 %v13359_v25, %v13359_v25  ;;  %v3875_v10 = vsub.f32 %v13039_v40, %v13333_v63 }
 0x67d   : > { %9916 = vrsqrt.f32 %v3891_v34  ;;  %v3743_v46 = vpop.xlane.xlu0 %3742 }
 0x67e   : > { %v4009_v50 = vpack.c.bf16 %v13354_v8, %v13351_v48  ;;  %v13367_v13 = vmul.f32 0.0078125, %v3743_v46  ;;  %v3597_v14 = vmul.f32 %v13365_v41, %v13365_v41 }
 0x67f   : > { %v3745_v53 = vpop.xlane.xlu1 %3744 }
 0x680   : > { %4248 = vmatprep.mubr.bf16.mxu1 %v4009_v50  ;;  %v13377_v15 = vmul.f32 0.0078125, %v3745_v53  ;;  %v3844_v34 = vmul.f32 %v13367_v13, %v13367_v13 }
 0x681   : > { %v3559_v59 = vpop.xlane.xlu0 %3558  ;;  %4249 = vmatmul.mubr.bf16.gmra.mrb[44].mxu1 %v4008_v21  ;;  %v9911_v19 = vpop.eup %9910 }
 0x682   : > { %v3580_v52 = vmul.f32 0.0078125, %v3559_v59  ;;  %v3674_v46 = vmul.f32 %v9911_v19, %v3626_v42  ;;  %v3845_v53 = vmul.f32 %v13377_v15, %v13377_v15 }
 0x683   : > { %v9913_v9 = vpop.eup %9912  ;;  %v3561_v6 = vpop.xlane.xlu1 %3560 }
 0x684   : > { %v3612_v47 = vsub.f32 %v3580_v52, %v3596_v31  ;;  %v3581_v45 = vmul.f32 0.0078125, %v3561_v6  ;;  %v3675_v1 = vmul.f32 %v9913_v9, %v3627_v3 }
 0x685   : > { %v9915_v18 = vpop.eup %9914  ;;  %v3807_v22 = vpop.xlane.xlu0 %3806 }
 0x686   : > { %v3644_v50 = vadd.f32 0.1, %v3612_v47  ;;  %v3613_v26 = vsub.f32 %v3581_v45, %v3597_v14  ;;  %v3828_v17 = vmul.f32 0.0078125, %v3807_v22  ;;  %v3922_v21 = vmul.f32 %v9915_v18, %v3874_v32 }
 0x687   : > { %v9917_v11 = vpop.eup %9916  ;;  %v3809_v59 = vpop.xlane.xlu1 %3808  ;;  %v3695_v9 = vmul.f32 %v13194_v58, %v3675_v1  ;;  %v3694_v47 = vmul.f32 %v13194_v58, %v3674_v46 }
 0x688   : > { %v3645_v31 = vadd.f32 0.1, %v3613_v26  ;;  %v3860_v3 = vsub.f32 %v3828_v17, %v3844_v34  ;;  %v3829_v52 = vmul.f32 0.0078125, %v3809_v59  ;;  %9918 = vrsqrt.f32 %v3644_v50 }
 0x689   : > { %v3923_v6 = vmul.f32 %v9917_v11, %v3875_v10  ;;  %v3942_v19 = vmul.f32 %v13199_v54, %v3922_v21  ;;  %v13392_v18 = vadd.f32 %v13206_v43, %v3695_v9  ;;  %v13401_v50 = vadd.f32 %v13206_v43, %v3694_v47 }
 0x68a   : > { %9920 = vrsqrt.f32 %v3645_v31  ;;  %v3892_v42 = vadd.f32 0.1, %v3860_v3  ;;  %v3861_v32 = vsub.f32 %v3829_v52, %v3845_v53  ;;  %v3499_v14 = vpop.xlane.xlu0 %3498  ;;  %v3629_v31 = vsub.f32 %v13089_v51, %v13365_v41 }
 0x68b   : > { %v3943_v40 = vmul.f32 %v13199_v54, %v3923_v6  ;;  %v13395_v1 = vadd.f32 %v13211_v60, %v3942_v19  ;;  %v13403_v46 = vmul.f32 0.0078125, %v3499_v14  ;;  %v4010_v21 = vpack.c.bf16 %v13392_v18, %v13401_v50 }
 0x68c   : > { %9922 = vrsqrt.f32 %v3892_v42  ;;  %v3893_v63 = vadd.f32 0.1, %v3861_v32  ;;  %v3501_v45 = vpop.xlane.xlu1 %3500  ;;  %v3628_v6 = vsub.f32 %v13069_v35, %v13359_v25  ;;  %v3876_v19 = vsub.f32 %v13100_v36, %v13367_v13 }
 0x68d   : > { %v13398_v34 = vadd.f32 %v13211_v60, %v3943_v40  ;;  %v13409_v11 = vmul.f32 0.0078125, %v3501_v45  ;;  %v3598_v3 = vmul.f32 %v13403_v46, %v13403_v46  ;;  %v3877_v13 = vsub.f32 %v13105_v27, %v13377_v15 }
 0x68e   : > { %9924 = vrsqrt.f32 %v3893_v63  ;;  %v3747_v22 = vpop.xlane.xlu0 %3746 }
 0x68f   : > { %v4011_v26 = vpack.c.bf16 %v13398_v34, %v13395_v1  ;;  %v13411_v10 = vmul.f32 0.0078125, %v3747_v22  ;;  %v3599_v14 = vmul.f32 %v13409_v11, %v13409_v11 }
 0x690   : > { %v3749_v17 = vpop.xlane.xlu1 %3748 }
 0x691   : > { %4258 = vmatprep.mubr.bf16.mxu1 %v4011_v26  ;;  %v13421_v42 = vmul.f32 0.0078125, %v3749_v17  ;;  %v3846_v63 = vmul.f32 %v13411_v10, %v13411_v10 }
 0x692   : > { %v3563_v53 = vpop.xlane.xlu0 %3562  ;;  %4259 = vmatmul.mubr.bf16.gmra.mrb[48].mxu1 %v4010_v21  ;;  %v9919_v59 = vpop.eup %9918 }
 0x693   : > { %v3582_v52 = vmul.f32 0.0078125, %v3563_v53  ;;  %v3676_v22 = vmul.f32 %v9919_v59, %v3628_v6  ;;  %v3847_v17 = vmul.f32 %v13421_v42, %v13421_v42 }
 0x694   : > { %v9921_v9 = vpop.eup %9920  ;;  %v3565_v32 = vpop.xlane.xlu1 %3564 }
 0x695   : > { %v3614_v47 = vsub.f32 %v3582_v52, %v3598_v3  ;;  %v3583_v40 = vmul.f32 0.0078125, %v3565_v32  ;;  %v3677_v51 = vmul.f32 %v9921_v9, %v3629_v31 }
 0x696   : > { %v9923_v41 = vpop.eup %9922  ;;  %v3811_v45 = vpop.xlane.xlu0 %3810 }
 0x697   : > { %v3646_v26 = vadd.f32 0.1, %v3614_v47  ;;  %v3615_v35 = vsub.f32 %v3583_v40, %v3599_v14  ;;  %v3830_v25 = vmul.f32 0.0078125, %v3811_v45  ;;  %v3924_v21 = vmul.f32 %v9923_v41, %v3876_v19 }
 0x698   : > { %v9925_v36 = vpop.eup %9924  ;;  %v3813_v53 = vpop.xlane.xlu1 %3812  ;;  %v3697_v9 = vmul.f32 %v13194_v58, %v3677_v51  ;;  %v3696_v47 = vmul.f32 %v13194_v58, %v3676_v22 }
 0x699   : > { %v3647_v3 = vadd.f32 0.1, %v3615_v35  ;;  %v3862_v31 = vsub.f32 %v3830_v25, %v3846_v63  ;;  %v3831_v52 = vmul.f32 0.0078125, %v3813_v53  ;;  %9926 = vrsqrt.f32 %v3646_v26 }
 0x69a   : > { %v3503_v32 = vpop.xlane.xlu0 %3502  ;;  %v3925_v59 = vmul.f32 %v9925_v36, %v3877_v13  ;;  %v3944_v6 = vmul.f32 %v13199_v54, %v3924_v21  ;;  %v13436_v41 = vadd.f32 %v13206_v43, %v3697_v9  ;;  %v13445_v35 = vadd.f32 %v13206_v43, %v3696_v47 }
 0x69b   : > { %9928 = vrsqrt.f32 %v3647_v3  ;;  %v3894_v19 = vadd.f32 0.1, %v3862_v31  ;;  %v3863_v14 = vsub.f32 %v3831_v52, %v3847_v17  ;;  %v13451_v13 = vmul.f32 0.0078125, %v3503_v32 }
 0x69c   : > { %v3505_v27 = vpop.xlane.xlu1 %3504  ;;  %v3945_v15 = vmul.f32 %v13199_v54, %v3925_v59  ;;  %v13439_v51 = vadd.f32 %v13211_v60, %v3944_v6  ;;  %v4012_v36 = vpack.c.bf16 %v13436_v41, %v13445_v35  ;;  %v3631_v52 = vsub.f32 %v13123_v61, %v13409_v11 }
 0x69d   : > { %9930 = vrsqrt.f32 %v3894_v19  ;;  %v3895_v40 = vadd.f32 0.1, %v3863_v14  ;;  %v3521_v9 = vmul.f32 0.0078125, %v3505_v27  ;;  %v3630_v19 = vsub.f32 %v13119_v5, %v13403_v46 }
 0x69e   : > { %v3751_v63 = vpop.xlane.xlu0 %3750  ;;  %16624 = vst [vmem:[#allocation79_spill] sm:$0xff] %v13439_v51  ;;  %v13442_v45 = vadd.f32 %v13211_v60, %v3945_v15  ;;  %v3878_v32 = vsub.f32 %v13127_v57, %v13411_v10 }
 0x69f   : > { %9932 = vrsqrt.f32 %v3895_v40  ;;  %v3768_v26 = vmul.f32 0.0078125, %v3751_v63  ;;  %v3600_v40 = vmul.f32 %v13451_v13, %v13451_v13  ;;  %v3601_v5 = vmul.f32 %v3521_v9, %v3521_v9 }
 0x6a0   : > { %16625 = vst [vmem:[#allocation89_spill] sm:$0xff] %v13442_v45  ;;  %v3753_v22 = vpop.xlane.xlu1 %3752  ;;  %v4013_v25 = vpack.c.bf16 %v13442_v45, %v13439_v51 }
 0x6a1   : > { %v3769_v21 = vmul.f32 0.0078125, %v3753_v22  ;;  %v3848_v53 = vmul.f32 %v3768_v26, %v3768_v26 }
 0x6a2   : > { %4268 = vmatprep.mubr.bf16.mxu1 %v4013_v25  ;;  %v3815_v17 = vpop.xlane.xlu0 %3814 }
 0x6a3   : > { %v3832_v3 = vmul.f32 0.0078125, %v3815_v17  ;;  %4269 = vmatmul.mubr.bf16.gmra.mrb[52].mxu1 %v4012_v36  ;;  %v9927_v31 = vpop.eup %9926  ;;  %v3849_v14 = vmul.f32 %v3769_v21, %v3769_v21  ;;  %v3879_v17 = vsub.f32 %v13131_v37, %v13421_v42 }
 0x6a4   : > { %v3817_v59 = vpop.xlane.xlu1 %3816  ;;  %v3678_v27 = vmul.f32 %v9927_v31, %v3630_v19 }
 0x6a5   : > { %v9929_v6 = vpop.eup %9928  ;;  %v3864_v47 = vsub.f32 %v3832_v3, %v3848_v53  ;;  %v3833_v15 = vmul.f32 0.0078125, %v3817_v59 }
 0x6a6   : > { %v3567_v63 = vpop.xlane.xlu0 %3566  ;;  %v3679_v22 = vmul.f32 %v9929_v6, %v3631_v52  ;;  %v3698_v31 = vmul.f32 %v13194_v58, %v3678_v27 }
 0x6a7   : > { %v9931_v25 = vpop.eup %9930  ;;  %v3896_v36 = vadd.f32 0.1, %v3864_v47  ;;  %v3865_v61 = vsub.f32 %v3833_v15, %v3849_v14  ;;  %v3584_v11 = vmul.f32 0.0078125, %v3567_v63 }
 0x6a8   : > { %v3569_v46 = vpop.xlane.xlu1 %3568  ;;  %v3926_v53 = vmul.f32 %v9931_v25, %v3878_v32  ;;  %v3699_v3 = vmul.f32 %v13194_v58, %v3679_v22  ;;  %v13477_v32 = vadd.f32 %v13206_v43, %v3698_v31  ;;  %v3881_v22 = vsub.f32 %v13155_v28, %v3769_v21 }
 0x6a9   : > { %v9933_v59 = vpop.eup %9932  ;;  %9934 = vrsqrt.f32 %v3896_v36  ;;  %v3897_v57 = vadd.f32 0.1, %v3865_v61  ;;  %v3616_v10 = vsub.f32 %v3584_v11, %v3600_v40  ;;  %v3585_v45 = vmul.f32 0.0078125, %v3569_v46 }
 0x6aa   : > { %v3927_v51 = vmul.f32 %v9933_v59, %v3879_v17  ;;  %v3946_v52 = vmul.f32 %v13199_v54, %v3926_v53  ;;  %v13468_v19 = vadd.f32 %v13206_v43, %v3699_v3  ;;  %v3880_v40 = vsub.f32 %v13151_v12, %v3768_v26 }
 0x6ab   : > { %9936 = vrsqrt.f32 %v3897_v57  ;;  %v3648_v6 = vadd.f32 0.1, %v3616_v10  ;;  %v3617_v14 = vsub.f32 %v3585_v45, %v3601_v5  ;;  %v3632_v61 = vsub.f32 %v13143_v33, %v13451_v13 }
 0x6ac   : > { %v3947_v37 = vmul.f32 %v13199_v54, %v3927_v51  ;;  %v13471_v47 = vadd.f32 %v13211_v60, %v3946_v52  ;;  %v4014_v51 = vpack.c.bf16 %v13468_v19, %v13477_v32  ;;  %v3633_v5 = vsub.f32 %v13147_v20, %v3521_v9 }
 0x6ad   : > { %9938 = vrsqrt.f32 %v3648_v6  ;;  %v3649_v42 = vadd.f32 0.1, %v3617_v14  ;;  %v13518_v10 = vadd.f32 %v13225_v39, %v12696_v29  ;;  %v13523_v6 = vadd.f32 %v13219_v4, %v12701_v16 }
 0x6ae   : > { %v13474_v15 = vadd.f32 %v13211_v60, %v3947_v37  ;;  %v16627_v37 = vld [vmem:[#allocation52_spill] sm:$0xff] }
 0x6af   : > { %9940 = vrsqrt.f32 %v3649_v42 }
 0x6b0   : > { %v4015_v45 = vpack.c.bf16 %v13474_v15, %v13471_v47 }
 0x6b2   : > { %4278 = vmatprep.mubr.bf16.mxu1 %v4015_v45 }
 0x6b3   : > { %v9935_v63 = vpop.eup %9934  ;;  %4279 = vmatmul.mubr.bf16.gmra.mrb[56].mxu1 %v4014_v51  ;;  %v16629_v51 = vld [vmem:[#allocation85_spill] sm:$0xff] }
 0x6b4   : > { %v3928_v25 = vmul.f32 %v9935_v63, %v3880_v40  ;;  %v16630_v40 = vld [vmem:[#allocation81_spill] sm:$0xff] }
 0x6b5   : > { %v9937_v36 = vpop.eup %9936  ;;  %v13537_v63 = vadd.f32 %v16630_v40, %v16629_v51 }
 0x6b6   : > { %v3929_v11 = vmul.f32 %v9937_v36, %v3881_v22  ;;  %v3948_v27 = vmul.f32 %v13199_v54, %v3928_v25 }
 0x6b7   : > { %v9939_v17 = vpop.eup %9938  ;;  %16631 = vst [vmem:[#allocation52_spill] sm:$0xff] %v13537_v63 }
 0x6b8   : > { %v3949_v46 = vmul.f32 %v13199_v54, %v3929_v11  ;;  %v3680_v53 = vmul.f32 %v9939_v17, %v3632_v61  ;;  %v13491_v26 = vadd.f32 %v13211_v60, %v3948_v27 }
 0x6b9   : > { %v9941_v12 = vpop.eup %9940 }
 0x6ba   : > { %v13494_v28 = vadd.f32 %v13211_v60, %v3949_v46  ;;  %v3681_v21 = vmul.f32 %v9941_v12, %v3633_v5  ;;  %v3700_v3 = vmul.f32 %v13194_v58, %v3680_v53  ;;  %v16626_v60 = vld [vmem:[#allocation84_spill] sm:$0xff]  ;;  %v16632_v53 = vld [vmem:[#allocation53_spill] sm:$0xff] }
 0x6bb   : > { %v13510_v59 = vrot.slane %v13191_v23, %v16626_v60  ;;  %v13514_v57 = vrot.slane %v13196_v0, %v16626_v60  ;;  %v16628_v0 = vld [vmem:[#allocation78_spill] sm:$0xff]  ;;  %v13548_v12 = vadd.f32 %v13269_v30, %v16632_v53  ;;  %v16660_v60 = vld [vmem:[#allocation64_spill] sm:$0xff] }
 0x6bc   : > { %v4017_v33 = vpack.c.bf16 %v13494_v28, %v13491_v26  ;;  %v3701_v13 = vmul.f32 %v13194_v58, %v3681_v21  ;;  %v13501_v20 = vadd.f32 %v13206_v43, %v3700_v3  ;;  %v13529_v42 = vadd.f32 %v16628_v0, %v16627_v37  ;;  %v16638_v37 = vld [vmem:[#allocation54_spill] sm:$0xff] }
 0x6bd   : > { %16633 = vst [vmem:[#allocation78_spill] sm:$0xff] %v13548_v12  ;;  %v13562_v30 = vadd.f32 %v13266_v24, %v16638_v37 }
 0x6be   : > { %4288 = vmatprep.mubr.bf16.mxu1 %v4017_v33  ;;  %v13504_v54 = vadd.f32 %v13206_v43, %v3701_v13  ;;  %v16634_v33 = vld [vmem:[#allocation86_spill] sm:$0xff] }
 0x6bf   : > { %v13553_v13 = vadd.f32 %v13260_v56, %v16634_v33  ;;  %16639 = vst [vmem:[#allocation53_spill] sm:$0xff] %v13562_v30  ;;  %v9145_v33 = vld [vmem:[#allocation7 + $0x310] ss:$8 sps:$4 sm:$0xff]  }
 0x6c0   : > { %v4016_v9 = vpack.c.bf16 %v13504_v54, %v13501_v20 }
 0x6c1   : > { %16635 = vst [vmem:[#allocation85_spill] sm:$0xff] %v13553_v13 }
 0x6c2   : > { %4289 = vmatmul.mubr.bf16.gmra.mrb[60].mxu1 %v4016_v9 }
 0x721   : > { %v4220_v58 = vpop.f32.mrb[32].mxu1 }
 0x722   : > { %v4221_v43 = vadd.f32 %v4220_v58, %v13510_v59  ;;  %v4222_v52 = vpop.f32.mrb[33].mxu1 }
 0x723   : > { %v4223_v14 = vadd.f32 %v4222_v52, %v13514_v57  ;;  %v4224_v23 = vpop.f32.mrb[34].mxu1 }
 0x724   : > { %v4299_v31 = vadd.f32 %v4221_v43, %v13518_v10  ;;  %v4225_v45 = vadd.f32 %v4224_v23, %v13510_v59  ;;  %v4226_v29 = vpop.f32.mrb[35].mxu1  ;;  %v16636_v43 = vld [vmem:[#allocation57_spill] sm:$0xff] }
 0x725   : > { %v13533_v39 = vadd.f32 %v4223_v14, %v13523_v6  ;;  %v4227_v16 = vadd.f32 %v4226_v29, %v13514_v57  ;;  %v13557_v52 = vadd.f32 %v13263_v49, %v16636_v43 }
 0x726   : > { %v8621_v4 = vmul.f32 -1.442695, %v4299_v31  ;;  %v4301_v22 = vadd.f32 %v4225_v45, %v13529_v42 }
 0x727   : > { %v8622_v25 = vmul.f32 -1.442695, %v13533_v39  ;;  %v13543_v36 = vadd.f32 %v4227_v16, %v13537_v63  ;;  %16637 = vst [vmem:[#allocation81_spill] sm:$0xff] %v13557_v52 }
 0x728   : > { %9942 = vpow2.f32 %v8621_v4  ;;  %v8623_v61 = vmul.f32 -1.442695, %v4301_v22 }
 0x729   : > { %9944 = vpow2.f32 %v8622_v25  ;;  %v8624_v11 = vmul.f32 -1.442695, %v13543_v36 }
 0x72a   : > { %9946 = vpow2.f32 %v8623_v61 }
 0x72b   : > { %9948 = vpow2.f32 %v8624_v11 }
 0x732   : > { %v9943_v27 = vpop.eup %9942  ;;  %v4230_v17 = vpop.f32.mrb[36].mxu1 }
 0x733   : > { %v9945_v5 = vpop.eup %9944  ;;  %v4427_v46 = vadd.f32 1.0, %v9943_v27  ;;  %v4231_v21 = vadd.f32 %v4230_v17, %v13510_v59  ;;  %v4232_v3 = vpop.f32.mrb[37].mxu1  ;;  %v9142_v17 = vld [vmem:[#allocation7 + $0x300] ss:$8 sps:$4 sm:$0xff]  }
 0x734   : > { %v9947_v9 = vpop.eup %9946  ;;  %v4428_v58 = vadd.f32 1.0, %v9945_v5  ;;  %v4233_v14 = vadd.f32 %v4232_v3, %v13514_v57  ;;  %v4234_v23 = vpop.f32.mrb[38].mxu1  ;;  %v9144_v5 = vld [vmem:[#allocation7 + $0x304] ss:$8 sps:$4 sm:$0xff]  }
 0x735   : > { %v9949_v0 = vpop.eup %9948  ;;  %9950 = vrcp.f32 %v4427_v46  ;;  %v4429_v45 = vadd.f32 1.0, %v9947_v9  ;;  %v13565_v29 = vadd.f32 %v4231_v21, %v13548_v12  ;;  %v4235_v56 = vadd.f32 %v4234_v23, %v13510_v59  ;;  %v4236_v51 = vpop.f32.mrb[39].mxu1  ;;  %5267 = vmatprep.subr.bf16.mxu0 %v9144_v5  ;;  %v9147_v9 = vld [vmem:[#allocation7 + $0x314] ss:$8 sps:$4 sm:$0xff]  }
 0x736   : > { %9952 = vrcp.f32 %v4428_v58  ;;  %v4430_v40 = vadd.f32 1.0, %v9949_v0  ;;  %v13569_v49 = vadd.f32 %v4233_v14, %v13557_v52  ;;  %v4237_v16 = vadd.f32 %v4236_v51, %v13514_v57  ;;  %5268 = vmatpush1.bf16.msra.mxu0 %v9142_v17  ;;  %v16640_v23 = vld [vmem:[#allocation55_spill] sm:$0xff]  ;;  %v16646_v17 = vld [vmem:[#allocation58_spill] sm:$0xff] }
 0x737   : > { %9954 = vrcp.f32 %v4429_v45  ;;  %v8625_v24 = vmul.f32 -1.442695, %v13565_v29  ;;  %v13574_v4 = vadd.f32 %v4235_v56, %v13553_v13  ;;  %v13589_v37 = vadd.f32 %v13313_v7, %v16640_v23  ;;  %v16642_v45 = vld [vmem:[#allocation56_spill] sm:$0xff]  ;;  %5269 = vmatprep.subr.bf16.mxu0 %v9147_v9 }
 0x738   : > { %9956 = vrcp.f32 %v4430_v40  ;;  %v8626_v25 = vmul.f32 -1.442695, %v13569_v49  ;;  %v13578_v61 = vadd.f32 %v4237_v16, %v13562_v30  ;;  %v13593_v56 = vadd.f32 %v13304_v55, %v16642_v45  ;;  %v16644_v16 = vld [vmem:[#allocation61_spill] sm:$0xff] }
 0x739   : > { %9958 = vpow2.f32 %v8625_v24  ;;  %v8627_v11 = vmul.f32 -1.442695, %v13574_v4  ;;  %16641 = vst [vmem:[#allocation86_spill] sm:$0xff] %v13589_v37  ;;  %v13598_v24 = vadd.f32 %v13307_v2, %v16644_v16  ;;  %v13607_v5 = vadd.f32 %v13310_v44, %v16646_v17  ;;  %v9148_v2 = vld [vmem:[#allocation7 + $0x320] ss:$8 sps:$4 sm:$0xff]  }
 0x73a   : > { %9960 = vpow2.f32 %v8626_v25  ;;  %v8628_v27 = vmul.f32 -1.442695, %v13578_v61  ;;  %16643 = vst [vmem:[#allocation57_spill] sm:$0xff] %v13593_v56  ;;  %5270 = vmatpush1.bf16.msra.mxu0 %v9145_v33  ;;  %v9154_v17 = vld [vmem:[#allocation7 + $0x340] ss:$8 sps:$4 sm:$0xff]  }
 0x73b   : > { %9962 = vpow2.f32 %v8627_v11  ;;  %16645 = vst [vmem:[#allocation54_spill] sm:$0xff] %v13598_v24  ;;  %16647 = vst [vmem:[#allocation55_spill] sm:$0xff] %v13607_v5  ;;  %v16690_v30 = vld [vmem:[#allocation49_spill] sm:$0xff] }
 0x73c   : > { %9964 = vpow2.f32 %v8628_v27 }
 0x73f   : > { %v9951_v46 = vpop.eup %9950 }
 0x740   : > { %v9953_v53 = vpop.eup %9952  ;;  %v13582_v21 = vmul.f32 %v9951_v46, %v4299_v31 }
 0x741   : > { %v9955_v3 = vpop.eup %9954  ;;  %v13602_v7 = vmul.f32 %v9953_v53, %v13533_v39 }
 0x742   : > { %v9957_v58 = vpop.eup %9956  ;;  %4555 = vadd.xlane.f32.xlu0 %v13582_v21  ;;  %v13585_v43 = vmul.f32 %v9955_v3, %v4301_v22  ;;  %v9150_v3 = vld [vmem:[#allocation7 + $0x324] ss:$8 sps:$4 sm:$0xff]  }
 0x743   : > { %v9959_v14 = vpop.eup %9958  ;;  %v4240_v0 = vpop.f32.mrb[40].mxu1  ;;  %v13610_v46 = vmul.f32 %v9957_v58, %v13543_v36  ;;  %5271 = vmatprep.subr.bf16.mxu0 %v9150_v3  ;;  %v9153_v58 = vld [vmem:[#allocation7 + $0x334] ss:$8 sps:$4 sm:$0xff]  }
 0x744   : > { %v9961_v31 = vpop.eup %9960  ;;  %v4431_v51 = vadd.f32 1.0, %v9959_v14  ;;  %v4241_v40 = vadd.f32 %v4240_v0, %v13510_v59  ;;  %v4242_v22 = vpop.f32.mrb[41].mxu1  ;;  %4557 = vadd.xlane.f32.xlu1 %v13585_v43  ;;  %5272 = vmatpush1.bf16.msra.mxu0 %v9148_v2  ;;  %v9159_v2 = vld [vmem:[#allocation7 + $0x354] ss:$8 sps:$4 sm:$0xff]  }
 0x745   : > { %v9963_v25 = vpop.eup %9962  ;;  %v4432_v11 = vadd.f32 1.0, %v9961_v31  ;;  %v4243_v55 = vadd.f32 %v4242_v22, %v13514_v57  ;;  %v4244_v27 = vpop.f32.mrb[42].mxu1  ;;  %v4603_v31 = vmul.f32 %v13582_v21, %v13582_v21  ;;  %5273 = vmatprep.subr.bf16.mxu0 %v9153_v58  ;;  %v9156_v22 = vld [vmem:[#allocation7 + $0x344] ss:$8 sps:$4 sm:$0xff]   ;;  %v4852_v3 = vmul.f32 %v13610_v46, %v13610_v46 }
 0x746   : > { %v9965_v9 = vpop.eup %9964  ;;  %9966 = vrcp.f32 %v4431_v51  ;;  %v4433_v14 = vadd.f32 1.0, %v9963_v25  ;;  %v13613_v39 = vadd.f32 %v4241_v40, %v13589_v37  ;;  %v4245_v53 = vadd.f32 %v4244_v27, %v13510_v59  ;;  %v4246_v33 = vpop.f32.mrb[43].mxu1  ;;  %4803 = vadd.xlane.f32.xlu0 %v13602_v7  ;;  %v9151_v51 = vld [vmem:[#allocation7 + $0x330] ss:$8 sps:$4 sm:$0xff]  }
 0x747   : > { %9968 = vrcp.f32 %v4432_v11  ;;  %v4434_v23 = vadd.f32 1.0, %v9965_v9  ;;  %v13618_v44 = vadd.f32 %v4243_v55, %v13598_v24  ;;  %v4247_v36 = vadd.f32 %v4246_v33, %v13514_v57  ;;  %v10592_v37 = vld [vmem:[#allocation10 + $0x18] sm:$0x7f] }
 0x748   : > { %9970 = vrcp.f32 %v4433_v14  ;;  %v8629_v0 = vmul.f32 -1.442695, %v13613_v39  ;;  %v13623_v45 = vadd.f32 %v4245_v53, %v13593_v56  ;;  %4805 = vadd.xlane.f32.xlu1 %v13610_v46  ;;  %v4604_v11 = vmul.f32 %v13585_v43, %v13585_v43  ;;  %5274 = vmatpush1.bf16.msra.mxu0 %v9151_v51  ;;  %v9157_v14 = vld [vmem:[#allocation7 + $0x350] ss:$8 sps:$4 sm:$0xff]  }
 0x749   : > { %9972 = vrcp.f32 %v4434_v23  ;;  %v8630_v40 = vmul.f32 -1.442695, %v13618_v44  ;;  %v13630_v16 = vadd.f32 %v4247_v36, %v13607_v5  ;;  %v4851_v27 = vmul.f32 %v13602_v7, %v13602_v7  ;;  %5275 = vmatprep.subr.bf16.mxu0 %v9156_v22  ;;  %v9162_v23 = vld [vmem:[#allocation7 + $0x364] ss:$8 sps:$4 sm:$0xff]   ;;  %v16648_v51 = vld [vmem:[#allocation59_spill] sm:$0xff] }
 0x74a   : > { %9974 = vpow2.f32 %v8629_v0  ;;  %v8631_v25 = vmul.f32 -1.442695, %v13623_v45  ;;  %4619 = vadd.xlane.f32.xlu0 %v4603_v31 }
 0x74b   : > { %9976 = vpow2.f32 %v8630_v40  ;;  %v8632_v55 = vmul.f32 -1.442695, %v13630_v16  ;;  %v13649_v40 = vadd.f32 %v13357_v38, %v16648_v51 }
 0x74c   : > { %9978 = vpow2.f32 %v8631_v25  ;;  %4621 = vadd.xlane.f32.xlu1 %v4604_v11  ;;  %5276 = vmatpush1.bf16.msra.mxu0 %v9154_v17  ;;  %v16650_v25 = vld [vmem:[#allocation60_spill] sm:$0xff] }
 0x74d   : > { %9980 = vpow2.f32 %v8632_v55  ;;  %5277 = vmatprep.subr.bf16.mxu0 %v9159_v2  ;;  %16649 = vst [vmem:[#allocation56_spill] sm:$0xff] %v13649_v40  ;;  %v13653_v11 = vadd.f32 %v13348_v62, %v16650_v25  ;;  %v16652_v2 = vld [vmem:[#allocation65_spill] sm:$0xff] }
 0x74e   : > { %4867 = vadd.xlane.f32.xlu0 %v4851_v27 }
 0x74f   : > { %16651 = vst [vmem:[#allocation61_spill] sm:$0xff] %v13653_v11 }
 0x750   : > { %v9967_v9 = vpop.eup %9966  ;;  %4869 = vadd.xlane.f32.xlu1 %v4852_v3  ;;  %5278 = vmatpush1.bf16.msra.mxu0 %v9157_v14 }
 0x751   : > { %v9969_v53 = vpop.eup %9968  ;;  %v13641_v33 = vmul.f32 %v9967_v9, %v13565_v29  ;;  %v9160_v29 = vld [vmem:[#allocation7 + $0x360] ss:$8 sps:$4 sm:$0xff]   ;;  %5279 = vmatprep.subr.bf16.mxu0 %v9162_v23  ;;  %v9165_v9 = vld [vmem:[#allocation7 + $0x374] ss:$8 sps:$4 sm:$0xff]  }
 0x752   : > { %v9971_v36 = vpop.eup %9970  ;;  %v13662_v38 = vmul.f32 %v9969_v53, %v13569_v49 }
 0x753   : > { %v9973_v58 = vpop.eup %9972  ;;  %4559 = vadd.xlane.f32.xlu0 %v13641_v33  ;;  %v13645_v0 = vmul.f32 %v9971_v36, %v13574_v4  ;;  %v13658_v4 = vadd.f32 %v13351_v48, %v16652_v2 }
 0x754   : > { %v9975_v31 = vpop.eup %9974  ;;  %v4250_v22 = vpop.f32.mrb[44].mxu1  ;;  %v13670_v48 = vmul.f32 %v9973_v58, %v13578_v61  ;;  %5280 = vmatpush1.bf16.msra.mxu0 %v9160_v29  ;;  %v9163_v61 = vld [vmem:[#allocation7 + $0x370] ss:$8 sps:$4 sm:$0xff]  }
 0x755   : > { %v9977_v55 = vpop.eup %9976  ;;  %v4435_v27 = vadd.f32 1.0, %v9975_v31  ;;  %v4251_v17 = vadd.f32 %v4250_v22, %v13510_v59  ;;  %16653 = vst [vmem:[#allocation58_spill] sm:$0xff] %v13658_v4  ;;  %v4252_v3 = vpop.f32.mrb[45].mxu1  ;;  %4561 = vadd.xlane.f32.xlu1 %v13645_v0  ;;  %v16654_v31 = vld [vmem:[#allocation62_spill] sm:$0xff]  ;;  %5281 = vmatprep.subr.bf16.mxu0 %v9165_v9  ;;  %v4853_v9 = vmul.f32 %v13662_v38, %v13662_v38 }
 0x756   : > { %v9979_v62 = vpop.eup %9978  ;;  %v4436_v36 = vadd.f32 1.0, %v9977_v55  ;;  %v4253_v14 = vadd.f32 %v4252_v3, %v13514_v57  ;;  %v4254_v51 = vpop.f32.mrb[46].mxu1  ;;  %v13667_v22 = vadd.f32 %v13354_v8, %v16654_v31 }
 0x757   : > { %v9981_v25 = vpop.eup %9980  ;;  %9982 = vrcp.f32 %v4435_v27  ;;  %v4437_v2 = vadd.f32 1.0, %v9979_v62  ;;  %v13673_v49 = vadd.f32 %v4251_v17, %v13649_v40  ;;  %v4255_v53 = vadd.f32 %v4254_v51, %v13510_v59  ;;  %v4256_v23 = vpop.f32.mrb[47].mxu1  ;;  %4807 = vadd.xlane.f32.xlu0 %v13662_v38  ;;  %v9168_v62 = vld [vmem:[#allocation7 + $0x384] ss:$8 sps:$4 sm:$0xff]  }
 0x758   : > { %16655 = vst [vmem:[#allocation59_spill] sm:$0xff] %v13667_v22  ;;  %9984 = vrcp.f32 %v4436_v36  ;;  %v4438_v55 = vadd.f32 1.0, %v9981_v25  ;;  %v13678_v3 = vadd.f32 %v4253_v14, %v13658_v4  ;;  %v4257_v8 = vadd.f32 %v4256_v23, %v13514_v57  ;;  %5282 = vmatpush1.bf16.msra.mxu0 %v9163_v61  ;;  %v9166_v25 = vld [vmem:[#allocation7 + $0x380] ss:$8 sps:$4 sm:$0xff]  }
 0x759   : > { %9986 = vrcp.f32 %v4437_v2  ;;  %v8633_v58 = vmul.f32 -1.442695, %v13673_v49  ;;  %v13683_v27 = vadd.f32 %v4255_v53, %v13653_v11  ;;  %4809 = vadd.xlane.f32.xlu1 %v13670_v48  ;;  %v4605_v17 = vmul.f32 %v13641_v33, %v13641_v33  ;;  %5283 = vmatprep.subr.bf16.mxu0 %v9168_v62  ;;  %v16671_v40 = vld [vmem:[#allocation73_spill] sm:$0xff] }
 0x75a   : > { %9988 = vrcp.f32 %v4438_v55  ;;  %v8634_v36 = vmul.f32 -1.442695, %v13678_v3  ;;  %v13690_v14 = vadd.f32 %v4257_v8, %v13667_v22  ;;  %v4606_v51 = vmul.f32 %v13645_v0, %v13645_v0  ;;  %v9171_v8 = vld [vmem:[#allocation7 + $0x394] ss:$8 sps:$4 sm:$0xff]  }
 0x75b   : > { %9990 = vpow2.f32 %v8633_v58  ;;  %v8635_v29 = vmul.f32 -1.442695, %v13683_v27  ;;  %4623 = vadd.xlane.f32.xlu0 %v4605_v17  ;;  %v4854_v2 = vmul.f32 %v13670_v48, %v13670_v48  ;;  %v9169_v58 = vld [vmem:[#allocation7 + $0x390] ss:$8 sps:$4 sm:$0xff]  }
 0x75c   : > { %9992 = vpow2.f32 %v8634_v36  ;;  %v8636_v31 = vmul.f32 -1.442695, %v13690_v14  ;;  %5284 = vmatpush1.bf16.msra.mxu0 %v9166_v25  ;;  %v16658_v25 = vld [vmem:[#allocation87_spill] sm:$0xff] }
 0x75d   : > { %9994 = vpow2.f32 %v8635_v29  ;;  %4625 = vadd.xlane.f32.xlu1 %v4606_v51  ;;  %5285 = vmatprep.subr.bf16.mxu0 %v9171_v8  ;;  %v16656_v29 = vld [vmem:[#allocation63_spill] sm:$0xff] }
 0x75e   : > { %9996 = vpow2.f32 %v8636_v31  ;;  %v13709_v51 = vadd.f32 %v13401_v50, %v16656_v29 }
 0x75f   : > { %4871 = vadd.xlane.f32.xlu0 %v4853_v9 }
 0x760   : > { %16657 = vst [vmem:[#allocation60_spill] sm:$0xff] %v13709_v51  ;;  %5286 = vmatpush1.bf16.msra.mxu0 %v9169_v58 }
 0x761   : > { %v9983_v53 = vpop.eup %9982  ;;  %4873 = vadd.xlane.f32.xlu1 %v4854_v2 }
 0x762   : > { %v9985_v23 = vpop.eup %9984  ;;  %v13701_v55 = vmul.f32 %v9983_v53, %v13613_v39  ;;  %v13713_v39 = vadd.f32 %v13392_v18, %v16658_v25  ;;  %v16662_v25 = vld [vmem:[#allocation69_spill] sm:$0xff] }
 0x763   : > { %v9987_v61 = vpop.eup %9986  ;;  %v13722_v50 = vmul.f32 %v9985_v23, %v13618_v44 }
 0x764   : > { %v9989_v17 = vpop.eup %9988  ;;  %4563 = vadd.xlane.f32.xlu0 %v13701_v55  ;;  %v13705_v62 = vmul.f32 %v9987_v61, %v13623_v45  ;;  %16659 = vst [vmem:[#allocation65_spill] sm:$0xff] %v13713_v39  ;;  %v13718_v45 = vadd.f32 %v13395_v1, %v16660_v60  ;;  %v9174_v61 = vld [vmem:[#allocation7 + $0x3a4] ss:$8 sps:$4 sm:$0xff]   ;;  %v9172_v1 = vld [vmem:[#allocation7 + $0x3a0] ss:$8 sps:$4 sm:$0xff]  }
 0x765   : > { %v9991_v36 = vpop.eup %9990  ;;  %v4260_v31 = vpop.f32.mrb[48].mxu1  ;;  %5287 = vmatprep.subr.bf16.mxu0 %v9174_v61  ;;  %v9177_v61 = vld [vmem:[#allocation7 + $0x3b4] ss:$8 sps:$4 sm:$0xff]  }
 0x766   : > { %v9993_v9 = vpop.eup %9992  ;;  %v4439_v2 = vadd.f32 1.0, %v9991_v36  ;;  %v4261_v53 = vadd.f32 %v4260_v31, %v13510_v59  ;;  %16661 = vst [vmem:[#allocation62_spill] sm:$0xff] %v13718_v45  ;;  %v4262_v8 = vpop.f32.mrb[49].mxu1  ;;  %4565 = vadd.xlane.f32.xlu1 %v13705_v62  ;;  %v13727_v36 = vadd.f32 %v13398_v34, %v16662_v25  ;;  %v13730_v31 = vmul.f32 %v9989_v17, %v13630_v16  ;;  %v9180_v25 = vld [vmem:[#allocation7 + $0x3c4] ss:$8 sps:$4 sm:$0xff]  }
 0x767   : > { %v9995_v29 = vpop.eup %9994  ;;  %v4440_v22 = vadd.f32 1.0, %v9993_v9  ;;  %v4263_v18 = vadd.f32 %v4262_v8, %v13514_v57  ;;  %v4264_v58 = vpop.f32.mrb[50].mxu1  ;;  %5288 = vmatpush1.bf16.msra.mxu0 %v9172_v1 }
 0x768   : > { %16663 = vst [vmem:[#allocation63_spill] sm:$0xff] %v13727_v36  ;;  %v9997_v60 = vpop.eup %9996  ;;  %9998 = vrcp.f32 %v4439_v2  ;;  %v4441_v4 = vadd.f32 1.0, %v9995_v29  ;;  %v13733_v44 = vadd.f32 %v4261_v53, %v13709_v51  ;;  %v4265_v23 = vadd.f32 %v4264_v58, %v13510_v59  ;;  %v4266_v9 = vpop.f32.mrb[51].mxu1  ;;  %4811 = vadd.xlane.f32.xlu0 %v13722_v50  ;;  %5289 = vmatprep.subr.bf16.mxu0 %v9177_v61 }
 0x769   : > { %10000 = vrcp.f32 %v4440_v22  ;;  %v4442_v8 = vadd.f32 1.0, %v9997_v60  ;;  %v13738_v34 = vadd.f32 %v4263_v18, %v13718_v45  ;;  %v4267_v16 = vadd.f32 %v4266_v9, %v13514_v57  ;;  %v9175_v18 = vld [vmem:[#allocation7 + $0x3b0] ss:$8 sps:$4 sm:$0xff]   ;;  %v9178_v60 = vld [vmem:[#allocation7 + $0x3c0] ss:$8 sps:$4 sm:$0xff]  }
 0x76a   : > { %10002 = vrcp.f32 %v4441_v4  ;;  %v8637_v17 = vmul.f32 -1.442695, %v13733_v44  ;;  %v13743_v2 = vadd.f32 %v4265_v23, %v13713_v39  ;;  %4813 = vadd.xlane.f32.xlu1 %v13730_v31  ;;  %v4607_v53 = vmul.f32 %v13701_v55, %v13701_v55 }
 0x76b   : > { %10004 = vrcp.f32 %v4442_v8  ;;  %v8638_v22 = vmul.f32 -1.442695, %v13738_v34  ;;  %v13750_v29 = vadd.f32 %v4267_v16, %v13727_v36  ;;  %v4608_v58 = vmul.f32 %v13705_v62, %v13705_v62  ;;  %5290 = vmatpush1.bf16.msra.mxu0 %v9175_v18  ;;  %v9181_v8 = vld [vmem:[#allocation7 + $0x3d0] ss:$8 sps:$4 sm:$0xff]   ;;  %v9183_v16 = vld [vmem:[#allocation7 + $0x3d4] ss:$8 sps:$4 sm:$0xff]  }
 0x76c   : > { %10006 = vpow2.f32 %v8637_v17  ;;  %v8639_v4 = vmul.f32 -1.442695, %v13743_v2  ;;  %4627 = vadd.xlane.f32.xlu0 %v4607_v53  ;;  %v4855_v23 = vmul.f32 %v13722_v50, %v13722_v50  ;;  %5291 = vmatprep.subr.bf16.mxu0 %v9180_v25  ;;  %v4856_v9 = vmul.f32 %v13730_v31, %v13730_v31  ;;  %v9186_v25 = vld [vmem:[#allocation7 + $0x3e4] ss:$8 sps:$4 sm:$0xff]  }
 0x76d   : > { %10008 = vpow2.f32 %v8638_v22  ;;  %v8640_v1 = vmul.f32 -1.442695, %v13750_v29  ;;  %v16666_v36 = vld [vmem:[#allocation68_spill] sm:$0xff] }
 0x76e   : > { %10010 = vpow2.f32 %v8639_v4  ;;  %4629 = vadd.xlane.f32.xlu1 %v4608_v58  ;;  %v9184_v58 = vld [vmem:[#allocation7 + $0x3e0] ss:$8 sps:$4 sm:$0xff]  }
 0x76f   : > { %10012 = vpow2.f32 %v8640_v1  ;;  %5292 = vmatpush1.bf16.msra.mxu0 %v9178_v60  ;;  %v16664_v60 = vld [vmem:[#allocation67_spill] sm:$0xff] }
 0x770   : > { %4875 = vadd.xlane.f32.xlu0 %v4855_v23  ;;  %5293 = vmatprep.subr.bf16.mxu0 %v9183_v16  ;;  %v13769_v23 = vadd.f32 %v13445_v35, %v16664_v60  ;;  %v9189_v16 = vld [vmem:[#allocation7 + $0x3f4] ss:$8 sps:$4 sm:$0xff]  }
 0x772   : > { %v9999_v17 = vpop.eup %9998  ;;  %4877 = vadd.xlane.f32.xlu1 %v4856_v9  ;;  %16665 = vst [vmem:[#allocation87_spill] sm:$0xff] %v13769_v23 }
 0x773   : > { %v10001_v53 = vpop.eup %10000  ;;  %v13761_v61 = vmul.f32 %v9999_v17, %v13673_v49  ;;  %5294 = vmatpush1.bf16.msra.mxu0 %v9181_v8  ;;  %v13773_v49 = vadd.f32 %v13436_v41, %v16666_v36 }
 0x774   : > { %v10003_v22 = vpop.eup %10002  ;;  %v13782_v35 = vmul.f32 %v10001_v53, %v13678_v3  ;;  %5295 = vmatprep.subr.bf16.mxu0 %v9186_v25 }
 0x775   : > { %v10005_v18 = vpop.eup %10004  ;;  %4567 = vadd.xlane.f32.xlu0 %v13761_v61  ;;  %v13765_v4 = vmul.f32 %v10003_v22, %v13683_v27  ;;  %16667 = vst [vmem:[#allocation64_spill] sm:$0xff] %v13773_v49  ;;  %v16668_v27 = vld [vmem:[#allocation66_spill] sm:$0xff]  ;;  %v16669_v22 = vld [vmem:[#allocation79_spill] sm:$0xff] }
 0x776   : > { %v10007_v1 = vpop.eup %10006  ;;  %v4270_v9 = vpop.f32.mrb[52].mxu1  ;;  %v13778_v8 = vadd.f32 %v16669_v22, %v16668_v27 }
 0x777   : > { %v10009_v17 = vpop.eup %10008  ;;  %v4443_v45 = vadd.f32 1.0, %v10007_v1  ;;  %v4271_v39 = vadd.f32 %v4270_v9, %v13510_v59  ;;  %v4272_v51 = vpop.f32.mrb[53].mxu1  ;;  %4569 = vadd.xlane.f32.xlu1 %v13765_v4  ;;  %v16672_v1 = vld [vmem:[#allocation89_spill] sm:$0xff]  ;;  %v13790_v9 = vmul.f32 %v10005_v18, %v13690_v14  ;;  %5296 = vmatpush1.bf16.msra.mxu0 %v9184_v58  ;;  %v4609_v18 = vmul.f32 %v13761_v61, %v13761_v61 }
 0x778   : > { %16670 = vst [vmem:[#allocation69_spill] sm:$0xff] %v13778_v8  ;;  %v10011_v60 = vpop.eup %10010  ;;  %v4444_v11 = vadd.f32 1.0, %v10009_v17  ;;  %v4273_v41 = vadd.f32 %v4272_v51, %v13514_v57  ;;  %v4274_v36 = vpop.f32.mrb[54].mxu1  ;;  %v13787_v5 = vadd.f32 %v16672_v1, %v16671_v40  ;;  %v9187_v51 = vld [vmem:[#allocation7 + $0x3f0] ss:$8 sps:$4 sm:$0xff]   ;;  %5297 = vmatprep.subr.bf16.mxu0 %v9189_v16  ;;  %v4610_v17 = vmul.f32 %v13765_v4, %v13765_v4 }
 0x779   : > { %v10013_v27 = vpop.eup %10012  ;;  %10014 = vrcp.f32 %v4443_v45  ;;  %v4445_v22 = vadd.f32 1.0, %v10011_v60  ;;  %v13793_v24 = vadd.f32 %v4271_v39, %v13769_v23  ;;  %v4275_v3 = vadd.f32 %v4274_v36, %v13510_v59  ;;  %v4276_v53 = vpop.f32.mrb[55].mxu1  ;;  %4815 = vadd.xlane.f32.xlu0 %v13782_v35 }
 0x77a   : > { %16673 = vst [vmem:[#allocation67_spill] sm:$0xff] %v13787_v5  ;;  %10016 = vrcp.f32 %v4444_v11  ;;  %v4446_v25 = vadd.f32 1.0, %v10013_v27  ;;  %v13798_v40 = vadd.f32 %v4273_v41, %v13778_v8  ;;  %v4277_v14 = vadd.f32 %v4276_v53, %v13514_v57 }
 0x77b   : > { %10018 = vrcp.f32 %v4445_v22  ;;  %v8641_v45 = vmul.f32 -1.442695, %v13793_v24  ;;  %v13803_v39 = vadd.f32 %v4275_v3, %v13773_v49  ;;  %4817 = vadd.xlane.f32.xlu1 %v13790_v9  ;;  %5298 = vmatpush1.bf16.msra.mxu0 %v9187_v51  ;;  %v4857_v41 = vmul.f32 %v13782_v35, %v13782_v35 }
 0x77c   : > { %10020 = vrcp.f32 %v4446_v25  ;;  %v8642_v11 = vmul.f32 -1.442695, %v13798_v40  ;;  %v13810_v58 = vadd.f32 %v4277_v14, %v13787_v5  ;;  %v4858_v36 = vmul.f32 %v13790_v9, %v13790_v9 }
 0x77d   : > { %10022 = vpow2.f32 %v8641_v45  ;;  %v8643_v16 = vmul.f32 -1.442695, %v13803_v39  ;;  %4631 = vadd.xlane.f32.xlu0 %v4609_v18  ;;  %v16674_v45 = vld [vmem:[#allocation71_spill] sm:$0xff] }
 0x77e   : > { %10024 = vpow2.f32 %v8642_v11  ;;  %v8644_v60 = vmul.f32 -1.442695, %v13810_v58  ;;  %v13829_v18 = vadd.f32 %v13477_v32, %v16674_v45  ;;  %v16680_v32 = vld [vmem:[#allocation88_spill] sm:$0xff] }
 0x77f   : > { %10026 = vpow2.f32 %v8643_v16  ;;  %4633 = vadd.xlane.f32.xlu1 %v4610_v17  ;;  %v16676_v16 = vld [vmem:[#allocation70_spill] sm:$0xff]  ;;  %v13844_v45 = vadd.f32 %v13474_v15, %v16680_v32 }
 0x780   : > { %10028 = vpow2.f32 %v8644_v60  ;;  %16675 = vst [vmem:[#allocation68_spill] sm:$0xff] %v13829_v18  ;;  %v13834_v17 = vadd.f32 %v13471_v47, %v16676_v16  ;;  %v16678_v60 = vld [vmem:[#allocation72_spill] sm:$0xff] }
 0x781   : > { %4879 = vadd.xlane.f32.xlu0 %v4857_v41  ;;  %v13838_v41 = vadd.f32 %v13468_v19, %v16678_v60  ;;  %16681 = vst [vmem:[#allocation73_spill] sm:$0xff] %v13844_v45 }
 0x782   : > { %16677 = vst [vmem:[#allocation66_spill] sm:$0xff] %v13834_v17 }
 0x783   : > { %v10015_v1 = vpop.eup %10014  ;;  %4881 = vadd.xlane.f32.xlu1 %v4858_v36  ;;  %16679 = vst [vmem:[#allocation79_spill] sm:$0xff] %v13838_v41 }
 0x784   : > { %v10017_v27 = vpop.eup %10016  ;;  %v13821_v22 = vmul.f32 %v10015_v1, %v13733_v44 }
 0x785   : > { %v10019_v3 = vpop.eup %10018 }
 0x786   : > { %v10021_v53 = vpop.eup %10020  ;;  %v4280_v51 = vpop.f32.mrb[56].mxu1  ;;  %4571 = vadd.xlane.f32.xlu0 %v13821_v22  ;;  %v13825_v25 = vmul.f32 %v10019_v3, %v13743_v2 }
 0x787   : > { %v10023_v14 = vpop.eup %10022  ;;  %v4281_v11 = vadd.f32 %v4280_v51, %v13510_v59  ;;  %v4282_v44 = vpop.f32.mrb[57].mxu1  ;;  %v13847_v51 = vmul.f32 %v10017_v27, %v13738_v34 }
 0x788   : > { %v10025_v36 = vpop.eup %10024  ;;  %v4447_v1 = vadd.f32 1.0, %v10023_v14  ;;  %v4283_v2 = vadd.f32 %v4282_v44, %v13514_v57  ;;  %v4284_v3 = vpop.f32.mrb[58].mxu1  ;;  %4573 = vadd.xlane.f32.xlu1 %v13825_v25  ;;  %v13854_v44 = vmul.f32 %v10021_v53, %v13750_v29 }
 0x789   : > { %v10027_v47 = vpop.eup %10026  ;;  %v4448_v16 = vadd.f32 1.0, %v10025_v36  ;;  %v13850_v5 = vadd.f32 %v4281_v11, %v13829_v18  ;;  %v4285_v19 = vadd.f32 %v4284_v3, %v13510_v59  ;;  %v4286_v14 = vpop.f32.mrb[59].mxu1  ;;  %v4859_v32 = vmul.f32 %v13847_v51, %v13847_v51 }
 0x78a   : > { %v10029_v60 = vpop.eup %10028  ;;  %10030 = vrcp.f32 %v4447_v1  ;;  %v4449_v8 = vadd.f32 1.0, %v10027_v47  ;;  %v13857_v15 = vadd.f32 %v4283_v2, %v13834_v17  ;;  %v4287_v34 = vadd.f32 %v4286_v14, %v13514_v57  ;;  %4819 = vadd.xlane.f32.xlu0 %v13847_v51 }
 0x78b   : > { %10032 = vrcp.f32 %v4448_v16  ;;  %v4450_v27 = vadd.f32 1.0, %v10029_v60  ;;  %v8645_v11 = vmul.f32 -1.442695, %v13850_v5  ;;  %v13863_v36 = vadd.f32 %v4285_v19, %v13838_v41 }
 0x78c   : > { %10034 = vrcp.f32 %v4449_v8  ;;  %v8646_v29 = vmul.f32 -1.442695, %v13857_v15  ;;  %v13867_v53 = vadd.f32 %v4287_v34, %v13844_v45  ;;  %4821 = vadd.xlane.f32.xlu1 %v13854_v44  ;;  %v4611_v1 = vmul.f32 %v13821_v22, %v13821_v22 }
 0x78d   : > { %10036 = vrcp.f32 %v4450_v27  ;;  %v8647_v2 = vmul.f32 -1.442695, %v13863_v36  ;;  %v4612_v8 = vmul.f32 %v13825_v25, %v13825_v25  ;;  %v4860_v47 = vmul.f32 %v13854_v44, %v13854_v44  ;;  %v16682_v27 = vld [vmem:[#allocation77_spill] sm:$0xff] }
 0x78e   : > { %10038 = vpow2.f32 %v8645_v11  ;;  %v8648_v3 = vmul.f32 -1.442695, %v13867_v53  ;;  %4635 = vadd.xlane.f32.xlu0 %v4611_v1  ;;  %v13885_v11 = vadd.f32 %v13501_v20, %v16682_v27  ;;  %v16686_v27 = vld [vmem:[#allocation74_spill] sm:$0xff] }
 0x78f   : > { %10040 = vpow2.f32 %v8646_v29 }
 0x790   : > { %10042 = vpow2.f32 %v8647_v2  ;;  %4637 = vadd.xlane.f32.xlu1 %v4612_v8  ;;  %16683 = vst [vmem:[#allocation89_spill] sm:$0xff] %v13885_v11 }
 0x791   : > { %10044 = vpow2.f32 %v8648_v3  ;;  %v16684_v3 = vld [vmem:[#allocation75_spill] sm:$0xff] }
 0x792   : > { %4883 = vadd.xlane.f32.xlu0 %v4859_v32  ;;  %v13890_v8 = vadd.f32 %v13491_v26, %v16684_v3  ;;  %v16688_v26 = vld [vmem:[#allocation76_spill] sm:$0xff] }
 0x793   : > { %v13907_v3 = vadd.f32 %v13494_v28, %v16688_v26 }
 0x794   : > { %v10031_v16 = vpop.eup %10030  ;;  %4885 = vadd.xlane.f32.xlu1 %v4860_v47  ;;  %16685 = vst [vmem:[#allocation71_spill] sm:$0xff] %v13890_v8 }
 0x795   : > { %v10033_v19 = vpop.eup %10032  ;;  %v4290_v14 = vpop.f32.mrb[60].mxu1  ;;  %v13881_v60 = vmul.f32 %v10031_v16, %v13793_v24  ;;  %16689 = vst [vmem:[#allocation72_spill] sm:$0xff] %v13907_v3 }
 0x796   : > { %v10035_v34 = vpop.eup %10034  ;;  %v4291_v29 = vadd.f32 %v4290_v14, %v13510_v59  ;;  %v4292_v1 = vpop.f32.mrb[61].mxu1  ;;  %v13902_v14 = vadd.f32 %v13504_v54, %v16686_v27 }
 0x797   : > { %v10037_v2 = vpop.eup %10036  ;;  %v4293_v32 = vadd.f32 %v4292_v1, %v13514_v57  ;;  %4575 = vadd.xlane.f32.xlu0 %v13881_v60  ;;  %v4294_v47 = vpop.f32.mrb[62].mxu1  ;;  %v13895_v24 = vmul.f32 %v10035_v34, %v13803_v39 }
 0x798   : > { %v10039_v16 = vpop.eup %10038  ;;  %v13898_v20 = vadd.f32 %v4291_v29, %v13885_v11  ;;  %16687 = vst [vmem:[#allocation70_spill] sm:$0xff] %v13902_v14  ;;  %v4295_v45 = vadd.f32 %v4294_v47, %v13510_v59  ;;  %v4296_v1 = vpop.f32.mrb[63].mxu1  ;;  %v13915_v29 = vmul.f32 %v10033_v19, %v13798_v40  ;;  %v13921_v28 = vmul.f32 %v10037_v2, %v13810_v58 }
 0x799   : > { %v10041_v17 = vpop.eup %10040  ;;  %v4451_v41 = vadd.f32 1.0, %v10039_v16  ;;  %v13910_v39 = vadd.f32 %v4293_v32, %v13890_v8  ;;  %v4297_v34 = vadd.f32 %v4296_v1, %v13514_v57  ;;  %4577 = vadd.xlane.f32.xlu1 %v13895_v24  ;;  %v4613_v58 = vmul.f32 %v13881_v60, %v13881_v60 }
 0x79a   : > { %v10043_v54 = vpop.eup %10042  ;;  %v4452_v27 = vadd.f32 1.0, %v10041_v17  ;;  %v13918_v59 = vadd.f32 %v4295_v45, %v13902_v14  ;;  %v8649_v32 = vmul.f32 -1.442695, %v13898_v20  ;;  %v4614_v19 = vmul.f32 %v13895_v24, %v13895_v24 }
 0x79b   : > { %v10045_v47 = vpop.eup %10044  ;;  %10046 = vrcp.f32 %v4451_v41  ;;  %v4453_v16 = vadd.f32 1.0, %v10043_v54  ;;  %v13925_v57 = vadd.f32 %v4297_v34, %v13907_v3  ;;  %4823 = vadd.xlane.f32.xlu0 %v13915_v29  ;;  %v8650_v17 = vmul.f32 -1.442695, %v13910_v39 }
 0x79c   : > { %10048 = vrcp.f32 %v4452_v27  ;;  %v4454_v40 = vadd.f32 1.0, %v10045_v47  ;;  %v8651_v45 = vmul.f32 -1.442695, %v13918_v59  ;;  %v4861_v2 = vmul.f32 %v13915_v29, %v13915_v29 }
 0x79d   : > { %10050 = vrcp.f32 %v4453_v16  ;;  %4825 = vadd.xlane.f32.xlu1 %v13921_v28  ;;  %v8652_v41 = vmul.f32 -1.442695, %v13925_v57  ;;  %v4862_v26 = vmul.f32 %v13921_v28, %v13921_v28 }
 0x79e   : > { %10052 = vrcp.f32 %v4454_v40 }
 0x79f   : > { %10054 = vpow2.f32 %v8649_v32  ;;  %4639 = vadd.xlane.f32.xlu0 %v4613_v58 }
 0x7a0   : > { %10056 = vpow2.f32 %v8650_v17 }
 0x7a1   : > { %10058 = vpow2.f32 %v8651_v45  ;;  %4641 = vadd.xlane.f32.xlu1 %v4614_v19 }
 0x7a2   : > { %10060 = vpow2.f32 %v8652_v41 }
 0x7a3   : > { %4887 = vadd.xlane.f32.xlu0 %v4861_v2 }
 0x7a5   : > { %v10047_v1 = vpop.eup %10046  ;;  %4889 = vadd.xlane.f32.xlu1 %v4862_v26 }
 0x7a6   : > { %v10049_v34 = vpop.eup %10048  ;;  %v13941_v54 = vmul.f32 %v10047_v1, %v13850_v5 }
 0x7a7   : > { %v10051_v27 = vpop.eup %10050  ;;  %v13949_v45 = vmul.f32 %v10049_v34, %v13857_v15 }
 0x7a8   : > { %v10053_v47 = vpop.eup %10052  ;;  %4579 = vadd.xlane.f32.xlu0 %v13941_v54  ;;  %v13945_v16 = vmul.f32 %v10051_v27, %v13863_v36  ;;  %v4615_v26 = vmul.f32 %v13941_v54, %v13941_v54 }
 0x7a9   : > { %v10055_v32 = vpop.eup %10054  ;;  %v13953_v2 = vmul.f32 %v10053_v47, %v13867_v53  ;;  %v4863_v1 = vmul.f32 %v13949_v45, %v13949_v45 }
 0x7aa   : > { %v10057_v40 = vpop.eup %10056  ;;  %v4455_v17 = vadd.f32 1.0, %v10055_v32  ;;  %4581 = vadd.xlane.f32.xlu1 %v13945_v16  ;;  %v4616_v15 = vmul.f32 %v13945_v16, %v13945_v16 }
 0x7ab   : > { %v10059_v58 = vpop.eup %10058  ;;  %v4456_v41 = vadd.f32 1.0, %v10057_v40  ;;  %v4864_v53 = vmul.f32 %v13953_v2, %v13953_v2 }
 0x7ac   : > { %v10061_v19 = vpop.eup %10060  ;;  %10062 = vrcp.f32 %v4455_v17  ;;  %v4457_v5 = vadd.f32 1.0, %v10059_v58  ;;  %4827 = vadd.xlane.f32.xlu0 %v13949_v45 }
 0x7ad   : > { %10064 = vrcp.f32 %v4456_v41  ;;  %v4458_v36 = vadd.f32 1.0, %v10061_v19 }
 0x7ae   : > { %10066 = vrcp.f32 %v4457_v5  ;;  %4829 = vadd.xlane.f32.xlu1 %v13953_v2 }
 0x7af   : > { %10068 = vrcp.f32 %v4458_v36 }
 0x7b0   : > { %4643 = vadd.xlane.f32.xlu0 %v4615_v26 }
 0x7b2   : > { %4645 = vadd.xlane.f32.xlu1 %v4616_v15 }
 0x7b4   : > { %4891 = vadd.xlane.f32.xlu0 %v4863_v1 }
 0x7b6   : > { %v10063_v34 = vpop.eup %10062  ;;  %4893 = vadd.xlane.f32.xlu1 %v4864_v53 }
 0x7b7   : > { %v10065_v27 = vpop.eup %10064  ;;  %v13965_v47 = vmul.f32 %v10063_v34, %v13898_v20 }
 0x7b8   : > { %v10067_v32 = vpop.eup %10066  ;;  %v13973_v58 = vmul.f32 %v10065_v27, %v13910_v39 }
 0x7b9   : > { %4583 = vadd.xlane.f32.xlu0 %v13965_v47  ;;  %v13969_v40 = vmul.f32 %v10067_v32, %v13918_v59  ;;  %v10069_v17 = vpop.eup %10068  ;;  %v4617_v19 = vmul.f32 %v13965_v47, %v13965_v47 }
 0x7ba   : > { %v13977_v41 = vmul.f32 %v10069_v17, %v13925_v57  ;;  %v4865_v20 = vmul.f32 %v13973_v58, %v13973_v58 }
 0x7bb   : > { %4585 = vadd.xlane.f32.xlu1 %v13969_v40  ;;  %v4618_v39 = vmul.f32 %v13969_v40, %v13969_v40 }
 0x7bc   : > { %v4866_v59 = vmul.f32 %v13977_v41, %v13977_v41 }
 0x7bd   : > { %4831 = vadd.xlane.f32.xlu0 %v13973_v58 }
 0x7bf   : > { %4833 = vadd.xlane.f32.xlu1 %v13977_v41 }
 0x7c1   : > { %4895 = vadd.xlane.f32.xlu0 %v4865_v20 }
 0x7c3   : > { %4897 = vadd.xlane.f32.xlu1 %v4866_v59 }
 0x7c5   : > { %4647 = vadd.xlane.f32.xlu0 %v4617_v19 }
 0x7c7   : > { %4649 = vadd.xlane.f32.xlu1 %v4618_v39 }
 0x7cf   : > { %v4556_v57 = vpop.xlane.xlu0 %4555 }
 0x7d0   : > { %v4587_v26 = vmul.f32 0.0078125, %v4556_v57 }
 0x7d1   : > { %v4558_v5 = vpop.xlane.xlu1 %4557 }
 0x7d2   : > { %v4588_v1 = vmul.f32 0.0078125, %v4558_v5  ;;  %v4667_v34 = vmul.f32 %v4587_v26, %v4587_v26 }
 0x7d3   : > { %v4804_v36 = vpop.xlane.xlu0 %4803 }
 0x7d4   : > { %v4835_v27 = vmul.f32 0.0078125, %v4804_v36  ;;  %v4668_v20 = vmul.f32 %v4588_v1, %v4588_v1 }
 0x7d5   : > { %v4806_v15 = vpop.xlane.xlu1 %4805 }
 0x7d6   : > { %v13988_v59 = vmul.f32 0.0078125, %v4806_v15  ;;  %v4915_v8 = vmul.f32 %v4835_v27, %v4835_v27 }
 0x7d7   : > { %v4620_v53 = vpop.xlane.xlu0 %4619 }
 0x7d8   : > { %v4651_v32 = vmul.f32 0.0078125, %v4620_v53  ;;  %v4916_v57 = vmul.f32 %v13988_v59, %v13988_v59 }
 0x7d9   : > { %v4622_v17 = vpop.xlane.xlu1 %4621 }
 0x7da   : > { %v4683_v3 = vsub.f32 %v4651_v32, %v4667_v34  ;;  %v4652_v19 = vmul.f32 0.0078125, %v4622_v17 }
 0x7db   : > { %v4868_v14 = vpop.xlane.xlu0 %4867 }
 0x7dc   : > { %v4715_v11 = vadd.f32 0.1, %v4683_v3  ;;  %v4684_v39 = vsub.f32 %v4652_v19, %v4668_v20  ;;  %v4899_v18 = vmul.f32 0.0078125, %v4868_v14 }
 0x7dd   : > { %v4870_v49 = vpop.xlane.xlu1 %4869 }
 0x7de   : > { %v4716_v5 = vadd.f32 0.1, %v4684_v39  ;;  %v4931_v23 = vsub.f32 %v4899_v18, %v4915_v8  ;;  %v4900_v56 = vmul.f32 0.0078125, %v4870_v49  ;;  %10070 = vrsqrt.f32 %v4715_v11 }
 0x7df   : > { %v4700_v49 = vsub.f32 %v13585_v43, %v4588_v1  ;;  %v4699_v8 = vsub.f32 %v13582_v21, %v4587_v26  ;;  %v14010_v21 = vrot.slane %v10592_v37, %v16690_v30 }
 0x7e0   : > { %10072 = vrsqrt.f32 %v4716_v5  ;;  %v4963_v36 = vadd.f32 0.1, %v4931_v23  ;;  %v4932_v53 = vsub.f32 %v4900_v56, %v4916_v57  ;;  %v4560_v15 = vpop.xlane.xlu0 %4559  ;;  %v4947_v57 = vsub.f32 %v13602_v7, %v4835_v27  ;;  %v10593_v7 = vld [vmem:[#allocation10 + $0x10] sm:$0x7f] }
 0x7e1   : > { %v13992_v3 = vmul.f32 0.0078125, %v4560_v15  ;;  %v14013_v26 = vrot.slane %v10593_v7, %v16690_v30 }
 0x7e2   : > { %10074 = vrsqrt.f32 %v4963_v36  ;;  %v4964_v34 = vadd.f32 0.1, %v4932_v53  ;;  %v4562_v32 = vpop.xlane.xlu1 %4561 }
 0x7e3   : > { %v13994_v20 = vmul.f32 0.0078125, %v4562_v32  ;;  %v4669_v56 = vmul.f32 %v13992_v3, %v13992_v3 }
 0x7e4   : > { %10076 = vrsqrt.f32 %v4964_v34  ;;  %v4808_v17 = vpop.xlane.xlu0 %4807 }
 0x7e5   : > { %v13996_v19 = vmul.f32 0.0078125, %v4808_v17  ;;  %v4670_v15 = vmul.f32 %v13994_v20, %v13994_v20 }
 0x7e6   : > { %v4810_v14 = vpop.xlane.xlu1 %4809 }
 0x7e7   : > { %v14003_v5 = vmul.f32 0.0078125, %v4810_v14  ;;  %v4917_v1 = vmul.f32 %v13996_v19, %v13996_v19 }
 0x7e8   : > { %v4624_v39 = vpop.xlane.xlu0 %4623  ;;  %v10071_v18 = vpop.eup %10070 }
 0x7e9   : > { %v4653_v23 = vmul.f32 0.0078125, %v4624_v39  ;;  %v4747_v43 = vmul.f32 %v10071_v18, %v4699_v8  ;;  %v4948_v18 = vsub.f32 %v13610_v46, %v13988_v59 }
 0x7ea   : > { %v10073_v11 = vpop.eup %10072  ;;  %v4626_v36 = vpop.xlane.xlu1 %4625 }
 0x7eb   : > { %v4748_v53 = vmul.f32 %v10073_v11, %v4700_v49  ;;  %v4685_v34 = vsub.f32 %v4653_v23, %v4669_v56  ;;  %v4654_v32 = vmul.f32 0.0078125, %v4626_v36  ;;  %v4918_v23 = vmul.f32 %v14003_v5, %v14003_v5  ;;  %v16691_v36 = vld [vmem:[#allocation50_spill] sm:$0xff] }
 0x7ec   : > { %v10075_v17 = vpop.eup %10074  ;;  %v4872_v39 = vpop.xlane.xlu0 %4871  ;;  %v14020_v52 = vrot.slane %v10593_v7, %v16691_v36 }
 0x7ed   : > { %v4717_v27 = vadd.f32 0.1, %v4685_v34  ;;  %v4686_v14 = vsub.f32 %v4654_v32, %v4670_v15  ;;  %v4901_v49 = vmul.f32 0.0078125, %v4872_v39  ;;  %v4995_v11 = vmul.f32 %v10075_v17, %v4947_v57 }
 0x7ee   : > { %v10077_v56 = vpop.eup %10076  ;;  %v4874_v8 = vpop.xlane.xlu1 %4873  ;;  %v4768_v30 = vmul.f32 %v14013_v26, %v4748_v53  ;;  %v14025_v34 = vrot.slane %v10592_v37, %v16691_v36  ;;  %v4767_v17 = vmul.f32 %v14013_v26, %v4747_v43 }
 0x7ef   : > { %v4718_v13 = vadd.f32 0.1, %v4686_v14  ;;  %v4933_v12 = vsub.f32 %v4901_v49, %v4917_v1  ;;  %v4902_v63 = vmul.f32 0.0078125, %v4874_v8  ;;  %10078 = vrsqrt.f32 %v4717_v27 }
 0x7f0   : > { %v4996_v15 = vmul.f32 %v10077_v56, %v4948_v18  ;;  %v5015_v57 = vmul.f32 %v14010_v21, %v4995_v11  ;;  %v14030_v53 = vadd.f32 %v14020_v52, %v4768_v30 }
 0x7f1   : > { %10080 = vrsqrt.f32 %v4718_v13  ;;  %v4965_v46 = vadd.f32 0.1, %v4933_v12  ;;  %v4934_v59 = vsub.f32 %v4902_v63, %v4918_v23  ;;  %v4564_v32 = vpop.xlane.xlu0 %4563  ;;  %v14039_v63 = vadd.f32 %v14020_v52, %v4767_v17 }
 0x7f2   : > { %v5016_v39 = vmul.f32 %v14010_v21, %v4996_v15  ;;  %v14033_v27 = vadd.f32 %v14025_v34, %v5015_v57  ;;  %v14041_v13 = vmul.f32 0.0078125, %v4564_v32  ;;  %v4702_v23 = vsub.f32 %v13645_v0, %v13994_v20 }
 0x7f3   : > { %10082 = vrsqrt.f32 %v4965_v46  ;;  %v4966_v1 = vadd.f32 0.1, %v4934_v59  ;;  %v4566_v7 = vpop.xlane.xlu1 %4565  ;;  %v5083_v30 = vpack.c.bf16 %v14030_v53, %v14039_v63  ;;  %v4701_v46 = vsub.f32 %v13641_v33, %v13992_v3 }
 0x7f4   : > { %v14036_v37 = vadd.f32 %v14025_v34, %v5016_v39  ;;  %v14047_v49 = vmul.f32 0.0078125, %v4566_v7  ;;  %v4671_v8 = vmul.f32 %v14041_v13, %v14041_v13  ;;  %v4949_v59 = vsub.f32 %v13662_v38, %v13996_v19 }
 0x7f5   : > { %10084 = vrsqrt.f32 %v4966_v1  ;;  %v4812_v12 = vpop.xlane.xlu0 %4811  ;;  %v4950_v19 = vsub.f32 %v13670_v48, %v14003_v5 }
 0x7f6   : > { %16692 = vst [vmem:[#allocation88_spill] sm:$0xff] %v14036_v37  ;;  %v5084_v43 = vpack.c.bf16 %v14036_v37, %v14033_v27  ;;  %v14049_v11 = vmul.f32 0.0078125, %v4812_v12  ;;  %v4672_v39 = vmul.f32 %v14047_v49, %v14047_v49 }
 0x7f7   : > { %v4814_v14 = vpop.xlane.xlu1 %4813 }
 0x7f8   : > { %5299 = vmatprep.mubr.bf16.mxu0 %v5084_v43  ;;  %v14059_v32 = vmul.f32 0.0078125, %v4814_v14  ;;  %v4919_v12 = vmul.f32 %v14049_v11, %v14049_v11 }
 0x7f9   : > { %v4628_v56 = vpop.xlane.xlu0 %4627  ;;  %5300 = vmatmul.mubr.bf16.vlgmr.msra.gmra.mrb[64].mxu0 %v5083_v30  ;;  %v10079_v18 = vpop.eup %10078 }
 0x7fa   : > { %v4655_v15 = vmul.f32 0.0078125, %v4628_v56  ;;  %v4749_v30 = vmul.f32 %v10079_v18, %v4701_v46  ;;  %v4920_v14 = vmul.f32 %v14059_v32, %v14059_v32 }
 0x7fb   : > { %v10081_v57 = vpop.eup %10080  ;;  %v4630_v17 = vpop.xlane.xlu1 %4629 }
 0x7fc   : > { %v4687_v1 = vsub.f32 %v4655_v15, %v4671_v8  ;;  %v4656_v7 = vmul.f32 0.0078125, %v4630_v17  ;;  %v4750_v0 = vmul.f32 %v10081_v57, %v4702_v23 }
 0x7fd   : > { %v10083_v20 = vpop.eup %10082  ;;  %v4876_v43 = vpop.xlane.xlu0 %4875 }
 0x7fe   : > { %v4719_v56 = vadd.f32 0.1, %v4687_v1  ;;  %v4688_v33 = vsub.f32 %v4656_v7, %v4672_v39  ;;  %v4903_v3 = vmul.f32 0.0078125, %v4876_v43  ;;  %v4997_v36 = vmul.f32 %v10083_v20, %v4949_v59 }
 0x7ff   : > { %v10085_v38 = vpop.eup %10084  ;;  %v4878_v8 = vpop.xlane.xlu1 %4877  ;;  %v4770_v17 = vmul.f32 %v14013_v26, %v4750_v0  ;;  %v4769_v1 = vmul.f32 %v14013_v26, %v4749_v30 }
 0x800   : > { %v4720_v15 = vadd.f32 0.1, %v4688_v33  ;;  %v4935_v23 = vsub.f32 %v4903_v3, %v4919_v12  ;;  %v4904_v57 = vmul.f32 0.0078125, %v4878_v8  ;;  %10086 = vrsqrt.f32 %v4719_v56 }
 0x801   : > { %v4998_v37 = vmul.f32 %v10085_v38, %v4950_v19  ;;  %v5017_v18 = vmul.f32 %v14010_v21, %v4997_v36  ;;  %v14074_v20 = vadd.f32 %v14020_v52, %v4770_v17  ;;  %v14083_v43 = vadd.f32 %v14020_v52, %v4769_v1 }
 0x802   : > { %10088 = vrsqrt.f32 %v4720_v15  ;;  %v4967_v46 = vadd.f32 0.1, %v4935_v23  ;;  %v4936_v59 = vsub.f32 %v4904_v57, %v4920_v14  ;;  %v4568_v39 = vpop.xlane.xlu0 %4567  ;;  %v4704_v8 = vsub.f32 %v13705_v62, %v14047_v49 }
 0x803   : > { %v5018_v48 = vmul.f32 %v14010_v21, %v4998_v37  ;;  %v14077_v0 = vadd.f32 %v14025_v34, %v5017_v18  ;;  %v14085_v30 = vmul.f32 0.0078125, %v4568_v39  ;;  %v5085_v33 = vpack.c.bf16 %v14074_v20, %v14083_v43 }
 0x804   : > { %10090 = vrsqrt.f32 %v4967_v46  ;;  %v4968_v5 = vadd.f32 0.1, %v4936_v59  ;;  %v4570_v7 = vpop.xlane.xlu1 %4569  ;;  %v4703_v17 = vsub.f32 %v13701_v55, %v14041_v13  ;;  %v4951_v18 = vsub.f32 %v13722_v50, %v14049_v11 }
 0x805   : > { %v14080_v12 = vadd.f32 %v14025_v34, %v5018_v48  ;;  %v14091_v3 = vmul.f32 0.0078125, %v4570_v7  ;;  %v4673_v15 = vmul.f32 %v14085_v30, %v14085_v30  ;;  %v4952_v11 = vsub.f32 %v13730_v31, %v14059_v32 }
 0x806   : > { %10092 = vrsqrt.f32 %v4968_v5  ;;  %v4816_v36 = vpop.xlane.xlu0 %4815 }
 0x807   : > { %v5086_v37 = vpack.c.bf16 %v14080_v12, %v14077_v0  ;;  %v14093_v38 = vmul.f32 0.0078125, %v4816_v36  ;;  %v4674_v39 = vmul.f32 %v14091_v3, %v14091_v3 }
 0x808   : > { %v4818_v56 = vpop.xlane.xlu1 %4817 }
 0x809   : > { %5309 = vmatprep.mubr.bf16.mxu0 %v5086_v37  ;;  %v14103_v46 = vmul.f32 0.0078125, %v4818_v56  ;;  %v4921_v5 = vmul.f32 %v14093_v38, %v14093_v38 }
 0x80a   : > { %v4632_v19 = vpop.xlane.xlu0 %4631  ;;  %5310 = vmatmul.mubr.bf16.gmra.mrb[68].mxu0 %v5085_v33  ;;  %v10087_v14 = vpop.eup %10086 }
 0x80b   : > { %v4657_v23 = vmul.f32 0.0078125, %v4632_v19  ;;  %v4751_v36 = vmul.f32 %v10087_v14, %v4703_v17  ;;  %v4922_v56 = vmul.f32 %v14103_v46, %v14103_v46 }
 0x80c   : > { %v10089_v57 = vpop.eup %10088  ;;  %v4634_v59 = vpop.xlane.xlu1 %4633 }
 0x80d   : > { %v4689_v1 = vsub.f32 %v4657_v23, %v4673_v15  ;;  %v4658_v48 = vmul.f32 0.0078125, %v4634_v59  ;;  %v4752_v62 = vmul.f32 %v10089_v57, %v4704_v8 }
 0x80e   : > { %v10091_v49 = vpop.eup %10090  ;;  %v4880_v7 = vpop.xlane.xlu0 %4879 }
 0x80f   : > { %v4721_v37 = vadd.f32 0.1, %v4689_v1  ;;  %v4690_v55 = vsub.f32 %v4658_v48, %v4674_v39  ;;  %v4905_v13 = vmul.f32 0.0078125, %v4880_v7  ;;  %v4999_v33 = vmul.f32 %v10091_v49, %v4951_v18 }
 0x810   : > { %v10093_v50 = vpop.eup %10092  ;;  %v4882_v19 = vpop.xlane.xlu1 %4881  ;;  %v4772_v57 = vmul.f32 %v14013_v26, %v4752_v62  ;;  %v4771_v1 = vmul.f32 %v14013_v26, %v4751_v36 }
 0x811   : > { %v4722_v15 = vadd.f32 0.1, %v4690_v55  ;;  %v4937_v8 = vsub.f32 %v4905_v13, %v4921_v5  ;;  %v4906_v23 = vmul.f32 0.0078125, %v4882_v19  ;;  %10094 = vrsqrt.f32 %v4721_v37 }
 0x812   : > { %v5000_v59 = vmul.f32 %v10093_v50, %v4952_v11  ;;  %v5019_v14 = vmul.f32 %v14010_v21, %v4999_v33  ;;  %v14118_v49 = vadd.f32 %v14020_v52, %v4772_v57  ;;  %v14127_v37 = vadd.f32 %v14020_v52, %v4771_v1 }
 0x813   : > { %10096 = vrsqrt.f32 %v4722_v15  ;;  %v4969_v17 = vadd.f32 0.1, %v4937_v8  ;;  %v4938_v18 = vsub.f32 %v4906_v23, %v4922_v56  ;;  %v4572_v39 = vpop.xlane.xlu0 %4571  ;;  %v4706_v15 = vsub.f32 %v13765_v4, %v14091_v3 }
 0x814   : > { %v5020_v31 = vmul.f32 %v14010_v21, %v5000_v59  ;;  %v14121_v62 = vadd.f32 %v14025_v34, %v5019_v14  ;;  %v14129_v36 = vmul.f32 0.0078125, %v4572_v39  ;;  %v5087_v33 = vpack.c.bf16 %v14118_v49, %v14127_v37 }
 0x815   : > { %10098 = vrsqrt.f32 %v4969_v17  ;;  %v4970_v32 = vadd.f32 0.1, %v4938_v18  ;;  %v4574_v48 = vpop.xlane.xlu1 %4573  ;;  %v4705_v59 = vsub.f32 %v13761_v61, %v14085_v30  ;;  %v4953_v14 = vsub.f32 %v13782_v35, %v14093_v38 }
 0x816   : > { %v14124_v5 = vadd.f32 %v14025_v34, %v5020_v31  ;;  %v14135_v50 = vmul.f32 0.0078125, %v4574_v48  ;;  %v4675_v8 = vmul.f32 %v14129_v36, %v14129_v36  ;;  %v4954_v38 = vsub.f32 %v13790_v9, %v14103_v46 }
 0x817   : > { %10100 = vrsqrt.f32 %v4970_v32  ;;  %v4820_v7 = vpop.xlane.xlu0 %4819 }
 0x818   : > { %v5088_v55 = vpack.c.bf16 %v14124_v5, %v14121_v62  ;;  %v14137_v11 = vmul.f32 0.0078125, %v4820_v7  ;;  %v4676_v39 = vmul.f32 %v14135_v50, %v14135_v50 }
 0x819   : > { %v4822_v13 = vpop.xlane.xlu1 %4821 }
 0x81a   : > { %5319 = vmatprep.mubr.bf16.mxu0 %v5088_v55  ;;  %v14147_v17 = vmul.f32 0.0078125, %v4822_v13  ;;  %v4923_v32 = vmul.f32 %v14137_v11, %v14137_v11 }
 0x81b   : > { %v4636_v56 = vpop.xlane.xlu0 %4635  ;;  %5320 = vmatmul.mubr.bf16.gmra.mrb[72].mxu0 %v5087_v33  ;;  %v10095_v19 = vpop.eup %10094 }
 0x81c   : > { %v4659_v23 = vmul.f32 0.0078125, %v4636_v56  ;;  %v4753_v7 = vmul.f32 %v10095_v19, %v4705_v59  ;;  %v4924_v13 = vmul.f32 %v14147_v17, %v14147_v17 }
 0x81d   : > { %v10097_v57 = vpop.eup %10096  ;;  %v4638_v18 = vpop.xlane.xlu1 %4637 }
 0x81e   : > { %v4691_v1 = vsub.f32 %v4659_v23, %v4675_v8  ;;  %v4660_v31 = vmul.f32 0.0078125, %v4638_v18  ;;  %v4754_v4 = vmul.f32 %v10097_v57, %v4706_v15 }
 0x81f   : > { %v10099_v3 = vpop.eup %10098  ;;  %v4884_v48 = vpop.xlane.xlu0 %4883 }
 0x820   : > { %v4723_v55 = vadd.f32 0.1, %v4691_v1  ;;  %v4692_v61 = vsub.f32 %v4660_v31, %v4676_v39  ;;  %v4907_v30 = vmul.f32 0.0078125, %v4884_v48  ;;  %v5001_v33 = vmul.f32 %v10099_v3, %v4953_v14 }
 0x821   : > { %v10101_v35 = vpop.eup %10100  ;;  %v4886_v56 = vpop.xlane.xlu1 %4885  ;;  %v4774_v57 = vmul.f32 %v14013_v26, %v4754_v4  ;;  %v4773_v1 = vmul.f32 %v14013_v26, %v4753_v7 }
 0x822   : > { %v4724_v8 = vadd.f32 0.1, %v4692_v61  ;;  %v4939_v15 = vsub.f32 %v4907_v30, %v4923_v32  ;;  %v4908_v23 = vmul.f32 0.0078125, %v4886_v56  ;;  %10102 = vrsqrt.f32 %v4723_v55 }
 0x823   : > { %v5002_v18 = vmul.f32 %v10101_v35, %v4954_v38  ;;  %v5021_v19 = vmul.f32 %v14010_v21, %v5001_v33  ;;  %v14162_v3 = vadd.f32 %v14020_v52, %v4774_v57  ;;  %v14171_v55 = vadd.f32 %v14020_v52, %v4773_v1 }
 0x824   : > { %10104 = vrsqrt.f32 %v4724_v8  ;;  %v4971_v59 = vadd.f32 0.1, %v4939_v15  ;;  %v4940_v14 = vsub.f32 %v4908_v23, %v4924_v13  ;;  %v4576_v39 = vpop.xlane.xlu0 %4575  ;;  %v4708_v8 = vsub.f32 %v13825_v25, %v14135_v50 }
 0x825   : > { %v5022_v9 = vmul.f32 %v14010_v21, %v5002_v18  ;;  %v14165_v4 = vadd.f32 %v14025_v34, %v5021_v19  ;;  %v14173_v7 = vmul.f32 0.0078125, %v4576_v39  ;;  %v5089_v33 = vpack.c.bf16 %v14162_v3, %v14171_v55 }
 0x826   : > { %10106 = vrsqrt.f32 %v4971_v59  ;;  %v4972_v46 = vadd.f32 0.1, %v4940_v14  ;;  %v4578_v31 = vpop.xlane.xlu1 %4577  ;;  %v4707_v18 = vsub.f32 %v13821_v22, %v14129_v36  ;;  %v4955_v19 = vsub.f32 %v13847_v51, %v14137_v11 }
 0x827   : > { %v14168_v32 = vadd.f32 %v14025_v34, %v5022_v9  ;;  %v14179_v35 = vmul.f32 0.0078125, %v4578_v31  ;;  %v4677_v15 = vmul.f32 %v14173_v7, %v14173_v7  ;;  %v4956_v11 = vsub.f32 %v13854_v44, %v14147_v17 }
 0x828   : > { %10108 = vrsqrt.f32 %v4972_v46  ;;  %v4824_v48 = vpop.xlane.xlu0 %4823 }
 0x829   : > { %v5090_v61 = vpack.c.bf16 %v14168_v32, %v14165_v4  ;;  %v14181_v38 = vmul.f32 0.0078125, %v4824_v48  ;;  %v4678_v39 = vmul.f32 %v14179_v35, %v14179_v35 }
 0x82a   : > { %v4826_v30 = vpop.xlane.xlu1 %4825 }
 0x82b   : > { %5329 = vmatprep.mubr.bf16.mxu0 %v5090_v61  ;;  %v14191_v59 = vmul.f32 0.0078125, %v4826_v30  ;;  %v4925_v46 = vmul.f32 %v14181_v38, %v14181_v38 }
 0x82c   : > { %v4640_v13 = vpop.xlane.xlu0 %4639  ;;  %5330 = vmatmul.mubr.bf16.gmra.mrb[76].mxu0 %v5089_v33  ;;  %v10103_v56 = vpop.eup %10102 }
 0x82d   : > { %v4661_v23 = vmul.f32 0.0078125, %v4640_v13  ;;  %v4755_v48 = vmul.f32 %v10103_v56, %v4707_v18  ;;  %v4926_v30 = vmul.f32 %v14191_v59, %v14191_v59 }
 0x82e   : > { %v10105_v57 = vpop.eup %10104  ;;  %v4642_v14 = vpop.xlane.xlu1 %4641 }
 0x82f   : > { %v4693_v1 = vsub.f32 %v4661_v23, %v4677_v15  ;;  %v4662_v9 = vmul.f32 0.0078125, %v4642_v14  ;;  %v4756_v25 = vmul.f32 %v10105_v57, %v4708_v8 }
 0x830   : > { %v10107_v50 = vpop.eup %10106  ;;  %v4888_v31 = vpop.xlane.xlu0 %4887 }
 0x831   : > { %v4725_v61 = vadd.f32 0.1, %v4693_v1  ;;  %v4694_v22 = vsub.f32 %v4662_v9, %v4678_v39  ;;  %v4909_v36 = vmul.f32 0.0078125, %v4888_v31  ;;  %v5003_v33 = vmul.f32 %v10107_v50, %v4955_v19 }
 0x832   : > { %v10109_v51 = vpop.eup %10108  ;;  %v4890_v13 = vpop.xlane.xlu1 %4889  ;;  %v4776_v57 = vmul.f32 %v14013_v26, %v4756_v25  ;;  %v4775_v1 = vmul.f32 %v14013_v26, %v4755_v48 }
 0x833   : > { %v4726_v15 = vadd.f32 0.1, %v4694_v22  ;;  %v4941_v8 = vsub.f32 %v4909_v36, %v4925_v46  ;;  %v4910_v23 = vmul.f32 0.0078125, %v4890_v13  ;;  %10110 = vrsqrt.f32 %v4725_v61 }
 0x834   : > { %v5004_v14 = vmul.f32 %v10109_v51, %v4956_v11  ;;  %v5023_v56 = vmul.f32 %v14010_v21, %v5003_v33  ;;  %v14206_v50 = vadd.f32 %v14020_v52, %v4776_v57  ;;  %v14215_v61 = vadd.f32 %v14020_v52, %v4775_v1 }
 0x835   : > { %10112 = vrsqrt.f32 %v4726_v15  ;;  %v4973_v18 = vadd.f32 0.1, %v4941_v8  ;;  %v4942_v19 = vsub.f32 %v4910_v23, %v4926_v30  ;;  %v4580_v39 = vpop.xlane.xlu0 %4579  ;;  %v4710_v15 = vsub.f32 %v13895_v24, %v14179_v35 }
 0x836   : > { %v5024_v44 = vmul.f32 %v14010_v21, %v5004_v14  ;;  %v14209_v25 = vadd.f32 %v14025_v34, %v5023_v56  ;;  %v14217_v48 = vmul.f32 0.0078125, %v4580_v39  ;;  %v5091_v33 = vpack.c.bf16 %v14206_v50, %v14215_v61 }
 0x837   : > { %10114 = vrsqrt.f32 %v4973_v18  ;;  %v4974_v17 = vadd.f32 0.1, %v4942_v19  ;;  %v4582_v9 = vpop.xlane.xlu1 %4581  ;;  %v4709_v14 = vsub.f32 %v13881_v60, %v14173_v7  ;;  %v4957_v56 = vsub.f32 %v13915_v29, %v14181_v38 }
 0x838   : > { %v14212_v46 = vadd.f32 %v14025_v34, %v5024_v44  ;;  %v14223_v51 = vmul.f32 0.0078125, %v4582_v9  ;;  %v4679_v8 = vmul.f32 %v14217_v48, %v14217_v48  ;;  %v4958_v38 = vsub.f32 %v13921_v28, %v14191_v59 }
 0x839   : > { %10116 = vrsqrt.f32 %v4974_v17  ;;  %v4828_v31 = vpop.xlane.xlu0 %4827 }
 0x83a   : > { %v5092_v22 = vpack.c.bf16 %v14212_v46, %v14209_v25  ;;  %v14225_v11 = vmul.f32 0.0078125, %v4828_v31  ;;  %v4680_v39 = vmul.f32 %v14223_v51, %v14223_v51 }
 0x83b   : > { %v4830_v36 = vpop.xlane.xlu1 %4829 }
 0x83c   : > { %5339 = vmatprep.mubr.bf16.mxu0 %v5092_v22  ;;  %v14235_v18 = vmul.f32 0.0078125, %v4830_v36  ;;  %v4927_v17 = vmul.f32 %v14225_v11, %v14225_v11 }
 0x83d   : > { %v4644_v30 = vpop.xlane.xlu0 %4643  ;;  %5340 = vmatmul.mubr.bf16.gmra.mrb[80].mxu0 %v5091_v33  ;;  %v10111_v13 = vpop.eup %10110 }
 0x83e   : > { %v4663_v23 = vmul.f32 0.0078125, %v4644_v30  ;;  %v4757_v31 = vmul.f32 %v10111_v13, %v4709_v14  ;;  %v4928_v36 = vmul.f32 %v14235_v18, %v14235_v18 }
 0x83f   : > { %v10113_v57 = vpop.eup %10112  ;;  %v4646_v19 = vpop.xlane.xlu1 %4645 }
 0x840   : > { %v4695_v1 = vsub.f32 %v4663_v23, %v4679_v8  ;;  %v4664_v44 = vmul.f32 0.0078125, %v4646_v19  ;;  %v4758_v24 = vmul.f32 %v10113_v57, %v4710_v15 }
 0x841   : > { %v10115_v35 = vpop.eup %10114  ;;  %v4892_v9 = vpop.xlane.xlu0 %4891 }
 0x842   : > { %v4727_v22 = vadd.f32 0.1, %v4695_v1  ;;  %v4696_v60 = vsub.f32 %v4664_v44, %v4680_v39  ;;  %v4911_v7 = vmul.f32 0.0078125, %v4892_v9  ;;  %v5005_v33 = vmul.f32 %v10115_v35, %v4957_v56 }
 0x843   : > { %v10117_v29 = vpop.eup %10116  ;;  %v4894_v30 = vpop.xlane.xlu1 %4893  ;;  %v4778_v57 = vmul.f32 %v14013_v26, %v4758_v24  ;;  %v4777_v1 = vmul.f32 %v14013_v26, %v4757_v31 }
 0x844   : > { %v4728_v8 = vadd.f32 0.1, %v4696_v60  ;;  %v4943_v15 = vsub.f32 %v4911_v7, %v4927_v17  ;;  %v4912_v23 = vmul.f32 0.0078125, %v4894_v30  ;;  %10118 = vrsqrt.f32 %v4727_v22 }
 0x845   : > { %v5006_v19 = vmul.f32 %v10117_v29, %v4958_v38  ;;  %v5025_v13 = vmul.f32 %v14010_v21, %v5005_v33  ;;  %v14250_v35 = vadd.f32 %v14020_v52, %v4778_v57  ;;  %v14259_v22 = vadd.f32 %v14020_v52, %v4777_v1 }
 0x846   : > { %10120 = vrsqrt.f32 %v4728_v8  ;;  %v4975_v14 = vadd.f32 0.1, %v4943_v15  ;;  %v4944_v56 = vsub.f32 %v4912_v23, %v4928_v36  ;;  %v4584_v39 = vpop.xlane.xlu0 %4583  ;;  %v4712_v8 = vsub.f32 %v13945_v16, %v14223_v51 }
 0x847   : > { %v5026_v28 = vmul.f32 %v14010_v21, %v5006_v19  ;;  %v14253_v24 = vadd.f32 %v14025_v34, %v5025_v13  ;;  %v5093_v33 = vpack.c.bf16 %v14250_v35, %v14259_v22  ;;  %v14265_v38 = vmul.f32 0.0078125, %v4584_v39 }
 0x848   : > { %10122 = vrsqrt.f32 %v4975_v14  ;;  %v4976_v59 = vadd.f32 0.1, %v4944_v56  ;;  %v4586_v44 = vpop.xlane.xlu1 %4585  ;;  %v4711_v19 = vsub.f32 %v13941_v54, %v14217_v48  ;;  %v4959_v13 = vsub.f32 %v13949_v45, %v14225_v11 }
 0x849   : > { %v14256_v17 = vadd.f32 %v14025_v34, %v5026_v28  ;;  %v4602_v14 = vmul.f32 0.0078125, %v4586_v44  ;;  %v4960_v45 = vsub.f32 %v13953_v2, %v14235_v18 }
 0x84a   : > { %10124 = vrsqrt.f32 %v4976_v59  ;;  %v4832_v9 = vpop.xlane.xlu0 %4831 }
 0x84b   : > { %16693 = vst [vmem:[#allocation77_spill] sm:$0xff] %v14256_v17  ;;  %v4849_v31 = vmul.f32 0.0078125, %v4832_v9  ;;  %v5094_v60 = vpack.c.bf16 %v14256_v17, %v14253_v24  ;;  %v4682_v48 = vmul.f32 %v4602_v14, %v4602_v14 }
 0x84c   : > { %v4834_v7 = vpop.xlane.xlu1 %4833 }
 0x84d   : > { %v4850_v29 = vmul.f32 0.0078125, %v4834_v7  ;;  %5349 = vmatprep.mubr.bf16.mxu0 %v5094_v60  ;;  %v4929_v15 = vmul.f32 %v4849_v31, %v4849_v31  ;;  %v4681_v60 = vmul.f32 %v14265_v38, %v14265_v38 }
 0x84e   : > { %v4896_v36 = vpop.xlane.xlu0 %4895  ;;  %5350 = vmatmul.mubr.bf16.gmra.mrb[84].mxu0 %v5093_v33  ;;  %v10119_v30 = vpop.eup %10118 }
 0x84f   : > { %v4913_v23 = vmul.f32 0.0078125, %v4896_v36  ;;  %v4930_v1 = vmul.f32 %v4850_v29, %v4850_v29  ;;  %v4759_v51 = vmul.f32 %v10119_v30, %v4711_v19 }
 0x850   : > { %v10121_v57 = vpop.eup %10120  ;;  %v4898_v56 = vpop.xlane.xlu1 %4897 }
 0x851   : > { %v4945_v39 = vsub.f32 %v4913_v23, %v4929_v15  ;;  %v4914_v28 = vmul.f32 0.0078125, %v4898_v56  ;;  %v4760_v59 = vmul.f32 %v10121_v57, %v4712_v8 }
 0x852   : > { %v10123_v9 = vpop.eup %10122  ;;  %v4648_v16 = vpop.xlane.xlu0 %4647 }
 0x853   : > { %v4977_v7 = vadd.f32 0.1, %v4945_v39  ;;  %v4946_v33 = vsub.f32 %v4914_v28, %v4930_v1  ;;  %v4665_v36 = vmul.f32 0.0078125, %v4648_v16  ;;  %v5007_v17 = vmul.f32 %v10123_v9, %v4959_v13 }
 0x854   : > { %v10125_v54 = vpop.eup %10124  ;;  %v4650_v11 = vpop.xlane.xlu1 %4649  ;;  %v4780_v44 = vmul.f32 %v14013_v26, %v4760_v59  ;;  %v4779_v13 = vmul.f32 %v14013_v26, %v4759_v51  ;;  %v4962_v51 = vsub.f32 %v13977_v41, %v4850_v29 }
 0x855   : > { %10126 = vrsqrt.f32 %v4977_v7  ;;  %v4978_v8 = vadd.f32 0.1, %v4946_v33  ;;  %v4697_v15 = vsub.f32 %v4665_v36, %v4681_v60  ;;  %v4666_v23 = vmul.f32 0.0078125, %v4650_v11 }
 0x856   : > { %v5008_v57 = vmul.f32 %v10125_v54, %v4960_v45  ;;  %v5027_v56 = vmul.f32 %v14010_v21, %v5007_v17  ;;  %v14282_v18 = vadd.f32 %v14020_v52, %v4780_v44  ;;  %v14291_v17 = vadd.f32 %v14020_v52, %v4779_v13 }
 0x857   : > { %10128 = vrsqrt.f32 %v4978_v8  ;;  %v4729_v30 = vadd.f32 0.1, %v4697_v15  ;;  %v4698_v19 = vsub.f32 %v4666_v23, %v4682_v48  ;;  %v4961_v60 = vsub.f32 %v13973_v58, %v4849_v31  ;;  %v16694_v23 = vld [vmem:[#allocation80_spill] sm:$0xff] }
 0x858   : > { %v5028_v1 = vmul.f32 %v14010_v21, %v5008_v57  ;;  %v14285_v39 = vadd.f32 %v14025_v34, %v5027_v56  ;;  %v5095_v9 = vpack.c.bf16 %v14282_v18, %v14291_v17  ;;  %v4713_v36 = vsub.f32 %v13965_v47, %v14265_v38  ;;  %v10595_v56 = vld [vmem:[#allocation10 + $0x8] sm:$0xff] }
 0x859   : > { %10130 = vrsqrt.f32 %v4729_v30  ;;  %v4730_v2 = vadd.f32 0.1, %v4698_v19  ;;  %v4714_v11 = vsub.f32 %v13969_v40, %v4602_v14  ;;  %v14326_v30 = vrot.slane %v10595_v56, %v16694_v23 }
 0x85a   : > { %v14288_v28 = vadd.f32 %v14025_v34, %v5028_v1  ;;  %v5051_v19 = vadd.f32 %v14039_v63, %v13518_v10  ;;  %v5052_v1 = vadd.f32 %v14033_v27, %v13523_v6  ;;  %v16696_v10 = vld [vmem:[#allocation88_spill] sm:$0xff] }
 0x85b   : > { %10132 = vrsqrt.f32 %v4730_v2 }
 0x85c   : > { %v5096_v59 = vpack.c.bf16 %v14288_v28, %v14285_v39 }
 0x85e   : > { %5359 = vmatprep.mubr.bf16.mxu0 %v5096_v59 }
 0x85f   : > { %v10127_v16 = vpop.eup %10126  ;;  %5360 = vmatmul.mubr.bf16.gmra.mrb[88].mxu0 %v5095_v9 }
 0x860   : > { %v5009_v7 = vmul.f32 %v10127_v16, %v4961_v60  ;;  %v5053_v60 = vadd.f32 %v14030_v53, %v13529_v42 }
 0x861   : > { %v10129_v33 = vpop.eup %10128 }
 0x862   : > { %v5010_v54 = vmul.f32 %v10129_v33, %v4962_v51  ;;  %v5029_v45 = vmul.f32 %v14010_v21, %v5009_v7  ;;  %v16695_v33 = vld [vmem:[#allocation52_spill] sm:$0xff] }
 0x863   : > { %v10131_v48 = vpop.eup %10130  ;;  %v5054_v63 = vadd.f32 %v16696_v10, %v16695_v33 }
 0x864   : > { %v5030_v44 = vmul.f32 %v14010_v21, %v5010_v54  ;;  %v4761_v8 = vmul.f32 %v10131_v48, %v4713_v36  ;;  %v14305_v31 = vadd.f32 %v14025_v34, %v5029_v45 }
 0x865   : > { %v10133_v58 = vpop.eup %10132 }
 0x866   : > { %v14308_v41 = vadd.f32 %v14025_v34, %v5030_v44  ;;  %v4762_v29 = vmul.f32 %v10133_v58, %v4714_v11  ;;  %v4781_v15 = vmul.f32 %v14013_v26, %v4761_v8  ;;  %v10594_v34 = vld [vmem:[#allocation10] sm:$0xff]  ;;  %v16697_v58 = vld [vmem:[#allocation78_spill] sm:$0xff] }
 0x867   : > { %v14323_v57 = vrot.slane %v10594_v34, %v16694_v23 }
 0x868   : > { %v5098_v47 = vpack.c.bf16 %v14308_v41, %v14305_v31  ;;  %v4782_v38 = vmul.f32 %v14013_v26, %v4762_v29  ;;  %v14315_v40 = vadd.f32 %v14020_v52, %v4781_v15  ;;  %v5055_v29 = vadd.f32 %v14083_v43, %v16697_v58 }
 0x86a   : > { %5369 = vmatprep.mubr.bf16.mxu0 %v5098_v47  ;;  %v14318_v21 = vadd.f32 %v14020_v52, %v4782_v38  ;;  %v16698_v38 = vld [vmem:[#allocation85_spill] sm:$0xff] }
 0x86c   : > { %v5097_v14 = vpack.c.bf16 %v14318_v21, %v14315_v40 }
 0x86e   : > { %5370 = vmatmul.mubr.bf16.gmra.mrb[92].mxu0 %v5097_v14  ;;  %v5057_v14 = vadd.f32 %v14074_v20, %v16698_v38  ;;  %v9199_v38 = vld [vmem:[#allocation8 + $0x38] ss:$24 sps:$4 sm:$0xff]  }
 0x8cc   : > { %v5301_v26 = vpop.f32.mrb[64].mxu0 }
 0x8cd   : > { %v5302_v13 = vadd.f32 %v5301_v26, %v14323_v57  ;;  %v5303_v52 = vpop.f32.mrb[65].mxu0  ;;  %v16699_v26 = vld [vmem:[#allocation81_spill] sm:$0xff] }
 0x8ce   : > { %v5304_v2 = vadd.f32 %v5303_v52, %v14326_v30  ;;  %v5305_v59 = vpop.f32.mrb[66].mxu0 }
 0x8cf   : > { %v5380_v9 = vadd.f32 %v5302_v13, %v5051_v19  ;;  %v5306_v16 = vadd.f32 %v5305_v59, %v14323_v57  ;;  %v5307_v51 = vpop.f32.mrb[67].mxu0  ;;  %v5056_v19 = vadd.f32 %v14077_v0, %v16699_v26 }
 0x8d0   : > { %v14337_v7 = vadd.f32 %v5304_v2, %v5052_v1  ;;  %v5308_v36 = vadd.f32 %v5307_v51, %v14326_v30  ;;  %v16700_v1 = vld [vmem:[#allocation53_spill] sm:$0xff] }
 0x8d1   : > { %v8685_v54 = vmul.f32 -1.442695, %v5380_v9  ;;  %v5382_v45 = vadd.f32 %v5306_v16, %v5053_v60  ;;  %v5058_v2 = vadd.f32 %v14080_v12, %v16700_v1 }
 0x8d2   : > { %v8686_v6 = vmul.f32 -1.442695, %v14337_v7  ;;  %v14343_v27 = vadd.f32 %v5308_v36, %v5054_v63 }
 0x8d3   : > { %10134 = vpow2.f32 %v8685_v54  ;;  %v8687_v48 = vmul.f32 -1.442695, %v5382_v45 }
 0x8d4   : > { %10136 = vpow2.f32 %v8686_v6  ;;  %v8688_v42 = vmul.f32 -1.442695, %v14343_v27 }
 0x8d5   : > { %10138 = vpow2.f32 %v8687_v48  ;;  %v9190_v48 = vld [vmem:[#allocation8] ss:$24 sps:$4 sm:$0xff]  }
 0x8d6   : > { %10140 = vpow2.f32 %v8688_v42  ;;  %v9192_v42 = vld [vmem:[#allocation8 + $0x4] ss:$24 sps:$4 sm:$0xff]  }
 0x8d7   : > { %6659 = vmatprep.subr.bf16.mxu1 %v9192_v42 }
 0x8d8   : > { %6660 = vmatpush1.bf16.msra.mxu1 %v9190_v48  ;;  %v9204_v48 = vld [vmem:[#allocation8 + $0x64] ss:$24 sps:$4 sm:$0xff]  }
 0x8dd   : > { %v10135_v53 = vpop.eup %10134  ;;  %v5311_v11 = vpop.f32.mrb[68].mxu0 }
 0x8de   : > { %v10137_v44 = vpop.eup %10136  ;;  %v5508_v8 = vadd.f32 1.0, %v10135_v53  ;;  %v5312_v15 = vadd.f32 %v5311_v11, %v14323_v57  ;;  %v5313_v47 = vpop.f32.mrb[69].mxu0  ;;  %v9193_v53 = vld [vmem:[#allocation8 + $0x8] ss:$24 sps:$4 sm:$0xff]   ;;  %v9195_v11 = vld [vmem:[#allocation8 + $0xc] ss:$24 sps:$4 sm:$0xff]  }
 0x8df   : > { %v10139_v34 = vpop.eup %10138  ;;  %v5509_v56 = vadd.f32 1.0, %v10137_v44  ;;  %v5314_v13 = vadd.f32 %v5313_v47, %v14326_v30  ;;  %v5315_v52 = vpop.f32.mrb[70].mxu0  ;;  %6772 = vmatprep.subr.bf16.mxu0 %v9195_v11  ;;  %v9198_v47 = vld [vmem:[#allocation8 + $0x34] ss:$24 sps:$4 sm:$0xff]  }
 0x8e0   : > { %v10141_v59 = vpop.eup %10140  ;;  %10142 = vrcp.f32 %v5508_v8  ;;  %v5510_v43 = vadd.f32 1.0, %v10139_v34  ;;  %v14356_v60 = vadd.f32 %v5312_v15, %v5055_v29  ;;  %v5316_v16 = vadd.f32 %v5315_v52, %v14323_v57  ;;  %v5317_v51 = vpop.f32.mrb[71].mxu0  ;;  %6773 = vmatpush1.bf16.msra.mxu0 %v9193_v53  ;;  %v9196_v15 = vld [vmem:[#allocation8 + $0x30] ss:$24 sps:$4 sm:$0xff]   ;;  %6661 = vmatprep.subr.bf16.mxu1 %v9198_v47  ;;  %v9210_v47 = vld [vmem:[#allocation8 + $0x94] ss:$24 sps:$4 sm:$0xff]  }
 0x8e1   : > { %10144 = vrcp.f32 %v5509_v56  ;;  %v5511_v20 = vadd.f32 1.0, %v10141_v59  ;;  %v14359_v33 = vadd.f32 %v5314_v13, %v5056_v19  ;;  %v5318_v0 = vadd.f32 %v5317_v51, %v14326_v30  ;;  %v9201_v56 = vld [vmem:[#allocation8 + $0x3c] ss:$24 sps:$4 sm:$0xff]   ;;  %6662 = vmatpush1.bf16.msra.mxu1 %v9196_v15 }
 0x8e2   : > { %10146 = vrcp.f32 %v5510_v43  ;;  %v8689_v10 = vmul.f32 -1.442695, %v14356_v60  ;;  %v14363_v63 = vadd.f32 %v5316_v16, %v5057_v14  ;;  %v16701_v19 = vld [vmem:[#allocation86_spill] sm:$0xff]  ;;  %6774 = vmatprep.subr.bf16.mxu0 %v9201_v56  ;;  %6663 = vmatprep.subr.bf16.mxu1 %v9204_v48 }
 0x8e3   : > { %10148 = vrcp.f32 %v5511_v20  ;;  %v8690_v12 = vmul.f32 -1.442695, %v14359_v33  ;;  %v14366_v36 = vadd.f32 %v5318_v0, %v5058_v2  ;;  %v5059_v13 = vadd.f32 %v14127_v37, %v16701_v19  ;;  %v16703_v16 = vld [vmem:[#allocation54_spill] sm:$0xff] }
 0x8e4   : > { %10150 = vpow2.f32 %v8689_v10  ;;  %v8691_v54 = vmul.f32 -1.442695, %v14363_v63  ;;  %v5060_v51 = vadd.f32 %v14121_v62, %v16703_v16  ;;  %6775 = vmatpush1.bf16.msra.mxu0 %v9199_v38  ;;  %v9202_v62 = vld [vmem:[#allocation8 + $0x60] ss:$24 sps:$4 sm:$0xff]   ;;  %v9219_v16 = vld [vmem:[#allocation8 + $0xcc] ss:$24 sps:$4 sm:$0xff]  }
 0x8e5   : > { %10152 = vpow2.f32 %v8690_v12  ;;  %v8692_v6 = vmul.f32 -1.442695, %v14366_v36  ;;  %v16704_v12 = vld [vmem:[#allocation55_spill] sm:$0xff]  ;;  %6664 = vmatpush1.bf16.msra.mxu1 %v9202_v62  ;;  %v9220_v48 = vld [vmem:[#allocation8 + $0xf0] ss:$24 sps:$4 sm:$0xff]  }
 0x8e6   : > { %10154 = vpow2.f32 %v8691_v54  ;;  %v5062_v54 = vadd.f32 %v14124_v5, %v16704_v12  ;;  %6665 = vmatprep.subr.bf16.mxu1 %v9210_v47 }
 0x8e7   : > { %10156 = vpow2.f32 %v8692_v6 }
 0x8ea   : > { %v10143_v44 = vpop.eup %10142 }
 0x8eb   : > { %v10145_v8 = vpop.eup %10144  ;;  %v14370_v58 = vmul.f32 %v10143_v44, %v5380_v9  ;;  %v16702_v9 = vld [vmem:[#allocation57_spill] sm:$0xff] }
 0x8ec   : > { %v10147_v29 = vpop.eup %10146  ;;  %v5061_v1 = vadd.f32 %v14118_v49, %v16702_v9  ;;  %v9211_v9 = vld [vmem:[#allocation8 + $0x98] ss:$24 sps:$4 sm:$0xff]  }
 0x8ed   : > { %v10149_v14 = vpop.eup %10148  ;;  %5636 = vadd.xlane.f32.xlu0 %v14370_v58  ;;  %v14373_v34 = vmul.f32 %v10147_v29, %v5382_v45  ;;  %v14384_v45 = vmul.f32 %v10145_v8, %v14337_v7  ;;  %v9205_v8 = vld [vmem:[#allocation8 + $0x68] ss:$24 sps:$4 sm:$0xff]   ;;  %v9207_v29 = vld [vmem:[#allocation8 + $0x6c] ss:$24 sps:$4 sm:$0xff]   ;;  %v5684_v56 = vmul.f32 %v14370_v58, %v14370_v58 }
 0x8ee   : > { %v10151_v26 = vpop.eup %10150  ;;  %v5321_v52 = vpop.f32.mrb[72].mxu0  ;;  %v14390_v6 = vmul.f32 %v10149_v14, %v14343_v27  ;;  %6776 = vmatprep.subr.bf16.mxu0 %v9207_v29  ;;  %v9231_v29 = vld [vmem:[#allocation8 + $0x12c] ss:$24 sps:$4 sm:$0xff]  }
 0x8ef   : > { %v10153_v2 = vpop.eup %10152  ;;  %v5512_v59 = vadd.f32 1.0, %v10151_v26  ;;  %v5322_v43 = vadd.f32 %v5321_v52, %v14323_v57  ;;  %v5323_v20 = vpop.f32.mrb[73].mxu0  ;;  %5638 = vadd.xlane.f32.xlu1 %v14373_v34  ;;  %v9213_v26 = vld [vmem:[#allocation8 + $0x9c] ss:$24 sps:$4 sm:$0xff]   ;;  %6777 = vmatpush1.bf16.msra.mxu0 %v9205_v8  ;;  %v9208_v52 = vld [vmem:[#allocation8 + $0x90] ss:$24 sps:$4 sm:$0xff]  }
 0x8f0   : > { %v10155_v37 = vpop.eup %10154  ;;  %v5513_v0 = vadd.f32 1.0, %v10153_v2  ;;  %v5324_v10 = vadd.f32 %v5323_v20, %v14326_v30  ;;  %v5325_v49 = vpop.f32.mrb[74].mxu0  ;;  %v5685_v2 = vmul.f32 %v14373_v34, %v14373_v34  ;;  %6778 = vmatprep.subr.bf16.mxu0 %v9213_v26  ;;  %6666 = vmatpush1.bf16.msra.mxu1 %v9208_v52  ;;  %v9214_v20 = vld [vmem:[#allocation8 + $0xc0] ss:$24 sps:$4 sm:$0xff]  }
 0x8f1   : > { %v10157_v42 = vpop.eup %10156  ;;  %10158 = vrcp.f32 %v5512_v59  ;;  %v5514_v7 = vadd.f32 1.0, %v10155_v37  ;;  %v14392_v53 = vadd.f32 %v5322_v43, %v5059_v13  ;;  %v5326_v11 = vadd.f32 %v5325_v49, %v14323_v57  ;;  %v5327_v44 = vpop.f32.mrb[75].mxu0  ;;  %5884 = vadd.xlane.f32.xlu0 %v14384_v45  ;;  %v9216_v59 = vld [vmem:[#allocation8 + $0xc4] ss:$24 sps:$4 sm:$0xff]   ;;  %v9217_v37 = vld [vmem:[#allocation8 + $0xc8] ss:$24 sps:$4 sm:$0xff]  }
 0x8f2   : > { %10160 = vrcp.f32 %v5513_v0  ;;  %v5515_v5 = vadd.f32 1.0, %v10157_v42  ;;  %v14396_v27 = vadd.f32 %v5324_v10, %v5060_v51  ;;  %v5328_v15 = vadd.f32 %v5327_v44, %v14326_v30  ;;  %6667 = vmatprep.subr.bf16.mxu1 %v9216_v59  ;;  %v9222_v10 = vld [vmem:[#allocation8 + $0xf4] ss:$24 sps:$4 sm:$0xff]   ;;  %v9226_v59 = vld [vmem:[#allocation8 + $0x120] ss:$24 sps:$4 sm:$0xff]  }
 0x8f3   : > { %10162 = vrcp.f32 %v5514_v7  ;;  %v8693_v38 = vmul.f32 -1.442695, %v14392_v53  ;;  %v14400_v14 = vadd.f32 %v5326_v11, %v5061_v1  ;;  %5886 = vadd.xlane.f32.xlu1 %v14390_v6  ;;  %v5932_v51 = vmul.f32 %v14384_v45, %v14384_v45  ;;  %6779 = vmatpush1.bf16.msra.mxu0 %v9211_v9  ;;  %v9225_v49 = vld [vmem:[#allocation8 + $0xfc] ss:$24 sps:$4 sm:$0xff]   ;;  %v9223_v7 = vld [vmem:[#allocation8 + $0xf8] ss:$24 sps:$4 sm:$0xff]  }
 0x8f4   : > { %10164 = vrcp.f32 %v5515_v5  ;;  %v8694_v19 = vmul.f32 -1.442695, %v14396_v27  ;;  %v14406_v13 = vadd.f32 %v5328_v15, %v5062_v54  ;;  %v5933_v0 = vmul.f32 %v14390_v6, %v14390_v6  ;;  %6780 = vmatprep.subr.bf16.mxu0 %v9219_v16  ;;  %6668 = vmatpush1.bf16.msra.mxu1 %v9214_v20  ;;  %v9228_v11 = vld [vmem:[#allocation8 + $0x124] ss:$24 sps:$4 sm:$0xff]   ;;  %v16707_v9 = vld [vmem:[#allocation58_spill] sm:$0xff] }
 0x8f5   : > { %10166 = vpow2.f32 %v8693_v38  ;;  %v8695_v1 = vmul.f32 -1.442695, %v14400_v14  ;;  %5700 = vadd.xlane.f32.xlu0 %v5684_v56  ;;  %6669 = vmatprep.subr.bf16.mxu1 %v9222_v10  ;;  %v16705_v15 = vld [vmem:[#allocation56_spill] sm:$0xff]  ;;  %v16706_v38 = vld [vmem:[#allocation61_spill] sm:$0xff] }
 0x8f6   : > { %10168 = vpow2.f32 %v8694_v19  ;;  %v8696_v43 = vmul.f32 -1.442695, %v14406_v13  ;;  %v5065_v56 = vadd.f32 %v14162_v3, %v16706_v38 }
 0x8f7   : > { %10170 = vpow2.f32 %v8695_v1  ;;  %5702 = vadd.xlane.f32.xlu1 %v5685_v2  ;;  %6781 = vmatpush1.bf16.msra.mxu0 %v9217_v37  ;;  %v5064_v1 = vadd.f32 %v14165_v4, %v16707_v9  ;;  %v9229_v4 = vld [vmem:[#allocation8 + $0x128] ss:$24 sps:$4 sm:$0xff]  }
 0x8f8   : > { %10172 = vpow2.f32 %v8696_v43  ;;  %6782 = vmatprep.subr.bf16.mxu0 %v9225_v49  ;;  %6670 = vmatpush1.bf16.msra.mxu1 %v9220_v48  ;;  %v9237_v48 = vld [vmem:[#allocation8 + $0x15c] ss:$24 sps:$4 sm:$0xff]  }
 0x8f9   : > { %5948 = vadd.xlane.f32.xlu0 %v5932_v51  ;;  %v16708_v51 = vld [vmem:[#allocation59_spill] sm:$0xff]  ;;  %6671 = vmatprep.subr.bf16.mxu1 %v9228_v11 }
 0x8fa   : > { %v5066_v20 = vadd.f32 %v14168_v32, %v16708_v51 }
 0x8fb   : > { %v10159_v12 = vpop.eup %10158  ;;  %5950 = vadd.xlane.f32.xlu1 %v5933_v0  ;;  %6783 = vmatpush1.bf16.msra.mxu0 %v9223_v7  ;;  %v9234_v0 = vld [vmem:[#allocation8 + $0x154] ss:$24 sps:$4 sm:$0xff]  }
 0x8fc   : > { %v10161_v54 = vpop.eup %10160  ;;  %v14417_v62 = vmul.f32 %v10159_v12, %v14356_v60  ;;  %v5063_v60 = vadd.f32 %v14171_v55, %v16705_v15  ;;  %6784 = vmatprep.subr.bf16.mxu0 %v9231_v29  ;;  %6672 = vmatpush1.bf16.msra.mxu1 %v9226_v59 }
 0x8fd   : > { %v10163_v42 = vpop.eup %10162  ;;  %6673 = vmatprep.subr.bf16.mxu1 %v9234_v0 }
 0x8fe   : > { %v10165_v44 = vpop.eup %10164  ;;  %5640 = vadd.xlane.f32.xlu0 %v14417_v62  ;;  %v14421_v8 = vmul.f32 %v10163_v42, %v14363_v63  ;;  %v14432_v63 = vmul.f32 %v10161_v54, %v14359_v33 }
 0x8ff   : > { %v10167_v5 = vpop.eup %10166  ;;  %v5331_v47 = vpop.f32.mrb[76].mxu0  ;;  %v14438_v37 = vmul.f32 %v10165_v44, %v14366_v36  ;;  %v5686_v44 = vmul.f32 %v14417_v62, %v14417_v62  ;;  %6785 = vmatpush1.bf16.msra.mxu0 %v9229_v4  ;;  %v9247_v4 = vld [vmem:[#allocation8 + $0x1b8] ss:$24 sps:$4 sm:$0xff]  }
 0x900   : > { %v10169_v26 = vpop.eup %10168  ;;  %v5516_v19 = vadd.f32 1.0, %v10167_v5  ;;  %v5332_v52 = vadd.f32 %v5331_v47, %v14323_v57  ;;  %v5333_v2 = vpop.f32.mrb[77].mxu0  ;;  %5642 = vadd.xlane.f32.xlu1 %v14421_v8  ;;  %v9232_v5 = vld [vmem:[#allocation8 + $0x150] ss:$24 sps:$4 sm:$0xff]   ;;  %v5687_v38 = vmul.f32 %v14421_v8, %v14421_v8  ;;  %6786 = vmatprep.subr.bf16.mxu0 %v9237_v48 }
 0x901   : > { %v10171_v55 = vpop.eup %10170  ;;  %v5517_v43 = vadd.f32 1.0, %v10169_v26  ;;  %v5334_v16 = vadd.f32 %v5333_v2, %v14326_v30  ;;  %v5335_v3 = vpop.f32.mrb[78].mxu0  ;;  %v5934_v26 = vmul.f32 %v14432_v63, %v14432_v63  ;;  %6674 = vmatpush1.bf16.msra.mxu1 %v9232_v5  ;;  %v5935_v9 = vmul.f32 %v14438_v37, %v14438_v37  ;;  %v9241_v2 = vld [vmem:[#allocation8 + $0x188] ss:$24 sps:$4 sm:$0xff]   ;;  %v16711_v5 = vld [vmem:[#allocation62_spill] sm:$0xff] }
 0x902   : > { %v10173_v10 = vpop.eup %10172  ;;  %10174 = vrcp.f32 %v5516_v19  ;;  %v5518_v33 = vadd.f32 1.0, %v10171_v55  ;;  %v14440_v49 = vadd.f32 %v5332_v52, %v5063_v60  ;;  %v5336_v12 = vadd.f32 %v5335_v3, %v14323_v57  ;;  %v5337_v54 = vpop.f32.mrb[79].mxu0  ;;  %5888 = vadd.xlane.f32.xlu0 %v14432_v63  ;;  %v9235_v60 = vld [vmem:[#allocation8 + $0x158] ss:$24 sps:$4 sm:$0xff]   ;;  %v9240_v19 = vld [vmem:[#allocation8 + $0x184] ss:$24 sps:$4 sm:$0xff]  }
 0x903   : > { %10176 = vrcp.f32 %v5517_v43  ;;  %v5519_v32 = vadd.f32 1.0, %v10173_v10  ;;  %v14444_v36 = vadd.f32 %v5334_v16, %v5064_v1  ;;  %v5338_v42 = vadd.f32 %v5337_v54, %v14326_v30  ;;  %6787 = vmatpush1.bf16.msra.mxu0 %v9235_v60  ;;  %v9243_v52 = vld [vmem:[#allocation8 + $0x18c] ss:$24 sps:$4 sm:$0xff]   ;;  %v9238_v1 = vld [vmem:[#allocation8 + $0x180] ss:$24 sps:$4 sm:$0xff]   ;;  %6675 = vmatprep.subr.bf16.mxu1 %v9240_v19 }
 0x904   : > { %10178 = vrcp.f32 %v5518_v33  ;;  %v8697_v7 = vmul.f32 -1.442695, %v14440_v49  ;;  %v14448_v11 = vadd.f32 %v5336_v12, %v5065_v56  ;;  %5890 = vadd.xlane.f32.xlu1 %v14438_v37  ;;  %6788 = vmatprep.subr.bf16.mxu0 %v9243_v52  ;;  %v9246_v16 = vld [vmem:[#allocation8 + $0x1b4] ss:$24 sps:$4 sm:$0xff]   ;;  %v16709_v12 = vld [vmem:[#allocation60_spill] sm:$0xff]  ;;  %v16712_v19 = vld [vmem:[#allocation63_spill] sm:$0xff] }
 0x905   : > { %10180 = vrcp.f32 %v5519_v32  ;;  %v8698_v29 = vmul.f32 -1.442695, %v14444_v36  ;;  %v14454_v15 = vadd.f32 %v5338_v42, %v5066_v20  ;;  %6676 = vmatpush1.bf16.msra.mxu1 %v9238_v1  ;;  %v9249_v3 = vld [vmem:[#allocation8 + $0x1bc] ss:$24 sps:$4 sm:$0xff]   ;;  %v9244_v20 = vld [vmem:[#allocation8 + $0x1b0] ss:$24 sps:$4 sm:$0xff]   ;;  %v5067_v54 = vadd.f32 %v14215_v61, %v16709_v12 }
 0x906   : > { %10182 = vpow2.f32 %v8697_v7  ;;  %v8699_v47 = vmul.f32 -1.442695, %v14448_v11  ;;  %5704 = vadd.xlane.f32.xlu0 %v5686_v44  ;;  %6677 = vmatprep.subr.bf16.mxu1 %v9246_v16  ;;  %v9252_v61 = vld [vmem:[#allocation8 + $0x1e4] ss:$24 sps:$4 sm:$0xff]   ;;  %v5070_v52 = vadd.f32 %v14212_v46, %v16712_v19  ;;  %v9253_v1 = vld [vmem:[#allocation8 + $0x1e8] ss:$24 sps:$4 sm:$0xff]  }
 0x907   : > { %10184 = vpow2.f32 %v8698_v29  ;;  %v8700_v56 = vmul.f32 -1.442695, %v14454_v15  ;;  %6789 = vmatpush1.bf16.msra.mxu0 %v9241_v2  ;;  %v5068_v29 = vadd.f32 %v14209_v25, %v16711_v5  ;;  %v9250_v25 = vld [vmem:[#allocation8 + $0x1e0] ss:$24 sps:$4 sm:$0xff]   ;;  %v9264_v5 = vld [vmem:[#allocation8 + $0x244] ss:$24 sps:$4 sm:$0xff]  }
 0x908   : > { %10186 = vpow2.f32 %v8699_v47  ;;  %5706 = vadd.xlane.f32.xlu1 %v5687_v38  ;;  %6790 = vmatprep.subr.bf16.mxu0 %v9249_v3  ;;  %v9255_v47 = vld [vmem:[#allocation8 + $0x1ec] ss:$24 sps:$4 sm:$0xff]  }
 0x909   : > { %10188 = vpow2.f32 %v8700_v56  ;;  %6678 = vmatpush1.bf16.msra.mxu1 %v9244_v20 }
 0x90a   : > { %5952 = vadd.xlane.f32.xlu0 %v5934_v26  ;;  %6679 = vmatprep.subr.bf16.mxu1 %v9252_v61  ;;  %v9265_v61 = vld [vmem:[#allocation8 + $0x248] ss:$24 sps:$4 sm:$0xff]  }
 0x90b   : > { %6791 = vmatpush1.bf16.msra.mxu0 %v9247_v4 }
 0x90c   : > { %v10175_v59 = vpop.eup %10174  ;;  %5954 = vadd.xlane.f32.xlu1 %v5935_v9  ;;  %6792 = vmatprep.subr.bf16.mxu0 %v9255_v47 }
 0x90d   : > { %v10177_v55 = vpop.eup %10176  ;;  %v14465_v43 = vmul.f32 %v10175_v59, %v14392_v53  ;;  %v16710_v53 = vld [vmem:[#allocation65_spill] sm:$0xff]  ;;  %6680 = vmatpush1.bf16.msra.mxu1 %v9250_v25  ;;  %v9271_v25 = vld [vmem:[#allocation8 + $0x278] ss:$24 sps:$4 sm:$0xff]  }
 0x90e   : > { %v10179_v51 = vpop.eup %10178  ;;  %v5069_v32 = vadd.f32 %v14206_v50, %v16710_v53  ;;  %v14480_v60 = vmul.f32 %v10177_v55, %v14396_v27  ;;  %v9259_v53 = vld [vmem:[#allocation8 + $0x218] ss:$24 sps:$4 sm:$0xff]  }
 0x90f   : > { %v10181_v0 = vpop.eup %10180  ;;  %5644 = vadd.xlane.f32.xlu0 %v14465_v43  ;;  %v14469_v10 = vmul.f32 %v10179_v51, %v14400_v14  ;;  %v5688_v4 = vmul.f32 %v14465_v43, %v14465_v43  ;;  %6793 = vmatpush1.bf16.msra.mxu0 %v9253_v1 }
 0x910   : > { %v10183_v33 = vpop.eup %10182  ;;  %v5341_v48 = vpop.f32.mrb[80].mxu0  ;;  %v14486_v9 = vmul.f32 %v10181_v0, %v14406_v13  ;;  %v9258_v0 = vld [vmem:[#allocation8 + $0x214] ss:$24 sps:$4 sm:$0xff]  }
 0x911   : > { %v10185_v42 = vpop.eup %10184  ;;  %v5520_v7 = vadd.f32 1.0, %v10183_v33  ;;  %v5342_v44 = vadd.f32 %v5341_v48, %v14323_v57  ;;  %v5343_v14 = vpop.f32.mrb[81].mxu0  ;;  %5646 = vadd.xlane.f32.xlu1 %v14469_v10  ;;  %v9261_v33 = vld [vmem:[#allocation8 + $0x21c] ss:$24 sps:$4 sm:$0xff]   ;;  %v9256_v48 = vld [vmem:[#allocation8 + $0x210] ss:$24 sps:$4 sm:$0xff]   ;;  %6681 = vmatprep.subr.bf16.mxu1 %v9258_v0 }
 0x912   : > { %v10187_v38 = vpop.eup %10186  ;;  %v5521_v50 = vadd.f32 1.0, %v10185_v42  ;;  %v5344_v56 = vadd.f32 %v5343_v14, %v14326_v30  ;;  %v5345_v26 = vpop.f32.mrb[82].mxu0  ;;  %6794 = vmatprep.subr.bf16.mxu0 %v9261_v33  ;;  %6682 = vmatpush1.bf16.msra.mxu1 %v9256_v48  ;;  %v9262_v14 = vld [vmem:[#allocation8 + $0x240] ss:$24 sps:$4 sm:$0xff]   ;;  %v5937_v47 = vmul.f32 %v14486_v9, %v14486_v9 }
 0x913   : > { %v10189_v2 = vpop.eup %10188  ;;  %10190 = vrcp.f32 %v5520_v7  ;;  %v5522_v27 = vadd.f32 1.0, %v10187_v38  ;;  %v14488_v59 = vadd.f32 %v5342_v44, %v5067_v54  ;;  %v5346_v55 = vadd.f32 %v5345_v26, %v14323_v57  ;;  %v5347_v16 = vpop.f32.mrb[83].mxu0  ;;  %5892 = vadd.xlane.f32.xlu0 %v14480_v60  ;;  %6795 = vmatpush1.bf16.msra.mxu0 %v9259_v53  ;;  %v9277_v33 = vld [vmem:[#allocation8 + $0x2a8] ss:$24 sps:$4 sm:$0xff]  }
 0x914   : > { %10192 = vrcp.f32 %v5521_v50  ;;  %v5523_v3 = vadd.f32 1.0, %v10189_v2  ;;  %v14492_v51 = vadd.f32 %v5344_v56, %v5068_v29  ;;  %v5348_v46 = vadd.f32 %v5347_v16, %v14326_v30  ;;  %v9267_v29 = vld [vmem:[#allocation8 + $0x24c] ss:$24 sps:$4 sm:$0xff]   ;;  %6683 = vmatprep.subr.bf16.mxu1 %v9264_v5  ;;  %v9273_v56 = vld [vmem:[#allocation8 + $0x27c] ss:$24 sps:$4 sm:$0xff]  }
 0x915   : > { %10194 = vrcp.f32 %v5522_v27  ;;  %v8701_v13 = vmul.f32 -1.442695, %v14488_v59  ;;  %v14496_v20 = vadd.f32 %v5346_v55, %v5069_v32  ;;  %5894 = vadd.xlane.f32.xlu1 %v14486_v9  ;;  %v5689_v32 = vmul.f32 %v14469_v10, %v14469_v10  ;;  %6796 = vmatprep.subr.bf16.mxu0 %v9267_v29  ;;  %v9270_v50 = vld [vmem:[#allocation8 + $0x274] ss:$24 sps:$4 sm:$0xff]   ;;  %v9274_v55 = vld [vmem:[#allocation8 + $0x2a0] ss:$24 sps:$4 sm:$0xff]  }
 0x916   : > { %10196 = vrcp.f32 %v5523_v3  ;;  %v8702_v12 = vmul.f32 -1.442695, %v14492_v51  ;;  %v14502_v54 = vadd.f32 %v5348_v46, %v5070_v52  ;;  %v5936_v44 = vmul.f32 %v14480_v60, %v14480_v60  ;;  %6684 = vmatpush1.bf16.msra.mxu1 %v9262_v14  ;;  %v9268_v52 = vld [vmem:[#allocation8 + $0x270] ss:$24 sps:$4 sm:$0xff]   ;;  %v9276_v16 = vld [vmem:[#allocation8 + $0x2a4] ss:$24 sps:$4 sm:$0xff]  }
 0x917   : > { %10198 = vpow2.f32 %v8701_v13  ;;  %v8703_v42 = vmul.f32 -1.442695, %v14496_v20  ;;  %5708 = vadd.xlane.f32.xlu0 %v5688_v4  ;;  %6797 = vmatpush1.bf16.msra.mxu0 %v9265_v61  ;;  %v16713_v46 = vld [vmem:[#allocation87_spill] sm:$0xff]  ;;  %v16714_v4 = vld [vmem:[#allocation64_spill] sm:$0xff]  ;;  %v16717_v61 = vld [vmem:[#allocation77_spill] sm:$0xff] }
 0x918   : > { %10200 = vpow2.f32 %v8702_v12  ;;  %v8704_v7 = vmul.f32 -1.442695, %v14502_v54  ;;  %6685 = vmatprep.subr.bf16.mxu1 %v9270_v50  ;;  %6798 = vmatprep.subr.bf16.mxu0 %v9273_v56  ;;  %v5071_v13 = vadd.f32 %v14259_v22, %v16713_v46  ;;  %v5073_v0 = vadd.f32 %v14250_v35, %v16714_v4  ;;  %v9279_v12 = vld [vmem:[#allocation8 + $0x2ac] ss:$24 sps:$4 sm:$0xff]   ;;  %v16716_v14 = vld [vmem:[#allocation67_spill] sm:$0xff] }
 0x919   : > { %10202 = vpow2.f32 %v8703_v42  ;;  %5710 = vadd.xlane.f32.xlu1 %v5689_v32 }
 0x91a   : > { %10204 = vpow2.f32 %v8704_v7  ;;  %6686 = vmatpush1.bf16.msra.mxu1 %v9268_v52 }
 0x91b   : > { %5956 = vadd.xlane.f32.xlu0 %v5936_v44  ;;  %6799 = vmatpush1.bf16.msra.mxu0 %v9271_v25  ;;  %v9280_v25 = vld [vmem:[#allocation8 + $0x2d0] ss:$24 sps:$4 sm:$0xff]  }
 0x91c   : > { %6687 = vmatprep.subr.bf16.mxu1 %v9276_v16  ;;  %6800 = vmatprep.subr.bf16.mxu0 %v9279_v12 }
 0x91d   : > { %v10191_v38 = vpop.eup %10190  ;;  %5958 = vadd.xlane.f32.xlu1 %v5937_v47  ;;  %v5074_v47 = vadd.f32 %v16717_v61, %v16716_v14 }
 0x91e   : > { %v10193_v26 = vpop.eup %10192  ;;  %v14513_v19 = vmul.f32 %v10191_v38, %v14440_v49  ;;  %6688 = vmatpush1.bf16.msra.mxu1 %v9274_v55 }
 0x91f   : > { %v10195_v1 = vpop.eup %10194  ;;  %v14528_v44 = vmul.f32 %v10193_v26, %v14444_v36  ;;  %6801 = vmatpush1.bf16.msra.mxu0 %v9277_v33 }
 0x920   : > { %v10197_v2 = vpop.eup %10196  ;;  %5648 = vadd.xlane.f32.xlu0 %v14513_v19  ;;  %v14517_v27 = vmul.f32 %v10195_v1, %v14448_v11  ;;  %v16715_v11 = vld [vmem:[#allocation69_spill] sm:$0xff]  ;;  %v9285_v1 = vld [vmem:[#allocation8 + $0x2dc] ss:$24 sps:$4 sm:$0xff]   ;;  %v5690_v55 = vmul.f32 %v14513_v19, %v14513_v19 }
 0x921   : > { %v10199_v3 = vpop.eup %10198  ;;  %v5351_v49 = vpop.f32.mrb[84].mxu0  ;;  %v5072_v32 = vadd.f32 %v14253_v24, %v16715_v11  ;;  %v14534_v38 = vmul.f32 %v10197_v2, %v14454_v15  ;;  %v9282_v24 = vld [vmem:[#allocation8 + $0x2d4] ss:$24 sps:$4 sm:$0xff]   ;;  %v9283_v2 = vld [vmem:[#allocation8 + $0x2d8] ss:$24 sps:$4 sm:$0xff]   ;;  %6802 = vmatprep.subr.bf16.mxu0 %v9285_v1 }
 0x922   : > { %v10201_v48 = vpop.eup %10200  ;;  %v5524_v53 = vadd.f32 1.0, %v10199_v3  ;;  %v5352_v42 = vadd.f32 %v5351_v49, %v14323_v57  ;;  %v5353_v7 = vpop.f32.mrb[85].mxu0  ;;  %5650 = vadd.xlane.f32.xlu1 %v14517_v27  ;;  %6689 = vmatprep.subr.bf16.mxu1 %v9282_v24  ;;  %v5691_v12 = vmul.f32 %v14517_v27, %v14517_v27 }
 0x923   : > { %v10203_v22 = vpop.eup %10202  ;;  %v5525_v5 = vadd.f32 1.0, %v10201_v48  ;;  %v5354_v35 = vadd.f32 %v5353_v7, %v14326_v30  ;;  %v5355_v29 = vpop.f32.mrb[86].mxu0  ;;  %6690 = vmatpush1.bf16.msra.mxu1 %v9280_v25  ;;  %6803 = vmatpush1.bf16.msra.mxu0 %v9283_v2  ;;  %v5938_v48 = vmul.f32 %v14528_v44, %v14528_v44  ;;  %v16721_v2 = vld [vmem:[#allocation73_spill] sm:$0xff] }
 0x924   : > { %v10205_v50 = vpop.eup %10204  ;;  %10206 = vrcp.f32 %v5524_v53  ;;  %v5526_v56 = vadd.f32 1.0, %v10203_v22  ;;  %v14536_v52 = vadd.f32 %v5352_v42, %v5071_v13  ;;  %v5356_v36 = vadd.f32 %v5355_v29, %v14323_v57  ;;  %v5357_v26 = vpop.f32.mrb[87].mxu0  ;;  %5896 = vadd.xlane.f32.xlu0 %v14528_v44  ;;  %v16718_v29 = vld [vmem:[#allocation68_spill] sm:$0xff] }
 0x925   : > { %10208 = vrcp.f32 %v5525_v5  ;;  %v5527_v16 = vadd.f32 1.0, %v10205_v50  ;;  %v14540_v3 = vadd.f32 %v5354_v35, %v5072_v32  ;;  %v5358_v15 = vadd.f32 %v5357_v26, %v14326_v30 }
 0x926   : > { %10210 = vrcp.f32 %v5526_v56  ;;  %v8705_v46 = vmul.f32 -1.442695, %v14536_v52  ;;  %v14544_v13 = vadd.f32 %v5356_v36, %v5073_v0  ;;  %5898 = vadd.xlane.f32.xlu1 %v14534_v38  ;;  %v5939_v53 = vmul.f32 %v14534_v38, %v14534_v38  ;;  %v16720_v36 = vld [vmem:[#allocation66_spill] sm:$0xff] }
 0x927   : > { %10212 = vrcp.f32 %v5527_v16  ;;  %v8706_v49 = vmul.f32 -1.442695, %v14540_v3  ;;  %v14550_v4 = vadd.f32 %v5358_v15, %v5074_v47  ;;  %v5075_v14 = vadd.f32 %v14291_v17, %v16718_v29  ;;  %v16719_v47 = vld [vmem:[#allocation79_spill] sm:$0xff] }
 0x928   : > { %10214 = vpow2.f32 %v8705_v46  ;;  %v8707_v33 = vmul.f32 -1.442695, %v14544_v13  ;;  %5712 = vadd.xlane.f32.xlu0 %v5690_v55  ;;  %v5077_v24 = vadd.f32 %v14282_v18, %v16719_v47  ;;  %v5076_v26 = vadd.f32 %v14285_v39, %v16720_v36  ;;  %v16722_v36 = vld [vmem:[#allocation89_spill] sm:$0xff] }
 0x929   : > { %10216 = vpow2.f32 %v8706_v49  ;;  %v8708_v0 = vmul.f32 -1.442695, %v14550_v4  ;;  %v5078_v18 = vadd.f32 %v14288_v28, %v16721_v2 }
 0x92a   : > { %10218 = vpow2.f32 %v8707_v33  ;;  %5714 = vadd.xlane.f32.xlu1 %v5691_v12 }
 0x92b   : > { %10220 = vpow2.f32 %v8708_v0 }
 0x92c   : > { %5960 = vadd.xlane.f32.xlu0 %v5938_v48 }
 0x92e   : > { %v10207_v42 = vpop.eup %10206  ;;  %5962 = vadd.xlane.f32.xlu1 %v5939_v53 }
 0x92f   : > { %v10209_v11 = vpop.eup %10208  ;;  %v14561_v32 = vmul.f32 %v10207_v42, %v14488_v59 }
 0x930   : > { %v10211_v7 = vpop.eup %10210 }
 0x931   : > { %v10213_v22 = vpop.eup %10212  ;;  %5652 = vadd.xlane.f32.xlu0 %v14561_v32  ;;  %v14565_v5 = vmul.f32 %v10211_v7, %v14496_v20  ;;  %v14576_v20 = vmul.f32 %v10209_v11, %v14492_v51  ;;  %v5692_v53 = vmul.f32 %v14561_v32, %v14561_v32 }
 0x932   : > { %v10215_v35 = vpop.eup %10214  ;;  %v5361_v61 = vpop.f32.mrb[88].mxu0  ;;  %v14582_v46 = vmul.f32 %v10213_v22, %v14502_v54 }
 0x933   : > { %v10217_v50 = vpop.eup %10216  ;;  %v5528_v56 = vadd.f32 1.0, %v10215_v35  ;;  %v5362_v59 = vadd.f32 %v5361_v61, %v14323_v57  ;;  %v5363_v25 = vpop.f32.mrb[89].mxu0  ;;  %5654 = vadd.xlane.f32.xlu1 %v14565_v5  ;;  %v5693_v22 = vmul.f32 %v14565_v5, %v14565_v5  ;;  %v5940_v29 = vmul.f32 %v14576_v20, %v14576_v20 }
 0x934   : > { %v10219_v1 = vpop.eup %10218  ;;  %v5529_v16 = vadd.f32 1.0, %v10217_v50  ;;  %v5364_v17 = vadd.f32 %v5363_v25, %v14326_v30  ;;  %v5365_v15 = vpop.f32.mrb[90].mxu0 }
 0x935   : > { %v10221_v55 = vpop.eup %10220  ;;  %10222 = vrcp.f32 %v5528_v56  ;;  %v5530_v39 = vadd.f32 1.0, %v10219_v1  ;;  %v14584_v49 = vadd.f32 %v5362_v59, %v5075_v14  ;;  %v5366_v33 = vadd.f32 %v5365_v15, %v14323_v57  ;;  %v5367_v51 = vpop.f32.mrb[91].mxu0  ;;  %5900 = vadd.xlane.f32.xlu0 %v14576_v20  ;;  %v16723_v15 = vld [vmem:[#allocation71_spill] sm:$0xff] }
 0x936   : > { %10224 = vrcp.f32 %v5529_v16  ;;  %v5531_v12 = vadd.f32 1.0, %v10221_v55  ;;  %v14588_v0 = vadd.f32 %v5364_v17, %v5076_v26  ;;  %v5368_v48 = vadd.f32 %v5367_v51, %v14326_v30 }
 0x937   : > { %10226 = vrcp.f32 %v5530_v39  ;;  %v8709_v28 = vmul.f32 -1.442695, %v14584_v49  ;;  %v14592_v54 = vadd.f32 %v5366_v33, %v5077_v24  ;;  %5902 = vadd.xlane.f32.xlu1 %v14582_v46  ;;  %v5941_v14 = vmul.f32 %v14582_v46, %v14582_v46  ;;  %v16725_v33 = vld [vmem:[#allocation72_spill] sm:$0xff] }
 0x938   : > { %10228 = vrcp.f32 %v5531_v12  ;;  %v8710_v42 = vmul.f32 -1.442695, %v14588_v0  ;;  %v14598_v11 = vadd.f32 %v5368_v48, %v5078_v18  ;;  %v5079_v26 = vadd.f32 %v14315_v40, %v16722_v36  ;;  %v16724_v18 = vld [vmem:[#allocation70_spill] sm:$0xff] }
 0x939   : > { %10230 = vpow2.f32 %v8709_v28  ;;  %v8711_v7 = vmul.f32 -1.442695, %v14592_v54  ;;  %5716 = vadd.xlane.f32.xlu0 %v5692_v53  ;;  %v5080_v2 = vadd.f32 %v14305_v31, %v16723_v15  ;;  %v5081_v55 = vadd.f32 %v14318_v21, %v16724_v18 }
 0x93a   : > { %10232 = vpow2.f32 %v8710_v42  ;;  %v8712_v35 = vmul.f32 -1.442695, %v14598_v11  ;;  %v5082_v40 = vadd.f32 %v14308_v41, %v16725_v33 }
 0x93b   : > { %10234 = vpow2.f32 %v8711_v7  ;;  %5718 = vadd.xlane.f32.xlu1 %v5693_v22 }
 0x93c   : > { %10236 = vpow2.f32 %v8712_v35 }
 0x93d   : > { %5964 = vadd.xlane.f32.xlu0 %v5940_v29 }
 0x93f   : > { %v10223_v61 = vpop.eup %10222  ;;  %5966 = vadd.xlane.f32.xlu1 %v5941_v14 }
 0x940   : > { %v10225_v47 = vpop.eup %10224  ;;  %v14609_v24 = vmul.f32 %v10223_v61, %v14536_v52 }
 0x941   : > { %v10227_v50 = vpop.eup %10226  ;;  %v5371_v56 = vpop.f32.mrb[92].mxu0  ;;  %v14630_v31 = vmul.f32 %v10225_v47, %v14540_v3 }
 0x942   : > { %v10229_v59 = vpop.eup %10228  ;;  %v5372_v25 = vadd.f32 %v5371_v56, %v14323_v57  ;;  %v5373_v1 = vpop.f32.mrb[93].mxu0  ;;  %5656 = vadd.xlane.f32.xlu0 %v14609_v24  ;;  %v14616_v16 = vmul.f32 %v10227_v50, %v14544_v13 }
 0x943   : > { %v10231_v17 = vpop.eup %10230  ;;  %v5374_v52 = vadd.f32 %v5373_v1, %v14326_v30  ;;  %v5375_v39 = vpop.f32.mrb[94].mxu0  ;;  %v14636_v41 = vmul.f32 %v10229_v59, %v14550_v4  ;;  %v5942_v56 = vmul.f32 %v14630_v31, %v14630_v31 }
 0x944   : > { %v10233_v51 = vpop.eup %10232  ;;  %v5532_v12 = vadd.f32 1.0, %v10231_v17  ;;  %v14625_v48 = vadd.f32 %v5372_v25, %v5079_v26  ;;  %v5376_v13 = vadd.f32 %v5375_v39, %v14323_v57  ;;  %v5377_v28 = vpop.f32.mrb[95].mxu0  ;;  %5658 = vadd.xlane.f32.xlu1 %v14616_v16  ;;  %v5695_v50 = vmul.f32 %v14616_v16, %v14616_v16 }
 0x945   : > { %v10235_v53 = vpop.eup %10234  ;;  %v5533_v42 = vadd.f32 1.0, %v10233_v51  ;;  %v14632_v7 = vadd.f32 %v5374_v52, %v5080_v2  ;;  %v5378_v21 = vadd.f32 %v5377_v28, %v14326_v30  ;;  %v5694_v30 = vmul.f32 %v14609_v24, %v14609_v24  ;;  %v9288_v28 = vld [vmem:[#allocation8 + $0x14] ss:$24 sps:$4 sm:$0xff]  }
 0x946   : > { %v10237_v22 = vpop.eup %10236  ;;  %10238 = vrcp.f32 %v5532_v12  ;;  %v5534_v35 = vadd.f32 1.0, %v10235_v53  ;;  %v8713_v57 = vmul.f32 -1.442695, %v14625_v48  ;;  %v5410_v29 = vadd.f32 %v5376_v13, %v5081_v55  ;;  %5904 = vadd.xlane.f32.xlu0 %v14630_v31  ;;  %6885 = vmatprep.subr.bf16.mxu1 %v9288_v28 }
 0x947   : > { %10240 = vrcp.f32 %v5533_v42  ;;  %v5535_v3 = vadd.f32 1.0, %v10237_v22  ;;  %v8714_v14 = vmul.f32 -1.442695, %v14632_v7  ;;  %v5411_v61 = vadd.f32 %v5378_v21, %v5082_v40 }
 0x948   : > { %10242 = vrcp.f32 %v5534_v35  ;;  %v8715_v47 = vmul.f32 -1.442695, %v5410_v29  ;;  %5906 = vadd.xlane.f32.xlu1 %v14636_v41  ;;  %v5943_v59 = vmul.f32 %v14636_v41, %v14636_v41 }
 0x949   : > { %10244 = vrcp.f32 %v5535_v3  ;;  %v8716_v4 = vmul.f32 -1.442695, %v5411_v61 }
 0x94a   : > { %10246 = vpow2.f32 %v8713_v57  ;;  %5720 = vadd.xlane.f32.xlu0 %v5694_v30 }
 0x94b   : > { %10248 = vpow2.f32 %v8714_v14 }
 0x94c   : > { %10250 = vpow2.f32 %v8715_v47  ;;  %5722 = vadd.xlane.f32.xlu1 %v5695_v50 }
 0x94d   : > { %10252 = vpow2.f32 %v8716_v4 }
 0x94e   : > { %5968 = vadd.xlane.f32.xlu0 %v5942_v56 }
 0x950   : > { %v10239_v36 = vpop.eup %10238  ;;  %5970 = vadd.xlane.f32.xlu1 %v5943_v59 }
 0x951   : > { %v10241_v26 = vpop.eup %10240  ;;  %v14651_v25 = vmul.f32 %v10239_v36, %v14584_v49 }
 0x952   : > { %v10243_v1 = vpop.eup %10242  ;;  %v14659_v55 = vmul.f32 %v10241_v26, %v14588_v0 }
 0x953   : > { %v10245_v17 = vpop.eup %10244  ;;  %5660 = vadd.xlane.f32.xlu0 %v14651_v25  ;;  %v14655_v15 = vmul.f32 %v10243_v1, %v14592_v54  ;;  %v5696_v12 = vmul.f32 %v14651_v25, %v14651_v25 }
 0x954   : > { %v10247_v2 = vpop.eup %10246  ;;  %v14663_v51 = vmul.f32 %v10245_v17, %v14598_v11  ;;  %v5944_v13 = vmul.f32 %v14659_v55, %v14659_v55 }
 0x955   : > { %v10249_v52 = vpop.eup %10248  ;;  %v5536_v18 = vadd.f32 1.0, %v10247_v2  ;;  %5662 = vadd.xlane.f32.xlu1 %v14655_v15  ;;  %v5697_v0 = vmul.f32 %v14655_v15, %v14655_v15 }
 0x956   : > { %v10251_v39 = vpop.eup %10250  ;;  %v5537_v33 = vadd.f32 1.0, %v10249_v52  ;;  %v5945_v11 = vmul.f32 %v14663_v51, %v14663_v51 }
 0x957   : > { %v10253_v40 = vpop.eup %10252  ;;  %10254 = vrcp.f32 %v5536_v18  ;;  %v5538_v49 = vadd.f32 1.0, %v10251_v39  ;;  %5908 = vadd.xlane.f32.xlu0 %v14659_v55 }
 0x958   : > { %10256 = vrcp.f32 %v5537_v33  ;;  %v5539_v54 = vadd.f32 1.0, %v10253_v40 }
 0x959   : > { %10258 = vrcp.f32 %v5538_v49  ;;  %5910 = vadd.xlane.f32.xlu1 %v14663_v51 }
 0x95a   : > { %10260 = vrcp.f32 %v5539_v54 }
 0x95b   : > { %5724 = vadd.xlane.f32.xlu0 %v5696_v12 }
 0x95d   : > { %5726 = vadd.xlane.f32.xlu1 %v5697_v0 }
 0x95f   : > { %5972 = vadd.xlane.f32.xlu0 %v5944_v13 }
 0x961   : > { %v10255_v53 = vpop.eup %10254  ;;  %5974 = vadd.xlane.f32.xlu1 %v5945_v11 }
 0x962   : > { %v10257_v42 = vpop.eup %10256  ;;  %v14675_v21 = vmul.f32 %v10255_v53, %v14625_v48 }
 0x963   : > { %v10259_v22 = vpop.eup %10258  ;;  %v14682_v3 = vmul.f32 %v10257_v42, %v14632_v7 }
 0x964   : > { %5664 = vadd.xlane.f32.xlu0 %v14675_v21  ;;  %v14678_v35 = vmul.f32 %v10259_v22, %v5410_v29  ;;  %v10261_v57 = vpop.eup %10260  ;;  %v5698_v47 = vmul.f32 %v14675_v21, %v14675_v21 }
 0x965   : > { %v14685_v14 = vmul.f32 %v10261_v57, %v5411_v61  ;;  %v5946_v48 = vmul.f32 %v14682_v3, %v14682_v3 }
 0x966   : > { %5666 = vadd.xlane.f32.xlu1 %v14678_v35  ;;  %v5699_v7 = vmul.f32 %v14678_v35, %v14678_v35 }
 0x967   : > { %v5947_v29 = vmul.f32 %v14685_v14, %v14685_v14 }
 0x968   : > { %5912 = vadd.xlane.f32.xlu0 %v14682_v3 }
 0x96a   : > { %5914 = vadd.xlane.f32.xlu1 %v14685_v14 }
 0x96c   : > { %5976 = vadd.xlane.f32.xlu0 %v5946_v48 }
 0x96e   : > { %5978 = vadd.xlane.f32.xlu1 %v5947_v29 }
 0x970   : > { %5728 = vadd.xlane.f32.xlu0 %v5698_v47 }
 0x972   : > { %5730 = vadd.xlane.f32.xlu1 %v5699_v7 }
 0x97a   : > { %v5637_v61 = vpop.xlane.xlu0 %5636 }
 0x97b   : > { %v5668_v50 = vmul.f32 0.0078125, %v5637_v61 }
 0x97c   : > { %v5639_v30 = vpop.xlane.xlu1 %5638 }
 0x97d   : > { %v5669_v59 = vmul.f32 0.0078125, %v5639_v30  ;;  %v5748_v26 = vmul.f32 %v5668_v50, %v5668_v50 }
 0x97e   : > { %v5885_v4 = vpop.xlane.xlu0 %5884 }
 0x97f   : > { %v5916_v1 = vmul.f32 0.0078125, %v5885_v4  ;;  %v5749_v52 = vmul.f32 %v5669_v59, %v5669_v59 }
 0x980   : > { %v5887_v56 = vpop.xlane.xlu1 %5886 }
 0x981   : > { %v14696_v18 = vmul.f32 0.0078125, %v5887_v56  ;;  %v5996_v49 = vmul.f32 %v5916_v1, %v5916_v1 }
 0x982   : > { %v5701_v36 = vpop.xlane.xlu0 %5700 }
 0x983   : > { %v5732_v17 = vmul.f32 0.0078125, %v5701_v36  ;;  %v5997_v11 = vmul.f32 %v14696_v18, %v14696_v18 }
 0x984   : > { %v5703_v2 = vpop.xlane.xlu1 %5702 }
 0x985   : > { %v5764_v39 = vsub.f32 %v5732_v17, %v5748_v26  ;;  %v5733_v33 = vmul.f32 0.0078125, %v5703_v2  ;;  %v5781_v17 = vsub.f32 %v14373_v34, %v5669_v59 }
 0x986   : > { %v5949_v40 = vpop.xlane.xlu0 %5948 }
 0x987   : > { %v5796_v54 = vadd.f32 0.1, %v5764_v39  ;;  %v5765_v12 = vsub.f32 %v5733_v33, %v5749_v52  ;;  %v5980_v0 = vmul.f32 0.0078125, %v5949_v40  ;;  %v5780_v33 = vsub.f32 %v14370_v58, %v5668_v50 }
 0x988   : > { %v5951_v13 = vpop.xlane.xlu1 %5950  ;;  %v6028_v40 = vsub.f32 %v14384_v45, %v5916_v1  ;;  %v10597_v45 = vld [vmem:[#allocation10 + $0x10] sm:$0x7f] }
 0x989   : > { %v5797_v28 = vadd.f32 0.1, %v5765_v12  ;;  %v6012_v53 = vsub.f32 %v5980_v0, %v5996_v49  ;;  %v5981_v42 = vmul.f32 0.0078125, %v5951_v13  ;;  %10262 = vrsqrt.f32 %v5796_v54 }
 0x98b   : > { %10264 = vrsqrt.f32 %v5797_v28  ;;  %v6044_v22 = vadd.f32 0.1, %v6012_v53  ;;  %v6013_v57 = vsub.f32 %v5981_v42, %v5997_v11  ;;  %v5641_v48 = vpop.xlane.xlu0 %5640  ;;  %v10596_v42 = vld [vmem:[#allocation10 + $0x18] sm:$0x7f] }
 0x98c   : > { %v14700_v61 = vmul.f32 0.0078125, %v5641_v48 }
 0x98d   : > { %10266 = vrsqrt.f32 %v6044_v22  ;;  %v6045_v29 = vadd.f32 0.1, %v6013_v57  ;;  %v5643_v47 = vpop.xlane.xlu1 %5642  ;;  %v16726_v22 = vld [vmem:[#allocation82_spill] sm:$0xff] }
 0x98e   : > { %v14702_v4 = vmul.f32 0.0078125, %v5643_v47  ;;  %v5750_v2 = vmul.f32 %v14700_v61, %v14700_v61  ;;  %v14718_v58 = vrot.slane %v10596_v42, %v16726_v22  ;;  %v14721_v50 = vrot.slane %v10597_v45, %v16726_v22 }
 0x98f   : > { %10268 = vrsqrt.f32 %v6045_v29  ;;  %v5889_v7 = vpop.xlane.xlu0 %5888 }
 0x990   : > { %v14704_v56 = vmul.f32 0.0078125, %v5889_v7  ;;  %v5751_v0 = vmul.f32 %v14702_v4, %v14702_v4  ;;  %v6029_v7 = vsub.f32 %v14390_v6, %v14696_v18 }
 0x991   : > { %v5891_v30 = vpop.xlane.xlu1 %5890 }
 0x992   : > { %v14711_v49 = vmul.f32 0.0078125, %v5891_v30  ;;  %v5998_v59 = vmul.f32 %v14704_v56, %v14704_v56 }
 0x993   : > { %v5705_v36 = vpop.xlane.xlu0 %5704  ;;  %v10263_v26 = vpop.eup %10262 }
 0x994   : > { %v5734_v52 = vmul.f32 0.0078125, %v5705_v36  ;;  %v5828_v34 = vmul.f32 %v10263_v26, %v5780_v33  ;;  %v5999_v30 = vmul.f32 %v14711_v49, %v14711_v49  ;;  %v16727_v26 = vld [vmem:[#allocation83_spill] sm:$0xff] }
 0x995   : > { %v10265_v39 = vpop.eup %10264  ;;  %v5707_v54 = vpop.xlane.xlu1 %5706 }
 0x996   : > { %v5829_v12 = vmul.f32 %v10265_v39, %v5781_v17  ;;  %v5766_v13 = vsub.f32 %v5734_v52, %v5750_v2  ;;  %v5735_v11 = vmul.f32 0.0078125, %v5707_v54  ;;  %v14728_v17 = vrot.slane %v10597_v45, %v16727_v26 }
 0x997   : > { %v10267_v28 = vpop.eup %10266  ;;  %v5953_v53 = vpop.xlane.xlu0 %5952 }
 0x998   : > { %v5798_v1 = vadd.f32 0.1, %v5766_v13  ;;  %v5767_v57 = vsub.f32 %v5735_v11, %v5751_v0  ;;  %v5982_v48 = vmul.f32 0.0078125, %v5953_v53  ;;  %v6076_v29 = vmul.f32 %v10267_v28, %v6028_v40 }
 0x999   : > { %v10269_v47 = vpop.eup %10268  ;;  %v5955_v36 = vpop.xlane.xlu1 %5954  ;;  %v5849_v33 = vmul.f32 %v14721_v50, %v5829_v12  ;;  %v14733_v0 = vrot.slane %v10596_v42, %v16727_v26  ;;  %v5848_v11 = vmul.f32 %v14721_v50, %v5828_v34  ;;  %v9286_v34 = vld [vmem:[#allocation8 + $0x10] ss:$24 sps:$4 sm:$0xff]  }
 0x99a   : > { %v5799_v2 = vadd.f32 0.1, %v5767_v57  ;;  %v6014_v52 = vsub.f32 %v5982_v48, %v5998_v59  ;;  %v5983_v39 = vmul.f32 0.0078125, %v5955_v36  ;;  %10270 = vrsqrt.f32 %v5798_v1 }
 0x99b   : > { %v6077_v54 = vmul.f32 %v10269_v47, %v6029_v7  ;;  %v6096_v40 = vmul.f32 %v14718_v58, %v6076_v29  ;;  %v5869_v12 = vadd.f32 %v14728_v17, %v5849_v33  ;;  %v5868_v57 = vadd.f32 %v14728_v17, %v5848_v11 }
 0x99c   : > { %10272 = vrsqrt.f32 %v5799_v2  ;;  %v6046_v6 = vadd.f32 0.1, %v6014_v52  ;;  %v6015_v18 = vsub.f32 %v5983_v39, %v5999_v30  ;;  %v5645_v13 = vpop.xlane.xlu0 %5644  ;;  %v9291_v30 = vld [vmem:[#allocation8 + $0x44] ss:$24 sps:$4 sm:$0xff]   ;;  %v5783_v39 = vsub.f32 %v14421_v8, %v14702_v4 }
 0x99d   : > { %v6097_v28 = vmul.f32 %v14718_v58, %v6077_v54  ;;  %v6116_v45 = vadd.f32 %v14733_v0, %v6096_v40  ;;  %v14741_v48 = vmul.f32 0.0078125, %v5645_v13  ;;  %v14745_v7 = vpack.c.bf16 %v5869_v12, %v5868_v57  ;;  %v9289_v40 = vld [vmem:[#allocation8 + $0x40] ss:$24 sps:$4 sm:$0xff]  }
 0x99e   : > { %10274 = vrsqrt.f32 %v6046_v6  ;;  %v6047_v59 = vadd.f32 0.1, %v6015_v18  ;;  %v5647_v53 = vpop.xlane.xlu1 %5646  ;;  %v5782_v18 = vsub.f32 %v14417_v62, %v14700_v61  ;;  %v6030_v13 = vsub.f32 %v14432_v63, %v14704_v56 }
 0x99f   : > { %v6117_v1 = vadd.f32 %v14733_v0, %v6097_v28  ;;  %v14747_v36 = vmul.f32 0.0078125, %v5647_v53  ;;  %v5752_v33 = vmul.f32 %v14741_v48, %v14741_v48 }
 0x9a0   : > { %10276 = vrsqrt.f32 %v6047_v59  ;;  %v5893_v42 = vpop.xlane.xlu0 %5892  ;;  %v9294_v59 = vld [vmem:[#allocation8 + $0x74] ss:$24 sps:$4 sm:$0xff]  }
 0x9a1   : > { %v14743_v29 = vpack.c.bf16 %v6117_v1, %v6116_v45  ;;  %v14751_v26 = vmul.f32 0.0078125, %v5893_v42  ;;  %v5753_v8 = vmul.f32 %v14747_v36, %v14747_v36 }
 0x9a2   : > { %v5895_v47 = vpop.xlane.xlu1 %5894 }
 0x9a3   : > { %6691 = vmatprep.mubr.bf16.mxu1 %v14743_v29  ;;  %6804 = vmatprep.mubr.bf16.mxu0 %v14743_v29  ;;  %v14763_v11 = vmul.f32 0.0078125, %v5895_v47  ;;  %v6000_v1 = vmul.f32 %v14751_v26, %v14751_v26 }
 0x9a4   : > { %v5709_v2 = vpop.xlane.xlu0 %5708  ;;  %6692 = vmatmul.mubr.bf16.vlgmr.msra.gmra.mrb[64].mxu1 %v14745_v7  ;;  %6805 = vmatmul.mubr.bf16.vlgmr.msra.gmra.mrb[96].mxu0 %v14745_v7  ;;  %v10271_v52 = vpop.eup %10270 }
 0x9a5   : > { %v5736_v54 = vmul.f32 0.0078125, %v5709_v2  ;;  %6886 = vmatpush1.bf16.msra.mxu1 %v9286_v34  ;;  %v5830_v62 = vmul.f32 %v10271_v52, %v5782_v18  ;;  %v9292_v34 = vld [vmem:[#allocation8 + $0x70] ss:$24 sps:$4 sm:$0xff]   ;;  %v6001_v2 = vmul.f32 %v14763_v11, %v14763_v11 }
 0x9a6   : > { %v10273_v6 = vpop.eup %10272  ;;  %v5711_v28 = vpop.xlane.xlu1 %5710  ;;  %6887 = vmatprep.subr.bf16.mxu1 %v9291_v30  ;;  %v6031_v30 = vsub.f32 %v14438_v37, %v14711_v49  ;;  %v9295_v49 = vld [vmem:[#allocation8 + $0xa0] ss:$24 sps:$4 sm:$0xff]  }
 0x9a7   : > { %v5768_v4 = vsub.f32 %v5736_v54, %v5752_v33  ;;  %v5737_v53 = vmul.f32 0.0078125, %v5711_v28  ;;  %v5831_v12 = vmul.f32 %v10273_v6, %v5783_v39  ;;  %v9297_v33 = vld [vmem:[#allocation8 + $0xa4] ss:$24 sps:$4 sm:$0xff]   ;;  %v5850_v37 = vmul.f32 %v14721_v50, %v5830_v62 }
 0x9a8   : > { %v10275_v45 = vpop.eup %10274  ;;  %v5957_v42 = vpop.xlane.xlu0 %5956 }
 0x9a9   : > { %v5800_v61 = vadd.f32 0.1, %v5768_v4  ;;  %v5769_v57 = vsub.f32 %v5737_v53, %v5753_v8  ;;  %v5984_v63 = vmul.f32 0.0078125, %v5957_v42  ;;  %v6078_v56 = vmul.f32 %v10275_v45, %v6030_v13  ;;  %6888 = vmatpush1.bf16.msra.mxu1 %v9289_v40  ;;  %v9300_v53 = vld [vmem:[#allocation8 + $0xd4] ss:$24 sps:$4 sm:$0xff]  }
 0x9aa   : > { %v10277_v47 = vpop.eup %10276  ;;  %v5959_v39 = vpop.xlane.xlu1 %5958  ;;  %6889 = vmatprep.subr.bf16.mxu1 %v9294_v59  ;;  %v5851_v52 = vmul.f32 %v14721_v50, %v5831_v12 }
 0x9ab   : > { %v5801_v54 = vadd.f32 0.1, %v5769_v57  ;;  %v6016_v6 = vsub.f32 %v5984_v63, %v6000_v1  ;;  %v5985_v28 = vmul.f32 0.0078125, %v5959_v39  ;;  %10278 = vrsqrt.f32 %v5800_v61 }
 0x9ac   : > { %v6079_v18 = vmul.f32 %v10277_v47, %v6031_v30  ;;  %v6098_v40 = vmul.f32 %v14718_v58, %v6078_v56  ;;  %v5871_v12 = vadd.f32 %v14728_v17, %v5851_v52  ;;  %v5870_v63 = vadd.f32 %v14728_v17, %v5850_v37 }
 0x9ad   : > { %10280 = vrsqrt.f32 %v5801_v54  ;;  %v6048_v13 = vadd.f32 0.1, %v6016_v6  ;;  %v6017_v8 = vsub.f32 %v5985_v28, %v6001_v2  ;;  %v5649_v4 = vpop.xlane.xlu0 %5648  ;;  %6890 = vmatpush1.bf16.msra.mxu1 %v9292_v34  ;;  %v9298_v34 = vld [vmem:[#allocation8 + $0xd0] ss:$24 sps:$4 sm:$0xff]   ;;  %v9303_v2 = vld [vmem:[#allocation8 + $0x104] ss:$24 sps:$4 sm:$0xff]   ;;  %v5785_v28 = vsub.f32 %v14469_v10, %v14747_v36 }
 0x9ae   : > { %v6099_v59 = vmul.f32 %v14718_v58, %v6079_v18  ;;  %6891 = vmatprep.subr.bf16.mxu1 %v9297_v33  ;;  %v6118_v42 = vadd.f32 %v14733_v0, %v6098_v40  ;;  %v14781_v62 = vmul.f32 0.0078125, %v5649_v4  ;;  %v14785_v30 = vpack.c.bf16 %v5871_v12, %v5870_v63  ;;  %v9301_v40 = vld [vmem:[#allocation8 + $0x100] ss:$24 sps:$4 sm:$0xff]  }
 0x9af   : > { %10282 = vrsqrt.f32 %v6048_v13  ;;  %v6049_v45 = vadd.f32 0.1, %v6017_v8  ;;  %v5651_v1 = vpop.xlane.xlu1 %5650  ;;  %v5784_v8 = vsub.f32 %v14465_v43, %v14741_v48  ;;  %v6032_v4 = vsub.f32 %v14480_v60, %v14751_v26 }
 0x9b0   : > { %v6119_v61 = vadd.f32 %v14733_v0, %v6099_v59  ;;  %v14787_v39 = vmul.f32 0.0078125, %v5651_v1  ;;  %v5754_v52 = vmul.f32 %v14781_v62, %v14781_v62  ;;  %v9306_v59 = vld [vmem:[#allocation8 + $0x134] ss:$24 sps:$4 sm:$0xff]  }
 0x9b1   : > { %10284 = vrsqrt.f32 %v6049_v45  ;;  %v5897_v57 = vpop.xlane.xlu0 %5896  ;;  %6892 = vmatpush1.bf16.msra.mxu1 %v9295_v49 }
 0x9b2   : > { %v14783_v56 = vpack.c.bf16 %v6119_v61, %v6118_v42  ;;  %6893 = vmatprep.subr.bf16.mxu1 %v9300_v53  ;;  %v14791_v33 = vmul.f32 0.0078125, %v5897_v57  ;;  %v5755_v10 = vmul.f32 %v14787_v39, %v14787_v39  ;;  %v9304_v57 = vld [vmem:[#allocation8 + $0x130] ss:$24 sps:$4 sm:$0xff]  }
 0x9b3   : > { %v5899_v47 = vpop.xlane.xlu1 %5898 }
 0x9b4   : > { %6701 = vmatprep.mubr.bf16.mxu1 %v14783_v56  ;;  %6814 = vmatprep.mubr.bf16.mxu0 %v14783_v56  ;;  %v14803_v37 = vmul.f32 0.0078125, %v5899_v47  ;;  %v6002_v12 = vmul.f32 %v14791_v33, %v14791_v33 }
 0x9b5   : > { %v5713_v54 = vpop.xlane.xlu0 %5712  ;;  %6702 = vmatmul.mubr.bf16.gmra.mrb[68].mxu1 %v14785_v30  ;;  %6815 = vmatmul.mubr.bf16.gmra.mrb[100].mxu0 %v14785_v30  ;;  %v10279_v6 = vpop.eup %10278 }
 0x9b6   : > { %v5738_v18 = vmul.f32 0.0078125, %v5713_v54  ;;  %6894 = vmatpush1.bf16.msra.mxu1 %v9298_v34  ;;  %v5832_v43 = vmul.f32 %v10279_v6, %v5784_v8  ;;  %v6033_v34 = vsub.f32 %v14486_v9, %v14763_v11  ;;  %v6003_v47 = vmul.f32 %v14803_v37, %v14803_v37  ;;  %v9309_v54 = vld [vmem:[#allocation8 + $0x164] ss:$24 sps:$4 sm:$0xff]   ;;  %v9307_v11 = vld [vmem:[#allocation8 + $0x160] ss:$24 sps:$4 sm:$0xff]  }
 0x9b7   : > { %v10281_v13 = vpop.eup %10280  ;;  %v5715_v49 = vpop.xlane.xlu1 %5714  ;;  %6895 = vmatprep.subr.bf16.mxu1 %v9303_v2 }
 0x9b8   : > { %v5770_v36 = vsub.f32 %v5738_v18, %v5754_v52  ;;  %v5739_v53 = vmul.f32 0.0078125, %v5715_v49  ;;  %v5833_v45 = vmul.f32 %v10281_v13, %v5785_v28  ;;  %v5852_v9 = vmul.f32 %v14721_v50, %v5832_v43 }
 0x9b9   : > { %v10283_v1 = vpop.eup %10282  ;;  %v5961_v42 = vpop.xlane.xlu0 %5960 }
 0x9ba   : > { %v5802_v48 = vadd.f32 0.1, %v5770_v36  ;;  %v5771_v61 = vsub.f32 %v5739_v53, %v5755_v10  ;;  %v5986_v60 = vmul.f32 0.0078125, %v5961_v42  ;;  %v6080_v26 = vmul.f32 %v10283_v1, %v6032_v4  ;;  %6896 = vmatpush1.bf16.msra.mxu1 %v9301_v40  ;;  %v9312_v10 = vld [vmem:[#allocation8 + $0x194] ss:$24 sps:$4 sm:$0xff]  }
 0x9bb   : > { %v10285_v63 = vpop.eup %10284  ;;  %v5963_v2 = vpop.xlane.xlu1 %5962  ;;  %6897 = vmatprep.subr.bf16.mxu1 %v9306_v59  ;;  %v5853_v6 = vmul.f32 %v14721_v50, %v5833_v45 }
 0x9bc   : > { %v5803_v28 = vadd.f32 0.1, %v5771_v61  ;;  %v6018_v52 = vsub.f32 %v5986_v60, %v6002_v12  ;;  %v5987_v18 = vmul.f32 0.0078125, %v5963_v2  ;;  %10286 = vrsqrt.f32 %v5802_v48  ;;  %v9310_v60 = vld [vmem:[#allocation8 + $0x190] ss:$24 sps:$4 sm:$0xff]  }
 0x9bd   : > { %v6081_v13 = vmul.f32 %v10285_v63, %v6033_v34  ;;  %v6100_v40 = vmul.f32 %v14718_v58, %v6080_v26  ;;  %v5873_v45 = vadd.f32 %v14728_v17, %v5853_v6  ;;  %v5872_v48 = vadd.f32 %v14728_v17, %v5852_v9  ;;  %v9315_v63 = vld [vmem:[#allocation8 + $0x1c4] ss:$24 sps:$4 sm:$0xff]   ;;  %v9313_v6 = vld [vmem:[#allocation8 + $0x1c0] ss:$24 sps:$4 sm:$0xff]   ;;  %v9318_v9 = vld [vmem:[#allocation8 + $0x1f4] ss:$24 sps:$4 sm:$0xff]  }
 0x9be   : > { %10288 = vrsqrt.f32 %v5803_v28  ;;  %v6050_v8 = vadd.f32 0.1, %v6018_v52  ;;  %v6019_v4 = vsub.f32 %v5987_v18, %v6003_v47  ;;  %v5653_v49 = vpop.xlane.xlu0 %5652  ;;  %6898 = vmatpush1.bf16.msra.mxu1 %v9304_v57  ;;  %v5787_v28 = vsub.f32 %v14517_v27, %v14787_v39 }
 0x9bf   : > { %v6101_v59 = vmul.f32 %v14718_v58, %v6081_v13  ;;  %6899 = vmatprep.subr.bf16.mxu1 %v9309_v54  ;;  %v6120_v1 = vadd.f32 %v14733_v0, %v6100_v40  ;;  %v14821_v43 = vmul.f32 0.0078125, %v5653_v49  ;;  %v14825_v57 = vpack.c.bf16 %v5873_v45, %v5872_v48 }
 0x9c0   : > { %10290 = vrsqrt.f32 %v6050_v8  ;;  %v6051_v36 = vadd.f32 0.1, %v6019_v4  ;;  %v5655_v53 = vpop.xlane.xlu1 %5654  ;;  %v5786_v40 = vsub.f32 %v14513_v19, %v14781_v62  ;;  %v6034_v8 = vsub.f32 %v14528_v44, %v14791_v33 }
 0x9c1   : > { %v6121_v12 = vadd.f32 %v14733_v0, %v6101_v59  ;;  %v14827_v34 = vmul.f32 0.0078125, %v5655_v53  ;;  %v5756_v52 = vmul.f32 %v14821_v43, %v14821_v43 }
 0x9c2   : > { %10292 = vrsqrt.f32 %v6051_v36  ;;  %v5901_v42 = vpop.xlane.xlu0 %5900  ;;  %6900 = vmatpush1.bf16.msra.mxu1 %v9307_v11 }
 0x9c3   : > { %v14823_v61 = vpack.c.bf16 %v6121_v12, %v6120_v1  ;;  %6901 = vmatprep.subr.bf16.mxu1 %v9312_v10  ;;  %v14831_v47 = vmul.f32 0.0078125, %v5901_v42  ;;  %v5757_v27 = vmul.f32 %v14827_v34, %v14827_v34  ;;  %v9316_v1 = vld [vmem:[#allocation8 + $0x1f0] ss:$24 sps:$4 sm:$0xff]   ;;  %v6035_v42 = vsub.f32 %v14534_v38, %v14803_v37  ;;  %v9319_v37 = vld [vmem:[#allocation8 + $0x220] ss:$24 sps:$4 sm:$0xff]  }
 0x9c4   : > { %v5903_v26 = vpop.xlane.xlu1 %5902 }
 0x9c5   : > { %6711 = vmatprep.mubr.bf16.mxu1 %v14823_v61  ;;  %6824 = vmatprep.mubr.bf16.mxu0 %v14823_v61  ;;  %v14843_v4 = vmul.f32 0.0078125, %v5903_v26  ;;  %v6004_v36 = vmul.f32 %v14831_v47, %v14831_v47  ;;  %v9321_v26 = vld [vmem:[#allocation8 + $0x224] ss:$24 sps:$4 sm:$0xff]  }
 0x9c6   : > { %v5717_v2 = vpop.xlane.xlu0 %5716  ;;  %6712 = vmatmul.mubr.bf16.gmra.mrb[72].mxu1 %v14825_v57  ;;  %6825 = vmatmul.mubr.bf16.gmra.mrb[104].mxu0 %v14825_v57  ;;  %v10287_v54 = vpop.eup %10286 }
 0x9c7   : > { %v5740_v18 = vmul.f32 0.0078125, %v5717_v2  ;;  %6902 = vmatpush1.bf16.msra.mxu1 %v9310_v60  ;;  %v5834_v19 = vmul.f32 %v10287_v54, %v5786_v40  ;;  %v6005_v48 = vmul.f32 %v14843_v4, %v14843_v4 }
 0x9c8   : > { %v10289_v13 = vpop.eup %10288  ;;  %v5719_v49 = vpop.xlane.xlu1 %5718  ;;  %6903 = vmatprep.subr.bf16.mxu1 %v9315_v63 }
 0x9c9   : > { %v5772_v39 = vsub.f32 %v5740_v18, %v5756_v52  ;;  %v5741_v11 = vmul.f32 0.0078125, %v5719_v49  ;;  %v5835_v59 = vmul.f32 %v10289_v13, %v5787_v28  ;;  %v5854_v38 = vmul.f32 %v14721_v50, %v5834_v19  ;;  %v9324_v49 = vld [vmem:[#allocation8 + $0x254] ss:$24 sps:$4 sm:$0xff]  }
 0x9ca   : > { %v10291_v10 = vpop.eup %10290  ;;  %v5965_v53 = vpop.xlane.xlu0 %5964 }
 0x9cb   : > { %v5804_v62 = vadd.f32 0.1, %v5772_v39  ;;  %v5773_v45 = vsub.f32 %v5741_v11, %v5757_v27  ;;  %v5988_v44 = vmul.f32 0.0078125, %v5965_v53  ;;  %v6082_v33 = vmul.f32 %v10291_v10, %v6034_v8  ;;  %6904 = vmatpush1.bf16.msra.mxu1 %v9313_v6 }
 0x9cc   : > { %v10293_v12 = vpop.eup %10292  ;;  %v5967_v60 = vpop.xlane.xlu1 %5966  ;;  %6905 = vmatprep.subr.bf16.mxu1 %v9318_v9  ;;  %v5855_v54 = vmul.f32 %v14721_v50, %v5835_v59 }
 0x9cd   : > { %v5805_v63 = vadd.f32 0.1, %v5773_v45  ;;  %v6020_v2 = vsub.f32 %v5988_v44, %v6004_v36  ;;  %v5989_v28 = vmul.f32 0.0078125, %v5967_v60  ;;  %10294 = vrsqrt.f32 %v5804_v62  ;;  %v9322_v62 = vld [vmem:[#allocation8 + $0x250] ss:$24 sps:$4 sm:$0xff]  }
 0x9ce   : > { %v6083_v52 = vmul.f32 %v10293_v12, %v6035_v42  ;;  %v6102_v18 = vmul.f32 %v14718_v58, %v6082_v33  ;;  %v5875_v39 = vadd.f32 %v14728_v17, %v5855_v54  ;;  %v5874_v36 = vadd.f32 %v14728_v17, %v5854_v38  ;;  %v9327_v33 = vld [vmem:[#allocation8 + $0x284] ss:$24 sps:$4 sm:$0xff]  }
 0x9cf   : > { %10296 = vrsqrt.f32 %v5805_v63  ;;  %v6052_v6 = vadd.f32 0.1, %v6020_v2  ;;  %v6021_v13 = vsub.f32 %v5989_v28, %v6005_v48  ;;  %v5657_v40 = vpop.xlane.xlu0 %5656  ;;  %6906 = vmatpush1.bf16.msra.mxu1 %v9316_v1  ;;  %v5789_v60 = vsub.f32 %v14565_v5, %v14827_v34  ;;  %v9325_v2 = vld [vmem:[#allocation8 + $0x280] ss:$24 sps:$4 sm:$0xff]  }
 0x9d0   : > { %v6103_v8 = vmul.f32 %v14718_v58, %v6083_v52  ;;  %6907 = vmatprep.subr.bf16.mxu1 %v9321_v26  ;;  %v6122_v11 = vadd.f32 %v14733_v0, %v6102_v18  ;;  %v14861_v53 = vmul.f32 0.0078125, %v5657_v40  ;;  %v14865_v44 = vpack.c.bf16 %v5875_v39, %v5874_v36  ;;  %v9333_v36 = vld [vmem:[#allocation8 + $0x2e4] ss:$24 sps:$4 sm:$0xff]  }
 0x9d1   : > { %10298 = vrsqrt.f32 %v6052_v6  ;;  %v6053_v9 = vadd.f32 0.1, %v6021_v13  ;;  %v5659_v27 = vpop.xlane.xlu1 %5658  ;;  %v5788_v54 = vsub.f32 %v14561_v32, %v14821_v43  ;;  %v6036_v52 = vsub.f32 %v14576_v20, %v14831_v47  ;;  %v9330_v13 = vld [vmem:[#allocation8 + $0x2b4] ss:$24 sps:$4 sm:$0xff]  }
 0x9d2   : > { %v6123_v59 = vadd.f32 %v14733_v0, %v6103_v8  ;;  %v14867_v1 = vmul.f32 0.0078125, %v5659_v27  ;;  %v5758_v26 = vmul.f32 %v14861_v53, %v14861_v53  ;;  %v9328_v27 = vld [vmem:[#allocation8 + $0x2b0] ss:$24 sps:$4 sm:$0xff]  }
 0x9d3   : > { %10300 = vrsqrt.f32 %v6053_v9  ;;  %v5905_v10 = vpop.xlane.xlu0 %5904  ;;  %6908 = vmatpush1.bf16.msra.mxu1 %v9319_v37 }
 0x9d4   : > { %v14863_v19 = vpack.c.bf16 %v6123_v59, %v6122_v11  ;;  %6909 = vmatprep.subr.bf16.mxu1 %v9324_v49  ;;  %v14871_v12 = vmul.f32 0.0078125, %v5905_v10  ;;  %v5759_v5 = vmul.f32 %v14867_v1, %v14867_v1  ;;  %v6037_v11 = vsub.f32 %v14582_v46, %v14843_v4  ;;  %v9331_v4 = vld [vmem:[#allocation8 + $0x2e0] ss:$24 sps:$4 sm:$0xff]  }
 0x9d5   : > { %v5907_v45 = vpop.xlane.xlu1 %5906 }
 0x9d6   : > { %6721 = vmatprep.mubr.bf16.mxu1 %v14863_v19  ;;  %6834 = vmatprep.mubr.bf16.mxu0 %v14863_v19  ;;  %v14883_v18 = vmul.f32 0.0078125, %v5907_v45  ;;  %v6006_v8 = vmul.f32 %v14871_v12, %v14871_v12 }
 0x9d7   : > { %v5721_v42 = vpop.xlane.xlu0 %5720  ;;  %6722 = vmatmul.mubr.bf16.gmra.mrb[76].mxu1 %v14865_v44  ;;  %6835 = vmatmul.mubr.bf16.gmra.mrb[108].mxu0 %v14865_v44  ;;  %v10295_v48 = vpop.eup %10294 }
 0x9d8   : > { %v5742_v63 = vmul.f32 0.0078125, %v5721_v42  ;;  %6910 = vmatpush1.bf16.msra.mxu1 %v9322_v62  ;;  %v5836_v32 = vmul.f32 %v10295_v48, %v5788_v54  ;;  %v6007_v59 = vmul.f32 %v14883_v18, %v14883_v18 }
 0x9d9   : > { %v10297_v28 = vpop.eup %10296  ;;  %v5723_v6 = vpop.xlane.xlu1 %5722  ;;  %6911 = vmatprep.subr.bf16.mxu1 %v9327_v33 }
 0x9da   : > { %v5774_v34 = vsub.f32 %v5742_v63, %v5758_v26  ;;  %v5743_v40 = vmul.f32 0.0078125, %v5723_v6  ;;  %v5837_v38 = vmul.f32 %v10297_v28, %v5789_v60  ;;  %v5856_v46 = vmul.f32 %v14721_v50, %v5836_v32 }
 0x9db   : > { %v10299_v37 = vpop.eup %10298  ;;  %v5969_v49 = vpop.xlane.xlu0 %5968 }
 0x9dc   : > { %v5806_v43 = vadd.f32 0.1, %v5774_v34  ;;  %v5775_v9 = vsub.f32 %v5743_v40, %v5759_v5  ;;  %v5990_v20 = vmul.f32 0.0078125, %v5969_v49  ;;  %v6084_v47 = vmul.f32 %v10299_v37, %v6036_v52  ;;  %6912 = vmatpush1.bf16.msra.mxu1 %v9325_v2 }
 0x9dd   : > { %v10301_v39 = vpop.eup %10300  ;;  %v5971_v10 = vpop.xlane.xlu1 %5970  ;;  %6913 = vmatprep.subr.bf16.mxu1 %v9330_v13  ;;  %v5857_v42 = vmul.f32 %v14721_v50, %v5837_v38  ;;  %v5876_v40 = vadd.f32 %v14728_v17, %v5856_v46 }
 0x9de   : > { %v5807_v62 = vadd.f32 0.1, %v5775_v9  ;;  %v6022_v45 = vsub.f32 %v5990_v20, %v6006_v8  ;;  %v5991_v33 = vmul.f32 0.0078125, %v5971_v10  ;;  %10302 = vrsqrt.f32 %v5806_v43 }
 0x9df   : > { %v6085_v48 = vmul.f32 %v10301_v39, %v6037_v11  ;;  %v6104_v60 = vmul.f32 %v14718_v58, %v6084_v47  ;;  %v5877_v6 = vadd.f32 %v14728_v17, %v5857_v42  ;;  %v5791_v47 = vsub.f32 %v14616_v16, %v14867_v1 }
 0x9e0   : > { %10304 = vrsqrt.f32 %v5807_v62  ;;  %v6054_v26 = vadd.f32 0.1, %v6022_v45  ;;  %v6023_v63 = vsub.f32 %v5991_v33, %v6007_v59  ;;  %v5661_v2 = vpop.xlane.xlu0 %5660  ;;  %6914 = vmatpush1.bf16.msra.mxu1 %v9328_v27  ;;  %v5790_v59 = vsub.f32 %v14609_v24, %v14861_v53 }
 0x9e1   : > { %v6105_v28 = vmul.f32 %v14718_v58, %v6085_v48  ;;  %6915 = vmatprep.subr.bf16.mxu1 %v9333_v36  ;;  %v6124_v13 = vadd.f32 %v14733_v0, %v6104_v60  ;;  %v14901_v38 = vmul.f32 0.0078125, %v5661_v2  ;;  %v14905_v49 = vpack.c.bf16 %v5877_v6, %v5876_v40 }
 0x9e2   : > { %10306 = vrsqrt.f32 %v6054_v26  ;;  %v6055_v54 = vadd.f32 0.1, %v6023_v63  ;;  %v5663_v52 = vpop.xlane.xlu1 %5662  ;;  %v6038_v10 = vsub.f32 %v14630_v31, %v14871_v12  ;;  %v6039_v12 = vsub.f32 %v14636_v41, %v14883_v18 }
 0x9e3   : > { %v6125_v5 = vadd.f32 %v14733_v0, %v6105_v28  ;;  %v14907_v32 = vmul.f32 0.0078125, %v5663_v52  ;;  %v5760_v27 = vmul.f32 %v14901_v38, %v14901_v38 }
 0x9e4   : > { %10308 = vrsqrt.f32 %v6055_v54  ;;  %v5909_v34 = vpop.xlane.xlu0 %5908  ;;  %6916 = vmatpush1.bf16.msra.mxu1 %v9331_v4 }
 0x9e5   : > { %v14903_v37 = vpack.c.bf16 %v6125_v5, %v6124_v13  ;;  %v14911_v43 = vmul.f32 0.0078125, %v5909_v34  ;;  %v5761_v45 = vmul.f32 %v14907_v32, %v14907_v32 }
 0x9e6   : > { %v5911_v8 = vpop.xlane.xlu1 %5910 }
 0x9e7   : > { %6731 = vmatprep.mubr.bf16.mxu1 %v14903_v37  ;;  %6844 = vmatprep.mubr.bf16.mxu0 %v14903_v37  ;;  %v14923_v36 = vmul.f32 0.0078125, %v5911_v8  ;;  %v6008_v48 = vmul.f32 %v14911_v43, %v14911_v43 }
 0x9e8   : > { %v5725_v9 = vpop.xlane.xlu0 %5724  ;;  %6732 = vmatmul.mubr.bf16.gmra.mrb[80].mxu1 %v14905_v49  ;;  %6845 = vmatmul.mubr.bf16.gmra.mrb[112].mxu0 %v14905_v49  ;;  %v10303_v20 = vpop.eup %10302 }
 0x9e9   : > { %v5744_v39 = vmul.f32 0.0078125, %v5725_v9  ;;  %v5838_v26 = vmul.f32 %v10303_v20, %v5790_v59  ;;  %v6009_v46 = vmul.f32 %v14923_v36, %v14923_v36 }
 0x9ea   : > { %v10305_v11 = vpop.eup %10304  ;;  %v5727_v62 = vpop.xlane.xlu1 %5726 }
 0x9eb   : > { %v5776_v33 = vsub.f32 %v5744_v39, %v5760_v27  ;;  %v5745_v42 = vmul.f32 0.0078125, %v5727_v62  ;;  %v5839_v16 = vmul.f32 %v10305_v11, %v5791_v47  ;;  %v5858_v9 = vmul.f32 %v14721_v50, %v5838_v26 }
 0x9ec   : > { %v10307_v1 = vpop.eup %10306  ;;  %v5973_v60 = vpop.xlane.xlu0 %5972 }
 0x9ed   : > { %v5808_v63 = vadd.f32 0.1, %v5776_v33  ;;  %v5777_v24 = vsub.f32 %v5745_v42, %v5761_v45  ;;  %v5992_v53 = vmul.f32 0.0078125, %v5973_v60  ;;  %v6086_v2 = vmul.f32 %v10307_v1, %v6038_v10 }
 0x9ee   : > { %v10309_v31 = vpop.eup %10308  ;;  %v5975_v4 = vpop.xlane.xlu1 %5974  ;;  %v5859_v6 = vmul.f32 %v14721_v50, %v5839_v16  ;;  %v5878_v59 = vadd.f32 %v14728_v17, %v5858_v9  ;;  %v5793_v60 = vsub.f32 %v14655_v15, %v14907_v32 }
 0x9ef   : > { %v5809_v28 = vadd.f32 0.1, %v5777_v24  ;;  %v6024_v54 = vsub.f32 %v5992_v53, %v6008_v48  ;;  %v5993_v52 = vmul.f32 0.0078125, %v5975_v4  ;;  %10310 = vrsqrt.f32 %v5808_v63 }
 0x9f0   : > { %v6087_v13 = vmul.f32 %v10309_v31, %v6039_v12  ;;  %v6106_v5 = vmul.f32 %v14718_v58, %v6086_v2  ;;  %v5879_v47 = vadd.f32 %v14728_v17, %v5859_v6  ;;  %v5792_v53 = vsub.f32 %v14651_v25, %v14901_v38 }
 0x9f1   : > { %10312 = vrsqrt.f32 %v5809_v28  ;;  %v6056_v34 = vadd.f32 0.1, %v6024_v54  ;;  %v6025_v40 = vsub.f32 %v5993_v52, %v6009_v46  ;;  %v5665_v8 = vpop.xlane.xlu0 %5664  ;;  %v6040_v2 = vsub.f32 %v14659_v55, %v14911_v43 }
 0x9f2   : > { %v6107_v41 = vmul.f32 %v14718_v58, %v6087_v13  ;;  %v6126_v27 = vadd.f32 %v14733_v0, %v6106_v5  ;;  %v14945_v33 = vpack.c.bf16 %v5879_v47, %v5878_v59  ;;  %v14951_v16 = vmul.f32 0.0078125, %v5665_v8 }
 0x9f3   : > { %10314 = vrsqrt.f32 %v6056_v34  ;;  %v6057_v18 = vadd.f32 0.1, %v6025_v40  ;;  %v5667_v20 = vpop.xlane.xlu1 %5666  ;;  %v6041_v55 = vsub.f32 %v14663_v51, %v14923_v36 }
 0x9f4   : > { %v6127_v39 = vadd.f32 %v14733_v0, %v6107_v41  ;;  %v5683_v31 = vmul.f32 0.0078125, %v5667_v20  ;;  %v5762_v32 = vmul.f32 %v14951_v16, %v14951_v16 }
 0x9f5   : > { %10316 = vrsqrt.f32 %v6057_v18  ;;  %v5913_v11 = vpop.xlane.xlu0 %5912 }
 0x9f6   : > { %v14941_v10 = vmul.f32 0.0078125, %v5913_v11  ;;  %v14943_v62 = vpack.c.bf16 %v6127_v39, %v6126_v27  ;;  %v5763_v43 = vmul.f32 %v5683_v31, %v5683_v31 }
 0x9f7   : > { %v5915_v45 = vpop.xlane.xlu1 %5914 }
 0x9f8   : > { %v14947_v42 = vmul.f32 0.0078125, %v5915_v45  ;;  %6741 = vmatprep.mubr.bf16.mxu1 %v14943_v62  ;;  %6854 = vmatprep.mubr.bf16.mxu0 %v14943_v62  ;;  %v6010_v26 = vmul.f32 %v14941_v10, %v14941_v10 }
 0x9f9   : > { %v5977_v1 = vpop.xlane.xlu0 %5976  ;;  %6742 = vmatmul.mubr.bf16.gmra.mrb[84].mxu1 %v14945_v33  ;;  %6855 = vmatmul.mubr.bf16.gmra.mrb[116].mxu0 %v14945_v33  ;;  %v10311_v48 = vpop.eup %10310 }
 0x9fa   : > { %v5994_v63 = vmul.f32 0.0078125, %v5977_v1  ;;  %v6011_v46 = vmul.f32 %v14947_v42, %v14947_v42  ;;  %v5840_v6 = vmul.f32 %v10311_v48, %v5792_v53  ;;  %v6043_v53 = vsub.f32 %v14685_v14, %v14947_v42 }
 0x9fb   : > { %v10313_v24 = vpop.eup %10312  ;;  %v5979_v12 = vpop.xlane.xlu1 %5978 }
 0x9fc   : > { %v6026_v4 = vsub.f32 %v5994_v63, %v6010_v26  ;;  %v5995_v28 = vmul.f32 0.0078125, %v5979_v12  ;;  %v5841_v54 = vmul.f32 %v10313_v24, %v5793_v60  ;;  %v5860_v11 = vmul.f32 %v14721_v50, %v5840_v6 }
 0x9fd   : > { %v10315_v15 = vpop.eup %10314  ;;  %v5729_v52 = vpop.xlane.xlu0 %5728  ;;  %v6042_v63 = vsub.f32 %v14682_v3, %v14941_v10 }
 0x9fe   : > { %v6058_v13 = vadd.f32 0.1, %v6026_v4  ;;  %v6027_v5 = vsub.f32 %v5995_v28, %v6011_v46  ;;  %v5746_v25 = vmul.f32 0.0078125, %v5729_v52  ;;  %v6088_v38 = vmul.f32 %v10315_v15, %v6040_v2 }
 0x9ff   : > { %v10317_v34 = vpop.eup %10316  ;;  %v5731_v40 = vpop.xlane.xlu1 %5730  ;;  %v5861_v8 = vmul.f32 %v14721_v50, %v5841_v54  ;;  %v5880_v48 = vadd.f32 %v14728_v17, %v5860_v11  ;;  %v5794_v46 = vsub.f32 %v14675_v21, %v14951_v16  ;;  %v5795_v15 = vsub.f32 %v14678_v35, %v5683_v31 }
 0xa00   : > { %10318 = vrsqrt.f32 %v6058_v13  ;;  %v6059_v9 = vadd.f32 0.1, %v6027_v5  ;;  %v5778_v41 = vsub.f32 %v5746_v25, %v5762_v32  ;;  %v5747_v18 = vmul.f32 0.0078125, %v5731_v40 }
 0xa01   : > { %v6089_v20 = vmul.f32 %v10317_v34, %v6041_v55  ;;  %v6108_v47 = vmul.f32 %v14718_v58, %v6088_v38  ;;  %v5881_v36 = vadd.f32 %v14728_v17, %v5861_v8 }
 0xa02   : > { %10320 = vrsqrt.f32 %v6059_v9  ;;  %v5810_v27 = vadd.f32 0.1, %v5778_v41  ;;  %v5779_v39 = vsub.f32 %v5747_v18, %v5763_v43 }
 0xa03   : > { %v6109_v59 = vmul.f32 %v14718_v58, %v6089_v20  ;;  %v6128_v45 = vadd.f32 %v14733_v0, %v6108_v47  ;;  %v6144_v26 = vpack.c.bf16 %v5881_v36, %v5880_v48 }
 0xa04   : > { %10322 = vrsqrt.f32 %v5810_v27  ;;  %v5811_v51 = vadd.f32 0.1, %v5779_v39 }
 0xa05   : > { %v6129_v1 = vadd.f32 %v14733_v0, %v6109_v59 }
 0xa06   : > { %10324 = vrsqrt.f32 %v5811_v51 }
 0xa07   : > { %v6145_v60 = vpack.c.bf16 %v6129_v1, %v6128_v45 }
 0xa09   : > { %6751 = vmatprep.mubr.bf16.mxu1 %v6145_v60  ;;  %6864 = vmatprep.mubr.bf16.mxu0 %v6145_v60 }
 0xa0a   : > { %v10319_v24 = vpop.eup %10318  ;;  %6752 = vmatmul.mubr.bf16.gmra.mrb[88].mxu1 %v6144_v26  ;;  %6865 = vmatmul.mubr.bf16.gmra.mrb[120].mxu0 %v6144_v26 }
 0xa0b   : > { %v6090_v2 = vmul.f32 %v10319_v24, %v6042_v63 }
 0xa0c   : > { %v10321_v12 = vpop.eup %10320 }
 0xa0d   : > { %v6091_v4 = vmul.f32 %v10321_v12, %v6043_v53  ;;  %v6110_v28 = vmul.f32 %v14718_v58, %v6090_v2 }
 0xa0e   : > { %v10323_v54 = vpop.eup %10322 }
 0xa0f   : > { %v6111_v3 = vmul.f32 %v14718_v58, %v6091_v4  ;;  %v5842_v10 = vmul.f32 %v10323_v54, %v5794_v46  ;;  %v6130_v52 = vadd.f32 %v14733_v0, %v6110_v28  ;;  %v15007_v58 = vld [vmem:[%s16204_s5] sm:$0x3f] }
 0xa10   : > { %v10325_v32 = vpop.eup %10324  ;;  %v15029_v45 = vrot.slane %v15007_v58, %v16726_v22 }
 0xa11   : > { %v6131_v6 = vadd.f32 %v14733_v0, %v6111_v3  ;;  %v5843_v14 = vmul.f32 %v10325_v32, %v5795_v15  ;;  %v5862_v42 = vmul.f32 %v14721_v50, %v5842_v10  ;;  %v16729_v0 = vld [vmem:[#allocation51_spill] sm:$0xff] }
 0xa12   : > { %16731 = vst [vmem:[#allocation75_spill] sm:$0xff] %v15029_v45 }
 0xa13   : > { %v6147_v13 = vpack.c.bf16 %v6131_v6, %v6130_v52  ;;  %v5863_v21 = vmul.f32 %v14721_v50, %v5843_v14  ;;  %v5882_v16 = vadd.f32 %v14728_v17, %v5862_v42  ;;  %v16728_v50 = vld [vmem:[#allocation49_spill] sm:$0xff] }
 0xa15   : > { %6761 = vmatprep.mubr.bf16.mxu1 %v6147_v13  ;;  %6874 = vmatprep.mubr.bf16.mxu0 %v6147_v13  ;;  %v5883_v35 = vadd.f32 %v14728_v17, %v5863_v21  ;;  %v15011_v17 = vrot.slane %v15007_v58, %v16728_v50 }
 0xa17   : > { %v6146_v31 = vpack.c.bf16 %v5883_v35, %v5882_v16 }
 0xa19   : > { %6762 = vmatmul.mubr.bf16.gmra.mrb[92].mxu1 %v6146_v31  ;;  %6875 = vmatmul.mubr.bf16.gmra.mrb[124].mxu0 %v6146_v31 }
 0xa1a   : > { %6917 = vmatprep.mubr.bf16.mxu1 %v14743_v29  ;;  %v15015_v29 = vrot.slane %v15007_v58, %v16729_v0 }
 0xa21   : > { %6918 = vmatmul.mubr.bf16.vlgmr.msra.gmra.mrb[96].mxu1 %v14745_v7  ;;  %v16730_v7 = vld [vmem:[#allocation84_spill] sm:$0xff] }
 0xa22   : > { %6927 = vmatprep.mubr.bf16.mxu1 %v14783_v56  ;;  %v15019_v56 = vrot.slane %v15007_v58, %v16730_v7 }
 0xa29   : > { %6928 = vmatmul.mubr.bf16.gmra.mrb[100].mxu1 %v14785_v30 }
 0xa2a   : > { %6937 = vmatprep.mubr.bf16.mxu1 %v14823_v61 }
 0xa31   : > { %6938 = vmatmul.mubr.bf16.gmra.mrb[104].mxu1 %v14825_v57 }
 0xa32   : > { %6947 = vmatprep.mubr.bf16.mxu1 %v14863_v19 }
 0xa39   : > { %6948 = vmatmul.mubr.bf16.gmra.mrb[108].mxu1 %v14865_v44 }
 0xa3a   : > { %6957 = vmatprep.mubr.bf16.mxu1 %v14903_v37 }
 0xa41   : > { %6958 = vmatmul.mubr.bf16.gmra.mrb[112].mxu1 %v14905_v49 }
 0xa42   : > { %6967 = vmatprep.mubr.bf16.mxu1 %v14943_v62 }
 0xa49   : > { %6968 = vmatmul.mubr.bf16.gmra.mrb[116].mxu1 %v14945_v33 }
 0xa4a   : > { %6977 = vmatprep.mubr.bf16.mxu1 %v6145_v60 }
 0xa51   : > { %6978 = vmatmul.mubr.bf16.gmra.mrb[120].mxu1 %v6144_v26 }
 0xa52   : > { %6987 = vmatprep.mubr.bf16.mxu1 %v6147_v13 }
 0xa59   : > { %6988 = vmatmul.mubr.bf16.gmra.mrb[124].mxu1 %v6146_v31 }
 0xa77   : > { %v6693_v30 = vpop.f32.mrb[64].mxu1  ;;  %v6806_v61 = vpop.f32.mrb[96].mxu0 }
 0xa78   : > { %v6694_v57 = vadd.f32 %v6693_v30, %v15011_v17  ;;  %v6807_v19 = vadd.f32 %v6806_v61, %v15015_v29  ;;  %v6695_v44 = vpop.f32.mrb[65].mxu1  ;;  %v6808_v37 = vpop.f32.mrb[97].mxu0 }
 0xa79   : > { %v6809_v49 = vadd.f32 %v6808_v37, %v15019_v56  ;;  %v6697_v62 = vpop.f32.mrb[66].mxu1  ;;  %v6810_v33 = vpop.f32.mrb[98].mxu0  ;;  %v6696_v50 = vadd.f32 %v6695_v44, %v15029_v45 }
 0xa7a   : > { %v7451_v5 = vsub.f32 %v6694_v57, %v6807_v19  ;;  %v6698_v25 = vadd.f32 %v6697_v62, %v15011_v17  ;;  %v6811_v38 = vadd.f32 %v6810_v33, %v15015_v29  ;;  %v6699_v34 = vpop.f32.mrb[67].mxu1  ;;  %v6812_v55 = vpop.f32.mrb[99].mxu0  ;;  %v7371_v18 = vmul.f32 %v6694_v57, %v6694_v57 }
 0xa7b   : > { %v7483_v43 = vsub.f32 0.0, %v6809_v49  ;;  %v6813_v9 = vadd.f32 %v6812_v55, %v15019_v56  ;;  %v7435_v1 = vadd.f32 1.837877, %v6809_v49  ;;  %v6700_v7 = vadd.f32 %v6699_v34, %v15029_v45 }
 0xa7c   : > { %v7452_v8 = vsub.f32 %v6698_v25, %v6811_v38  ;;  %v7387_v47 = vadd.f32 1.837877, %v7371_v18  ;;  %v7595_v27 = vmul.f32 4.539993e-05, %v7371_v18  ;;  %v7372_v39 = vmul.f32 %v6698_v25, %v6698_v25 }
 0xa7d   : > { %v7499_v40 = vmul.f32 1.442695, %v7483_v43  ;;  %v7484_v41 = vsub.f32 0.0, %v6813_v9  ;;  %v7467_v11 = vmul.f32 %v7451_v5, %v7451_v5  ;;  %v7436_v61 = vadd.f32 1.837877, %v6813_v9 }
 0xa7e   : > { %v7403_v24 = vmul.f32 -0.5, %v7387_v47  ;;  %v7611_v53 = vadd.f32 11.837877, %v7595_v27  ;;  %v7596_v28 = vmul.f32 4.539993e-05, %v7372_v39  ;;  %v7468_v14 = vmul.f32 %v7452_v8, %v7452_v8 }
 0xa7f   : > { %10326 = vpow2.f32 %v7499_v40  ;;  %v7501_v20 = vmul.f32 1.442695, %v7484_v41  ;;  %v7388_v6 = vadd.f32 1.837877, %v7372_v39  ;;  %v7915_v38 = vadd.f32 1.837877, %v6696_v50 }
 0xa80   : > { %v7627_v42 = vmul.f32 -0.5, %v7611_v53  ;;  %v7419_v31 = vadd.f32 -1.89712, %v7403_v24  ;;  %v7612_v0 = vadd.f32 11.837877, %v7596_v28 }
 0xa81   : > { %10328 = vpow2.f32 %v7501_v20  ;;  %v7404_v19 = vmul.f32 -0.5, %v7388_v6  ;;  %v7916_v44 = vadd.f32 1.837877, %v6700_v7 }
 0xa82   : > { %v7643_v49 = vadd.f32 -2.3025851, %v7627_v42  ;;  %v7628_v5 = vmul.f32 -0.5, %v7612_v0  ;;  %v15076_v0 = vmul.f32 -0.5, %v7915_v38 }
 0xa83   : > { %v15047_v40 = vadd.f32 -1.89712, %v7404_v19  ;;  %v15078_v7 = vmul.f32 -0.5, %v7916_v44 }
 0xa84   : > { %v15055_v47 = vadd.f32 -2.3025851, %v7628_v5  ;;  %16733 = vst [vmem:[#allocation76_spill] sm:$0xff] %v15076_v0 }
 0xa85   : > { %16734 = vst [vmem:[#allocation80_spill] sm:$0xff] %v15078_v7 }
 0xa88   : > { %v6703_v59 = vpop.f32.mrb[68].mxu1  ;;  %v6816_v51 = vpop.f32.mrb[100].mxu0 }
 0xa89   : > { %v10327_v36 = vpop.eup %10326  ;;  %v6704_v48 = vadd.f32 %v6703_v59, %v15011_v17  ;;  %v6817_v60 = vadd.f32 %v6816_v51, %v15015_v29  ;;  %v6705_v26 = vpop.f32.mrb[69].mxu1 }
 0xa8a   : > { %v6818_v63 = vpop.f32.mrb[101].mxu0  ;;  %v7531_v2 = vmul.f32 %v10327_v36, %v7467_v11  ;;  %v6707_v46 = vpop.f32.mrb[70].mxu1  ;;  %v6706_v39 = vadd.f32 %v6705_v26, %v15029_v45 }
 0xa8b   : > { %v6819_v12 = vadd.f32 %v6818_v63, %v15019_v56  ;;  %v6820_v4 = vpop.f32.mrb[102].mxu0  ;;  %v7453_v54 = vsub.f32 %v6704_v48, %v6817_v60  ;;  %v6708_v15 = vadd.f32 %v6707_v46, %v15011_v17  ;;  %v15036_v3 = vpop.f32.mrb[71].mxu1  ;;  %v7373_v37 = vmul.f32 %v6704_v48, %v6704_v48 }
 0xa8c   : > { %v6821_v22 = vadd.f32 %v6820_v4, %v15015_v29  ;;  %v6822_v10 = vpop.f32.mrb[103].mxu0  ;;  %v7547_v32 = vadd.f32 %v7531_v2, %v7435_v1  ;;  %v10329_v35 = vpop.eup %10328  ;;  %v6710_v5 = vadd.f32 %v15036_v3, %v15029_v45 }
 0xa8d   : > { %v7485_v52 = vsub.f32 0.0, %v6819_v12  ;;  %v7532_v57 = vmul.f32 %v10329_v35, %v7468_v14  ;;  %v15043_v25 = vadd.f32 %v6822_v10, %v15019_v56  ;;  %v7389_v34 = vadd.f32 1.837877, %v7373_v37 }
 0xa8e   : > { %v7563_v13 = vmul.f32 -0.5, %v7547_v32  ;;  %v15038_v16 = vsub.f32 %v6708_v15, %v6821_v22  ;;  %v7597_v27 = vmul.f32 4.539993e-05, %v7373_v37  ;;  %v7437_v1 = vadd.f32 1.837877, %v6819_v12 }
 0xa8f   : > { %v7503_v21 = vmul.f32 1.442695, %v7485_v52  ;;  %v7548_v33 = vadd.f32 %v7532_v57, %v7436_v61  ;;  %v7486_v8 = vsub.f32 0.0, %v15043_v25  ;;  %v7405_v48 = vmul.f32 -0.5, %v7389_v34  ;;  %v16735_v61 = vld [vmem:[#allocation50_spill] sm:$0xff] }
 0xa90   : > { %v7579_v30 = vadd.f32 -0.2876821, %v7563_v13  ;;  %v7469_v60 = vmul.f32 %v7453_v54, %v7453_v54  ;;  %v7374_v63 = vmul.f32 %v6708_v15, %v6708_v15  ;;  %v7613_v12 = vadd.f32 11.837877, %v7597_v27 }
 0xa91   : > { %10330 = vpow2.f32 %v7503_v21  ;;  %v7564_v43 = vmul.f32 -0.5, %v7548_v33  ;;  %v7505_v11 = vmul.f32 1.442695, %v7486_v8  ;;  %v15086_v57 = vrot.slane %v15007_v58, %v16735_v61 }
 0xa92   : > { %v7659_v62 = vmax.f32 %v7419_v31, %v7579_v30  ;;  %v7629_v19 = vmul.f32 -0.5, %v7613_v12  ;;  %v7917_v37 = vadd.f32 1.837877, %v6706_v39  ;;  %v15088_v33 = vadd.f32 -1.89712, %v7405_v48 }
 0xa93   : > { %v15053_v20 = vadd.f32 -0.2876821, %v7564_v43  ;;  %10332 = vpow2.f32 %v7505_v11  ;;  %v7918_v39 = vadd.f32 1.837877, %v6710_v5  ;;  %v7438_v11 = vadd.f32 1.837877, %v15043_v25 }
 0xa94   : > { %v15045_v55 = vmax.f32 %v7659_v62, %v7643_v49  ;;  %v7390_v62 = vadd.f32 1.837877, %v7374_v63 }
 0xa95   : > { %v7660_v36 = vmax.f32 %v15047_v40, %v15053_v20 }
 0xa96   : > { %v7691_v9 = vsub.f32 %v7419_v31, %v15045_v55  ;;  %v7739_v41 = vsub.f32 %v7579_v30, %v15045_v55  ;;  %v7803_v18 = vsub.f32 %v7643_v49, %v15045_v55  ;;  %v7598_v31 = vmul.f32 4.539993e-05, %v7374_v63 }
 0xa97   : > { %v15061_v46 = vmax.f32 %v7660_v36, %v15055_v47  ;;  %v15082_v30 = vrot.slane %v15007_v58, %v16694_v23  ;;  %v7470_v58 = vmul.f32 %v15038_v16, %v15038_v16 }
 0xa98   : > { %v7707_v59 = vmul.f32 1.442695, %v7691_v9  ;;  %v7755_v51 = vmul.f32 1.442695, %v7739_v41  ;;  %v7819_v10 = vmul.f32 1.442695, %v7803_v18 }
 0xa99   : > { %v6713_v24 = vpop.f32.mrb[72].mxu1  ;;  %v6826_v53 = vpop.f32.mrb[104].mxu0  ;;  %16732 = vst [vmem:[#allocation74_spill] sm:$0xff] %v15061_v46  ;;  %v7692_v52 = vsub.f32 %v15047_v40, %v15061_v46  ;;  %v7740_v6 = vsub.f32 %v15053_v20, %v15061_v46  ;;  %v7804_v14 = vsub.f32 %v15055_v47, %v15061_v46  ;;  %v7614_v43 = vadd.f32 11.837877, %v7598_v31 }
 0xa9a   : > { %10334 = vpow2.f32 %v7707_v59  ;;  %v6714_v26 = vadd.f32 %v6713_v24, %v15011_v17  ;;  %v6827_v4 = vadd.f32 %v6826_v53, %v15015_v29  ;;  %v6715_v28 = vpop.f32.mrb[73].mxu1  ;;  %v6828_v22 = vpop.f32.mrb[105].mxu0  ;;  %v15099_v18 = vadd.f32 -2.3025851, %v7629_v19 }
 0xa9b   : > { %v10331_v2 = vpop.eup %10330  ;;  %10336 = vpow2.f32 %v7755_v51  ;;  %v6717_v54 = vpop.f32.mrb[74].mxu1  ;;  %v6829_v42 = vadd.f32 %v6828_v22, %v15019_v56  ;;  %v6716_v23 = vadd.f32 %v6715_v28, %v15029_v45  ;;  %v15101_v20 = vmul.f32 -0.5, %v7917_v37 }
 0xa9c   : > { %v7533_v32 = vmul.f32 %v10331_v2, %v7469_v60  ;;  %v6830_v15 = vpop.f32.mrb[106].mxu0  ;;  %v15072_v13 = vpop.f32.mrb[75].mxu1  ;;  %v15074_v50 = vsub.f32 %v6714_v26, %v6827_v4  ;;  %10338 = vpow2.f32 %v7819_v10  ;;  %v6718_v40 = vadd.f32 %v6717_v54, %v15011_v17 }
 0xa9d   : > { %v6832_v21 = vpop.f32.mrb[107].mxu0  ;;  %v7487_v38 = vsub.f32 0.0, %v6829_v42  ;;  %v7375_v34 = vmul.f32 %v6714_v26, %v6714_v26  ;;  %v6831_v9 = vadd.f32 %v6830_v15, %v15015_v29  ;;  %v10333_v41 = vpop.eup %10332  ;;  %16736 = vst [vmem:[#allocation52_spill] sm:$0xff] %v15101_v20  ;;  %v7406_v47 = vmul.f32 -0.5, %v7390_v62 }
 0xa9e   : > { %v7549_v35 = vadd.f32 %v7533_v32, %v7437_v1  ;;  %v7534_v59 = vmul.f32 %v10333_v41, %v7470_v58  ;;  %v7630_v36 = vmul.f32 -0.5, %v7614_v43  ;;  %v7919_v1 = vadd.f32 1.837877, %v6716_v23 }
 0xa9f   : > { %v7507_v8 = vmul.f32 1.442695, %v7487_v38  ;;  %v15109_v48 = vsub.f32 %v6718_v40, %v6831_v9  ;;  %v7709_v60 = vmul.f32 1.442695, %v7692_v52  ;;  %v7391_v24 = vadd.f32 1.837877, %v7375_v34 }
 0xaa0   : > { %v7565_v49 = vmul.f32 -0.5, %v7549_v35  ;;  %v7550_v63 = vadd.f32 %v7534_v59, %v7438_v11  ;;  %v7376_v53 = vmul.f32 %v6718_v40, %v6718_v40  ;;  %v15118_v4 = vadd.f32 %v6832_v21, %v15019_v56 }
 0xaa1   : > { %10340 = vpow2.f32 %v7507_v8  ;;  %v15120_v28 = vadd.f32 -1.89712, %v7406_v47  ;;  %v15122_v22 = vmul.f32 -0.5, %v7918_v39  ;;  %v7599_v12 = vmul.f32 4.539993e-05, %v7375_v34 }
 0xaa2   : > { %v15092_v44 = vadd.f32 -0.2876821, %v7565_v49  ;;  %v7566_v10 = vmul.f32 -0.5, %v7550_v63  ;;  %v7757_v32 = vmul.f32 1.442695, %v7740_v6  ;;  %10342 = vpow2.f32 %v7709_v60 }
 0xaa3   : > { %16738 = vst [vmem:[#allocation78_spill] sm:$0xff] %v15122_v22  ;;  %v7821_v54 = vmul.f32 1.442695, %v7804_v14  ;;  %v15124_v15 = vadd.f32 -2.3025851, %v7630_v36  ;;  %v15128_v61 = vmul.f32 -0.5, %v7919_v1 }
 0xaa4   : > { %v7661_v3 = vmax.f32 %v15088_v33, %v15092_v44  ;;  %v10335_v27 = vpop.eup %10334  ;;  %v15126_v31 = vadd.f32 -0.2876821, %v7566_v10  ;;  %v7439_v19 = vadd.f32 1.837877, %v6829_v42  ;;  %v7407_v21 = vmul.f32 -0.5, %v7391_v24 }
 0xaa5   : > { %v10337_v16 = vpop.eup %10336  ;;  %16739 = vst [vmem:[#allocation85_spill] sm:$0xff] %v15128_v61  ;;  %v7600_v37 = vmul.f32 4.539993e-05, %v7376_v53  ;;  %v7488_v49 = vsub.f32 0.0, %v15118_v4  ;;  %v7615_v14 = vadd.f32 11.837877, %v7599_v12  ;;  %10344 = vpow2.f32 %v7757_v32 }
 0xaa6   : > { %v15107_v51 = vmax.f32 %v7661_v3, %v15099_v18  ;;  %v7787_v52 = vadd.f32 %v10337_v16, %v10335_v27  ;;  %v10339_v35 = vpop.eup %10338  ;;  %v7662_v6 = vmax.f32 %v15120_v28, %v15126_v31  ;;  %v7471_v42 = vmul.f32 %v15074_v50, %v15074_v50 }
 0xaa7   : > { %v7392_v40 = vadd.f32 1.837877, %v7376_v53  ;;  %v7509_v58 = vmul.f32 1.442695, %v7488_v49  ;;  %10346 = vpow2.f32 %v7821_v54  ;;  %v7616_v11 = vadd.f32 11.837877, %v7600_v37 }
 0xaa8   : > { %16737 = vst [vmem:[#allocation88_spill] sm:$0xff] %v15107_v51  ;;  %v7693_v2 = vsub.f32 %v15088_v33, %v15107_v51  ;;  %v7741_v25 = vsub.f32 %v15092_v44, %v15107_v51  ;;  %v7805_v26 = vsub.f32 %v15099_v18, %v15107_v51  ;;  %v15131_v5 = vadd.f32 %v10339_v35, %v7787_v52 }
 0xaa9   : > { %v15140_v41 = vmax.f32 %v7662_v6, %v15124_v15  ;;  %v6720_v18 = vadd.f32 %v15072_v13, %v15029_v45  ;;  %10348 = vpow2.f32 %v7509_v58  ;;  %v7631_v13 = vmul.f32 -0.5, %v7615_v14 }
 0xaaa   : > { %v6723_v62 = vpop.f32.mrb[76].mxu1  ;;  %v6836_v33 = vpop.f32.mrb[108].mxu0  ;;  %v7711_v1 = vmul.f32 1.442695, %v7693_v2  ;;  %v7408_v63 = vmul.f32 -0.5, %v7392_v40  ;;  %v7472_v2 = vmul.f32 %v15109_v48, %v15109_v48 }
 0xaab   : > { %v6724_v38 = vadd.f32 %v6723_v62, %v15011_v17  ;;  %v6837_v44 = vadd.f32 %v6836_v33, %v15015_v29  ;;  %v6725_v43 = vpop.f32.mrb[77].mxu1  ;;  %v6838_v23 = vpop.f32.mrb[109].mxu0  ;;  %16740 = vst [vmem:[#allocation81_spill] sm:$0xff] %v15140_v41  ;;  %v7694_v59 = vsub.f32 %v15120_v28, %v15140_v41  ;;  %v7742_v16 = vsub.f32 %v15126_v31, %v15140_v41 }
 0xaac   : > { %v6727_v34 = vpop.f32.mrb[78].mxu1  ;;  %v6840_v8 = vpop.f32.mrb[110].mxu0  ;;  %v6839_v50 = vadd.f32 %v6838_v23, %v15019_v56  ;;  %v7806_v36 = vsub.f32 %v15124_v15, %v15140_v41  ;;  %v7759_v53 = vmul.f32 1.442695, %v7741_v25  ;;  %v15156_v10 = vadd.f32 -1.89712, %v7407_v21 }
 0xaad   : > { %v10341_v9 = vpop.eup %10340  ;;  %v15144_v3 = vsub.f32 %v6724_v38, %v6837_v44  ;;  %v15146_v47 = vpop.f32.mrb[79].mxu1  ;;  %v6728_v24 = vadd.f32 %v6727_v34, %v15011_v17  ;;  %v7920_v12 = vadd.f32 1.837877, %v6720_v18  ;;  %v7377_v32 = vmul.f32 %v6724_v38, %v6724_v38 }
 0xaae   : > { %v6842_v27 = vpop.f32.mrb[111].mxu0  ;;  %v7535_v39 = vmul.f32 %v10341_v9, %v7471_v42  ;;  %v7823_v54 = vmul.f32 1.442695, %v7805_v26  ;;  %v7632_v28 = vmul.f32 -0.5, %v7616_v11  ;;  %v7489_v35 = vsub.f32 0.0, %v6839_v50  ;;  %v15158_v37 = vpop.eup %10342 }
 0xaaf   : > { %v15160_v31 = vadd.f32 -2.3025851, %v7631_v13  ;;  %v6841_v49 = vadd.f32 %v6840_v8, %v15015_v29  ;;  %10350 = vpow2.f32 %v7711_v1  ;;  %v15168_v21 = vadd.f32 -1.89712, %v7408_v63  ;;  %v15172_v14 = vpop.eup %10344 }
 0xab0   : > { %v7551_v60 = vadd.f32 %v7535_v39, %v7439_v19  ;;  %v6726_v19 = vadd.f32 %v6725_v43, %v15029_v45  ;;  %v7378_v26 = vmul.f32 %v6728_v24, %v6728_v24  ;;  %10352 = vpow2.f32 %v7759_v53 }
 0xab1   : > { %v15170_v62 = vmul.f32 -0.5, %v7920_v12  ;;  %v7601_v33 = vmul.f32 4.539993e-05, %v7377_v32  ;;  %v7511_v6 = vmul.f32 1.442695, %v7489_v35  ;;  %10354 = vpow2.f32 %v7823_v54  ;;  %v15178_v43 = vpop.eup %10346 }
 0xab2   : > { %v7567_v52 = vmul.f32 -0.5, %v7551_v60  ;;  %v15176_v38 = vadd.f32 -2.3025851, %v7632_v28  ;;  %v7458_v44 = vsub.f32 %v6728_v24, %v6841_v49  ;;  %v7440_v23 = vadd.f32 1.837877, %v15118_v4 }
 0xab3   : > { %16741 = vst [vmem:[#allocation53_spill] sm:$0xff] %v15170_v62  ;;  %v7921_v42 = vadd.f32 1.837877, %v6726_v19  ;;  %10356 = vpow2.f32 %v7511_v6  ;;  %v15182_v40 = vadd.f32 %v6842_v27, %v15019_v56  ;;  %v10349_v58 = vpop.eup %10348  ;;  %v7393_v8 = vadd.f32 1.837877, %v7377_v32 }
 0xab4   : > { %v15166_v25 = vadd.f32 -0.2876821, %v7567_v52  ;;  %v7441_v9 = vadd.f32 1.837877, %v6839_v50  ;;  %v7602_v18 = vmul.f32 4.539993e-05, %v7378_v26  ;;  %v7536_v11 = vmul.f32 %v10349_v58, %v7472_v2 }
 0xab5   : > { %v7713_v39 = vmul.f32 1.442695, %v7694_v59  ;;  %v7617_v13 = vadd.f32 11.837877, %v7601_v33  ;;  %v7490_v1 = vsub.f32 0.0, %v15182_v40  ;;  %v7409_v35 = vmul.f32 -0.5, %v7393_v8 }
 0xab6   : > { %v7663_v48 = vmax.f32 %v15156_v10, %v15166_v25  ;;  %v7394_v63 = vadd.f32 1.837877, %v7378_v26  ;;  %v7552_v12 = vadd.f32 %v7536_v11, %v7440_v23  ;;  %v7761_v28 = vmul.f32 1.442695, %v7742_v16 }
 0xab7   : > { %v7513_v50 = vmul.f32 1.442695, %v7490_v1  ;;  %10358 = vlog2.f32 %v15131_v5  ;;  %v7633_v19 = vmul.f32 -0.5, %v7617_v13  ;;  %v15203_v23 = vmul.f32 -0.5, %v7921_v42 }
 0xab8   : > { %v15185_v34 = vmax.f32 %v7663_v48, %v15160_v31  ;;  %v7568_v2 = vmul.f32 -0.5, %v7552_v12  ;;  %v7473_v48 = vmul.f32 %v15144_v3, %v15144_v3  ;;  %v7410_v58 = vmul.f32 -0.5, %v7394_v63 }
 0xab9   : > { %10360 = vpow2.f32 %v7513_v50  ;;  %v15199_v6 = vpop.eup %10350  ;;  %16743 = vst [vmem:[#allocation57_spill] sm:$0xff] %v15203_v23  ;;  %v6730_v13 = vadd.f32 %v15146_v47, %v15029_v45  ;;  %v7825_v3 = vmul.f32 1.442695, %v7806_v36  ;;  %v15224_v12 = vadd.f32 -1.89712, %v7409_v35 }
 0xaba   : > { %16742 = vst [vmem:[#allocation86_spill] sm:$0xff] %v15185_v34  ;;  %v7695_v4 = vsub.f32 %v15156_v10, %v15185_v34  ;;  %v7743_v60 = vsub.f32 %v15166_v25, %v15185_v34  ;;  %v7618_v10 = vadd.f32 11.837877, %v7602_v18  ;;  %v15210_v18 = vpop.eup %10352  ;;  %10362 = vpow2.f32 %v7713_v39 }
 0xabb   : > { %v6733_v24 = vpop.f32.mrb[80].mxu1  ;;  %v6846_v53 = vpop.f32.mrb[112].mxu0  ;;  %v15212_v11 = vadd.f32 -0.2876821, %v7568_v2  ;;  %10364 = vpow2.f32 %v7761_v28  ;;  %v15226_v50 = vadd.f32 -2.3025851, %v7633_v19 }
 0xabc   : > { %v6734_v59 = vadd.f32 %v6733_v24, %v15011_v17  ;;  %v6847_v32 = vadd.f32 %v6846_v53, %v15015_v29  ;;  %v6735_v54 = vpop.f32.mrb[81].mxu1  ;;  %v6848_v52 = vpop.f32.mrb[113].mxu0  ;;  %v7634_v42 = vmul.f32 -0.5, %v7618_v10  ;;  %v7922_v28 = vadd.f32 1.837877, %v6730_v13 }
 0xabd   : > { %v6737_v26 = vpop.f32.mrb[82].mxu1  ;;  %v6850_v33 = vpop.f32.mrb[114].mxu0  ;;  %v15206_v16 = vadd.f32 %v6848_v52, %v15019_v56  ;;  %v7664_v39 = vmax.f32 %v15168_v21, %v15212_v11  ;;  %v7474_v52 = vmul.f32 %v7458_v44, %v7458_v44 }
 0xabe   : > { %v15197_v49 = vsub.f32 %v6734_v59, %v6847_v32  ;;  %v15208_v8 = vpop.f32.mrb[83].mxu1  ;;  %v6852_v5 = vpop.f32.mrb[115].mxu0  ;;  %v7379_v1 = vmul.f32 %v6734_v59, %v6734_v59  ;;  %v6738_v63 = vadd.f32 %v6737_v26, %v15011_v17  ;;  %v15229_v32 = vadd.f32 -1.89712, %v7410_v58 }
 0xabf   : > { %v15216_v24 = vpop.eup %10354  ;;  %v7491_v47 = vsub.f32 0.0, %v15206_v16  ;;  %v6851_v15 = vadd.f32 %v6850_v33, %v15015_v29  ;;  %v15233_v36 = vmax.f32 %v7664_v39, %v15176_v38  ;;  %v7715_v26 = vmul.f32 1.442695, %v7695_v4 }
 0xac0   : > { %v10357_v53 = vpop.eup %10356  ;;  %v7603_v10 = vmul.f32 4.539993e-05, %v7379_v1  ;;  %v15235_v35 = vadd.f32 -2.3025851, %v7634_v42  ;;  %v7380_v58 = vmul.f32 %v6738_v63, %v6738_v63  ;;  %v7395_v39 = vadd.f32 1.837877, %v7379_v1 }
 0xac1   : > { %v7537_v59 = vmul.f32 %v10357_v53, %v7473_v48  ;;  %16744 = vst [vmem:[#allocation54_spill] sm:$0xff] %v15233_v36  ;;  %v7515_v2 = vmul.f32 1.442695, %v7491_v47  ;;  %v15237_v19 = vsub.f32 %v6738_v63, %v6851_v15  ;;  %v7696_v48 = vsub.f32 %v15168_v21, %v15233_v36  ;;  %v10359_v53 = vpop.eup %10358 }
 0xac2   : > { %v7744_v44 = vsub.f32 %v15212_v11, %v15233_v36  ;;  %v6736_v4 = vadd.f32 %v6735_v54, %v15029_v45  ;;  %v7763_v42 = vmul.f32 1.442695, %v7743_v60  ;;  %v7442_v21 = vadd.f32 1.837877, %v15182_v40 }
 0xac3   : > { %v7553_v27 = vadd.f32 %v7537_v59, %v7441_v9  ;;  %10366 = vpow2.f32 %v7515_v2  ;;  %v10361_v9 = vpop.eup %10360  ;;  %v7619_v47 = vadd.f32 11.837877, %v7603_v10  ;;  %v16745_v11 = vsub.f32 %v15160_v31, %v15185_v34 }
 0xac4   : > { %10368 = vpow2.f32 %v7825_v3  ;;  %v7538_v1 = vmul.f32 %v10361_v9, %v7474_v52  ;;  %v15257_v54 = vpop.eup %10362  ;;  %v7604_v3 = vmul.f32 4.539993e-05, %v7380_v58  ;;  %v15260_v15 = vadd.f32 %v6852_v5, %v15019_v56 }
 0xac5   : > { %v7569_v13 = vmul.f32 -0.5, %v7553_v27  ;;  %v7827_v59 = vmul.f32 1.442695, %v16745_v11  ;;  %v15255_v27 = vmul.f32 -0.5, %v7922_v28  ;;  %10370 = vpow2.f32 %v7715_v26  ;;  %v15262_v60 = vpop.eup %10364 }
 0xac6   : > { %v7868_v25 = vmul.f32 0.6931472, %v10359_v53  ;;  %v7554_v31 = vadd.f32 %v7538_v1, %v7442_v21  ;;  %v7411_v10 = vmul.f32 -0.5, %v7395_v39  ;;  %v15266_v2 = vadd.f32 1.837877, %v6736_v4 }
 0xac7   : > { %v15253_v63 = vadd.f32 -0.2876821, %v7569_v13  ;;  %16746 = vst [vmem:[#allocation55_spill] sm:$0xff] %v15255_v27  ;;  %10372 = vpow2.f32 %v7763_v42  ;;  %v7635_v28 = vmul.f32 -0.5, %v7619_v47  ;;  %v7396_v52 = vadd.f32 1.837877, %v7380_v58 }
 0xac8   : > { %16747 = vst [vmem:[#allocation56_spill] sm:$0xff] %v15266_v2  ;;  %v7492_v13 = vsub.f32 0.0, %v15260_v15  ;;  %v7570_v53 = vmul.f32 -0.5, %v7554_v31  ;;  %10374 = vpow2.f32 %v7827_v59  ;;  %v7620_v4 = vadd.f32 11.837877, %v7604_v3 }
 0xac9   : > { %v7665_v40 = vmax.f32 %v15224_v12, %v15253_v63  ;;  %v15277_v47 = vadd.f32 %v7868_v25, %v15045_v55  ;;  %v7475_v3 = vmul.f32 %v15197_v49, %v15197_v49  ;;  %v15300_v2 = vadd.f32 -1.89712, %v7411_v10 }
 0xaca   : > { %v7517_v42 = vmul.f32 1.442695, %v7492_v13  ;;  %v7412_v13 = vmul.f32 -0.5, %v7396_v52 }
 0xacb   : > { %v15270_v5 = vmax.f32 %v7665_v40, %v15226_v50  ;;  %16750 = vst [vmem:[#allocation59_spill] sm:$0xff] %v15277_v47 }
 0xacc   : > { %v6743_v26 = vpop.f32.mrb[84].mxu1  ;;  %v6856_v9 = vpop.f32.mrb[116].mxu0  ;;  %10376 = vpow2.f32 %v7517_v42  ;;  %v7636_v42 = vmul.f32 -0.5, %v7620_v4  ;;  %v15315_v10 = vadd.f32 -1.89712, %v7412_v13 }
 0xacd   : > { %16748 = vst [vmem:[#allocation61_spill] sm:$0xff] %v15270_v5  ;;  %v6744_v11 = vadd.f32 %v6743_v26, %v15011_v17  ;;  %v6857_v33 = vadd.f32 %v6856_v9, %v15015_v29  ;;  %v15274_v27 = vpop.f32.mrb[85].mxu1  ;;  %v6858_v39 = vpop.f32.mrb[117].mxu0  ;;  %v7697_v1 = vsub.f32 %v15224_v12, %v15270_v5  ;;  %v7745_v40 = vsub.f32 %v15253_v63, %v15270_v5 }
 0xace   : > { %16749 = vst [vmem:[#allocation58_spill] sm:$0xff] %v15274_v27  ;;  %v6747_v21 = vpop.f32.mrb[86].mxu1  ;;  %v6860_v58 = vpop.f32.mrb[118].mxu0  ;;  %v7809_v31 = vsub.f32 %v15226_v50, %v15270_v5  ;;  %v15285_v26 = vadd.f32 -0.2876821, %v7570_v53  ;;  %v15296_v50 = vadd.f32 %v15208_v8, %v15029_v45  ;;  %v15303_v52 = vadd.f32 %v6858_v39, %v15019_v56 }
 0xacf   : > { %v15287_v9 = vpop.f32.mrb[87].mxu1  ;;  %v6862_v59 = vpop.f32.mrb[119].mxu0  ;;  %v7461_v55 = vsub.f32 %v6744_v11, %v6857_v33  ;;  %v7717_v27 = vmul.f32 1.442695, %v7696_v48  ;;  %v7443_v63 = vadd.f32 1.837877, %v15206_v16  ;;  %v7381_v16 = vmul.f32 %v6744_v11, %v6744_v11 }
 0xad0   : > { %16751 = vst [vmem:[#allocation60_spill] sm:$0xff] %v15287_v9  ;;  %v10367_v25 = vpop.eup %10366  ;;  %v7666_v12 = vmax.f32 %v15229_v32, %v15285_v26  ;;  %16752 = vst [vmem:[#allocation65_spill] sm:$0xff] %v15296_v50  ;;  %v7765_v9 = vmul.f32 1.442695, %v7744_v44  ;;  %v15308_v33 = vadd.f32 -2.3025851, %v7635_v28  ;;  %v16754_v8 = vsub.f32 %v15176_v38, %v15233_v36 }
 0xad1   : > { %v15298_v53 = vpop.eup %10368  ;;  %v7539_v49 = vmul.f32 %v10367_v25, %v7475_v3  ;;  %v7476_v39 = vmul.f32 %v15237_v19, %v15237_v19  ;;  %10378 = vpow2.f32 %v7717_v27  ;;  %v7719_v38 = vmul.f32 1.442695, %v7697_v1 }
 0xad2   : > { %v15306_v48 = vmax.f32 %v7666_v12, %v15235_v35  ;;  %v15310_v23 = vpop.eup %10370  ;;  %v7829_v50 = vmul.f32 1.442695, %v16754_v8  ;;  %10380 = vpow2.f32 %v7765_v9  ;;  %v7493_v13 = vsub.f32 0.0, %v15303_v52 }
 0xad3   : > { %v7555_v44 = vadd.f32 %v7539_v49, %v7443_v63  ;;  %v15325_v4 = vpop.eup %10372  ;;  %v7767_v12 = vmul.f32 1.442695, %v7745_v40  ;;  %v15328_v63 = vadd.f32 -2.3025851, %v7636_v42  ;;  %v7605_v19 = vmul.f32 4.539993e-05, %v7381_v16 }
 0xad4   : > { %16753 = vst [vmem:[#allocation62_spill] sm:$0xff] %v15306_v48  ;;  %v7698_v3 = vsub.f32 %v15229_v32, %v15306_v48  ;;  %v7746_v28 = vsub.f32 %v15285_v26, %v15306_v48  ;;  %v7810_v11 = vsub.f32 %v15235_v35, %v15306_v48  ;;  %v6748_v27 = vadd.f32 %v6747_v21, %v15011_v17  ;;  %v15331_v32 = vpop.eup %10374 }
 0xad5   : > { %v7571_v25 = vmul.f32 -0.5, %v7555_v44  ;;  %10382 = vpow2.f32 %v7829_v50  ;;  %v7519_v49 = vmul.f32 1.442695, %v7493_v13  ;;  %v6861_v35 = vadd.f32 %v6860_v58, %v15015_v29 }
 0xad6   : > { %v7831_v8 = vmul.f32 1.442695, %v7809_v31  ;;  %v7444_v1 = vadd.f32 1.837877, %v15260_v15  ;;  %v7397_v9 = vadd.f32 1.837877, %v7381_v16  ;;  %v7382_v44 = vmul.f32 %v6748_v27, %v6748_v27  ;;  %v10377_v45 = vpop.eup %10376 }
 0xad7   : > { %v15333_v26 = vadd.f32 -0.2876821, %v7571_v25  ;;  %10384 = vpow2.f32 %v7719_v38  ;;  %v7462_v42 = vsub.f32 %v6748_v27, %v6861_v35  ;;  %v7540_v50 = vmul.f32 %v10377_v45, %v7476_v39 }
 0xad8   : > { %10386 = vpow2.f32 %v7767_v12  ;;  %v7621_v25 = vadd.f32 11.837877, %v7605_v19  ;;  %v6863_v13 = vadd.f32 %v6862_v59, %v15019_v56  ;;  %v7721_v58 = vmul.f32 1.442695, %v7698_v3 }
 0xad9   : > { %v7667_v40 = vmax.f32 %v15300_v2, %v15333_v26  ;;  %v7477_v15 = vmul.f32 %v7461_v55, %v7461_v55  ;;  %10388 = vpow2.f32 %v7519_v49  ;;  %v7556_v16 = vadd.f32 %v7540_v50, %v7444_v1 }
 0xada   : > { %10390 = vpow2.f32 %v7831_v8  ;;  %v7413_v38 = vmul.f32 -0.5, %v7397_v9  ;;  %v7606_v48 = vmul.f32 4.539993e-05, %v7382_v44  ;;  %v7769_v27 = vmul.f32 1.442695, %v7746_v28 }
 0xadb   : > { %v15343_v31 = vmax.f32 %v7667_v40, %v15308_v33  ;;  %v15353_v55 = vpop.eup %10378  ;;  %v7833_v12 = vmul.f32 1.442695, %v7810_v11  ;;  %v7572_v19 = vmul.f32 -0.5, %v7556_v16  ;;  %v7637_v49 = vmul.f32 -0.5, %v7621_v25 }
 0xadc   : > { %v7494_v8 = vsub.f32 0.0, %v6863_v13  ;;  %v15355_v28 = vpop.eup %10380  ;;  %10392 = vpow2.f32 %v7721_v58  ;;  %v7398_v9 = vadd.f32 1.837877, %v7382_v44  ;;  %v15362_v11 = vadd.f32 -1.89712, %v7413_v38 }
 0xadd   : > { %16755 = vst [vmem:[#allocation63_spill] sm:$0xff] %v15343_v31  ;;  %v6753_v62 = vpop.f32.mrb[88].mxu1  ;;  %v7699_v35 = vsub.f32 %v15300_v2, %v15343_v31  ;;  %v7747_v45 = vsub.f32 %v15333_v26, %v15343_v31  ;;  %v7811_v59 = vsub.f32 %v15308_v33, %v15343_v31  ;;  %v6866_v39 = vpop.f32.mrb[120].mxu0  ;;  %v7445_v2 = vadd.f32 1.837877, %v15303_v52 }
 0xade   : > { %v15351_v3 = vpop.f32.mrb[89].mxu1  ;;  %v6868_v1 = vpop.f32.mrb[121].mxu0  ;;  %v6754_v26 = vadd.f32 %v6753_v62, %v15011_v17  ;;  %v7588_v40 = vadd.f32 -0.2876821, %v7572_v19  ;;  %v7622_v33 = vadd.f32 11.837877, %v7606_v48  ;;  %v6867_v21 = vadd.f32 %v6866_v39, %v15015_v29 }
 0xadf   : > { %16756 = vst [vmem:[#allocation87_spill] sm:$0xff] %v15351_v3  ;;  %v7521_v50 = vmul.f32 1.442695, %v7494_v8  ;;  %v15360_v47 = vpop.eup %10382  ;;  %10394 = vpow2.f32 %v7769_v27  ;;  %v6869_v16 = vadd.f32 %v6868_v1, %v15019_v56  ;;  %v6757_v0 = vpop.f32.mrb[90].mxu1  ;;  %v15366_v44 = vadd.f32 -2.3025851, %v7637_v49 }
 0xae0   : > { %v7383_v25 = vmul.f32 %v6754_v26, %v6754_v26  ;;  %v6870_v58 = vpop.f32.mrb[122].mxu0  ;;  %10396 = vpow2.f32 %v7833_v12  ;;  %v7668_v52 = vmax.f32 %v15315_v10, %v7588_v40  ;;  %v7463_v62 = vsub.f32 %v6754_v26, %v6867_v21  ;;  %v15368_v48 = vpop.f32.mrb[91].mxu1 }
 0xae1   : > { %16757 = vst [vmem:[#allocation64_spill] sm:$0xff] %v15368_v48  ;;  %v6872_v19 = vpop.f32.mrb[123].mxu0  ;;  %v15370_v39 = vpop.eup %10384  ;;  %v7414_v8 = vmul.f32 -0.5, %v7398_v9  ;;  %v15372_v27 = vadd.f32 1.837877, %v6863_v13  ;;  %v6758_v3 = vadd.f32 %v6757_v0, %v15011_v17  ;;  %v7638_v49 = vmul.f32 -0.5, %v7622_v33 }
 0xae2   : > { %v7607_v38 = vmul.f32 4.539993e-05, %v7383_v25  ;;  %v15375_v1 = vpop.eup %10386  ;;  %v7723_v31 = vmul.f32 1.442695, %v7699_v35  ;;  %v15378_v12 = vmax.f32 %v7668_v52, %v15328_v63  ;;  %10398 = vpow2.f32 %v7521_v50 }
 0xae3   : > { %v10389_v21 = vpop.eup %10388  ;;  %v7478_v26 = vmul.f32 %v7462_v42, %v7462_v42  ;;  %v7399_v48 = vadd.f32 1.837877, %v7383_v25  ;;  %v7495_v61 = vsub.f32 0.0, %v6869_v16  ;;  %v7771_v52 = vmul.f32 1.442695, %v7747_v45 }
 0xae4   : > { %16758 = vst [vmem:[#allocation69_spill] sm:$0xff] %v15378_v12  ;;  %v7623_v5 = vadd.f32 11.837877, %v7607_v38  ;;  %v15380_v36 = vpop.eup %10390  ;;  %v7700_v13 = vsub.f32 %v15315_v10, %v15378_v12  ;;  %v7748_v0 = vsub.f32 %v7588_v40, %v15378_v12  ;;  %v7812_v35 = vsub.f32 %v15328_v63, %v15378_v12 }
 0xae5   : > { %v7541_v9 = vmul.f32 %v10389_v21, %v7477_v15  ;;  %v15387_v34 = vadd.f32 -1.89712, %v7414_v8  ;;  %v7523_v33 = vmul.f32 1.442695, %v7495_v61  ;;  %v7384_v50 = vmul.f32 %v6758_v3, %v6758_v3 }
 0xae6   : > { %10400 = vpow2.f32 %v7723_v31  ;;  %v7835_v42 = vmul.f32 1.442695, %v7811_v59  ;;  %v15389_v38 = vadd.f32 -2.3025851, %v7638_v49  ;;  %v15391_v22 = vpop.eup %10392  ;;  %v7415_v20 = vmul.f32 -0.5, %v7399_v48 }
 0xae7   : > { %v7557_v25 = vadd.f32 %v7541_v9, %v7445_v2  ;;  %v15393_v10 = vadd.f32 1.837877, %v6869_v16  ;;  %10402 = vpow2.f32 %v7523_v33  ;;  %v7608_v40 = vmul.f32 4.539993e-05, %v7384_v50 }
 0xae8   : > { %v7725_v41 = vmul.f32 1.442695, %v7700_v13  ;;  %v7639_v15 = vmul.f32 -0.5, %v7623_v5  ;;  %v6871_v45 = vadd.f32 %v6870_v58, %v15015_v29  ;;  %10404 = vpow2.f32 %v7771_v52 }
 0xae9   : > { %v7573_v63 = vmul.f32 -0.5, %v7557_v25  ;;  %v15396_v8 = vpop.eup %10394  ;;  %v7773_v61 = vmul.f32 1.442695, %v7748_v0  ;;  %v7400_v31 = vadd.f32 1.837877, %v7384_v50  ;;  %v6873_v59 = vadd.f32 %v6872_v19, %v15019_v56 }
 0xaea   : > { %v15399_v21 = vpop.eup %10396  ;;  %10406 = vpow2.f32 %v7835_v42  ;;  %v7624_v48 = vadd.f32 11.837877, %v7608_v40  ;;  %v7464_v9 = vsub.f32 %v6758_v3, %v6871_v45  ;;  %v7837_v33 = vmul.f32 1.442695, %v7812_v35 }
 0xaeb   : > { %16759 = vst [vmem:[#allocation67_spill] sm:$0xff] %v15399_v21  ;;  %v7589_v16 = vadd.f32 -0.2876821, %v7573_v63  ;;  %v15403_v58 = vadd.f32 -1.89712, %v7415_v20  ;;  %v7479_v25 = vmul.f32 %v7463_v62, %v7463_v62  ;;  %v7496_v52 = vsub.f32 0.0, %v6873_v59 }
 0xaec   : > { %v6763_v2 = vpop.f32.mrb[92].mxu1  ;;  %v6876_v49 = vpop.f32.mrb[124].mxu0  ;;  %10408 = vpow2.f32 %v7725_v41  ;;  %v15406_v50 = vadd.f32 -2.3025851, %v7639_v15  ;;  %v7416_v3 = vmul.f32 -0.5, %v7400_v31  ;;  %v7640_v62 = vmul.f32 -0.5, %v7624_v48 }
 0xaed   : > { %v15401_v13 = vpop.f32.mrb[93].mxu1  ;;  %v6878_v5 = vpop.f32.mrb[125].mxu0  ;;  %v7669_v19 = vmax.f32 %v15362_v11, %v7589_v16  ;;  %v6764_v12 = vadd.f32 %v6763_v2, %v15011_v17  ;;  %v7525_v45 = vmul.f32 1.442695, %v7496_v52  ;;  %10410 = vpow2.f32 %v7773_v61 }
 0xaee   : > { %16760 = vst [vmem:[#allocation77_spill] sm:$0xff] %v15401_v13  ;;  %v10399_v0 = vpop.eup %10398  ;;  %v6767_v42 = vpop.f32.mrb[94].mxu1  ;;  %v6877_v13 = vadd.f32 %v6876_v49, %v15015_v29 }
 0xaef   : > { %v6880_v63 = vpop.f32.mrb[126].mxu0  ;;  %v7542_v40 = vmul.f32 %v10399_v0, %v7478_v26  ;;  %v15410_v35 = vpop.f32.mrb[95].mxu1  ;;  %v15415_v41 = vmax.f32 %v7669_v19, %v15366_v44  ;;  %v7385_v15 = vmul.f32 %v6764_v12, %v6764_v12  ;;  %10412 = vpow2.f32 %v7525_v45 }
 0xaf0   : > { %16761 = vst [vmem:[#allocation68_spill] sm:$0xff] %v15410_v35  ;;  %v15412_v20 = vpop.f32.mrb[127].mxu0  ;;  %v7465_v2 = vsub.f32 %v6764_v12, %v6877_v13  ;;  %v6879_v26 = vadd.f32 %v6878_v5, %v15019_v56  ;;  %v15419_v31 = vpop.eup %10400  ;;  %10414 = vpow2.f32 %v7837_v33  ;;  %v15426_v35 = vadd.f32 -1.89712, %v7416_v3 }
 0xaf1   : > { %16762 = vst [vmem:[#allocation79_spill] sm:$0xff] %v15415_v41  ;;  %v7558_v51 = vadd.f32 %v7542_v40, %v15372_v27  ;;  %16763 = vst [vmem:[#allocation66_spill] sm:$0xff] %v15419_v31  ;;  %v7701_v49 = vsub.f32 %v15362_v11, %v15415_v41  ;;  %v7749_v52 = vsub.f32 %v7589_v16, %v15415_v41  ;;  %v7401_v0 = vadd.f32 1.837877, %v7385_v15  ;;  %v10403_v19 = vpop.eup %10402 }
 0xaf2   : > { %v7813_v61 = vsub.f32 %v15366_v44, %v15415_v41  ;;  %v7609_v27 = vmul.f32 4.539993e-05, %v7385_v15  ;;  %v7543_v5 = vmul.f32 %v10403_v19, %v7479_v25  ;;  %v7448_v40 = vadd.f32 1.837877, %v6873_v59  ;;  %v15429_v7 = vpop.eup %10404 }
 0xaf3   : > { %v7574_v48 = vmul.f32 -0.5, %v7558_v51  ;;  %v7727_v13 = vmul.f32 1.442695, %v7701_v49  ;;  %v6768_v45 = vadd.f32 %v6767_v42, %v15011_v17  ;;  %16764 = vst [vmem:[#allocation73_spill] sm:$0xff] %v15429_v7  ;;  %v7480_v16 = vmul.f32 %v7464_v9, %v7464_v9 }
 0xaf4   : > { %v6919_v12 = vpop.f32.mrb[96].mxu1  ;;  %v7417_v46 = vmul.f32 -0.5, %v7401_v0  ;;  %v7625_v31 = vadd.f32 11.837877, %v7609_v27  ;;  %v15431_v44 = vpop.eup %10406  ;;  %v7559_v33 = vadd.f32 %v7543_v5, %v15393_v10  ;;  %v15434_v51 = vadd.f32 -2.3025851, %v7640_v62 }
 0xaf5   : > { %v7590_v11 = vadd.f32 -0.2876821, %v7574_v48  ;;  %16765 = vst [vmem:[#allocation89_spill] sm:$0xff] %v15431_v44  ;;  %v15436_v3 = vmul.f32 %v7465_v2, %v7465_v2  ;;  %v7497_v15 = vsub.f32 0.0, %v6879_v26  ;;  %v6921_v49 = vpop.f32.mrb[97].mxu1  ;;  %10416 = vpow2.f32 %v7727_v13 }
 0xaf6   : > { %v7775_v59 = vmul.f32 1.442695, %v7749_v52  ;;  %v7839_v25 = vmul.f32 1.442695, %v7813_v61  ;;  %v6923_v42 = vpop.f32.mrb[98].mxu1  ;;  %v15439_v19 = vpop.eup %10408  ;;  %v7575_v9 = vmul.f32 -0.5, %v7559_v33  ;;  %v7386_v27 = vmul.f32 %v6768_v45, %v6768_v45 }
 0xaf7   : > { %v7670_v17 = vmax.f32 %v15387_v34, %v7590_v11  ;;  %16766 = vst [vmem:[#allocation71_spill] sm:$0xff] %v15439_v19  ;;  %v15441_v0 = vadd.f32 1.837877, %v6879_v26  ;;  %v7527_v48 = vmul.f32 1.442695, %v7497_v15  ;;  %v6925_v10 = vpop.f32.mrb[99].mxu1  ;;  %v6881_v52 = vadd.f32 %v6880_v63, %v15015_v29  ;;  %v15449_v61 = vpop.eup %10410 }
 0xaf8   : > { %v15446_v2 = vadd.f32 -1.89712, %v7417_v46  ;;  %v7641_v5 = vmul.f32 -0.5, %v7625_v31  ;;  %16767 = vst [vmem:[#allocation70_spill] sm:$0xff] %v15449_v61  ;;  %v7591_v13 = vadd.f32 -0.2876821, %v7575_v9 }
 0xaf9   : > { %v15444_v62 = vmax.f32 %v7670_v17, %v15389_v38  ;;  %10418 = vpow2.f32 %v7527_v48  ;;  %v7402_v41 = vadd.f32 1.837877, %v7386_v27  ;;  %v7610_v44 = vmul.f32 4.539993e-05, %v7386_v27  ;;  %v10413_v33 = vpop.eup %10412 }
 0xafa   : > { %v7466_v46 = vsub.f32 %v6768_v45, %v6881_v52  ;;  %v7671_v31 = vmax.f32 %v15403_v58, %v7591_v13  ;;  %v7544_v29 = vmul.f32 %v10413_v33, %v7480_v16  ;;  %v15457_v48 = vpop.eup %10414  ;;  %10420 = vpow2.f32 %v7775_v59 }
 0xafb   : > { %v7702_v26 = vsub.f32 %v15387_v34, %v15444_v62  ;;  %v7750_v15 = vsub.f32 %v7590_v11, %v15444_v62  ;;  %v7814_v17 = vsub.f32 %v15389_v38, %v15444_v62  ;;  %v7418_v63 = vmul.f32 -0.5, %v7402_v41 }
 0xafc   : > { %v6929_v19 = vpop.f32.mrb[100].mxu1  ;;  %v7626_v61 = vadd.f32 11.837877, %v7610_v44  ;;  %10422 = vpow2.f32 %v7839_v25  ;;  %v15460_v34 = vmax.f32 %v7671_v31, %v15406_v50  ;;  %v7560_v11 = vadd.f32 %v7544_v29, %v7448_v40 }
 0xafd   : > { %v6931_v9 = vpop.f32.mrb[101].mxu1  ;;  %v7729_v27 = vmul.f32 1.442695, %v7702_v26  ;;  %v7777_v7 = vmul.f32 1.442695, %v7750_v15  ;;  %v6883_v41 = vadd.f32 %v15412_v20, %v15019_v56  ;;  %v15467_v16 = vadd.f32 %v6919_v12, %v15082_v30 }
 0xafe   : > { %v7841_v21 = vmul.f32 1.442695, %v7814_v17  ;;  %v7642_v38 = vmul.f32 -0.5, %v7626_v61  ;;  %v6933_v45 = vpop.f32.mrb[102].mxu1  ;;  %v15462_v52 = vadd.f32 -2.3025851, %v7641_v5  ;;  %v7703_v59 = vsub.f32 %v15403_v58, %v15460_v34 }
 0xaff   : > { %10424 = vpow2.f32 %v7729_v27  ;;  %v6935_v44 = vpop.f32.mrb[103].mxu1  ;;  %v7751_v25 = vsub.f32 %v7591_v13, %v15460_v34  ;;  %v7815_v40 = vsub.f32 %v15406_v50, %v15460_v34  ;;  %v15474_v61 = vpop.eup %10416  ;;  %v7576_v5 = vmul.f32 -0.5, %v7560_v11 }
 0xb00   : > { %10426 = vpow2.f32 %v7777_v7  ;;  %v15476_v33 = vadd.f32 -1.89712, %v7418_v63  ;;  %v15478_v56 = vmul.f32 %v7466_v46, %v7466_v46  ;;  %v7731_v20 = vmul.f32 1.442695, %v7703_v59 }
 0xb01   : > { %10428 = vpow2.f32 %v7841_v21  ;;  %v7779_v12 = vmul.f32 1.442695, %v7751_v25  ;;  %v15480_v26 = vadd.f32 -2.3025851, %v7642_v38  ;;  %v15483_v7 = vadd.f32 %v6921_v49, %v15086_v57 }
 0xb02   : > { %v7843_v58 = vmul.f32 1.442695, %v7815_v40  ;;  %v7592_v13 = vadd.f32 -0.2876821, %v7576_v5  ;;  %v7498_v15 = vsub.f32 0.0, %v6883_v41  ;;  %v15486_v50 = vadd.f32 %v6923_v42, %v15082_v30 }
 0xb03   : > { %v10419_v17 = vpop.eup %10418  ;;  %v15488_v31 = vadd.f32 1.837877, %v6883_v41  ;;  %v8837_v46 = vpack.c.bf16 %v15483_v7, %v15467_v16  ;;  %v15493_v29 = vadd.f32 %v6925_v10, %v15086_v57  ;;  %v6998_v49 = vmax.f32 %v15467_v16, %v15483_v7 }
 0xb04   : > { %v6939_v21 = vpop.f32.mrb[104].mxu1  ;;  %10430 = vpow2.f32 %v7731_v20  ;;  %v7672_v27 = vmax.f32 %v15426_v35, %v7592_v13  ;;  %v7545_v42 = vmul.f32 %v10419_v17, %v15436_v3  ;;  %v7529_v11 = vmul.f32 1.442695, %v7498_v15  ;;  %v15511_v25 = vpop.eup %10420 }
 0xb05   : > { %16768 = vst [vmem:[#allocation72_spill] sm:$0xff] %v15493_v29  ;;  %v6941_v63 = vpop.f32.mrb[105].mxu1  ;;  %10432 = vpow2.f32 %v7779_v12  ;;  %8192 = vst [vmem:[%s15501_s1] sm:$0xff] %v8837_v46  ;;  %v8838_v10 = vpack.c.bf16 %v15493_v29, %v15486_v50  ;;  %6999 = vmax.xlane.f32.xlu0 %v6998_v49  ;;  %v15507_v41 = vadd.f32 %v6929_v19, %v15082_v30 }
 0xb06   : > { %v6943_v38 = vpop.f32.mrb[106].mxu1  ;;  %v7001_v59 = vmax.f32 %v15486_v50, %v15493_v29  ;;  %v15514_v40 = vmax.f32 %v7672_v27, %v15434_v51  ;;  %v7561_v5 = vadd.f32 %v7545_v42, %v15441_v0  ;;  %10434 = vpow2.f32 %v7529_v11  ;;  %v15520_v12 = vpop.eup %10422 }
 0xb07   : > { %16769 = vst [vmem:[#allocation82_spill] sm:$0xff] %v15507_v41  ;;  %v6945_v3 = vpop.f32.mrb[107].mxu1  ;;  %v15518_v20 = vadd.f32 %v6931_v9, %v15086_v57  ;;  %8193 = vst [vmem:[%s15501_s1 + $0x8] sm:$0xff] %v8838_v10  ;;  %v15524_v19 = vadd.f32 %v6933_v45, %v15082_v30  ;;  %v15527_v15 = vadd.f32 %v6935_v44, %v15086_v57  ;;  %10436 = vpow2.f32 %v7843_v58 }
 0xb08   : > { %7002 = vmax.xlane.f32.xlu1 %v7001_v59  ;;  %v15530_v17 = vadd.f32 %v6939_v21, %v15082_v30  ;;  %v15533_v46 = vadd.f32 %v6941_v63, %v15086_v57  ;;  %v7704_v9 = vsub.f32 %v15426_v35, %v15514_v40  ;;  %v7752_v49 = vsub.f32 %v7592_v13, %v15514_v40 }
 0xb09   : > { %16770 = vst [vmem:[#allocation83_spill] sm:$0xff] %v15518_v20  ;;  %16771 = vst [vmem:[#allocation49_spill] sm:$0xff] %v15524_v19  ;;  %v15535_v0 = vpop.eup %10424  ;;  %v7816_v45 = vsub.f32 %v15434_v51, %v15514_v40  ;;  %v7577_v44 = vmul.f32 -0.5, %v7561_v5  ;;  %v8839_v21 = vpack.c.bf16 %v15518_v20, %v15507_v41  ;;  %v8840_v63 = vpack.c.bf16 %v15527_v15, %v15524_v19 }
 0xb0a   : > { %16772 = vst [vmem:[#allocation51_spill] sm:$0xff] %v15527_v15  ;;  %16773 = vst [vmem:[#allocation84_spill] sm:$0xff] %v15530_v17  ;;  %v15542_v27 = vpop.eup %10426  ;;  %v7004_v42 = vmax.f32 %v15507_v41, %v15518_v20  ;;  %v7007_v35 = vmax.f32 %v15524_v19, %v15527_v15  ;;  %v7733_v11 = vmul.f32 1.442695, %v7704_v9  ;;  %v7781_v51 = vmul.f32 1.442695, %v7752_v49 }
 0xb0b   : > { %16774 = vst [vmem:[#allocation50_spill] sm:$0xff] %v15533_v46  ;;  %v15552_v13 = vpop.eup %10428  ;;  %v7845_v10 = vmul.f32 1.442695, %v7816_v45  ;;  %v8841_v59 = vpack.c.bf16 %v15533_v46, %v15530_v17  ;;  %v7593_v5 = vadd.f32 -0.2876821, %v7577_v44  ;;  %8194 = vst [vmem:[%s15501_s1 + $0x10] sm:$0xff] %v8839_v21  ;;  %v15559_v29 = vadd.f32 %v6943_v38, %v15082_v30 }
 0xb0c   : > { %8195 = vst [vmem:[%s15501_s1 + $0x18] sm:$0xff] %v8840_v63  ;;  %7005 = vmax.xlane.f32.xlu0 %v7004_v42  ;;  %7008 = vmax.xlane.f32.xlu1 %v7007_v35  ;;  %v15562_v20 = vadd.f32 %v6945_v3, %v15086_v57  ;;  %v7010_v15 = vmax.f32 %v15530_v17, %v15533_v46  ;;  %v6949_v9 = vpop.f32.mrb[108].mxu1  ;;  %10438 = vpow2.f32 %v7733_v11 }
 0xb0d   : > { %16775 = vst [vmem:[#allocation90_spill] sm:$0xff] %v15559_v29  ;;  %8196 = vst [vmem:[%s15501_s1 + $0x20] sm:$0xff] %v8841_v59  ;;  %v15568_v49 = vadd.f32 %v6949_v9, %v15082_v30  ;;  %v6951_v45 = vpop.f32.mrb[109].mxu1  ;;  %v7788_v44 = vadd.f32 %v15172_v14, %v15158_v37  ;;  %v7789_v38 = vadd.f32 %v15210_v18, %v15199_v6  ;;  %10440 = vpow2.f32 %v7781_v51 }
 0xb0e   : > { %16776 = vst [vmem:[#allocation91_spill] sm:$0xff] %v15562_v20  ;;  %v7673_v3 = vmax.f32 %v15446_v2, %v7593_v5  ;;  %v8842_v21 = vpack.c.bf16 %v15562_v20, %v15559_v29  ;;  %v7013_v58 = vmax.f32 %v15559_v29, %v15562_v20  ;;  %v6953_v63 = vpop.f32.mrb[110].mxu1  ;;  %v15579_v42 = vpop.eup %10430  ;;  %v15582_v35 = vadd.f32 %v6951_v45, %v15086_v57 }
 0xb0f   : > { %16777 = vst [vmem:[#allocation92_spill] sm:$0xff] %v15568_v49  ;;  %v15585_v37 = vadd.f32 %v6953_v63, %v15082_v30  ;;  %v6955_v14 = vpop.f32.mrb[111].mxu1  ;;  %v7852_v6 = vadd.f32 %v15178_v43, %v7788_v44  ;;  %v15588_v18 = vpop.eup %10432  ;;  %10442 = vpow2.f32 %v7845_v10  ;;  %v7853_v59 = vadd.f32 %v15216_v24, %v7789_v38 }
 0xb10   : > { %16778 = vst [vmem:[#allocation93_spill] sm:$0xff] %v15582_v35  ;;  %v15591_v11 = vmax.f32 %v7673_v3, %v15462_v52  ;;  %8197 = vst [vmem:[%s15501_s1 + $0x28] sm:$0xff] %v8842_v21  ;;  %7011 = vmax.xlane.f32.xlu0 %v7010_v15  ;;  %7014 = vmax.xlane.f32.xlu1 %v7013_v58  ;;  %v15595_v51 = vadd.f32 %v6955_v14, %v15086_v57  ;;  %v10435_v9 = vpop.eup %10434 }
 0xb11   : > { %16779 = vst [vmem:[#allocation94_spill] sm:$0xff] %v15585_v37  ;;  %v8843_v45 = vpack.c.bf16 %v15582_v35, %v15568_v49  ;;  %v7016_v43 = vmax.f32 %v15568_v49, %v15582_v35  ;;  %10444 = vlog2.f32 %v7852_v6  ;;  %v7790_v10 = vadd.f32 %v15262_v60, %v15257_v54 }
 0xb12   : > { %v7705_v15 = vsub.f32 %v15446_v2, %v15591_v11  ;;  %v7753_v44 = vsub.f32 %v7593_v5, %v15591_v11  ;;  %v7817_v24 = vsub.f32 %v15462_v52, %v15591_v11  ;;  %v7546_v38 = vmul.f32 %v10435_v9, %v15478_v56 }
 0xb13   : > { %8198 = vst [vmem:[%s15501_s1 + $0x30] sm:$0xff] %v8843_v45  ;;  %v8844_v3 = vpack.c.bf16 %v15595_v51, %v15585_v37  ;;  %v7019_v58 = vmax.f32 %v15585_v37, %v15595_v51  ;;  %10446 = vlog2.f32 %v7853_v59  ;;  %v7854_v54 = vadd.f32 %v15298_v53, %v7790_v10  ;;  %v15630_v45 = vpop.eup %10436 }
 0xb14   : > { %v6959_v21 = vpop.f32.mrb[112].mxu1  ;;  %v7735_v60 = vmul.f32 1.442695, %v7705_v15  ;;  %v7783_v2 = vmul.f32 1.442695, %v7753_v44  ;;  %v7562_v5 = vadd.f32 %v7546_v38, %v15488_v31  ;;  %7017 = vmax.xlane.f32.xlu0 %v7016_v43  ;;  %v7791_v14 = vadd.f32 %v15325_v4, %v15310_v23 }
 0xb15   : > { %v7847_v63 = vmul.f32 1.442695, %v7817_v24  ;;  %8199 = vst [vmem:[%s15501_s1 + $0x38] sm:$0xff] %v8844_v3  ;;  %v15619_v52 = vadd.f32 %v6959_v21, %v15082_v30  ;;  %7020 = vmax.xlane.f32.xlu1 %v7019_v58  ;;  %v6961_v56 = vpop.f32.mrb[113].mxu1  ;;  %10448 = vlog2.f32 %v7854_v54  ;;  %v7792_v6 = vadd.f32 %v15355_v28, %v15353_v55 }
 0xb16   : > { %10450 = vpow2.f32 %v7735_v60  ;;  %v7578_v53 = vmul.f32 -0.5, %v7562_v5  ;;  %v15626_v59 = vadd.f32 %v6961_v56, %v15086_v57  ;;  %v6963_v31 = vpop.f32.mrb[114].mxu1  ;;  %v7793_v9 = vadd.f32 %v15375_v1, %v15370_v39  ;;  %v15637_v28 = vpop.eup %10438  ;;  %v16786_v5 = vld [vmem:[#allocation70_spill] sm:$0xff] }
 0xb17   : > { %10452 = vpow2.f32 %v7783_v2  ;;  %v15633_v43 = vadd.f32 %v6963_v31, %v15082_v30  ;;  %v6965_v23 = vpop.f32.mrb[115].mxu1  ;;  %v7855_v4 = vadd.f32 %v15331_v32, %v7791_v14  ;;  %v7856_v55 = vadd.f32 %v15360_v47, %v7792_v6  ;;  %v15644_v1 = vpop.eup %10440  ;;  %v16783_v2 = vld [vmem:[#allocation66_spill] sm:$0xff] }
 0xb18   : > { %10454 = vpow2.f32 %v7847_v63  ;;  %v7594_v10 = vadd.f32 -0.2876821, %v7578_v53  ;;  %v8845_v15 = vpack.c.bf16 %v15626_v59, %v15619_v52  ;;  %v15642_v39 = vadd.f32 %v6965_v23, %v15086_v57  ;;  %v16785_v63 = vld [vmem:[#allocation71_spill] sm:$0xff] }
 0xb19   : > { %16780 = vst [vmem:[#allocation95_spill] sm:$0xff] %v15633_v43  ;;  %v7022_v44 = vmax.f32 %v15619_v52, %v15626_v59  ;;  %10456 = vlog2.f32 %v7855_v4  ;;  %v7857_v32 = vadd.f32 %v15380_v36, %v7793_v9  ;;  %v7794_v47 = vadd.f32 %v15396_v8, %v15391_v22  ;;  %v15651_v24 = vpop.eup %10442  ;;  %v16782_v36 = vld [vmem:[#allocation67_spill] sm:$0xff]  ;;  %v16784_v22 = vld [vmem:[#allocation73_spill] sm:$0xff] }
 0xb1a   : > { %16781 = vst [vmem:[#allocation96_spill] sm:$0xff] %v15642_v39  ;;  %v7674_v38 = vmax.f32 %v15476_v33, %v7594_v10  ;;  %8200 = vst [vmem:[%s15501_s1 + $0x40] sm:$0xff] %v8845_v15  ;;  %v8846_v3 = vpack.c.bf16 %v15642_v39, %v15633_v43  ;;  %v7025_v21 = vmax.f32 %v15633_v43, %v15642_v39  ;;  %10458 = vlog2.f32 %v7856_v55  ;;  %v16787_v15 = vld [vmem:[#allocation89_spill] sm:$0xff] }
 0xb1b   : > { %v10445_v58 = vpop.eup %10444  ;;  %7023 = vmax.xlane.f32.xlu0 %v7022_v44  ;;  %10460 = vlog2.f32 %v7857_v32  ;;  %v7858_v60 = vadd.f32 %v16782_v36, %v7794_v47  ;;  %v7795_v8 = vadd.f32 %v16784_v22, %v16783_v2  ;;  %v7796_v56 = vadd.f32 %v16786_v5, %v16785_v63  ;;  %v16791_v5 = vld [vmem:[#allocation80_spill] sm:$0xff] }
 0xb1c   : > { %v6969_v54 = vpop.f32.mrb[116].mxu1  ;;  %v15665_v14 = vmax.f32 %v7674_v38, %v15480_v26  ;;  %8201 = vst [vmem:[%s15501_s1 + $0x48] sm:$0xff] %v8846_v3  ;;  %7026 = vmax.xlane.f32.xlu1 %v7025_v21  ;;  %v7870_v31 = vmul.f32 0.6931472, %v10445_v58  ;;  %v7797_v9 = vadd.f32 %v15511_v25, %v15474_v61 }
 0xb1d   : > { %v15669_v6 = vadd.f32 %v6969_v54, %v15082_v30  ;;  %v6971_v53 = vpop.f32.mrb[117].mxu1  ;;  %v10447_v23 = vpop.eup %10446  ;;  %10462 = vlog2.f32 %v7858_v60  ;;  %v7859_v44 = vadd.f32 %v16787_v15, %v7795_v8  ;;  %v7860_v32 = vadd.f32 %v15457_v48, %v7796_v56 }
 0xb1e   : > { %v15674_v4 = vadd.f32 %v6971_v53, %v15086_v57  ;;  %v6973_v55 = vpop.f32.mrb[118].mxu1  ;;  %v7706_v47 = vsub.f32 %v15476_v33, %v15665_v14  ;;  %v7754_v38 = vsub.f32 %v7594_v10, %v15665_v14  ;;  %v7818_v3 = vsub.f32 %v15480_v26, %v15665_v14  ;;  %v16790_v33 = vld [vmem:[#allocation74_spill] sm:$0xff] }
 0xb1f   : > { %v15684_v61 = vadd.f32 %v6973_v55, %v15082_v30  ;;  %v6975_v25 = vpop.f32.mrb[119].mxu1  ;;  %v10449_v21 = vpop.eup %10448  ;;  %v15694_v36 = vadd.f32 %v7870_v31, %v16790_v33  ;;  %10464 = vlog2.f32 %v7859_v44  ;;  %v7872_v53 = vmul.f32 0.6931472, %v10447_v23 }
 0xb20   : > { %v8847_v58 = vpack.c.bf16 %v15674_v4, %v15669_v6  ;;  %v15689_v54 = vadd.f32 %v6975_v25, %v15086_v57  ;;  %v7028_v48 = vmax.f32 %v15669_v6, %v15674_v4  ;;  %v15696_v10 = vpop.eup %10450  ;;  %v7737_v26 = vmul.f32 1.442695, %v7706_v47 }
 0xb21   : > { %16788 = vst [vmem:[#allocation67_spill] sm:$0xff] %v15684_v61  ;;  %v7785_v60 = vmul.f32 1.442695, %v7754_v38  ;;  %v7849_v2 = vmul.f32 1.442695, %v7818_v3  ;;  %v15698_v22 = vpop.eup %10452  ;;  %v7861_v15 = vadd.f32 %v15520_v12, %v7797_v9  ;;  %v7798_v44 = vadd.f32 %v15542_v27, %v15535_v0  ;;  %v16792_v3 = vld [vmem:[#allocation88_spill] sm:$0xff] }
 0xb22   : > { %16789 = vst [vmem:[#allocation66_spill] sm:$0xff] %v15689_v54  ;;  %8202 = vst [vmem:[%s15501_s1 + $0x50] sm:$0xff] %v8847_v58  ;;  %v8848_v8 = vpack.c.bf16 %v15689_v54, %v15684_v61  ;;  %7029 = vmax.xlane.f32.xlu0 %v7028_v48  ;;  %v7031_v63 = vmax.f32 %v15684_v61, %v15689_v54  ;;  %v15707_v31 = vpop.eup %10454  ;;  %10466 = vpow2.f32 %v7737_v26  ;;  %v7874_v55 = vmul.f32 0.6931472, %v10449_v21  ;;  %v16794_v27 = vld [vmem:[#allocation81_spill] sm:$0xff] }
 0xb23   : > { %v10457_v47 = vpop.eup %10456  ;;  %10468 = vpow2.f32 %v7785_v60  ;;  %v15714_v25 = vadd.f32 %v7872_v53, %v16792_v3  ;;  %v7799_v23 = vadd.f32 %v15588_v18, %v15579_v42  ;;  %v7800_v58 = vadd.f32 %v15644_v1, %v15637_v28  ;;  %v16797_v42 = vld [vmem:[#allocation52_spill] sm:$0xff]  ;;  %v16800_v53 = vld [vmem:[#allocation86_spill] sm:$0xff]  ;;  %v16805_v18 = vld [vmem:[#allocation61_spill] sm:$0xff] }
 0xb24   : > { %8203 = vst [vmem:[%s15501_s1 + $0x58] sm:$0xff] %v8848_v8  ;;  %v6979_v38 = vpop.f32.mrb[120].mxu1  ;;  %7032 = vmax.xlane.f32.xlu1 %v7031_v63  ;;  %v10459_v21 = vpop.eup %10458  ;;  %10470 = vpow2.f32 %v7849_v2  ;;  %v15724_v9 = vadd.f32 %v7874_v55, %v16794_v27  ;;  %v7876_v48 = vmul.f32 0.6931472, %v10457_v47  ;;  %v16799_v2 = vld [vmem:[#allocation78_spill] sm:$0xff]  ;;  %v7862_v56 = vadd.f32 %v15552_v13, %v7798_v44 }
 0xb25   : > { %v15721_v12 = vadd.f32 %v6979_v38, %v15082_v30  ;;  %v6981_v0 = vpop.f32.mrb[121].mxu1  ;;  %v10461_v33 = vpop.eup %10460  ;;  %v7878_v8 = vmul.f32 0.6931472, %v10459_v21  ;;  %10472 = vlog2.f32 %v7860_v32  ;;  %v16803_v21 = vld [vmem:[#allocation54_spill] sm:$0xff]  ;;  %v7801_v13 = vadd.f32 %v15698_v22, %v15696_v10 }
 0xb26   : > { %16795 = vst [vmem:[#allocation71_spill] sm:$0xff] %v15724_v9  ;;  %v15727_v26 = vadd.f32 %v6981_v0, %v15086_v57  ;;  %v6983_v60 = vpop.f32.mrb[122].mxu1  ;;  %v15737_v55 = vadd.f32 %v7876_v48, %v16800_v53  ;;  %v7880_v47 = vmul.f32 0.6931472, %v10461_v33  ;;  %10474 = vlog2.f32 %v7861_v15 }
 0xb27   : > { %16793 = vst [vmem:[#allocation73_spill] sm:$0xff] %v15721_v12  ;;  %v15732_v28 = vadd.f32 %v6983_v60, %v15082_v30  ;;  %v6985_v1 = vpop.f32.mrb[123].mxu1  ;;  %v10463_v38 = vpop.eup %10462  ;;  %v15747_v27 = vadd.f32 %v7878_v8, %v16803_v21  ;;  %v16807_v8 = vld [vmem:[#allocation53_spill] sm:$0xff]  ;;  %v7863_v15 = vadd.f32 %v15630_v45, %v7799_v23  ;;  %10476 = vlog2.f32 %v7862_v56 }
 0xb28   : > { %16796 = vst [vmem:[#allocation70_spill] sm:$0xff] %v15727_v26  ;;  %16801 = vst [vmem:[#allocation74_spill] sm:$0xff] %v15737_v55  ;;  %v8849_v3 = vpack.c.bf16 %v15727_v26, %v15721_v12  ;;  %v15742_v0 = vadd.f32 %v6985_v1, %v15086_v57  ;;  %v7034_v32 = vmax.f32 %v15721_v12, %v15727_v26  ;;  %v7882_v33 = vmul.f32 0.6931472, %v10463_v38  ;;  %v16829_v55 = vld [vmem:[#allocation79_spill] sm:$0xff] }
 0xb29   : > { %16798 = vst [vmem:[#allocation89_spill] sm:$0xff] %v15732_v28  ;;  %v15752_v48 = vadd.f32 %v7880_v47, %v16805_v18  ;;  %v10465_v63 = vpop.eup %10464  ;;  %v16809_v47 = vld [vmem:[#allocation62_spill] sm:$0xff]  ;;  %v16813_v18 = vld [vmem:[#allocation75_spill] sm:$0xff]  ;;  %10478 = vlog2.f32 %v7863_v15  ;;  %v7865_v10 = vadd.f32 %v15707_v31, %v7801_v13 }
 0xb2a   : > { %16802 = vst [vmem:[#allocation80_spill] sm:$0xff] %v15742_v0  ;;  %8204 = vst [vmem:[%s15501_s1 + $0x60] sm:$0xff] %v8849_v3  ;;  %v8850_v1 = vpack.c.bf16 %v15742_v0, %v15732_v28  ;;  %7035 = vmax.xlane.f32.xlu0 %v7034_v32  ;;  %v7037_v53 = vmax.f32 %v15732_v28, %v15742_v0  ;;  %v15765_v38 = vadd.f32 %v7882_v33, %v16809_v47  ;;  %v16811_v32 = vld [vmem:[#allocation56_spill] sm:$0xff] }
 0xb2b   : > { %16806 = vst [vmem:[#allocation88_spill] sm:$0xff] %v15752_v48  ;;  %v7864_v3 = vadd.f32 %v15651_v24, %v7800_v58  ;;  %v15770_v60 = vmul.f32 -0.5, %v16811_v32  ;;  %v7884_v21 = vmul.f32 0.6931472, %v10465_v63  ;;  %v16814_v48 = vld [vmem:[#allocation58_spill] sm:$0xff]  ;;  %v16818_v63 = vld [vmem:[#allocation63_spill] sm:$0xff] }
 0xb2c   : > { %16810 = vst [vmem:[#allocation81_spill] sm:$0xff] %v15765_v38  ;;  %8205 = vst [vmem:[%s15501_s1 + $0x68] sm:$0xff] %v8850_v1  ;;  %v6989_v9 = vpop.f32.mrb[124].mxu1  ;;  %7038 = vmax.xlane.f32.xlu1 %v7037_v53  ;;  %v10467_v44 = vpop.eup %10466  ;;  %v6746_v33 = vadd.f32 %v16814_v48, %v16813_v18  ;;  %v16820_v48 = vld [vmem:[#allocation65_spill] sm:$0xff] }
 0xb2d   : > { %16812 = vst [vmem:[#allocation52_spill] sm:$0xff] %v15770_v60  ;;  %v15778_v47 = vadd.f32 %v6989_v9, %v15082_v30  ;;  %v6991_v45 = vpop.f32.mrb[125].mxu1  ;;  %v10469_v58 = vpop.eup %10468  ;;  %v15786_v53 = vadd.f32 %v7884_v21, %v16818_v63  ;;  %10480 = vlog2.f32 %v7864_v3  ;;  %v7924_v9 = vadd.f32 1.837877, %v16820_v48  ;;  %v16823_v3 = vld [vmem:[#allocation60_spill] sm:$0xff] }
 0xb2e   : > { %v15783_v1 = vadd.f32 %v6991_v45, %v15086_v57  ;;  %v6993_v56 = vpop.f32.mrb[126].mxu1  ;;  %v10471_v22 = vpop.eup %10470  ;;  %v7802_v15 = vadd.f32 %v10469_v58, %v10467_v44  ;;  %10482 = vlog2.f32 %v7865_v10  ;;  %v7925_v58 = vadd.f32 1.837877, %v6746_v33  ;;  %v16826_v10 = vld [vmem:[#allocation69_spill] sm:$0xff] }
 0xb2f   : > { %16815 = vst [vmem:[#allocation78_spill] sm:$0xff] %v15778_v47  ;;  %16819 = vst [vmem:[#allocation54_spill] sm:$0xff] %v15786_v53  ;;  %v15791_v32 = vadd.f32 %v6993_v56, %v15082_v30  ;;  %v6995_v23 = vpop.f32.mrb[127].mxu1  ;;  %v10473_v38 = vpop.eup %10472  ;;  %v6750_v30 = vadd.f32 %v16823_v3, %v16813_v18  ;;  %v16824_v56 = vld [vmem:[#allocation87_spill] sm:$0xff]  ;;  %v15811_v31 = vmul.f32 -0.5, %v7924_v9  ;;  %v16825_v3 = vld [vmem:[#allocation64_spill] sm:$0xff] }
 0xb30   : > { %16817 = vst [vmem:[#allocation86_spill] sm:$0xff] %v15783_v1  ;;  %v8851_v45 = vpack.c.bf16 %v15783_v1, %v15778_v47  ;;  %v15796_v24 = vadd.f32 %v6995_v23, %v15086_v57  ;;  %v7040_v21 = vmax.f32 %v15778_v47, %v15783_v1  ;;  %v7886_v13 = vmul.f32 0.6931472, %v10473_v38  ;;  %v10475_v48 = vpop.eup %10474  ;;  %v16828_v9 = vld [vmem:[#allocation77_spill] sm:$0xff] }
 0xb31   : > { %16821 = vst [vmem:[#allocation61_spill] sm:$0xff] %v15791_v32  ;;  %v7866_v44 = vadd.f32 %v10471_v22, %v7802_v15  ;;  %v6756_v63 = vadd.f32 %v16824_v56, %v16813_v18  ;;  %v6760_v38 = vadd.f32 %v16825_v3, %v16813_v18  ;;  %v7888_v33 = vmul.f32 0.6931472, %v10475_v48 }
 0xb32   : > { %16822 = vst [vmem:[#allocation53_spill] sm:$0xff] %v15796_v24  ;;  %8206 = vst [vmem:[%s15501_s1 + $0x70] sm:$0xff] %v8851_v45  ;;  %v8852_v57 = vpack.c.bf16 %v15796_v24, %v15791_v32  ;;  %7041 = vmax.xlane.f32.xlu0 %v7040_v21  ;;  %v7043_v23 = vmax.f32 %v15791_v32, %v15796_v24  ;;  %v15816_v22 = vadd.f32 %v7886_v13, %v16826_v10  ;;  %v10477_v21 = vpop.eup %10476 }
 0xb33   : > { %10484 = vlog2.f32 %v7866_v44  ;;  %v7926_v15 = vadd.f32 1.837877, %v6750_v30  ;;  %v15821_v56 = vmul.f32 -0.5, %v7925_v58  ;;  %v7927_v53 = vadd.f32 1.837877, %v6756_v63  ;;  %v10479_v13 = vpop.eup %10478 }
 0xb34   : > { %16827 = vst [vmem:[#allocation62_spill] sm:$0xff] %v15816_v22  ;;  %8207 = vst [vmem:[%s15501_s1 + $0x78] sm:$0xff] %v8852_v57  ;;  %7044 = vmax.xlane.f32.xlu1 %v7043_v23  ;;  %v6766_v60 = vadd.f32 %v16828_v9, %v16813_v18  ;;  %v15826_v3 = vadd.f32 %v7888_v33, %v16829_v55  ;;  %v7928_v10 = vadd.f32 1.837877, %v6760_v38  ;;  %v7890_v44 = vmul.f32 0.6931472, %v10477_v21 }
 0xb35   : > { %v16830_v23 = vld [vmem:[#allocation68_spill] sm:$0xff]  ;;  %v7892_v45 = vmul.f32 0.6931472, %v10479_v13  ;;  %v15832_v58 = vmul.f32 -0.5, %v7926_v15  ;;  %v15837_v22 = vmul.f32 -0.5, %v7927_v53 }
 0xb36   : > { %v6770_v30 = vadd.f32 %v16830_v23, %v16813_v18  ;;  %v15835_v63 = vadd.f32 %v7890_v44, %v15444_v62  ;;  %v7929_v55 = vadd.f32 1.837877, %v6766_v60  ;;  %v15842_v21 = vmul.f32 -0.5, %v7928_v10 }
 0xb37   : > { %v10481_v57 = vpop.eup %10480  ;;  %v15840_v38 = vadd.f32 %v7892_v45, %v15460_v34 }
 0xb38   : > { %v7894_v9 = vmul.f32 0.6931472, %v10481_v57  ;;  %v10483_v33 = vpop.eup %10482  ;;  %v7930_v15 = vadd.f32 1.837877, %v6770_v30  ;;  %v15853_v34 = vmul.f32 -0.5, %v7929_v55 }
 0xb39   : > { %v7896_v44 = vmul.f32 0.6931472, %v10483_v33 }
 0xb3a   : > { %v15847_v13 = vadd.f32 %v7894_v9, %v15514_v40  ;;  %v15858_v57 = vmul.f32 -0.5, %v7930_v15 }
 0xb3b   : > { %v15856_v45 = vadd.f32 %v7896_v44, %v15591_v11 }
 0xb3c   : > { %16831 = vst [vmem:[#allocation56_spill] sm:$0xff] %v15858_v57 }
 0xb3d   : > { %v10485_v53 = vpop.eup %10484 }
 0xb3e   : > { %v7898_v10 = vmul.f32 0.6931472, %v10485_v53 }
 0xb40   : > { %v15863_v23 = vadd.f32 %v7898_v10, %v15665_v14  ;;  %v16833_v14 = vld [vmem:[#allocation72_spill] sm:$0xff] }
 0xb42   : > { %16832 = vst [vmem:[#allocation75_spill] sm:$0xff] %v15863_v23 }
 0xb92   : > { %v15867_v9 = vpop.xlane.xlu0 %6999 }
 0xb93   : > { %v7046_v55 = vsub.f32 %v15467_v16, %v15867_v9  ;;  %v7047_v11 = vsub.f32 %v15483_v7, %v15867_v9 }
 0xb95   : > { %v15873_v33 = vpop.xlane.xlu1 %7002  ;;  %v7078_v15 = vmul.f32 1.442695, %v7046_v55  ;;  %v7080_v44 = vmul.f32 1.442695, %v7047_v11  ;;  %v16834_v55 = vld [vmem:[#allocation83_spill] sm:$0xff] }
 0xb96   : > { %v7048_v53 = vsub.f32 %v15486_v50, %v15873_v33  ;;  %v7049_v10 = vsub.f32 %v16833_v14, %v15873_v33 }
 0xb97   : > { %10486 = vpow2.f32 %v7078_v15  ;;  %v16835_v15 = vld [vmem:[#allocation51_spill] sm:$0xff] }
 0xb98   : > { %v7082_v30 = vmul.f32 1.442695, %v7048_v53  ;;  %v7084_v40 = vmul.f32 1.442695, %v7049_v10  ;;  %10488 = vpow2.f32 %v7080_v44 }
 0xb99   : > { %v15879_v60 = vpop.xlane.xlu0 %7005  ;;  %v15881_v62 = vpop.xlane.xlu1 %7008 }
 0xb9a   : > { %10490 = vpow2.f32 %v7082_v30  ;;  %v7050_v18 = vsub.f32 %v15507_v41, %v15879_v60  ;;  %v7051_v11 = vsub.f32 %v16834_v55, %v15879_v60  ;;  %v7052_v48 = vsub.f32 %v15524_v19, %v15881_v62 }
 0xb9b   : > { %10492 = vpow2.f32 %v7084_v40  ;;  %v7053_v53 = vsub.f32 %v16835_v15, %v15881_v62 }
 0xb9c   : > { %v7086_v10 = vmul.f32 1.442695, %v7050_v18  ;;  %v7088_v44 = vmul.f32 1.442695, %v7051_v11  ;;  %v7090_v23 = vmul.f32 1.442695, %v7052_v48 }
 0xb9d   : > { %v7092_v57 = vmul.f32 1.442695, %v7053_v53  ;;  %v15891_v14 = vpop.xlane.xlu0 %7011  ;;  %v15893_v30 = vpop.xlane.xlu1 %7014 }
 0xb9e   : > { %10494 = vpow2.f32 %v7086_v10  ;;  %v7054_v41 = vsub.f32 %v15530_v17, %v15891_v14  ;;  %v7055_v55 = vsub.f32 %v15533_v46, %v15891_v14  ;;  %v7056_v40 = vsub.f32 %v15559_v29, %v15893_v30 }
 0xb9f   : > { %10496 = vpow2.f32 %v7088_v44  ;;  %v7057_v18 = vsub.f32 %v15562_v20, %v15893_v30 }
 0xba0   : > { %10498 = vpow2.f32 %v7090_v23  ;;  %v7094_v48 = vmul.f32 1.442695, %v7054_v41  ;;  %v7096_v11 = vmul.f32 1.442695, %v7055_v55  ;;  %v7098_v53 = vmul.f32 1.442695, %v7056_v40 }
 0xba1   : > { %10500 = vpow2.f32 %v7092_v57  ;;  %v7100_v15 = vmul.f32 1.442695, %v7057_v18  ;;  %v15903_v10 = vpop.xlane.xlu0 %7017  ;;  %v10487_v19 = vpop.eup %10486 }
 0xba2   : > { %16836 = vst [vmem:[#allocation58_spill] sm:$0xff] %v15903_v10  ;;  %10502 = vpow2.f32 %v7094_v48  ;;  %v7058_v46 = vsub.f32 %v15568_v49, %v15903_v10  ;;  %v7059_v29 = vsub.f32 %v15582_v35, %v15903_v10  ;;  %v15909_v44 = vpop.xlane.xlu1 %7020  ;;  %v10489_v17 = vpop.eup %10488 }
 0xba3   : > { %10504 = vpow2.f32 %v7096_v11  ;;  %v7060_v41 = vsub.f32 %v15585_v37, %v15909_v44  ;;  %v7061_v57 = vsub.f32 %v15595_v51, %v15909_v44  ;;  %v7142_v55 = vadd.f32 %v10489_v17, %v10487_v19 }
 0xba4   : > { %v10491_v23 = vpop.eup %10490  ;;  %10506 = vpow2.f32 %v7098_v53  ;;  %v7102_v40 = vmul.f32 1.442695, %v7058_v46  ;;  %v7104_v18 = vmul.f32 1.442695, %v7059_v29 }
 0xba5   : > { %v10493_v48 = vpop.eup %10492  ;;  %10508 = vpow2.f32 %v7100_v15  ;;  %v7106_v49 = vmul.f32 1.442695, %v7060_v41  ;;  %v7108_v20 = vmul.f32 1.442695, %v7061_v57  ;;  %7143 = vadd.xlane.f32.xlu0 %v7142_v55 }
 0xba6   : > { %v7145_v35 = vadd.f32 %v10493_v48, %v10491_v23  ;;  %10510 = vpow2.f32 %v7102_v40 }
 0xba7   : > { %10512 = vpow2.f32 %v7104_v18 }
 0xba8   : > { %v10495_v11 = vpop.eup %10494  ;;  %7146 = vadd.xlane.f32.xlu1 %v7145_v35  ;;  %10514 = vpow2.f32 %v7106_v49  ;;  %v15915_v37 = vpop.xlane.xlu0 %7023 }
 0xba9   : > { %v10497_v10 = vpop.eup %10496  ;;  %10516 = vpow2.f32 %v7108_v20  ;;  %v7062_v19 = vsub.f32 %v15619_v52, %v15915_v37  ;;  %v7063_v29 = vsub.f32 %v15626_v59, %v15915_v37  ;;  %v15921_v17 = vpop.xlane.xlu1 %7026 }
 0xbaa   : > { %v10499_v46 = vpop.eup %10498  ;;  %v7148_v15 = vadd.f32 %v10497_v10, %v10495_v11  ;;  %v7064_v53 = vsub.f32 %v15633_v43, %v15921_v17  ;;  %v7065_v49 = vsub.f32 %v15642_v39, %v15921_v17 }
 0xbab   : > { %v10501_v35 = vpop.eup %10500  ;;  %v7110_v41 = vmul.f32 1.442695, %v7062_v19  ;;  %v7112_v57 = vmul.f32 1.442695, %v7063_v29 }
 0xbac   : > { %v10503_v20 = vpop.eup %10502  ;;  %7149 = vadd.xlane.f32.xlu0 %v7148_v15  ;;  %v7151_v23 = vadd.f32 %v10501_v35, %v10499_v46  ;;  %v7114_v55 = vmul.f32 1.442695, %v7064_v53  ;;  %v7116_v40 = vmul.f32 1.442695, %v7065_v49 }
 0xbad   : > { %v10505_v18 = vpop.eup %10504  ;;  %10518 = vpow2.f32 %v7110_v41 }
 0xbae   : > { %v10507_v48 = vpop.eup %10506  ;;  %7152 = vadd.xlane.f32.xlu1 %v7151_v23  ;;  %10520 = vpow2.f32 %v7112_v57  ;;  %v7154_v10 = vadd.f32 %v10505_v18, %v10503_v20 }
 0xbaf   : > { %v15927_v11 = vpop.xlane.xlu0 %7029  ;;  %v10509_v43 = vpop.eup %10508  ;;  %10522 = vpow2.f32 %v7114_v55 }
 0xbb0   : > { %v7066_v39 = vsub.f32 %v15669_v6, %v15927_v11  ;;  %v7067_v19 = vsub.f32 %v15674_v4, %v15927_v11  ;;  %v10511_v29 = vpop.eup %10510  ;;  %10524 = vpow2.f32 %v7116_v40  ;;  %7155 = vadd.xlane.f32.xlu0 %v7154_v10  ;;  %v7157_v46 = vadd.f32 %v10509_v43, %v10507_v48 }
 0xbb1   : > { %v15933_v15 = vpop.xlane.xlu1 %7032  ;;  %v10513_v53 = vpop.eup %10512 }
 0xbb2   : > { %16837 = vst [vmem:[#allocation63_spill] sm:$0xff] %v15933_v15  ;;  %v7118_v49 = vmul.f32 1.442695, %v7066_v39  ;;  %v7120_v35 = vmul.f32 1.442695, %v7067_v19  ;;  %v7068_v41 = vsub.f32 %v15684_v61, %v15933_v15  ;;  %v7069_v57 = vsub.f32 %v15689_v54, %v15933_v15  ;;  %v10515_v20 = vpop.eup %10514  ;;  %7158 = vadd.xlane.f32.xlu1 %v7157_v46  ;;  %v16882_v54 = vld [vmem:[#allocation38_spill] sm:$0xff] }
 0xbb3   : > { %v7160_v23 = vadd.f32 %v10513_v53, %v10511_v29  ;;  %v10517_v55 = vpop.eup %10516  ;;  %v16883_v61 = vld [vmem:[#allocation39_spill] sm:$0xff]  ;;  %v16890_v15 = vld [vmem:[#allocation41_spill] sm:$0xff] }
 0xbb4   : > { %10526 = vpow2.f32 %v7118_v49  ;;  %v7122_v18 = vmul.f32 1.442695, %v7068_v41  ;;  %v7124_v40 = vmul.f32 1.442695, %v7069_v57  ;;  %v7163_v43 = vadd.f32 %v10517_v55, %v10515_v20 }
 0xbb5   : > { %10528 = vpow2.f32 %v7120_v35  ;;  %7161 = vadd.xlane.f32.xlu0 %v7160_v23 }
 0xbb6   : > { %10530 = vpow2.f32 %v7122_v18  ;;  %7164 = vadd.xlane.f32.xlu1 %v7163_v43 }
 0xbb7   : > { %10532 = vpow2.f32 %v7124_v40  ;;  %v15939_v39 = vpop.xlane.xlu0 %7035  ;;  %v10519_v48 = vpop.eup %10518 }
 0xbb8   : > { %16838 = vst [vmem:[#allocation65_spill] sm:$0xff] %v15939_v39  ;;  %v7070_v10 = vsub.f32 %v15721_v12, %v15939_v39  ;;  %v7071_v19 = vsub.f32 %v15727_v26, %v15939_v39  ;;  %v10521_v29 = vpop.eup %10520  ;;  %v16878_v12 = vld [vmem:[#allocation35_spill] sm:$0xff] }
 0xbb9   : > { %v15945_v46 = vpop.xlane.xlu1 %7038  ;;  %v10523_v53 = vpop.eup %10522  ;;  %v7166_v23 = vadd.f32 %v10521_v29, %v10519_v48 }
 0xbba   : > { %16839 = vst [vmem:[#allocation60_spill] sm:$0xff] %v15945_v46  ;;  %v7126_v49 = vmul.f32 1.442695, %v7070_v10  ;;  %v7128_v35 = vmul.f32 1.442695, %v7071_v19  ;;  %v7072_v41 = vsub.f32 %v15732_v28, %v15945_v46  ;;  %v7073_v57 = vsub.f32 %v15742_v0, %v15945_v46  ;;  %v10525_v20 = vpop.eup %10524  ;;  %v16872_v0 = vld [vmem:[#allocation32_spill] sm:$0xff] }
 0xbbb   : > { %v7169_v40 = vadd.f32 %v10525_v20, %v10523_v53  ;;  %7167 = vadd.xlane.f32.xlu0 %v7166_v23  ;;  %v16873_v46 = vld [vmem:[#allocation33_spill] sm:$0xff] }
 0xbbc   : > { %10534 = vpow2.f32 %v7126_v49  ;;  %v7130_v55 = vmul.f32 1.442695, %v7072_v41  ;;  %v7132_v18 = vmul.f32 1.442695, %v7073_v57 }
 0xbbd   : > { %10536 = vpow2.f32 %v7128_v35  ;;  %7170 = vadd.xlane.f32.xlu1 %v7169_v40 }
 0xbbe   : > { %v10527_v43 = vpop.eup %10526  ;;  %10538 = vpow2.f32 %v7130_v55 }
 0xbbf   : > { %v10529_v26 = vpop.eup %10528  ;;  %10540 = vpow2.f32 %v7132_v18  ;;  %v15951_v10 = vpop.xlane.xlu0 %7041 }
 0xbc0   : > { %16840 = vst [vmem:[#allocation87_spill] sm:$0xff] %v15951_v10  ;;  %v10531_v19 = vpop.eup %10530  ;;  %v7074_v28 = vsub.f32 %v15778_v47, %v15951_v10  ;;  %v7075_v48 = vsub.f32 %v15783_v1, %v15951_v10  ;;  %v7172_v29 = vadd.f32 %v10529_v26, %v10527_v43  ;;  %v16865_v10 = vld [vmem:[#allocation31_spill] sm:$0xff] }
 0xbc1   : > { %v10533_v49 = vpop.eup %10532  ;;  %v15957_v41 = vpop.xlane.xlu1 %7044 }
 0xbc2   : > { %16841 = vst [vmem:[#allocation64_spill] sm:$0xff] %v15957_v41  ;;  %v7134_v53 = vmul.f32 1.442695, %v7074_v28  ;;  %v7136_v35 = vmul.f32 1.442695, %v7075_v48  ;;  %v7076_v57 = vsub.f32 %v15791_v32, %v15957_v41  ;;  %v7077_v20 = vsub.f32 %v15796_v24, %v15957_v41  ;;  %7173 = vadd.xlane.f32.xlu0 %v7172_v29  ;;  %v16864_v41 = vld [vmem:[#allocation30_spill] sm:$0xff] }
 0xbc3   : > { %v7175_v23 = vadd.f32 %v10533_v49, %v10531_v19 }
 0xbc4   : > { %10542 = vpow2.f32 %v7134_v53  ;;  %v7138_v55 = vmul.f32 1.442695, %v7076_v57  ;;  %v7140_v18 = vmul.f32 1.442695, %v7077_v20  ;;  %v16842_v53 = vld [vmem:[#allocation16_spill] sm:$0xff]  ;;  %v16844_v20 = vld [vmem:[#allocation18_spill] sm:$0xff] }
 0xbc5   : > { %10544 = vpow2.f32 %v7136_v35  ;;  %7176 = vadd.xlane.f32.xlu1 %v7175_v23  ;;  %v16843_v35 = vld [vmem:[#allocation17_spill] sm:$0xff]  ;;  %v16845_v23 = vld [vmem:[#allocation19_spill] sm:$0xff] }
 0xbc6   : > { %v10535_v40 = vpop.eup %10534  ;;  %10546 = vpow2.f32 %v7138_v55  ;;  %v7995_v57 = vadd.f32 %v16843_v35, %v16842_v53  ;;  %v7998_v55 = vadd.f32 %v16845_v23, %v16844_v20 }
 0xbc7   : > { %v10537_v26 = vpop.eup %10536  ;;  %10548 = vpow2.f32 %v7140_v18  ;;  %v16846_v18 = vld [vmem:[#allocation76_spill] sm:$0xff] }
 0xbc8   : > { %v10539_v43 = vpop.eup %10538  ;;  %v7178_v28 = vadd.f32 %v10537_v26, %v10535_v40  ;;  %v16847_v40 = vld [vmem:[#allocation59_spill] sm:$0xff] }
 0xbc9   : > { %v10541_v48 = vpop.eup %10540  ;;  %v16848_v26 = vsub.f32 %v16846_v18, %v16847_v40  ;;  %v16859_v40 = vld [vmem:[#allocation24_spill] sm:$0xff] }
 0xbca   : > { %7179 = vadd.xlane.f32.xlu0 %v7178_v28  ;;  %v7181_v1 = vadd.f32 %v10541_v48, %v10539_v43  ;;  %v16850_v43 = vld [vmem:[#allocation21_spill] sm:$0xff] }
 0xbcc   : > { %7182 = vadd.xlane.f32.xlu1 %v7181_v1  ;;  %v16849_v1 = vld [vmem:[#allocation20_spill] sm:$0xff] }
 0xbcd   : > { %v8001_v28 = vadd.f32 %v16850_v43, %v16849_v1 }
 0xbce   : > { %v10543_v32 = vpop.eup %10542 }
 0xbcf   : > { %v10545_v47 = vpop.eup %10544 }
 0xbd0   : > { %v10547_v24 = vpop.eup %10546  ;;  %v7184_v29 = vadd.f32 %v10545_v47, %v10543_v32  ;;  %v16851_v47 = vsub.f32 %v16791_v5, %v15694_v36  ;;  %v16853_v32 = vld [vmem:[#allocation23_spill] sm:$0xff]  ;;  %v16860_v36 = vld [vmem:[#allocation25_spill] sm:$0xff] }
 0xbd1   : > { %v10549_v19 = vpop.eup %10548  ;;  %v8010_v5 = vadd.f32 %v16860_v36, %v16859_v40 }
 0xbd2   : > { %7185 = vadd.xlane.f32.xlu0 %v7184_v29  ;;  %v7187_v49 = vadd.f32 %v10549_v19, %v10547_v24  ;;  %v16852_v24 = vld [vmem:[#allocation22_spill] sm:$0xff]  ;;  %v16854_v29 = vsub.f32 %v16797_v42, %v15714_v25  ;;  %v8013_v25 = vadd.f32 %v16865_v10, %v16864_v41  ;;  %v16866_v42 = vsub.f32 %v16807_v8, %v15747_v27  ;;  %v16879_v8 = vld [vmem:[#allocation52_spill] sm:$0xff] }
 0xbd3   : > { %v8004_v48 = vadd.f32 %v16853_v32, %v16852_v24  ;;  %v16855_v19 = vld [vmem:[#allocation26_spill] sm:$0xff] }
 0xbd4   : > { %7188 = vadd.xlane.f32.xlu1 %v7187_v49  ;;  %v16856_v49 = vld [vmem:[#allocation27_spill] sm:$0xff] }
 0xbd6   : > { %7996 = vadd.xlane.f32.xlu0 %v7995_v57  ;;  %v8007_v57 = vadd.f32 %v16856_v49, %v16855_v19 }
 0xbd8   : > { %7999 = vadd.xlane.f32.xlu1 %v7998_v55  ;;  %v16857_v55 = vld [vmem:[#allocation71_spill] sm:$0xff] }
 0xbd9   : > { %v16858_v18 = vsub.f32 %v16799_v2, %v16857_v55  ;;  %v16870_v55 = vld [vmem:[#allocation88_spill] sm:$0xff] }
 0xbda   : > { %7963 = vadd.xlane.f32.xlu0 %v16848_v26  ;;  %v16861_v26 = vld [vmem:[#allocation85_spill] sm:$0xff] }
 0xbdc   : > { %7965 = vadd.xlane.f32.xlu1 %v16851_v47 }
 0xbde   : > { %8002 = vadd.xlane.f32.xlu0 %v8001_v28  ;;  %v16862_v28 = vld [vmem:[#allocation74_spill] sm:$0xff] }
 0xbdf   : > { %v16863_v47 = vsub.f32 %v16861_v26, %v16862_v28  ;;  %v8019_v26 = vadd.f32 %v16873_v46, %v16872_v0  ;;  %v16874_v28 = vld [vmem:[#allocation55_spill] sm:$0xff] }
 0xbe0   : > { %7967 = vadd.xlane.f32.xlu1 %v16854_v29  ;;  %v16868_v29 = vld [vmem:[#allocation29_spill] sm:$0xff] }
 0xbe2   : > { %8005 = vadd.xlane.f32.xlu0 %v8004_v48  ;;  %v16867_v48 = vld [vmem:[#allocation28_spill] sm:$0xff] }
 0xbe3   : > { %v8016_v2 = vadd.f32 %v16868_v29, %v16867_v48 }
 0xbe4   : > { %8008 = vadd.xlane.f32.xlu1 %v8007_v57  ;;  %v16869_v57 = vld [vmem:[#allocation57_spill] sm:$0xff] }
 0xbe6   : > { %7969 = vadd.xlane.f32.xlu0 %v16858_v18  ;;  %v16871_v18 = vsub.f32 %v16869_v57, %v16870_v55  ;;  %v8025_v57 = vadd.f32 %v16883_v61, %v16882_v54  ;;  %v16884_v55 = vld [vmem:[#allocation62_spill] sm:$0xff] }
 0xbe8   : > { %7971 = vadd.xlane.f32.xlu1 %v16863_v47  ;;  %v16875_v47 = vld [vmem:[#allocation81_spill] sm:$0xff] }
 0xbea   : > { %8011 = vadd.xlane.f32.xlu0 %v8010_v5  ;;  %v16876_v5 = vsub.f32 %v16874_v28, %v16875_v47  ;;  %v16888_v47 = vsub.f32 %v15821_v56, %v15826_v3  ;;  %v16897_v3 = vsub.f32 %v15842_v21, %v15847_v13 }
 0xbec   : > { %8014 = vadd.xlane.f32.xlu1 %v8013_v25  ;;  %v16877_v25 = vld [vmem:[#allocation34_spill] sm:$0xff] }
 0xbed   : > { %v8022_v27 = vadd.f32 %v16878_v12, %v16877_v25 }
 0xbee   : > { %7973 = vadd.xlane.f32.xlu0 %v16866_v42  ;;  %v16880_v42 = vld [vmem:[#allocation54_spill] sm:$0xff] }
 0xbef   : > { %v16881_v39 = vsub.f32 %v16879_v8, %v16880_v42  ;;  %v16893_v42 = vld [vmem:[#allocation43_spill] sm:$0xff] }
 0xbf0   : > { %7975 = vadd.xlane.f32.xlu1 %v16871_v18  ;;  %v16886_v18 = vld [vmem:[#allocation36_spill] sm:$0xff] }
 0xbf2   : > { %8017 = vadd.xlane.f32.xlu0 %v8016_v2  ;;  %v16885_v2 = vsub.f32 %v15811_v31, %v16884_v55  ;;  %v16895_v55 = vld [vmem:[#allocation44_spill] sm:$0xff] }
 0xbf4   : > { %8020 = vadd.xlane.f32.xlu1 %v8019_v26  ;;  %v16887_v26 = vld [vmem:[#allocation37_spill] sm:$0xff] }
 0xbf5   : > { %v8028_v28 = vadd.f32 %v16887_v26, %v16886_v18 }
 0xbf6   : > { %7977 = vadd.xlane.f32.xlu0 %v16876_v5  ;;  %v16889_v5 = vld [vmem:[#allocation40_spill] sm:$0xff] }
 0xbf7   : > { %v8031_v8 = vadd.f32 %v16890_v15, %v16889_v5 }
 0xbf8   : > { %7979 = vadd.xlane.f32.xlu1 %v16881_v39  ;;  %v16891_v39 = vsub.f32 %v15832_v58, %v15835_v63  ;;  %v16900_v63 = vsub.f32 %v15853_v34, %v15856_v45 }
 0xbfa   : > { %8023 = vadd.xlane.f32.xlu0 %v8022_v27  ;;  %v16892_v27 = vld [vmem:[#allocation42_spill] sm:$0xff] }
 0xbfb   : > { %v8034_v31 = vadd.f32 %v16893_v42, %v16892_v27 }
 0xbfc   : > { %8026 = vadd.xlane.f32.xlu1 %v8025_v57  ;;  %v16894_v57 = vsub.f32 %v15837_v22, %v15840_v38 }
 0xbfe   : > { %7981 = vadd.xlane.f32.xlu0 %v16885_v2  ;;  %v16896_v2 = vld [vmem:[#allocation45_spill] sm:$0xff] }
 0xbff   : > { %v8037_v56 = vadd.f32 %v16896_v2, %v16895_v55 }
 0xc00   : > { %7983 = vadd.xlane.f32.xlu1 %v16888_v47  ;;  %v16899_v47 = vld [vmem:[#allocation47_spill] sm:$0xff] }
 0xc02   : > { %8029 = vadd.xlane.f32.xlu0 %v8028_v28  ;;  %v16898_v28 = vld [vmem:[#allocation46_spill] sm:$0xff] }
 0xc03   : > { %v8040_v58 = vadd.f32 %v16899_v47, %v16898_v28 }
 0xc04   : > { %8032 = vadd.xlane.f32.xlu1 %v8031_v8 }
 0xc06   : > { %7985 = vadd.xlane.f32.xlu0 %v16891_v39 }
 0xc08   : > { %7987 = vadd.xlane.f32.xlu1 %v16894_v57 }
 0xc0a   : > { %8035 = vadd.xlane.f32.xlu0 %v8034_v31 }
 0xc0c   : > { %8038 = vadd.xlane.f32.xlu1 %v8037_v56 }
 0xc0e   : > { %7989 = vadd.xlane.f32.xlu0 %v16897_v3 }
 0xc10   : > { %7991 = vadd.xlane.f32.xlu1 %v16900_v63 }
 0xc12   : > { %8041 = vadd.xlane.f32.xlu0 %v8040_v58 }
 0xc32   : > { %v7144_v8 = vpop.xlane.xlu0 %7143 }
 0xc33   : > { %10550 = vlog2.f32 %v7144_v8 }
 0xc35   : > { %v7147_v22 = vpop.xlane.xlu1 %7146 }
 0xc36   : > { %10552 = vlog2.f32 %v7147_v22 }
 0xc39   : > { %v7150_v38 = vpop.xlane.xlu0 %7149 }
 0xc3a   : > { %10554 = vlog2.f32 %v7150_v38 }
 0xc3b   : > { %v7153_v39 = vpop.xlane.xlu1 %7152 }
 0xc3c   : > { %10556 = vlog2.f32 %v7153_v39 }
 0xc3d   : > { %v7156_v31 = vpop.xlane.xlu0 %7155  ;;  %v10551_v57 = vpop.eup %10550 }
 0xc3e   : > { %10558 = vlog2.f32 %v7156_v31  ;;  %v7191_v21 = vmul.f32 0.6931472, %v10551_v57  ;;  %v16901_v31 = vld [vmem:[#allocation72_spill] sm:$0xff] }
 0xc3f   : > { %v7159_v13 = vpop.xlane.xlu1 %7158 }
 0xc40   : > { %v10553_v56 = vpop.eup %10552  ;;  %10560 = vlog2.f32 %v7159_v13  ;;  %v7222_v3 = vadd.f32 %v7191_v21, %v15867_v9 }
 0xc41   : > { %v7193_v34 = vmul.f32 0.6931472, %v10553_v56 }
 0xc42   : > { %v7162_v45 = vpop.xlane.xlu0 %7161  ;;  %v7238_v58 = vsub.f32 %v15467_v16, %v7222_v3  ;;  %v7239_v63 = vsub.f32 %v15483_v7, %v7222_v3 }
 0xc43   : > { %10562 = vlog2.f32 %v7162_v45  ;;  %v7223_v8 = vadd.f32 %v7193_v34, %v15873_v33  ;;  %v7165_v22 = vpop.xlane.xlu1 %7164  ;;  %v16902_v45 = vld [vmem:[#allocation82_spill] sm:$0xff] }
 0xc44   : > { %v10555_v38 = vpop.eup %10554  ;;  %10564 = vlog2.f32 %v7165_v22  ;;  %v7270_v13 = vmul.f32 %v7238_v58, %v16842_v53  ;;  %v7271_v21 = vmul.f32 %v7239_v63, %v16843_v35 }
 0xc45   : > { %v7240_v39 = vsub.f32 %v15486_v50, %v7223_v8  ;;  %v7241_v57 = vsub.f32 %v16901_v31, %v7223_v8  ;;  %v7195_v47 = vmul.f32 0.6931472, %v10555_v38  ;;  %v16903_v50 = vld [vmem:[#allocation83_spill] sm:$0xff] }
 0xc46   : > { %v10557_v9 = vpop.eup %10556  ;;  %v7302_v34 = vadd.f32 %v7271_v21, %v7270_v13 }
 0xc47   : > { %v7224_v56 = vadd.f32 %v7195_v47, %v15879_v60  ;;  %v7197_v16 = vmul.f32 0.6931472, %v10557_v9  ;;  %v7272_v7 = vmul.f32 %v7240_v39, %v16844_v20  ;;  %v7273_v33 = vmul.f32 %v7241_v57, %v16845_v23  ;;  %v16904_v47 = vld [vmem:[#allocation49_spill] sm:$0xff]  ;;  %v16905_v20 = vld [vmem:[#allocation51_spill] sm:$0xff]  ;;  %v16906_v9 = vld [vmem:[#allocation84_spill] sm:$0xff] }
 0xc48   : > { %v10559_v3 = vpop.eup %10558  ;;  %v7168_v53 = vpop.xlane.xlu0 %7167  ;;  %7303 = vadd.xlane.f32.xlu1 %v7302_v34 }
 0xc49   : > { %v7242_v22 = vsub.f32 %v16902_v45, %v7224_v56  ;;  %v7243_v28 = vsub.f32 %v16903_v50, %v7224_v56  ;;  %v7225_v8 = vadd.f32 %v7197_v16, %v15881_v62  ;;  %v7199_v38 = vmul.f32 0.6931472, %v10559_v3  ;;  %v16907_v56 = vld [vmem:[#allocation50_spill] sm:$0xff] }
 0xc4a   : > { %v10561_v58 = vpop.eup %10560  ;;  %v7305_v35 = vadd.f32 %v7273_v33, %v7272_v7  ;;  %10566 = vlog2.f32 %v7168_v53  ;;  %v7171_v60 = vpop.xlane.xlu1 %7170 }
 0xc4b   : > { %v7244_v63 = vsub.f32 %v16904_v47, %v7225_v8  ;;  %v7245_v39 = vsub.f32 %v16905_v20, %v7225_v8  ;;  %v7226_v23 = vadd.f32 %v7199_v38, %v15891_v14  ;;  %v7201_v31 = vmul.f32 0.6931472, %v10561_v58  ;;  %v16908_v8 = vld [vmem:[#allocation90_spill] sm:$0xff] }
 0xc4c   : > { %7306 = vadd.xlane.f32.xlu0 %v7305_v35  ;;  %v7274_v13 = vmul.f32 %v7242_v22, %v16849_v1  ;;  %v7275_v62 = vmul.f32 %v7243_v28, %v16850_v43  ;;  %10568 = vlog2.f32 %v7171_v60  ;;  %v16909_v1 = vld [vmem:[#allocation91_spill] sm:$0xff]  ;;  %v16910_v43 = vld [vmem:[#allocation58_spill] sm:$0xff]  ;;  %v16911_v60 = vld [vmem:[#allocation92_spill] sm:$0xff] }
 0xc4d   : > { %v10563_v57 = vpop.eup %10562  ;;  %v7246_v21 = vsub.f32 %v16906_v9, %v7226_v23  ;;  %v7247_v16 = vsub.f32 %v16907_v56, %v7226_v23  ;;  %v7227_v7 = vadd.f32 %v7201_v31, %v15893_v30  ;;  %v7276_v45 = vmul.f32 %v7244_v63, %v16852_v24  ;;  %v16912_v24 = vld [vmem:[#allocation93_spill] sm:$0xff] }
 0xc4e   : > { %v7203_v33 = vmul.f32 0.6931472, %v10563_v57  ;;  %v10565_v3 = vpop.eup %10564  ;;  %v7308_v34 = vadd.f32 %v7275_v62, %v7274_v13  ;;  %v7277_v14 = vmul.f32 %v7245_v39, %v16853_v32  ;;  %v16913_v57 = vld [vmem:[#allocation94_spill] sm:$0xff] }
 0xc4f   : > { %v7174_v50 = vpop.xlane.xlu0 %7173  ;;  %v7248_v38 = vsub.f32 %v16908_v8, %v7227_v7  ;;  %v7249_v22 = vsub.f32 %v16909_v1, %v7227_v7  ;;  %v7205_v53 = vmul.f32 0.6931472, %v10565_v3  ;;  %v7278_v35 = vmul.f32 %v7246_v21, %v16855_v19 }
 0xc50   : > { %v7228_v28 = vadd.f32 %v7203_v33, %v16910_v43  ;;  %7309 = vadd.xlane.f32.xlu1 %v7308_v34  ;;  %v7311_v58 = vadd.f32 %v7277_v14, %v7276_v45  ;;  %v7279_v30 = vmul.f32 %v7247_v16, %v16856_v49  ;;  %10570 = vlog2.f32 %v7174_v50  ;;  %v16915_v50 = vld [vmem:[#allocation96_spill] sm:$0xff] }
 0xc51   : > { %v7229_v32 = vadd.f32 %v7205_v53, %v15909_v44  ;;  %v7280_v20 = vmul.f32 %v7248_v38, %v16859_v40  ;;  %v7281_v31 = vmul.f32 %v7249_v22, %v16860_v36 }
 0xc52   : > { %v7250_v47 = vsub.f32 %v16911_v60, %v7228_v28  ;;  %v7251_v63 = vsub.f32 %v16912_v24, %v7228_v28  ;;  %v7177_v39 = vpop.xlane.xlu1 %7176  ;;  %7312 = vadd.xlane.f32.xlu0 %v7311_v58  ;;  %v7314_v23 = vadd.f32 %v7279_v30, %v7278_v35  ;;  %v16916_v30 = vld [vmem:[#allocation63_spill] sm:$0xff] }
 0xc53   : > { %10572 = vlog2.f32 %v7177_v39  ;;  %v7252_v13 = vsub.f32 %v16913_v57, %v7229_v32  ;;  %v7253_v19 = vsub.f32 %v15595_v51, %v7229_v32  ;;  %v7317_v21 = vadd.f32 %v7281_v31, %v7280_v20  ;;  %v16917_v24 = vld [vmem:[#allocation67_spill] sm:$0xff] }
 0xc54   : > { %v7282_v49 = vmul.f32 %v7250_v47, %v16864_v41  ;;  %v7283_v62 = vmul.f32 %v7251_v63, %v16865_v10  ;;  %v10567_v9 = vpop.eup %10566  ;;  %7315 = vadd.xlane.f32.xlu1 %v7314_v23  ;;  %v16918_v63 = vld [vmem:[#allocation66_spill] sm:$0xff]  ;;  %v16919_v23 = vld [vmem:[#allocation65_spill] sm:$0xff] }
 0xc55   : > { %v7207_v44 = vmul.f32 0.6931472, %v10567_v9  ;;  %v7284_v40 = vmul.f32 %v7252_v13, %v16867_v48  ;;  %v7285_v16 = vmul.f32 %v7253_v19, %v16868_v29  ;;  %v16914_v29 = vld [vmem:[#allocation95_spill] sm:$0xff]  ;;  %v16921_v9 = vld [vmem:[#allocation70_spill] sm:$0xff] }
 0xc56   : > { %v7320_v56 = vadd.f32 %v7283_v62, %v7282_v49  ;;  %v10569_v7 = vpop.eup %10568  ;;  %7318 = vadd.xlane.f32.xlu0 %v7317_v21  ;;  %v16920_v49 = vld [vmem:[#allocation73_spill] sm:$0xff] }
 0xc57   : > { %v7180_v36 = vpop.xlane.xlu0 %7179  ;;  %v7230_v33 = vadd.f32 %v7207_v44, %v15915_v37  ;;  %v7209_v3 = vmul.f32 0.6931472, %v10569_v7  ;;  %v7323_v51 = vadd.f32 %v7285_v16, %v7284_v40  ;;  %v16922_v44 = vld [vmem:[#allocation60_spill] sm:$0xff] }
 0xc58   : > { %10574 = vlog2.f32 %v7180_v36  ;;  %7321 = vadd.xlane.f32.xlu1 %v7320_v56  ;;  %v16924_v40 = vld [vmem:[#allocation80_spill] sm:$0xff] }
 0xc59   : > { %v7183_v41 = vpop.xlane.xlu1 %7182  ;;  %v7254_v10 = vsub.f32 %v15619_v52, %v7230_v33  ;;  %v7255_v34 = vsub.f32 %v15626_v59, %v7230_v33  ;;  %v7231_v45 = vadd.f32 %v7209_v3, %v15921_v17 }
 0xc5a   : > { %10576 = vlog2.f32 %v7183_v41  ;;  %v10571_v48 = vpop.eup %10570  ;;  %7324 = vadd.xlane.f32.xlu0 %v7323_v51 }
 0xc5b   : > { %v7256_v14 = vsub.f32 %v16914_v29, %v7231_v45  ;;  %v7257_v8 = vsub.f32 %v16915_v50, %v7231_v45  ;;  %v7211_v38 = vmul.f32 0.6931472, %v10571_v48  ;;  %v7286_v37 = vmul.f32 %v7254_v10, %v16872_v0  ;;  %v16925_v45 = vld [vmem:[#allocation87_spill] sm:$0xff]  ;;  %v16926_v29 = vld [vmem:[#allocation64_spill] sm:$0xff]  ;;  %v16927_v50 = vld [vmem:[#allocation78_spill] sm:$0xff] }
 0xc5c   : > { %v7287_v22 = vmul.f32 %v7255_v34, %v16873_v46 }
 0xc5d   : > { %v10573_v1 = vpop.eup %10572  ;;  %v7232_v43 = vadd.f32 %v7211_v38, %v15927_v11  ;;  %v7288_v59 = vmul.f32 %v7256_v14, %v16877_v25  ;;  %v7289_v17 = vmul.f32 %v7257_v8, %v16878_v12  ;;  %v16928_v8 = vld [vmem:[#allocation86_spill] sm:$0xff]  ;;  %v16929_v38 = vld [vmem:[#allocation61_spill] sm:$0xff] }
 0xc5e   : > { %v7213_v52 = vmul.f32 0.6931472, %v10573_v1  ;;  %v7326_v28 = vadd.f32 %v7287_v22, %v7286_v37  ;;  %v16930_v1 = vld [vmem:[#allocation53_spill] sm:$0xff] }
 0xc5f   : > { %v7186_v53 = vpop.xlane.xlu0 %7185  ;;  %v7258_v58 = vsub.f32 %v15669_v6, %v7232_v43  ;;  %v7259_v35 = vsub.f32 %v15674_v4, %v7232_v43  ;;  %v7329_v47 = vadd.f32 %v7289_v17, %v7288_v59  ;;  %v16931_v43 = vld [vmem:[#allocation56_spill] sm:$0xff] }
 0xc60   : > { %v7233_v60 = vadd.f32 %v7213_v52, %v16916_v30  ;;  %7327 = vadd.xlane.f32.xlu1 %v7326_v28  ;;  %10578 = vlog2.f32 %v7186_v53  ;;  %v16932_v52 = vld [vmem:[#allocation75_spill] sm:$0xff]  ;;  %v16934_v28 = vld [vmem:[#allocation46_spill] sm:$0xff] }
 0xc61   : > { %v7189_v0 = vpop.xlane.xlu1 %7188  ;;  %7330 = vadd.xlane.f32.xlu0 %v7329_v47  ;;  %v7290_v12 = vmul.f32 %v7258_v58, %v16882_v54  ;;  %v7291_v6 = vmul.f32 %v7259_v35, %v16883_v61  ;;  %v16923_v54 = vld [vmem:[#allocation89_spill] sm:$0xff]  ;;  %v16933_v59 = vsub.f32 %v16931_v43, %v16932_v52  ;;  %v16935_v58 = vld [vmem:[#allocation47_spill] sm:$0xff] }
 0xc62   : > { %v10575_v46 = vpop.eup %10574  ;;  %v7260_v11 = vsub.f32 %v16917_v24, %v7233_v60  ;;  %v7261_v32 = vsub.f32 %v16918_v63, %v7233_v60  ;;  %10580 = vlog2.f32 %v7189_v0 }
 0xc63   : > { %v7215_v25 = vmul.f32 0.6931472, %v10575_v46  ;;  %v7332_v13 = vadd.f32 %v7291_v6, %v7290_v12  ;;  %v7997_v60 = vpop.xlane.xlu0 %7996 }
 0xc64   : > { %v10577_v20 = vpop.eup %10576  ;;  %v7292_v4 = vmul.f32 %v7260_v11, %v16886_v18  ;;  %v7293_v39 = vmul.f32 %v7261_v32, %v16887_v26 }
 0xc65   : > { %v7234_v31 = vadd.f32 %v7215_v25, %v16919_v23  ;;  %v7217_v57 = vmul.f32 0.6931472, %v10577_v20  ;;  %7333 = vadd.xlane.f32.xlu1 %v7332_v13  ;;  %v8000_v47 = vpop.xlane.xlu1 %7999 }
 0xc66   : > { %v7335_v19 = vadd.f32 %v7293_v39, %v7292_v4 }
 0xc67   : > { %v7262_v62 = vsub.f32 %v16920_v49, %v7234_v31  ;;  %v7263_v21 = vsub.f32 %v16921_v9, %v7234_v31  ;;  %v7235_v56 = vadd.f32 %v7217_v57, %v16922_v44 }
 0xc68   : > { %7336 = vadd.xlane.f32.xlu0 %v7335_v19 }
 0xc69   : > { %v7264_v61 = vsub.f32 %v16923_v54, %v7235_v56  ;;  %v7265_v16 = vsub.f32 %v16924_v40, %v7235_v56  ;;  %v7294_v18 = vmul.f32 %v7262_v62, %v16889_v5  ;;  %v7295_v26 = vmul.f32 %v7263_v21, %v16890_v15 }
 0xc6a   : > { %v10579_v7 = vpop.eup %10578 }
 0xc6b   : > { %v7338_v36 = vadd.f32 %v7295_v26, %v7294_v18  ;;  %v7296_v33 = vmul.f32 %v7264_v61, %v16892_v27  ;;  %v7297_v3 = vmul.f32 %v7265_v16, %v16893_v42  ;;  %v7219_v41 = vmul.f32 0.6931472, %v10579_v7 }
 0xc6c   : > { %v10581_v51 = vpop.eup %10580 }
 0xc6d   : > { %v7221_v10 = vmul.f32 0.6931472, %v10581_v51  ;;  %7339 = vadd.xlane.f32.xlu1 %v7338_v36  ;;  %v7341_v34 = vadd.f32 %v7297_v3, %v7296_v33  ;;  %v7236_v48 = vadd.f32 %v7219_v41, %v16925_v45 }
 0xc6f   : > { %v7237_v14 = vadd.f32 %v7221_v10, %v16926_v29  ;;  %7342 = vadd.xlane.f32.xlu0 %v7341_v34  ;;  %v7266_v5 = vsub.f32 %v16927_v50, %v7236_v48  ;;  %v7267_v15 = vsub.f32 %v16928_v8, %v7236_v48 }
 0xc71   : > { %v7268_v37 = vsub.f32 %v16929_v38, %v7237_v14  ;;  %v7269_v27 = vsub.f32 %v16930_v1, %v7237_v14  ;;  %v7298_v42 = vmul.f32 %v7266_v5, %v16895_v55  ;;  %v7299_v22 = vmul.f32 %v7267_v15, %v16896_v2  ;;  %v16123_v55 = vpop.xlane.xlu0 %7963  ;;  %v7966_v2 = vpop.xlane.xlu1 %7965 }
 0xc73   : > { %7993 = vadd.xlane.f32.xlu0 %v16933_v59  ;;  %v7344_v17 = vadd.f32 %v7299_v22, %v7298_v42  ;;  %v7300_v53 = vmul.f32 %v7268_v37, %v16934_v28  ;;  %v7301_v35 = vmul.f32 %v7269_v27, %v16935_v58 }
 0xc75   : > { %7345 = vadd.xlane.f32.xlu1 %v7344_v17  ;;  %v7347_v30 = vadd.f32 %v7301_v35, %v7300_v53  ;;  %v8003_v0 = vpop.xlane.xlu0 %8002  ;;  %v16125_v46 = vpop.xlane.xlu1 %7967 }
 0xc79   : > { %7348 = vadd.xlane.f32.xlu1 %v7347_v30  ;;  %v8006_v24 = vpop.xlane.xlu0 %8005  ;;  %v16127_v11 = vpop.xlane.xlu1 %8008 }
 0xc7d   : > { %v16129_v63 = vpop.xlane.xlu0 %7969  ;;  %v16138_v32 = vpop.xlane.xlu1 %7971 }
 0xc81   : > { %v8012_v12 = vpop.xlane.xlu0 %8011 }
 0xc82   : > { %10753 = shalt.err (!%p10750_p13)
}
 0xc83   : > { %s10754_s29 = scalar_lea.hbm %s16135_s18, 2048  ;;  %s10758_s1 = scalar_lea.hbm %s16205_s6, 4096 }
 0xc84   : > { %p10755_p9 = scmp.ne.s32.totalorder %s16135_s18, %s10754_s29  ;;  %p10759_p6 = scmp.lt.u32.totalorder %s16135_s18, %s16205_s6 }
 0xc85   : > { %p10760_p4 = scmp.lt.u32.totalorder %s10758_s1, %s10754_s29  ;;  %p10762_p10 = scmp.lt.u32.totalorder %s10754_s29, %s16135_s18 }
 0xc86   : > { %p10756_p0 = pnand %p10755_p9, %p11042_p3 }
 0xc87   : > { %p10761_p8 = por %p10760_p4, %p10759_p6 }
 0xc88   : > { %p10757_p11 = pneg %p10756_p0 }
 0xc89   : > { %p10763_p5 = por %p10762_p10, %p10761_p8 }
 0xc8b   : > { %p10764_p7 = pnand %p10763_p5, %p10757_p11 }
 0xc8d   : > { %10767 = shalt.err (!%p10764_p7)
}
 0xc8e   : > { %s10828_s15 = smov 128   ;;  %s10829_s22 = smov 8   ;;  %v8015_v25 = vpop.xlane.xlu1 %8014  ;;  %v7974_v6 = vpop.xlane.xlu0 %7973  ;;  %v8044_v61 = vmul.f32 0.005, %v8000_v47  ;;  %v8043_v16 = vmul.f32 0.005, %v7997_v60 }
 0xc8f   : > { %8873 = dma.vmem_to_hbm [thread:$0]  (%p11042_p3), %s16140_s12, 2048, %s16135_s18, %s8222_s16, %s10828_s15, %s10828_s15, %s10829_s22   ;;  %v8045_v18 = vmul.f32 0.005, %v8003_v0  ;;  %v8046_v7 = vmul.f32 0.005, %v8006_v24 }
 0xc90   : > { %v8060_v26 = vmul.f32 %v8044_v61, %v7966_v2  ;;  %v8059_v3 = vmul.f32 %v8043_v16, %v16123_v55  ;;  %v8047_v10 = vmul.f32 0.005, %v16127_v11  ;;  %v8048_v29 = vmul.f32 0.005, %v8012_v12  ;;  %p365_p3 = scmp.lt.s32.totalorder %s10891_s28, 1 }
 0xc91   : > { %v8061_v51 = vmul.f32 %v8045_v18, %v16125_v46  ;;  %v8062_v34 = vmul.f32 %v8046_v7, %v16129_v63  ;;  %v8049_v38 = vmul.f32 0.005, %v8015_v25 }
 0xc92   : > { %v7976_v20 = vpop.xlane.xlu1 %7975  ;;  %v8018_v4 = vpop.xlane.xlu0 %8017  ;;  %v8075_v41 = vadd.f32 %v8060_v26, %v8059_v3  ;;  %v8063_v5 = vmul.f32 %v8047_v10, %v16138_v32  ;;  %v8064_v37 = vmul.f32 %v8048_v29, %v7974_v6  ;;  %s16945_s28 = smov (!%p365_p3, %s10891_s28), 1 }
 0xc93   : > { %v8050_v42 = vmul.f32 0.005, %v8018_v4  ;;  %v8065_v52 = vmul.f32 %v8049_v38, %v7976_v20  ;;  %s8396_s11 = sshll.u32 %s16945_s28, 3 }
 0xc94   : > { %v8076_v48 = vadd.f32 %v8075_v41, %v8061_v51  ;;  %s368_s12 = scalar_lea.vmem %s16206_s7, %s8396_s11 }
 0xc96   : > { %v8021_v39 = vpop.xlane.xlu1 %8020  ;;  %v7978_v23 = vpop.xlane.xlu0 %7977  ;;  %v8077_v50 = vadd.f32 %v8076_v48, %v8062_v34 }
 0xc97   : > { %v8051_v28 = vmul.f32 0.005, %v8021_v39  ;;  %v8066_v53 = vmul.f32 %v8050_v42, %v7978_v23 }
 0xc98   : > { %v8078_v27 = vadd.f32 %v8077_v50, %v8063_v5 }
 0xc9a   : > { %v7980_v31 = vpop.xlane.xlu1 %7979  ;;  %v8024_v57 = vpop.xlane.xlu0 %8023  ;;  %v8079_v43 = vadd.f32 %v8078_v27, %v8064_v37  ;;  %v16936_v27 = vlaneseq }
 0xc9b   : > { %v8052_v30 = vmul.f32 0.005, %v8024_v57  ;;  %v8067_v55 = vmul.f32 %v8051_v28, %v7980_v31 }
 0xc9c   : > { %v8080_v35 = vadd.f32 %v8079_v43, %v8065_v52  ;;  %v16937_v52 = vld [vmem:[#allocation48_spill] sm:$0xff] }
 0xc9d   : > { %vm8212_vm1 = vcmp.eq.s32.totalorder %v16937_v52, 0 }
 0xc9e   : > { %v8027_v13 = vpop.xlane.xlu1 %8026  ;;  %v7982_v19 = vpop.xlane.xlu0 %7981  ;;  %v8081_v47 = vadd.f32 %v8080_v35, %v8066_v53 }
 0xc9f   : > { %v8053_v46 = vmul.f32 0.005, %v8027_v13  ;;  %v8068_v24 = vmul.f32 %v8052_v30, %v7982_v19 }
 0xca0   : > { %v8082_v63 = vadd.f32 %v8081_v47, %v8067_v55 }
 0xca2   : > { %v7984_v49 = vpop.xlane.xlu1 %7983  ;;  %v8030_v62 = vpop.xlane.xlu0 %8029  ;;  %v8083_v25 = vadd.f32 %v8082_v63, %v8068_v24 }
 0xca3   : > { %v8054_v32 = vmul.f32 0.005, %v8030_v62  ;;  %v8069_v6 = vmul.f32 %v8053_v46, %v7984_v49 }
 0xca5   : > { %v8084_v57 = vadd.f32 %v8083_v25, %v8069_v6 }
 0xca6   : > { %v8033_v9 = vpop.xlane.xlu1 %8032  ;;  %v7986_v21 = vpop.xlane.xlu0 %7985 }
 0xca7   : > { %v8055_v39 = vmul.f32 0.005, %v8033_v9  ;;  %v8070_v23 = vmul.f32 %v8054_v32, %v7986_v21 }
 0xca9   : > { %v8085_v26 = vadd.f32 %v8084_v57, %v8070_v23 }
 0xcaa   : > { %v7988_v44 = vpop.xlane.xlu1 %7987  ;;  %v8036_v56 = vpop.xlane.xlu0 %8035 }
 0xcab   : > { %v8056_v18 = vmul.f32 0.005, %v8036_v56  ;;  %v8071_v31 = vmul.f32 %v8055_v39, %v7988_v44 }
 0xcad   : > { %v8086_v62 = vadd.f32 %v8085_v26, %v8071_v31 }
 0xcae   : > { %v8039_v54 = vpop.xlane.xlu1 %8038  ;;  %v7990_v40 = vpop.xlane.xlu0 %7989 }
 0xcaf   : > { %v8057_v19 = vmul.f32 0.005, %v8039_v54  ;;  %v8072_v51 = vmul.f32 %v8056_v18, %v7990_v40 }
 0xcb1   : > { %v8087_v34 = vadd.f32 %v8086_v62, %v8072_v51 }
 0xcb2   : > { %v7992_v36 = vpop.xlane.xlu1 %7991  ;;  %v16166_v33 = vpop.xlane.xlu0 %8041 }
 0xcb3   : > { %v8073_v49 = vmul.f32 %v8057_v19, %v7992_v36  ;;  %v8058_v9 = vmul.f32 0.005, %v16166_v33  ;;  %v8211_v33 = vand.u32 127, %v16936_v27 }
 0xcb5   : > { %v8088_v56 = vadd.f32 %v8087_v34, %v8073_v49  ;;  %vm8213_vm0 = vcmp.eq.s32.totalorder %v8211_v33, 0  ;;  %vm8216_vm2 = vcmp.eq.s32.totalorder %v8211_v33, 1 }
 0xcb6   : > { %vm8214_vm3 = vmand %vm8212_vm1, %vm8213_vm0 }
 0xcb7   : > { %vm8217_vm4 = vmand %vm8212_vm1, %vm8216_vm2 }
 0xcd5   : > { %v7304_v45 = vpop.xlane.xlu1 %7303 }
 0xcd9   : > { %v7307_v14 = vpop.xlane.xlu0 %7306 }
 0xcda   : > { %v7350_v15 = vadd.f32 %v7307_v14, %v7304_v45 }
 0xcdd   : > { %v7310_v8 = vpop.xlane.xlu1 %7309 }
 0xcde   : > { %v7351_v1 = vadd.f32 %v7350_v15, %v7310_v8 }
 0xcdf   : > { %v7313_v22 = vpop.xlane.xlu0 %7312 }
 0xce0   : > { %v7352_v17 = vadd.f32 %v7351_v1, %v7313_v22 }
 0xce1   : > { %v7316_v59 = vpop.xlane.xlu1 %7315 }
 0xce2   : > { %v7353_v58 = vadd.f32 %v7352_v17, %v7316_v59 }
 0xce3   : > { %v7319_v60 = vpop.xlane.xlu0 %7318 }
 0xce4   : > { %v7354_v0 = vadd.f32 %v7353_v58, %v7319_v60 }
 0xce5   : > { %v7322_v2 = vpop.xlane.xlu1 %7321 }
 0xce6   : > { %v7355_v11 = vadd.f32 %v7354_v0, %v7322_v2 }
 0xce7   : > { %v7325_v12 = vpop.xlane.xlu0 %7324 }
 0xce8   : > { %v7356_v4 = vadd.f32 %v7355_v11, %v7325_v12 }
 0xced   : > { %v7328_v20 = vpop.xlane.xlu1 %7327 }
 0xcee   : > { %v7357_v61 = vadd.f32 %v7356_v4, %v7328_v20  ;;  %v7331_v16 = vpop.xlane.xlu0 %7330 }
 0xcf0   : > { %v7358_v3 = vadd.f32 %v7357_v61, %v7331_v16 }
 0xcf2   : > { %v7334_v7 = vpop.xlane.xlu1 %7333 }
 0xcf3   : > { %v7359_v41 = vadd.f32 %v7358_v3, %v7334_v7 }
 0xcf5   : > { %v7337_v13 = vpop.xlane.xlu0 %7336 }
 0xcf6   : > { %v7360_v48 = vadd.f32 %v7359_v41, %v7337_v13 }
 0xcfa   : > { %v7340_v45 = vpop.xlane.xlu1 %7339 }
 0xcfb   : > { %v7361_v21 = vadd.f32 %v7360_v48, %v7340_v45 }
 0xcfc   : > { %v7343_v10 = vpop.xlane.xlu0 %7342 }
 0xcfd   : > { %v7362_v5 = vadd.f32 %v7361_v21, %v7343_v10 }
 0xd00   : > { %v7994_v29 = vpop.xlane.xlu0 %7993 }
 0xd01   : > { %v8074_v14 = vmul.f32 %v8058_v9, %v7994_v29 }
 0xd02   : > { %v7346_v50 = vpop.xlane.xlu1 %7345 }
 0xd03   : > { %v8089_v44 = vadd.f32 %v8088_v56, %v8074_v14  ;;  %v7363_v40 = vadd.f32 %v7362_v5, %v7346_v50 }
 0xd05   : > { %v8090_v54 = vrot.slane %v8089_v44, 4 }
 0xd06   : > { %v7349_v15 = vpop.xlane.xlu1 %7348 }
 0xd07   : > { %v8091_v8 = vadd.f32 %v8090_v54, %v8089_v44  ;;  %v7364_v38 = vadd.f32 %v7363_v40, %v7349_v15 }
 0xd09   : > { %v8092_v37 = vrot.slane %v8091_v8, 2  ;;  %v7365_v36 = vrot.slane %v7364_v38, 4 }
 0xd0b   : > { %v8093_v1 = vadd.f32 %v8092_v37, %v8091_v8  ;;  %v7366_v42 = vadd.f32 %v7365_v36, %v7364_v38 }
 0xd0d   : > { %v8094_v22 = vrot.slane %v8093_v1, 1  ;;  %v7367_v43 = vrot.slane %v7366_v42, 2 }
 0xd0f   : > { %v7368_v59 = vadd.f32 %v7367_v43, %v7366_v42  ;;  %v8095_v17 = vadd.f32 %v8094_v22, %v8093_v1 }
 0xd11   : > { %v7369_v28 = vrot.slane %v7368_v59, 1  ;;  %v8218_v58 = vsel %vm8217_vm4, %v8095_v17, 0.0 }
 0xd13   : > { %v7370_v53 = vadd.f32 %v7369_v28, %v7368_v59 }
 0xd15   : > { %v8215_v35 = vsel %vm8214_vm3, %v7370_v53, 0.0 }
 0xd16   : > { %v8219_v30 = vadd.f32 %v8218_v58, %v8215_v35 }
 0xd18   : > { %8220 = vst [vmem:[%s368_s12] sm:$0xff] %v8219_v30 }
 0xd19 PF: > { %s8258_s16 = sand.u32 1, %s10802_s24   ;;  %p16938_p12 = scmp.ne.s32.totalorder %s16465_s8, 0 }
 0xd1a   : > { %p16939_p1 = scmp.ge.s32.totalorder %s10814_s27, 2  ;;  %s8259_s19 = scalar_lea.sflag [#allocation4], %s8258_s16 }
 0xd1c   : > { %p8893_p2 = pnand %p16939_p1, %p16938_p12 }
 0xd1e   : > { %10797 = dma.done.wait (!%p8893_p2), %s8259_s19, 2048  }
 0xd1f   : > { %10799 = vsyncadd (!%p8893_p2), %s8259_s19, 4294965248  ;;  %p23_p13 = scmp.ge.s32.totalorder %s11029_s17, 4   ;;  %s16940_s24 = smov %s10806_s25 }
 0xd20   : > { %s16941_s25 = smov %s10810_s26  ;;  %s16942_s26 = smov %s11038_s23 }
 0xd21   : > { %s16943_s27 = smov %s11029_s17  ;;  %25 = sbr.rel (!%p23_p13) target bundleno = 9 (0x9), region = 117 }
 0xd28   :  { %8271 = vsyncpa [#allocation3], 1 }
 0xd29   :  { %8273 = vsyncpa [#allocation3 + $0x1], 1 }
 0xd2a   :  { %8274 = vsyncpa [#allocation6], 1 }
 0xd2b   :  { %8275 = vsyncpa [#allocation9], 1 }
 0xd2c   :  { %8276 = vsyncpa [#allocation4], 1 }
 0xd2d   :  { %8278 = vsyncpa [#allocation4 + $0x1], 1 }

</bundles_post_ra>
